<compile_context>
chip_gen: v6e
topology: v6e:2x2x1
jax: 0.10.0
libtpu: 0.0.40
codegen_flags: <defaults>
</compile_context>

<pallas_src>
import math

import jax
import jax.numpy as jnp
from jax.experimental import pallas as pl
from jax.experimental.pallas import tpu as pltpu

_MARGIN = 1e-2       # same margin as pcdet's check_in_box2d
_NCAND = 24          # 16 edge-edge intersections + 4 + 4 corner-inside candidates
_BIG = 1e9           # sort key for invalid candidates (pushed to the back)
_BLOCK_LANES = 128   # lanes per grid step -> 8*128 = 1024 box pairs per block


def _batcher_network(n):
    """Batcher odd-even mergesort comparator list for n elements.

    Generated for the next power of two and restricted to comparators whose
    indices are all < n.  (Positions >= n behave as +inf under the removed
    comparators and never move below n, so the restriction is a valid sorting
    network for n elements.)
    """
    m = 1
    while m < n:
        m *= 2
    comps = []

    def merge(lo, hi, r):
        step = r * 2
        if step < hi - lo:
            merge(lo, hi, step)
            merge(lo + r, hi, step)
            for k in range(lo + r, hi - r, step):
                comps.append((k, k + r))
        else:
            comps.append((lo, lo + r))

    def sort(lo, hi):
        if hi - lo >= 1:
            mid = lo + (hi - lo) // 2
            sort(lo, mid)
            sort(mid + 1, hi)
            merge(lo, hi, 1)

    sort(0, m - 1)
    return tuple((i, j) for (i, j) in comps if j < n)


_SORT_NET = _batcher_network(_NCAND)


def _block_contrib(pred_ref, mask_ref, bp_ref, bg_ref):
    """Per-pair masked |pred - (2*iou3d - 1)| for one block of 8*L pairs."""
    # box param rows: [x, y, z, dx, dy, dz, cos(h), sin(h)], each (8, L)
    xa, ya = bp_ref[0], bp_ref[1]
    dxa, dya = bp_ref[3], bp_ref[4]
    ca, sa = bp_ref[6], bp_ref[7]
    xb, yb = bg_ref[0], bg_ref[1]
    dxb, dyb = bg_ref[3], bg_ref[4]
    cb, sb = bg_ref[6], bg_ref[7]
    hxa, hya = dxa * 0.5, dya * 0.5
    hxb, hyb = dxb * 0.5, dyb * 0.5

    def corners(cx, cy, hx, hy, c, s):
        pxs, pys = [], []
        for ex, ey in ((1.0, 1.0), (-1.0, 1.0), (-1.0, -1.0), (1.0, -1.0)):
            lx, ly = ex * hx, ey * hy
            pxs.append(cx + lx * c - ly * s)
            pys.append(cy + lx * s + ly * c)
        return pxs, pys

    ax_, ay_ = corners(xa, ya, hxa, hya, ca, sa)
    bx_, by_ = corners(xb, yb, hxb, hyb, cb, sb)
    aex = [ax_[(i + 1) % 4] - ax_[i] for i in range(4)]
    aey = [ay_[(i + 1) % 4] - ay_[i] for i in range(4)]
    bex = [bx_[(j + 1) % 4] - bx_[j] for j in range(4)]
    bey = [by_[(j + 1) % 4] - by_[j] for j in range(4)]

    def opposite_signs(u, v):
        # sign-based test; avoids u*v underflowing to 0 and dropping vertices
        return ((u > 0.0) & (v < 0.0)) | ((u < 0.0) & (v > 0.0))

    cand_x, cand_y, cand_v = [], [], []
    # 4x4 edge-edge intersection candidates
    for i in range(4):
        p1x, p1y = ax_[i], ay_[i]
        p2x, p2y = ax_[(i + 1) % 4], ay_[(i + 1) % 4]
        for j in range(4):
            q1x, q1y = bx_[j], by_[j]
            q2x, q2y = bx_[(j + 1) % 4], by_[(j + 1) % 4]
            d1 = (p1x - q1x) * bey[j] - (p1y - q1y) * bex[j]
            d2 = (p2x - q1x) * bey[j] - (p2y - q1y) * bex[j]
            d3 = (q1x - p1x) * aey[i] - (q1y - p1y) * aex[i]
            d4 = (q2x - p1x) * aey[i] - (q2y - p1y) * aex[i]
            valid = opposite_signs(d1, d2) & opposite_signs(d3, d4)
            denom = d1 - d2
            safe = jnp.where(jnp.abs(denom) > 1e-12, denom, 1.0)
            t = d1 / safe
            cand_x.append(p1x + t * aex[i])
            cand_y.append(p1y + t * aey[i])
            cand_v.append(valid)

    def in_box(px, py, cx, cy, hx, hy, c, s):
        dx0, dy0 = px - cx, py - cy
        lx = dx0 * c + dy0 * s
        ly = -dx0 * s + dy0 * c
        return (jnp.abs(lx) < hx + _MARGIN) & (jnp.abs(ly) < hy + _MARGIN)

    for i in range(4):  # corners of A inside B
        cand_x.append(ax_[i])
        cand_y.append(ay_[i])
        cand_v.append(in_box(ax_[i], ay_[i], xb, yb, hxb, hyb, cb, sb))
    for j in range(4):  # corners of B inside A
        cand_x.append(bx_[j])
        cand_y.append(by_[j])
        cand_v.append(in_box(bx_[j], by_[j], xa, ya, hxa, hya, ca, sa))

    # vertex count + centroid of the valid candidates
    vf = [v.astype(jnp.float32) for v in cand_v]
    n_valid = vf[0]
    sx_acc = vf[0] * cand_x[0]
    sy_acc = vf[0] * cand_y[0]
    for k in range(1, _NCAND):
        n_valid = n_valid + vf[k]
        sx_acc = sx_acc + vf[k] * cand_x[k]
        sy_acc = sy_acc + vf[k] * cand_y[k]
    inv_n = pl.reciprocal(jnp.maximum(n_valid, 1.0), approx=True)   # EUP slot
    cxc = sx_acc * inv_n
    cyc = sy_acc * inv_n

    # pseudo-angle ("diamond angle") around the centroid: monotone in angle,
    # no transcendentals; invalid candidates get a huge key -> sorted last.
    keys = []
    for k in range(_NCAND):
        ddx = cand_x[k] - cxc
        ddy = cand_y[k] - cyc
        den = jnp.abs(ddx) + jnp.abs(ddy)
        r = ddx * pl.reciprocal(jnp.where(den > 1e-12, den, 1.0), approx=True)
        pang = jnp.where(ddy >= 0.0, 1.0 - r, 3.0 + r)              # in [0, 4)
        keys.append(jnp.where(cand_v[k], pang, _BIG))

    # CCW order via a fixed compare-exchange network on (key, x, y) triples.
    sx, sy = list(cand_x), list(cand_y)
    for (i, j) in _SORT_NET:
        ki, kj = keys[i], keys[j]
        swap = kj < ki
        keys[i] = jnp.where(swap, kj, ki)
        keys[j] = jnp.where(swap, ki, kj)
        xi, xj = sx[i], sx[j]
        sx[i] = jnp.where(swap, xj, xi)
        sx[j] = jnp.where(swap, xi, xj)
        yi, yj = sy[i], sy[j]
        sy[i] = jnp.where(swap, yj, yi)
        sy[j] = jnp.where(swap, yi, yj)

    # shoelace over the first n_valid sorted vertices (convex polygon)
    area2 = jnp.zeros_like(n_valid)
    for k in range(_NCAND - 1):
        area2 = area2 + jnp.where(float(k + 1) < n_valid,
                                  sx[k] * sy[k + 1] - sx[k + 1] * sy[k], 0.0)
    # closing edge: (last valid vertex) -> (vertex 0)
    xl, yl = sx[0], sy[0]
    for k in range(1, _NCAND):
        last = n_valid == float(k + 1)
        xl = jnp.where(last, sx[k], xl)
        yl = jnp.where(last, sy[k], yl)
    area2 = area2 + (xl * sy[0] - sx[0] * yl)
    area_bev = jnp.where(n_valid >= 3.0, 0.5 * jnp.abs(area2), 0.0)

    # height overlap + 3D IoU (boxes_iou3d_gpu semantics, diagonal only)
    za, dza = bp_ref[2], bp_ref[5]
    zb, dzb = bg_ref[2], bg_ref[5]
    zmax = jnp.minimum(za + dza * 0.5, zb + dzb * 0.5)
    zmin = jnp.maximum(za - dza * 0.5, zb - dzb * 0.5)
    inter3d = area_bev * jnp.maximum(zmax - zmin, 0.0)
    vol = bp_ref[3] * bp_ref[4] * dza + bg_ref[3] * bg_ref[4] * dzb
    iou3d = inter3d * pl.reciprocal(jnp.maximum(vol - inter3d, 1e-6), approx=True)

    target = 2.0 * iou3d - 1.0
    return mask_ref[...] * jnp.abs(pred_ref[...] - target)


def _iou_loss_kernel(cnt_ref, pred_ref, mask_ref, bp_ref, bg_ref, out_ref):
    blk = pl.program_id(0)

    @pl.when(cnt_ref[blk] == 0)
    def _():
        # no valid pairs in this block: skip all polygon math
        out_ref[...] = jnp.zeros_like(out_ref)

    @pl.when(cnt_ref[blk] > 0)
    def _():
        out_ref[...] = _block_contrib(pred_ref, mask_ref, bp_ref, bg_ref)


def _transpose_and_gather_feat(feat, ind):
    # feat: (B, C, H, W) NCHW; ind: (B, M) flat indices into H*W (plain-JAX glue)
    B, C, H, W = feat.shape
    feat = jnp.transpose(feat, (0, 2, 3, 1)).reshape(B, H * W, C)
    return jnp.take_along_axis(feat, ind[:, :, None].astype(jnp.int32), axis=1)


def iou_loss(iou_pred, mask, ind, box_pred, box_gt, *, block_lanes=_BLOCK_LANES):
    B = iou_pred.shape[0]
    M = ind.shape[1]
    N = B * M
    pairs_per_block = 8 * block_lanes
    num_blocks = max(1, -(-N // pairs_per_block))
    n_pad = num_blocks * pairs_per_block
    lanes_total = n_pad // 8

    pred = _transpose_and_gather_feat(iou_pred, ind)[..., 0].reshape(N)
    pred_box = _transpose_and_gather_feat(box_pred, ind).reshape(N, 7)
    gt = box_gt.reshape(N, 7)
    msk = mask.reshape(N).astype(jnp.float32)

    def pack_pairs(v):               # (N,) -> (8, lanes_total): pair on (sublane, lane)
        v = jnp.pad(v.astype(jnp.float32), (0, n_pad - N))
        return v.reshape(8, lanes_total)

    def pack_boxes(b):               # (N, 7) -> (8, 8, lanes_total)
        b = b.astype(jnp.float32)    # param rows: x y z dx dy dz cos sin
        rows = jnp.concatenate(
            [b[:, :6], jnp.cos(b[:, 6:7]), jnp.sin(b[:, 6:7])], axis=1)
        rows = jnp.pad(rows, ((0, n_pad - N), (0, 0)))
        return jnp.transpose(rows, (1, 0)).reshape(8, 8, lanes_total)

    mask2d = pack_pairs(msk)
    # per-block valid-pair counts (scalar prefetch) -> skip empty blocks
    blk_cnt = mask2d.reshape(8, num_blocks, block_lanes).sum(
        axis=(0, 2)).astype(jnp.int32)

    grid_spec = pltpu.PrefetchScalarGridSpec(
        num_scalar_prefetch=1,
        grid=(num_blocks,),
        in_specs=[
            pl.BlockSpec((8, block_lanes), lambda i, cnt: (0, i)),          # pred
            pl.BlockSpec((8, block_lanes), lambda i, cnt: (0, i)),          # mask
            pl.BlockSpec((8, 8, block_lanes), lambda i, cnt: (0, 0, i)),    # boxes pred
            pl.BlockSpec((8, 8, block_lanes), lambda i, cnt: (0, 0, i)),    # boxes gt
        ],
        out_specs=pl.BlockSpec((8, block_lanes), lambda i, cnt: (0, i)),
    )
    contrib = pl.pallas_call(
        _iou_loss_kernel,
        out_shape=jax.ShapeDtypeStruct((8, lanes_total), jnp.float32),
        grid_spec=grid_spec,
        compiler_params=pltpu.CompilerParams(
            dimension_semantics=("parallel",)),
    )(blk_cnt, pack_pairs(pred), mask2d, pack_boxes(pred_box), pack_boxes(gt))

    # global reduction + division in plain JAX (tiny, lane-dense output)
    return jnp.sum(contrib) / (jnp.sum(msk) + 0.0001)


if __name__ == "__main__":
    # cheap static sanity check of the comparator network (pure Python)
    import random as _random
    _random.seed(0)
    for _ in range(200):
        v = [_random.random() for _ in range(_NCAND)]
        w = list(v)
        for (i, j) in _SORT_NET:
            if w[j] < w[i]:
                w[i], w[j] = w[j], w[i]
        assert w == sorted(v)

    key = jax.random.PRNGKey(0)
    ks = jax.random.split(key, 9)
    B, M, H, W = 2, 8, 16, 16

    iou_pred = jax.random.normal(ks[0], (B, 1, H, W), jnp.float32)
    ctr = jax.random.normal(ks[1], (B, 3, H, W), jnp.float32) * 2.0
    size = jax.random.uniform(ks[2], (B, 3, H, W), jnp.float32,
                              minval=1.0, maxval=3.0)
    head = jax.random.uniform(ks[3], (B, 1, H, W), jnp.float32,
                              minval=-math.pi, maxval=math.pi)
    box_pred = jnp.concatenate([ctr, size, head], axis=1)            # (B, 7, H, W)

    ind = jax.random.randint(ks[4], (B, M), 0, H * W)
    mask = (jax.random.uniform(ks[5], (B, M)) > 0.3).astype(jnp.float32)

    gt_ctr = jax.random.normal(ks[6], (B, M, 3), jnp.float32) * 2.0
    gt_size = jax.random.uniform(ks[7], (B, M, 3), jnp.float32,
                                 minval=1.0, maxval=3.0)
    gt_head = jax.random.uniform(ks[8], (B, M, 1), jnp.float32,
                                 minval=-math.pi, maxval=math.pi)
    box_gt = jnp.concatenate([gt_ctr, gt_size, gt_head], axis=-1)    # (B, M, 7)

    loss = iou_loss(iou_pred, mask, ind, box_pred, box_gt)
    loss = jax.block_until_ready(loss)
    assert bool(jnp.isfinite(loss)), loss
    print("KERNEL_OK")
</pallas_src>

<mosaic_0001>
module attributes {stable_mosaic.version = 11 : i64} {
  func.func @_iou_loss_kernel(%arg0: i32, %arg1: memref<1xi32, #tpu.memory_space<smem>>, %arg2: memref<8x128xf32, #tpu.memory_space<vmem>>, %arg3: memref<8x128xf32, #tpu.memory_space<vmem>>, %arg4: memref<8x8x128xf32, #tpu.memory_space<vmem>>, %arg5: memref<8x8x128xf32, #tpu.memory_space<vmem>>, %arg6: memref<8x128xf32, #tpu.memory_space<vmem>>) attributes {dimension_semantics = [#tpu.dimension_semantics<parallel>], iteration_bounds = array<i64: 1>, scalar_prefetch = 1 : i64, scratch_operands = 0 : i64, tpu.core_type = #tpu.core_type<tc>, window_params = [{transform_indices = @transform_0, window_bounds = array<i64: 8, 128>}, {transform_indices = @transform_1, window_bounds = array<i64: 8, 128>}, {transform_indices = @transform_2, window_bounds = array<i64: 8, 8, 128>}, {transform_indices = @transform_3, window_bounds = array<i64: 8, 8, 128>}, {transform_indices = @transform_4, window_bounds = array<i64: 8, 128>}]} {
    %0 = arith.index_cast %arg0 : i32 to index
    %1 = memref.load %arg1[%0] : memref<1xi32, #tpu.memory_space<smem>>
    %c0_i32 = arith.constant 0 : i32
    %2 = arith.cmpi eq, %1, %c0_i32 : i32
    %3 = arith.extui %2 : i1 to i32
    %c0_i32_0 = arith.constant 0 : i32
    %4 = arith.cmpi ne, %3, %c0_i32_0 : i32
    scf.if %4 {
      %cst = arith.constant 0.000000e+00 : f32
      %10 = vector.broadcast %cst : f32 to vector<8x128xf32>
      %c0 = arith.constant 0 : index
      %c0_3 = arith.constant 0 : index
      %11 = vector.load %arg6[%c0, %c0_3] : memref<8x128xf32, #tpu.memory_space<vmem>>, vector<8x128xf32>
      tpu.vector_store %arg6[%c0, %c0_3], %10 {strides = array<i32>} : memref<8x128xf32, #tpu.memory_space<vmem>>, vector<8x128xf32>,
    } else {
    }
    %5 = arith.index_cast %arg0 : i32 to index
    %6 = memref.load %arg1[%5] : memref<1xi32, #tpu.memory_space<smem>>
    %c0_i32_1 = arith.constant 0 : i32
    %7 = arith.cmpi sgt, %6, %c0_i32_1 : i32
    %8 = arith.extui %7 : i1 to i32
    %c0_i32_2 = arith.constant 0 : i32
    %9 = arith.cmpi ne, %8, %c0_i32_2 : i32
    scf.if %9 {
      %c0 = arith.constant 0 : index
      %c0_3 = arith.constant 0 : index
      %c0_4 = arith.constant 0 : index
      %10 = vector.load %arg4[%c0, %c0_3, %c0_4] : memref<8x8x128xf32, #tpu.memory_space<vmem>>, vector<1x8x128xf32>
      %11 = vector.shape_cast %10 : vector<1x8x128xf32> to vector<8x128xf32>
      %c1 = arith.constant 1 : index
      %c0_5 = arith.constant 0 : index
      %c0_6 = arith.constant 0 : index
      %12 = vector.load %arg4[%c1, %c0_5, %c0_6] : memref<8x8x128xf32, #tpu.memory_space<vmem>>, vector<1x8x128xf32>
      %13 = vector.shape_cast %12 : vector<1x8x128xf32> to vector<8x128xf32>
      %c3 = arith.constant 3 : index
      %c0_7 = arith.constant 0 : index
      %c0_8 = arith.constant 0 : index
      %14 = vector.load %arg4[%c3, %c0_7, %c0_8] : memref<8x8x128xf32, #tpu.memory_space<vmem>>, vector<1x8x128xf32>
      %15 = vector.shape_cast %14 : vector<1x8x128xf32> to vector<8x128xf32>
      %c4 = arith.constant 4 : index
      %c0_9 = arith.constant 0 : index
      %c0_10 = arith.constant 0 : index
      %16 = vector.load %arg4[%c4, %c0_9, %c0_10] : memref<8x8x128xf32, #tpu.memory_space<vmem>>, vector<1x8x128xf32>
      %17 = vector.shape_cast %16 : vector<1x8x128xf32> to vector<8x128xf32>
      %c6 = arith.constant 6 : index
      %c0_11 = arith.constant 0 : index
      %c0_12 = arith.constant 0 : index
      %18 = vector.load %arg4[%c6, %c0_11, %c0_12] : memref<8x8x128xf32, #tpu.memory_space<vmem>>, vector<1x8x128xf32>
      %19 = vector.shape_cast %18 : vector<1x8x128xf32> to vector<8x128xf32>
      %c7 = arith.constant 7 : index
      %c0_13 = arith.constant 0 : index
      %c0_14 = arith.constant 0 : index
      %20 = vector.load %arg4[%c7, %c0_13, %c0_14] : memref<8x8x128xf32, #tpu.memory_space<vmem>>, vector<1x8x128xf32>
      %21 = vector.shape_cast %20 : vector<1x8x128xf32> to vector<8x128xf32>
      %c0_15 = arith.constant 0 : index
      %c0_16 = arith.constant 0 : index
      %c0_17 = arith.constant 0 : index
      %22 = vector.load %arg5[%c0_15, %c0_16, %c0_17] : memref<8x8x128xf32, #tpu.memory_space<vmem>>, vector<1x8x128xf32>
      %23 = vector.shape_cast %22 : vector<1x8x128xf32> to vector<8x128xf32>
      %c1_18 = arith.constant 1 : index
      %c0_19 = arith.constant 0 : index
      %c0_20 = arith.constant 0 : index
      %24 = vector.load %arg5[%c1_18, %c0_19, %c0_20] : memref<8x8x128xf32, #tpu.memory_space<vmem>>, vector<1x8x128xf32>
      %25 = vector.shape_cast %24 : vector<1x8x128xf32> to vector<8x128xf32>
      %c3_21 = arith.constant 3 : index
      %c0_22 = arith.constant 0 : index
      %c0_23 = arith.constant 0 : index
      %26 = vector.load %arg5[%c3_21, %c0_22, %c0_23] : memref<8x8x128xf32, #tpu.memory_space<vmem>>, vector<1x8x128xf32>
      %27 = vector.shape_cast %26 : vector<1x8x128xf32> to vector<8x128xf32>
      %c4_24 = arith.constant 4 : index
      %c0_25 = arith.constant 0 : index
      %c0_26 = arith.constant 0 : index
      %28 = vector.load %arg5[%c4_24, %c0_25, %c0_26] : memref<8x8x128xf32, #tpu.memory_space<vmem>>, vector<1x8x128xf32>
      %29 = vector.shape_cast %28 : vector<1x8x128xf32> to vector<8x128xf32>
      %c6_27 = arith.constant 6 : index
      %c0_28 = arith.constant 0 : index
      %c0_29 = arith.constant 0 : index
      %30 = vector.load %arg5[%c6_27, %c0_28, %c0_29] : memref<8x8x128xf32, #tpu.memory_space<vmem>>, vector<1x8x128xf32>
      %31 = vector.shape_cast %30 : vector<1x8x128xf32> to vector<8x128xf32>
      %c7_30 = arith.constant 7 : index
      %c0_31 = arith.constant 0 : index
      %c0_32 = arith.constant 0 : index
      %32 = vector.load %arg5[%c7_30, %c0_31, %c0_32] : memref<8x8x128xf32, #tpu.memory_space<vmem>>, vector<1x8x128xf32>
      %33 = vector.shape_cast %32 : vector<1x8x128xf32> to vector<8x128xf32>
      %cst = arith.constant 5.000000e-01 : f32
      %34 = vector.broadcast %cst : f32 to vector<8x128xf32>
      %35 = arith.mulf %15, %34 : vector<8x128xf32>
      %cst_33 = arith.constant 5.000000e-01 : f32
      %36 = vector.broadcast %cst_33 : f32 to vector<8x128xf32>
      %37 = arith.mulf %17, %36 : vector<8x128xf32>
      %cst_34 = arith.constant 5.000000e-01 : f32
      %38 = vector.broadcast %cst_34 : f32 to vector<8x128xf32>
      %39 = arith.mulf %27, %38 : vector<8x128xf32>
      %cst_35 = arith.constant 5.000000e-01 : f32
      %40 = vector.broadcast %cst_35 : f32 to vector<8x128xf32>
      %41 = arith.mulf %29, %40 : vector<8x128xf32>
      %cst_36 = arith.constant 1.000000e+00 : f32
      %42 = vector.broadcast %cst_36 : f32 to vector<8x128xf32>
      %43 = arith.mulf %42, %35 : vector<8x128xf32>
      %cst_37 = arith.constant 1.000000e+00 : f32
      %44 = vector.broadcast %cst_37 : f32 to vector<8x128xf32>
      %45 = arith.mulf %44, %37 : vector<8x128xf32>
      %46 = arith.mulf %43, %19 : vector<8x128xf32>
      %47 = arith.addf %11, %46 : vector<8x128xf32>
      %48 = arith.mulf %45, %21 : vector<8x128xf32>
      %49 = arith.subf %47, %48 : vector<8x128xf32>
      %50 = arith.mulf %43, %21 : vector<8x128xf32>
      %51 = arith.addf %13, %50 : vector<8x128xf32>
      %52 = arith.mulf %45, %19 : vector<8x128xf32>
      %53 = arith.addf %51, %52 : vector<8x128xf32>
      %cst_38 = arith.constant -1.000000e+00 : f32
      %54 = vector.broadcast %cst_38 : f32 to vector<8x128xf32>
      %55 = arith.mulf %54, %35 : vector<8x128xf32>
      %cst_39 = arith.constant 1.000000e+00 : f32
      %56 = vector.broadcast %cst_39 : f32 to vector<8x128xf32>
      %57 = arith.mulf %56, %37 : vector<8x128xf32>
      %58 = arith.mulf %55, %19 : vector<8x128xf32>
      %59 = arith.addf %11, %58 : vector<8x128xf32>
      %60 = arith.mulf %57, %21 : vector<8x128xf32>
      %61 = arith.subf %59, %60 : vector<8x128xf32>
      %62 = arith.mulf %55, %21 : vector<8x128xf32>
      %63 = arith.addf %13, %62 : vector<8x128xf32>
      %64 = arith.mulf %57, %19 : vector<8x128xf32>
      %65 = arith.addf %63, %64 : vector<8x128xf32>
      %cst_40 = arith.constant -1.000000e+00 : f32
      %66 = vector.broadcast %cst_40 : f32 to vector<8x128xf32>
      %67 = arith.mulf %66, %35 : vector<8x128xf32>
      %cst_41 = arith.constant -1.000000e+00 : f32
      %68 = vector.broadcast %cst_41 : f32 to vector<8x128xf32>
      %69 = arith.mulf %68, %37 : vector<8x128xf32>
      %70 = arith.mulf %67, %19 : vector<8x128xf32>
      %71 = arith.addf %11, %70 : vector<8x128xf32>
      %72 = arith.mulf %69, %21 : vector<8x128xf32>
      %73 = arith.subf %71, %72 : vector<8x128xf32>
      %74 = arith.mulf %67, %21 : vector<8x128xf32>
      %75 = arith.addf %13, %74 : vector<8x128xf32>
      %76 = arith.mulf %69, %19 : vector<8x128xf32>
      %77 = arith.addf %75, %76 : vector<8x128xf32>
      %cst_42 = arith.constant 1.000000e+00 : f32
      %78 = vector.broadcast %cst_42 : f32 to vector<8x128xf32>
      %79 = arith.mulf %78, %35 : vector<8x128xf32>
      %cst_43 = arith.constant -1.000000e+00 : f32
      %80 = vector.broadcast %cst_43 : f32 to vector<8x128xf32>
      %81 = arith.mulf %80, %37 : vector<8x128xf32>
      %82 = arith.mulf %79, %19 : vector<8x128xf32>
      %83 = arith.addf %11, %82 : vector<8x128xf32>
      %84 = arith.mulf %81, %21 : vector<8x128xf32>
      %85 = arith.subf %83, %84 : vector<8x128xf32>
      %86 = arith.mulf %79, %21 : vector<8x128xf32>
      %87 = arith.addf %13, %86 : vector<8x128xf32>
      %88 = arith.mulf %81, %19 : vector<8x128xf32>
      %89 = arith.addf %87, %88 : vector<8x128xf32>
      %cst_44 = arith.constant 1.000000e+00 : f32
      %90 = vector.broadcast %cst_44 : f32 to vector<8x128xf32>
      %91 = arith.mulf %90, %39 : vector<8x128xf32>
      %cst_45 = arith.constant 1.000000e+00 : f32
      %92 = vector.broadcast %cst_45 : f32 to vector<8x128xf32>
      %93 = arith.mulf %92, %41 : vector<8x128xf32>
      %94 = arith.mulf %91, %31 : vector<8x128xf32>
      %95 = arith.addf %23, %94 : vector<8x128xf32>
      %96 = arith.mulf %93, %33 : vector<8x128xf32>
      %97 = arith.subf %95, %96 : vector<8x128xf32>
      %98 = arith.mulf %91, %33 : vector<8x128xf32>
      %99 = arith.addf %25, %98 : vector<8x128xf32>
      %100 = arith.mulf %93, %31 : vector<8x128xf32>
      %101 = arith.addf %99, %100 : vector<8x128xf32>
      %cst_46 = arith.constant -1.000000e+00 : f32
      %102 = vector.broadcast %cst_46 : f32 to vector<8x128xf32>
      %103 = arith.mulf %102, %39 : vector<8x128xf32>
      %cst_47 = arith.constant 1.000000e+00 : f32
      %104 = vector.broadcast %cst_47 : f32 to vector<8x128xf32>
      %105 = arith.mulf %104, %41 : vector<8x128xf32>
      %106 = arith.mulf %103, %31 : vector<8x128xf32>
      %107 = arith.addf %23, %106 : vector<8x128xf32>
      %108 = arith.mulf %105, %33 : vector<8x128xf32>
      %109 = arith.subf %107, %108 : vector<8x128xf32>
      %110 = arith.mulf %103, %33 : vector<8x128xf32>
      %111 = arith.addf %25, %110 : vector<8x128xf32>
      %112 = arith.mulf %105, %31 : vector<8x128xf32>
      %113 = arith.addf %111, %112 : vector<8x128xf32>
      %cst_48 = arith.constant -1.000000e+00 : f32
      %114 = vector.broadcast %cst_48 : f32 to vector<8x128xf32>
      %115 = arith.mulf %114, %39 : vector<8x128xf32>
      %cst_49 = arith.constant -1.000000e+00 : f32
      %116 = vector.broadcast %cst_49 : f32 to vector<8x128xf32>
      %117 = arith.mulf %116, %41 : vector<8x128xf32>
      %118 = arith.mulf %115, %31 : vector<8x128xf32>
      %119 = arith.addf %23, %118 : vector<8x128xf32>
      %120 = arith.mulf %117, %33 : vector<8x128xf32>
      %121 = arith.subf %119, %120 : vector<8x128xf32>
      %122 = arith.mulf %115, %33 : vector<8x128xf32>
      %123 = arith.addf %25, %122 : vector<8x128xf32>
      %124 = arith.mulf %117, %31 : vector<8x128xf32>
      %125 = arith.addf %123, %124 : vector<8x128xf32>
      %cst_50 = arith.constant 1.000000e+00 : f32
      %126 = vector.broadcast %cst_50 : f32 to vector<8x128xf32>
      %127 = arith.mulf %126, %39 : vector<8x128xf32>
      %cst_51 = arith.constant -1.000000e+00 : f32
      %128 = vector.broadcast %cst_51 : f32 to vector<8x128xf32>
      %129 = arith.mulf %128, %41 : vector<8x128xf32>
      %130 = arith.mulf %127, %31 : vector<8x128xf32>
      %131 = arith.addf %23, %130 : vector<8x128xf32>
      %132 = arith.mulf %129, %33 : vector<8x128xf32>
      %133 = arith.subf %131, %132 : vector<8x128xf32>
      %134 = arith.mulf %127, %33 : vector<8x128xf32>
      %135 = arith.addf %25, %134 : vector<8x128xf32>
      %136 = arith.mulf %129, %31 : vector<8x128xf32>
      %137 = arith.addf %135, %136 : vector<8x128xf32>
      %138 = arith.subf %61, %49 : vector<8x128xf32>
      %139 = arith.subf %73, %61 : vector<8x128xf32>
      %140 = arith.subf %85, %73 : vector<8x128xf32>
      %141 = arith.subf %49, %85 : vector<8x128xf32>
      %142 = arith.subf %65, %53 : vector<8x128xf32>
      %143 = arith.subf %77, %65 : vector<8x128xf32>
      %144 = arith.subf %89, %77 : vector<8x128xf32>
      %145 = arith.subf %53, %89 : vector<8x128xf32>
      %146 = arith.subf %109, %97 : vector<8x128xf32>
      %147 = arith.subf %121, %109 : vector<8x128xf32>
      %148 = arith.subf %133, %121 : vector<8x128xf32>
      %149 = arith.subf %97, %133 : vector<8x128xf32>
      %150 = arith.subf %113, %101 : vector<8x128xf32>
      %151 = arith.subf %125, %113 : vector<8x128xf32>
      %152 = arith.subf %137, %125 : vector<8x128xf32>
      %153 = arith.subf %101, %137 : vector<8x128xf32>
      %154 = arith.subf %49, %97 : vector<8x128xf32>
      %155 = arith.mulf %154, %150 : vector<8x128xf32>
      %156 = arith.subf %53, %101 : vector<8x128xf32>
      %157 = arith.mulf %156, %146 : vector<8x128xf32>
      %158 = arith.subf %155, %157 : vector<8x128xf32>
      %159 = arith.subf %61, %97 : vector<8x128xf32>
      %160 = arith.mulf %159, %150 : vector<8x128xf32>
      %161 = arith.subf %65, %101 : vector<8x128xf32>
      %162 = arith.mulf %161, %146 : vector<8x128xf32>
      %163 = arith.subf %160, %162 : vector<8x128xf32>
      %164 = arith.subf %97, %49 : vector<8x128xf32>
      %165 = arith.mulf %164, %142 : vector<8x128xf32>
      %166 = arith.subf %101, %53 : vector<8x128xf32>
      %167 = arith.mulf %166, %138 : vector<8x128xf32>
      %168 = arith.subf %165, %167 : vector<8x128xf32>
      %169 = arith.subf %109, %49 : vector<8x128xf32>
      %170 = arith.mulf %169, %142 : vector<8x128xf32>
      %171 = arith.subf %113, %53 : vector<8x128xf32>
      %172 = arith.mulf %171, %138 : vector<8x128xf32>
      %173 = arith.subf %170, %172 : vector<8x128xf32>
      %cst_52 = arith.constant 0.000000e+00 : f32
      %174 = vector.broadcast %cst_52 : f32 to vector<8x128xf32>
      %175 = arith.cmpf ogt, %158, %174 : vector<8x128xf32>
      %cst_53 = arith.constant 0.000000e+00 : f32
      %176 = vector.broadcast %cst_53 : f32 to vector<8x128xf32>
      %177 = arith.cmpf olt, %163, %176 : vector<8x128xf32>
      %178 = arith.andi %175, %177 : vector<8x128xi1>
      %cst_54 = arith.constant 0.000000e+00 : f32
      %179 = vector.broadcast %cst_54 : f32 to vector<8x128xf32>
      %180 = arith.cmpf olt, %158, %179 : vector<8x128xf32>
      %cst_55 = arith.constant 0.000000e+00 : f32
      %181 = vector.broadcast %cst_55 : f32 to vector<8x128xf32>
      %182 = arith.cmpf ogt, %163, %181 : vector<8x128xf32>
      %183 = arith.andi %180, %182 : vector<8x128xi1>
      %184 = arith.ori %178, %183 : vector<8x128xi1>
      %cst_56 = arith.constant 0.000000e+00 : f32
      %185 = vector.broadcast %cst_56 : f32 to vector<8x128xf32>
      %186 = arith.cmpf ogt, %168, %185 : vector<8x128xf32>
      %cst_57 = arith.constant 0.000000e+00 : f32
      %187 = vector.broadcast %cst_57 : f32 to vector<8x128xf32>
      %188 = arith.cmpf olt, %173, %187 : vector<8x128xf32>
      %189 = arith.andi %186, %188 : vector<8x128xi1>
      %cst_58 = arith.constant 0.000000e+00 : f32
      %190 = vector.broadcast %cst_58 : f32 to vector<8x128xf32>
      %191 = arith.cmpf olt, %168, %190 : vector<8x128xf32>
      %cst_59 = arith.constant 0.000000e+00 : f32
      %192 = vector.broadcast %cst_59 : f32 to vector<8x128xf32>
      %193 = arith.cmpf ogt, %173, %192 : vector<8x128xf32>
      %194 = arith.andi %191, %193 : vector<8x128xi1>
      %195 = arith.ori %189, %194 : vector<8x128xi1>
      %196 = arith.andi %184, %195 : vector<8x128xi1>
      %197 = arith.subf %158, %163 : vector<8x128xf32>
      %198 = math.absf %197 : vector<8x128xf32>
      %cst_60 = arith.constant 9.99999996E-13 : f32
      %199 = vector.broadcast %cst_60 : f32 to vector<8x128xf32>
      %200 = arith.cmpf ogt, %198, %199 : vector<8x128xf32>
      %cst_61 = arith.constant 1.000000e+00 : f32
      %201 = vector.broadcast %cst_61 : f32 to vector<8x128xf32>
      %202 = arith.select %200, %197, %201 : vector<8x128xi1>, vector<8x128xf32>
      %203 = arith.divf %158, %202 : vector<8x128xf32>
      %204 = arith.mulf %203, %138 : vector<8x128xf32>
      %205 = arith.addf %49, %204 : vector<8x128xf32>
      %206 = arith.mulf %203, %142 : vector<8x128xf32>
      %207 = arith.addf %53, %206 : vector<8x128xf32>
      %208 = arith.subf %49, %109 : vector<8x128xf32>
      %209 = arith.mulf %208, %151 : vector<8x128xf32>
      %210 = arith.subf %53, %113 : vector<8x128xf32>
      %211 = arith.mulf %210, %147 : vector<8x128xf32>
      %212 = arith.subf %209, %211 : vector<8x128xf32>
      %213 = arith.subf %61, %109 : vector<8x128xf32>
      %214 = arith.mulf %213, %151 : vector<8x128xf32>
      %215 = arith.subf %65, %113 : vector<8x128xf32>
      %216 = arith.mulf %215, %147 : vector<8x128xf32>
      %217 = arith.subf %214, %216 : vector<8x128xf32>
      %218 = arith.subf %109, %49 : vector<8x128xf32>
      %219 = arith.mulf %218, %142 : vector<8x128xf32>
      %220 = arith.subf %113, %53 : vector<8x128xf32>
      %221 = arith.mulf %220, %138 : vector<8x128xf32>
      %222 = arith.subf %219, %221 : vector<8x128xf32>
      %223 = arith.subf %121, %49 : vector<8x128xf32>
      %224 = arith.mulf %223, %142 : vector<8x128xf32>
      %225 = arith.subf %125, %53 : vector<8x128xf32>
      %226 = arith.mulf %225, %138 : vector<8x128xf32>
      %227 = arith.subf %224, %226 : vector<8x128xf32>
      %cst_62 = arith.constant 0.000000e+00 : f32
      %228 = vector.broadcast %cst_62 : f32 to vector<8x128xf32>
      %229 = arith.cmpf ogt, %212, %228 : vector<8x128xf32>
      %cst_63 = arith.constant 0.000000e+00 : f32
      %230 = vector.broadcast %cst_63 : f32 to vector<8x128xf32>
      %231 = arith.cmpf olt, %217, %230 : vector<8x128xf32>
      %232 = arith.andi %229, %231 : vector<8x128xi1>
      %cst_64 = arith.constant 0.000000e+00 : f32
      %233 = vector.broadcast %cst_64 : f32 to vector<8x128xf32>
      %234 = arith.cmpf olt, %212, %233 : vector<8x128xf32>
      %cst_65 = arith.constant 0.000000e+00 : f32
      %235 = vector.broadcast %cst_65 : f32 to vector<8x128xf32>
      %236 = arith.cmpf ogt, %217, %235 : vector<8x128xf32>
      %237 = arith.andi %234, %236 : vector<8x128xi1>
      %238 = arith.ori %232, %237 : vector<8x128xi1>
      %cst_66 = arith.constant 0.000000e+00 : f32
      %239 = vector.broadcast %cst_66 : f32 to vector<8x128xf32>
      %240 = arith.cmpf ogt, %222, %239 : vector<8x128xf32>
      %cst_67 = arith.constant 0.000000e+00 : f32
      %241 = vector.broadcast %cst_67 : f32 to vector<8x128xf32>
      %242 = arith.cmpf olt, %227, %241 : vector<8x128xf32>
      %243 = arith.andi %240, %242 : vector<8x128xi1>
      %cst_68 = arith.constant 0.000000e+00 : f32
      %244 = vector.broadcast %cst_68 : f32 to vector<8x128xf32>
      %245 = arith.cmpf olt, %222, %244 : vector<8x128xf32>
      %cst_69 = arith.constant 0.000000e+00 : f32
      %246 = vector.broadcast %cst_69 : f32 to vector<8x128xf32>
      %247 = arith.cmpf ogt, %227, %246 : vector<8x128xf32>
      %248 = arith.andi %245, %247 : vector<8x128xi1>
      %249 = arith.ori %243, %248 : vector<8x128xi1>
      %250 = arith.andi %238, %249 : vector<8x128xi1>
      %251 = arith.subf %212, %217 : vector<8x128xf32>
      %252 = math.absf %251 : vector<8x128xf32>
      %cst_70 = arith.constant 9.99999996E-13 : f32
      %253 = vector.broadcast %cst_70 : f32 to vector<8x128xf32>
      %254 = arith.cmpf ogt, %252, %253 : vector<8x128xf32>
      %cst_71 = arith.constant 1.000000e+00 : f32
      %255 = vector.broadcast %cst_71 : f32 to vector<8x128xf32>
      %256 = arith.select %254, %251, %255 : vector<8x128xi1>, vector<8x128xf32>
      %257 = arith.divf %212, %256 : vector<8x128xf32>
      %258 = arith.mulf %257, %138 : vector<8x128xf32>
      %259 = arith.addf %49, %258 : vector<8x128xf32>
      %260 = arith.mulf %257, %142 : vector<8x128xf32>
      %261 = arith.addf %53, %260 : vector<8x128xf32>
      %262 = arith.subf %49, %121 : vector<8x128xf32>
      %263 = arith.mulf %262, %152 : vector<8x128xf32>
      %264 = arith.subf %53, %125 : vector<8x128xf32>
      %265 = arith.mulf %264, %148 : vector<8x128xf32>
      %266 = arith.subf %263, %265 : vector<8x128xf32>
      %267 = arith.subf %61, %121 : vector<8x128xf32>
      %268 = arith.mulf %267, %152 : vector<8x128xf32>
      %269 = arith.subf %65, %125 : vector<8x128xf32>
      %270 = arith.mulf %269, %148 : vector<8x128xf32>
      %271 = arith.subf %268, %270 : vector<8x128xf32>
      %272 = arith.subf %121, %49 : vector<8x128xf32>
      %273 = arith.mulf %272, %142 : vector<8x128xf32>
      %274 = arith.subf %125, %53 : vector<8x128xf32>
      %275 = arith.mulf %274, %138 : vector<8x128xf32>
      %276 = arith.subf %273, %275 : vector<8x128xf32>
      %277 = arith.subf %133, %49 : vector<8x128xf32>
      %278 = arith.mulf %277, %142 : vector<8x128xf32>
      %279 = arith.subf %137, %53 : vector<8x128xf32>
      %280 = arith.mulf %279, %138 : vector<8x128xf32>
      %281 = arith.subf %278, %280 : vector<8x128xf32>
      %cst_72 = arith.constant 0.000000e+00 : f32
      %282 = vector.broadcast %cst_72 : f32 to vector<8x128xf32>
      %283 = arith.cmpf ogt, %266, %282 : vector<8x128xf32>
      %cst_73 = arith.constant 0.000000e+00 : f32
      %284 = vector.broadcast %cst_73 : f32 to vector<8x128xf32>
      %285 = arith.cmpf olt, %271, %284 : vector<8x128xf32>
      %286 = arith.andi %283, %285 : vector<8x128xi1>
      %cst_74 = arith.constant 0.000000e+00 : f32
      %287 = vector.broadcast %cst_74 : f32 to vector<8x128xf32>
      %288 = arith.cmpf olt, %266, %287 : vector<8x128xf32>
      %cst_75 = arith.constant 0.000000e+00 : f32
      %289 = vector.broadcast %cst_75 : f32 to vector<8x128xf32>
      %290 = arith.cmpf ogt, %271, %289 : vector<8x128xf32>
      %291 = arith.andi %288, %290 : vector<8x128xi1>
      %292 = arith.ori %286, %291 : vector<8x128xi1>
      %cst_76 = arith.constant 0.000000e+00 : f32
      %293 = vector.broadcast %cst_76 : f32 to vector<8x128xf32>
      %294 = arith.cmpf ogt, %276, %293 : vector<8x128xf32>
      %cst_77 = arith.constant 0.000000e+00 : f32
      %295 = vector.broadcast %cst_77 : f32 to vector<8x128xf32>
      %296 = arith.cmpf olt, %281, %295 : vector<8x128xf32>
      %297 = arith.andi %294, %296 : vector<8x128xi1>
      %cst_78 = arith.constant 0.000000e+00 : f32
      %298 = vector.broadcast %cst_78 : f32 to vector<8x128xf32>
      %299 = arith.cmpf olt, %276, %298 : vector<8x128xf32>
      %cst_79 = arith.constant 0.000000e+00 : f32
      %300 = vector.broadcast %cst_79 : f32 to vector<8x128xf32>
      %301 = arith.cmpf ogt, %281, %300 : vector<8x128xf32>
      %302 = arith.andi %299, %301 : vector<8x128xi1>
      %303 = arith.ori %297, %302 : vector<8x128xi1>
      %304 = arith.andi %292, %303 : vector<8x128xi1>
      %305 = arith.subf %266, %271 : vector<8x128xf32>
      %306 = math.absf %305 : vector<8x128xf32>
      %cst_80 = arith.constant 9.99999996E-13 : f32
      %307 = vector.broadcast %cst_80 : f32 to vector<8x128xf32>
      %308 = arith.cmpf ogt, %306, %307 : vector<8x128xf32>
      %cst_81 = arith.constant 1.000000e+00 : f32
      %309 = vector.broadcast %cst_81 : f32 to vector<8x128xf32>
      %310 = arith.select %308, %305, %309 : vector<8x128xi1>, vector<8x128xf32>
      %311 = arith.divf %266, %310 : vector<8x128xf32>
      %312 = arith.mulf %311, %138 : vector<8x128xf32>
      %313 = arith.addf %49, %312 : vector<8x128xf32>
      %314 = arith.mulf %311, %142 : vector<8x128xf32>
      %315 = arith.addf %53, %314 : vector<8x128xf32>
      %316 = arith.subf %49, %133 : vector<8x128xf32>
      %317 = arith.mulf %316, %153 : vector<8x128xf32>
      %318 = arith.subf %53, %137 : vector<8x128xf32>
      %319 = arith.mulf %318, %149 : vector<8x128xf32>
      %320 = arith.subf %317, %319 : vector<8x128xf32>
      %321 = arith.subf %61, %133 : vector<8x128xf32>
      %322 = arith.mulf %321, %153 : vector<8x128xf32>
      %323 = arith.subf %65, %137 : vector<8x128xf32>
      %324 = arith.mulf %323, %149 : vector<8x128xf32>
      %325 = arith.subf %322, %324 : vector<8x128xf32>
      %326 = arith.subf %133, %49 : vector<8x128xf32>
      %327 = arith.mulf %326, %142 : vector<8x128xf32>
      %328 = arith.subf %137, %53 : vector<8x128xf32>
      %329 = arith.mulf %328, %138 : vector<8x128xf32>
      %330 = arith.subf %327, %329 : vector<8x128xf32>
      %331 = arith.subf %97, %49 : vector<8x128xf32>
      %332 = arith.mulf %331, %142 : vector<8x128xf32>
      %333 = arith.subf %101, %53 : vector<8x128xf32>
      %334 = arith.mulf %333, %138 : vector<8x128xf32>
      %335 = arith.subf %332, %334 : vector<8x128xf32>
      %cst_82 = arith.constant 0.000000e+00 : f32
      %336 = vector.broadcast %cst_82 : f32 to vector<8x128xf32>
      %337 = arith.cmpf ogt, %320, %336 : vector<8x128xf32>
      %cst_83 = arith.constant 0.000000e+00 : f32
      %338 = vector.broadcast %cst_83 : f32 to vector<8x128xf32>
      %339 = arith.cmpf olt, %325, %338 : vector<8x128xf32>
      %340 = arith.andi %337, %339 : vector<8x128xi1>
      %cst_84 = arith.constant 0.000000e+00 : f32
      %341 = vector.broadcast %cst_84 : f32 to vector<8x128xf32>
      %342 = arith.cmpf olt, %320, %341 : vector<8x128xf32>
      %cst_85 = arith.constant 0.000000e+00 : f32
      %343 = vector.broadcast %cst_85 : f32 to vector<8x128xf32>
      %344 = arith.cmpf ogt, %325, %343 : vector<8x128xf32>
      %345 = arith.andi %342, %344 : vector<8x128xi1>
      %346 = arith.ori %340, %345 : vector<8x128xi1>
      %cst_86 = arith.constant 0.000000e+00 : f32
      %347 = vector.broadcast %cst_86 : f32 to vector<8x128xf32>
      %348 = arith.cmpf ogt, %330, %347 : vector<8x128xf32>
      %cst_87 = arith.constant 0.000000e+00 : f32
      %349 = vector.broadcast %cst_87 : f32 to vector<8x128xf32>
      %350 = arith.cmpf olt, %335, %349 : vector<8x128xf32>
      %351 = arith.andi %348, %350 : vector<8x128xi1>
      %cst_88 = arith.constant 0.000000e+00 : f32
      %352 = vector.broadcast %cst_88 : f32 to vector<8x128xf32>
      %353 = arith.cmpf olt, %330, %352 : vector<8x128xf32>
      %cst_89 = arith.constant 0.000000e+00 : f32
      %354 = vector.broadcast %cst_89 : f32 to vector<8x128xf32>
      %355 = arith.cmpf ogt, %335, %354 : vector<8x128xf32>
      %356 = arith.andi %353, %355 : vector<8x128xi1>
      %357 = arith.ori %351, %356 : vector<8x128xi1>
      %358 = arith.andi %346, %357 : vector<8x128xi1>
      %359 = arith.subf %320, %325 : vector<8x128xf32>
      %360 = math.absf %359 : vector<8x128xf32>
      %cst_90 = arith.constant 9.99999996E-13 : f32
      %361 = vector.broadcast %cst_90 : f32 to vector<8x128xf32>
      %362 = arith.cmpf ogt, %360, %361 : vector<8x128xf32>
      %cst_91 = arith.constant 1.000000e+00 : f32
      %363 = vector.broadcast %cst_91 : f32 to vector<8x128xf32>
      %364 = arith.select %362, %359, %363 : vector<8x128xi1>, vector<8x128xf32>
      %365 = arith.divf %320, %364 : vector<8x128xf32>
      %366 = arith.mulf %365, %138 : vector<8x128xf32>
      %367 = arith.addf %49, %366 : vector<8x128xf32>
      %368 = arith.mulf %365, %142 : vector<8x128xf32>
      %369 = arith.addf %53, %368 : vector<8x128xf32>
      %370 = arith.subf %61, %97 : vector<8x128xf32>
      %371 = arith.mulf %370, %150 : vector<8x128xf32>
      %372 = arith.subf %65, %101 : vector<8x128xf32>
      %373 = arith.mulf %372, %146 : vector<8x128xf32>
      %374 = arith.subf %371, %373 : vector<8x128xf32>
      %375 = arith.subf %73, %97 : vector<8x128xf32>
      %376 = arith.mulf %375, %150 : vector<8x128xf32>
      %377 = arith.subf %77, %101 : vector<8x128xf32>
      %378 = arith.mulf %377, %146 : vector<8x128xf32>
      %379 = arith.subf %376, %378 : vector<8x128xf32>
      %380 = arith.subf %97, %61 : vector<8x128xf32>
      %381 = arith.mulf %380, %143 : vector<8x128xf32>
      %382 = arith.subf %101, %65 : vector<8x128xf32>
      %383 = arith.mulf %382, %139 : vector<8x128xf32>
      %384 = arith.subf %381, %383 : vector<8x128xf32>
      %385 = arith.subf %109, %61 : vector<8x128xf32>
      %386 = arith.mulf %385, %143 : vector<8x128xf32>
      %387 = arith.subf %113, %65 : vector<8x128xf32>
      %388 = arith.mulf %387, %139 : vector<8x128xf32>
      %389 = arith.subf %386, %388 : vector<8x128xf32>
      %cst_92 = arith.constant 0.000000e+00 : f32
      %390 = vector.broadcast %cst_92 : f32 to vector<8x128xf32>
      %391 = arith.cmpf ogt, %374, %390 : vector<8x128xf32>
      %cst_93 = arith.constant 0.000000e+00 : f32
      %392 = vector.broadcast %cst_93 : f32 to vector<8x128xf32>
      %393 = arith.cmpf olt, %379, %392 : vector<8x128xf32>
      %394 = arith.andi %391, %393 : vector<8x128xi1>
      %cst_94 = arith.constant 0.000000e+00 : f32
      %395 = vector.broadcast %cst_94 : f32 to vector<8x128xf32>
      %396 = arith.cmpf olt, %374, %395 : vector<8x128xf32>
      %cst_95 = arith.constant 0.000000e+00 : f32
      %397 = vector.broadcast %cst_95 : f32 to vector<8x128xf32>
      %398 = arith.cmpf ogt, %379, %397 : vector<8x128xf32>
      %399 = arith.andi %396, %398 : vector<8x128xi1>
      %400 = arith.ori %394, %399 : vector<8x128xi1>
      %cst_96 = arith.constant 0.000000e+00 : f32
      %401 = vector.broadcast %cst_96 : f32 to vector<8x128xf32>
      %402 = arith.cmpf ogt, %384, %401 : vector<8x128xf32>
      %cst_97 = arith.constant 0.000000e+00 : f32
      %403 = vector.broadcast %cst_97 : f32 to vector<8x128xf32>
      %404 = arith.cmpf olt, %389, %403 : vector<8x128xf32>
      %405 = arith.andi %402, %404 : vector<8x128xi1>
      %cst_98 = arith.constant 0.000000e+00 : f32
      %406 = vector.broadcast %cst_98 : f32 to vector<8x128xf32>
      %407 = arith.cmpf olt, %384, %406 : vector<8x128xf32>
      %cst_99 = arith.constant 0.000000e+00 : f32
      %408 = vector.broadcast %cst_99 : f32 to vector<8x128xf32>
      %409 = arith.cmpf ogt, %389, %408 : vector<8x128xf32>
      %410 = arith.andi %407, %409 : vector<8x128xi1>
      %411 = arith.ori %405, %410 : vector<8x128xi1>
      %412 = arith.andi %400, %411 : vector<8x128xi1>
      %413 = arith.subf %374, %379 : vector<8x128xf32>
      %414 = math.absf %413 : vector<8x128xf32>
      %cst_100 = arith.constant 9.99999996E-13 : f32
      %415 = vector.broadcast %cst_100 : f32 to vector<8x128xf32>
      %416 = arith.cmpf ogt, %414, %415 : vector<8x128xf32>
      %cst_101 = arith.constant 1.000000e+00 : f32
      %417 = vector.broadcast %cst_101 : f32 to vector<8x128xf32>
      %418 = arith.select %416, %413, %417 : vector<8x128xi1>, vector<8x128xf32>
      %419 = arith.divf %374, %418 : vector<8x128xf32>
      %420 = arith.mulf %419, %139 : vector<8x128xf32>
      %421 = arith.addf %61, %420 : vector<8x128xf32>
      %422 = arith.mulf %419, %143 : vector<8x128xf32>
      %423 = arith.addf %65, %422 : vector<8x128xf32>
      %424 = arith.subf %61, %109 : vector<8x128xf32>
      %425 = arith.mulf %424, %151 : vector<8x128xf32>
      %426 = arith.subf %65, %113 : vector<8x128xf32>
      %427 = arith.mulf %426, %147 : vector<8x128xf32>
      %428 = arith.subf %425, %427 : vector<8x128xf32>
      %429 = arith.subf %73, %109 : vector<8x128xf32>
      %430 = arith.mulf %429, %151 : vector<8x128xf32>
      %431 = arith.subf %77, %113 : vector<8x128xf32>
      %432 = arith.mulf %431, %147 : vector<8x128xf32>
      %433 = arith.subf %430, %432 : vector<8x128xf32>
      %434 = arith.subf %109, %61 : vector<8x128xf32>
      %435 = arith.mulf %434, %143 : vector<8x128xf32>
      %436 = arith.subf %113, %65 : vector<8x128xf32>
      %437 = arith.mulf %436, %139 : vector<8x128xf32>
      %438 = arith.subf %435, %437 : vector<8x128xf32>
      %439 = arith.subf %121, %61 : vector<8x128xf32>
      %440 = arith.mulf %439, %143 : vector<8x128xf32>
      %441 = arith.subf %125, %65 : vector<8x128xf32>
      %442 = arith.mulf %441, %139 : vector<8x128xf32>
      %443 = arith.subf %440, %442 : vector<8x128xf32>
      %cst_102 = arith.constant 0.000000e+00 : f32
      %444 = vector.broadcast %cst_102 : f32 to vector<8x128xf32>
      %445 = arith.cmpf ogt, %428, %444 : vector<8x128xf32>
      %cst_103 = arith.constant 0.000000e+00 : f32
      %446 = vector.broadcast %cst_103 : f32 to vector<8x128xf32>
      %447 = arith.cmpf olt, %433, %446 : vector<8x128xf32>
      %448 = arith.andi %445, %447 : vector<8x128xi1>
      %cst_104 = arith.constant 0.000000e+00 : f32
      %449 = vector.broadcast %cst_104 : f32 to vector<8x128xf32>
      %450 = arith.cmpf olt, %428, %449 : vector<8x128xf32>
      %cst_105 = arith.constant 0.000000e+00 : f32
      %451 = vector.broadcast %cst_105 : f32 to vector<8x128xf32>
      %452 = arith.cmpf ogt, %433, %451 : vector<8x128xf32>
      %453 = arith.andi %450, %452 : vector<8x128xi1>
      %454 = arith.ori %448, %453 : vector<8x128xi1>
      %cst_106 = arith.constant 0.000000e+00 : f32
      %455 = vector.broadcast %cst_106 : f32 to vector<8x128xf32>
      %456 = arith.cmpf ogt, %438, %455 : vector<8x128xf32>
      %cst_107 = arith.constant 0.000000e+00 : f32
      %457 = vector.broadcast %cst_107 : f32 to vector<8x128xf32>
      %458 = arith.cmpf olt, %443, %457 : vector<8x128xf32>
      %459 = arith.andi %456, %458 : vector<8x128xi1>
      %cst_108 = arith.constant 0.000000e+00 : f32
      %460 = vector.broadcast %cst_108 : f32 to vector<8x128xf32>
      %461 = arith.cmpf olt, %438, %460 : vector<8x128xf32>
      %cst_109 = arith.constant 0.000000e+00 : f32
      %462 = vector.broadcast %cst_109 : f32 to vector<8x128xf32>
      %463 = arith.cmpf ogt, %443, %462 : vector<8x128xf32>
      %464 = arith.andi %461, %463 : vector<8x128xi1>
      %465 = arith.ori %459, %464 : vector<8x128xi1>
      %466 = arith.andi %454, %465 : vector<8x128xi1>
      %467 = arith.subf %428, %433 : vector<8x128xf32>
      %468 = math.absf %467 : vector<8x128xf32>
      %cst_110 = arith.constant 9.99999996E-13 : f32
      %469 = vector.broadcast %cst_110 : f32 to vector<8x128xf32>
      %470 = arith.cmpf ogt, %468, %469 : vector<8x128xf32>
      %cst_111 = arith.constant 1.000000e+00 : f32
      %471 = vector.broadcast %cst_111 : f32 to vector<8x128xf32>
      %472 = arith.select %470, %467, %471 : vector<8x128xi1>, vector<8x128xf32>
      %473 = arith.divf %428, %472 : vector<8x128xf32>
      %474 = arith.mulf %473, %139 : vector<8x128xf32>
      %475 = arith.addf %61, %474 : vector<8x128xf32>
      %476 = arith.mulf %473, %143 : vector<8x128xf32>
      %477 = arith.addf %65, %476 : vector<8x128xf32>
      %478 = arith.subf %61, %121 : vector<8x128xf32>
      %479 = arith.mulf %478, %152 : vector<8x128xf32>
      %480 = arith.subf %65, %125 : vector<8x128xf32>
      %481 = arith.mulf %480, %148 : vector<8x128xf32>
      %482 = arith.subf %479, %481 : vector<8x128xf32>
      %483 = arith.subf %73, %121 : vector<8x128xf32>
      %484 = arith.mulf %483, %152 : vector<8x128xf32>
      %485 = arith.subf %77, %125 : vector<8x128xf32>
      %486 = arith.mulf %485, %148 : vector<8x128xf32>
      %487 = arith.subf %484, %486 : vector<8x128xf32>
      %488 = arith.subf %121, %61 : vector<8x128xf32>
      %489 = arith.mulf %488, %143 : vector<8x128xf32>
      %490 = arith.subf %125, %65 : vector<8x128xf32>
      %491 = arith.mulf %490, %139 : vector<8x128xf32>
      %492 = arith.subf %489, %491 : vector<8x128xf32>
      %493 = arith.subf %133, %61 : vector<8x128xf32>
      %494 = arith.mulf %493, %143 : vector<8x128xf32>
      %495 = arith.subf %137, %65 : vector<8x128xf32>
      %496 = arith.mulf %495, %139 : vector<8x128xf32>
      %497 = arith.subf %494, %496 : vector<8x128xf32>
      %cst_112 = arith.constant 0.000000e+00 : f32
      %498 = vector.broadcast %cst_112 : f32 to vector<8x128xf32>
      %499 = arith.cmpf ogt, %482, %498 : vector<8x128xf32>
      %cst_113 = arith.constant 0.000000e+00 : f32
      %500 = vector.broadcast %cst_113 : f32 to vector<8x128xf32>
      %501 = arith.cmpf olt, %487, %500 : vector<8x128xf32>
      %502 = arith.andi %499, %501 : vector<8x128xi1>
      %cst_114 = arith.constant 0.000000e+00 : f32
      %503 = vector.broadcast %cst_114 : f32 to vector<8x128xf32>
      %504 = arith.cmpf olt, %482, %503 : vector<8x128xf32>
      %cst_115 = arith.constant 0.000000e+00 : f32
      %505 = vector.broadcast %cst_115 : f32 to vector<8x128xf32>
      %506 = arith.cmpf ogt, %487, %505 : vector<8x128xf32>
      %507 = arith.andi %504, %506 : vector<8x128xi1>
      %508 = arith.ori %502, %507 : vector<8x128xi1>
      %cst_116 = arith.constant 0.000000e+00 : f32
      %509 = vector.broadcast %cst_116 : f32 to vector<8x128xf32>
      %510 = arith.cmpf ogt, %492, %509 : vector<8x128xf32>
      %cst_117 = arith.constant 0.000000e+00 : f32
      %511 = vector.broadcast %cst_117 : f32 to vector<8x128xf32>
      %512 = arith.cmpf olt, %497, %511 : vector<8x128xf32>
      %513 = arith.andi %510, %512 : vector<8x128xi1>
      %cst_118 = arith.constant 0.000000e+00 : f32
      %514 = vector.broadcast %cst_118 : f32 to vector<8x128xf32>
      %515 = arith.cmpf olt, %492, %514 : vector<8x128xf32>
      %cst_119 = arith.constant 0.000000e+00 : f32
      %516 = vector.broadcast %cst_119 : f32 to vector<8x128xf32>
      %517 = arith.cmpf ogt, %497, %516 : vector<8x128xf32>
      %518 = arith.andi %515, %517 : vector<8x128xi1>
      %519 = arith.ori %513, %518 : vector<8x128xi1>
      %520 = arith.andi %508, %519 : vector<8x128xi1>
      %521 = arith.subf %482, %487 : vector<8x128xf32>
      %522 = math.absf %521 : vector<8x128xf32>
      %cst_120 = arith.constant 9.99999996E-13 : f32
      %523 = vector.broadcast %cst_120 : f32 to vector<8x128xf32>
      %524 = arith.cmpf ogt, %522, %523 : vector<8x128xf32>
      %cst_121 = arith.constant 1.000000e+00 : f32
      %525 = vector.broadcast %cst_121 : f32 to vector<8x128xf32>
      %526 = arith.select %524, %521, %525 : vector<8x128xi1>, vector<8x128xf32>
      %527 = arith.divf %482, %526 : vector<8x128xf32>
      %528 = arith.mulf %527, %139 : vector<8x128xf32>
      %529 = arith.addf %61, %528 : vector<8x128xf32>
      %530 = arith.mulf %527, %143 : vector<8x128xf32>
      %531 = arith.addf %65, %530 : vector<8x128xf32>
      %532 = arith.subf %61, %133 : vector<8x128xf32>
      %533 = arith.mulf %532, %153 : vector<8x128xf32>
      %534 = arith.subf %65, %137 : vector<8x128xf32>
      %535 = arith.mulf %534, %149 : vector<8x128xf32>
      %536 = arith.subf %533, %535 : vector<8x128xf32>
      %537 = arith.subf %73, %133 : vector<8x128xf32>
      %538 = arith.mulf %537, %153 : vector<8x128xf32>
      %539 = arith.subf %77, %137 : vector<8x128xf32>
      %540 = arith.mulf %539, %149 : vector<8x128xf32>
      %541 = arith.subf %538, %540 : vector<8x128xf32>
      %542 = arith.subf %133, %61 : vector<8x128xf32>
      %543 = arith.mulf %542, %143 : vector<8x128xf32>
      %544 = arith.subf %137, %65 : vector<8x128xf32>
      %545 = arith.mulf %544, %139 : vector<8x128xf32>
      %546 = arith.subf %543, %545 : vector<8x128xf32>
      %547 = arith.subf %97, %61 : vector<8x128xf32>
      %548 = arith.mulf %547, %143 : vector<8x128xf32>
      %549 = arith.subf %101, %65 : vector<8x128xf32>
      %550 = arith.mulf %549, %139 : vector<8x128xf32>
      %551 = arith.subf %548, %550 : vector<8x128xf32>
      %cst_122 = arith.constant 0.000000e+00 : f32
      %552 = vector.broadcast %cst_122 : f32 to vector<8x128xf32>
      %553 = arith.cmpf ogt, %536, %552 : vector<8x128xf32>
      %cst_123 = arith.constant 0.000000e+00 : f32
      %554 = vector.broadcast %cst_123 : f32 to vector<8x128xf32>
      %555 = arith.cmpf olt, %541, %554 : vector<8x128xf32>
      %556 = arith.andi %553, %555 : vector<8x128xi1>
      %cst_124 = arith.constant 0.000000e+00 : f32
      %557 = vector.broadcast %cst_124 : f32 to vector<8x128xf32>
      %558 = arith.cmpf olt, %536, %557 : vector<8x128xf32>
      %cst_125 = arith.constant 0.000000e+00 : f32
      %559 = vector.broadcast %cst_125 : f32 to vector<8x128xf32>
      %560 = arith.cmpf ogt, %541, %559 : vector<8x128xf32>
      %561 = arith.andi %558, %560 : vector<8x128xi1>
      %562 = arith.ori %556, %561 : vector<8x128xi1>
      %cst_126 = arith.constant 0.000000e+00 : f32
      %563 = vector.broadcast %cst_126 : f32 to vector<8x128xf32>
      %564 = arith.cmpf ogt, %546, %563 : vector<8x128xf32>
      %cst_127 = arith.constant 0.000000e+00 : f32
      %565 = vector.broadcast %cst_127 : f32 to vector<8x128xf32>
      %566 = arith.cmpf olt, %551, %565 : vector<8x128xf32>
      %567 = arith.andi %564, %566 : vector<8x128xi1>
      %cst_128 = arith.constant 0.000000e+00 : f32
      %568 = vector.broadcast %cst_128 : f32 to vector<8x128xf32>
      %569 = arith.cmpf olt, %546, %568 : vector<8x128xf32>
      %cst_129 = arith.constant 0.000000e+00 : f32
      %570 = vector.broadcast %cst_129 : f32 to vector<8x128xf32>
      %571 = arith.cmpf ogt, %551, %570 : vector<8x128xf32>
      %572 = arith.andi %569, %571 : vector<8x128xi1>
      %573 = arith.ori %567, %572 : vector<8x128xi1>
      %574 = arith.andi %562, %573 : vector<8x128xi1>
      %575 = arith.subf %536, %541 : vector<8x128xf32>
      %576 = math.absf %575 : vector<8x128xf32>
      %cst_130 = arith.constant 9.99999996E-13 : f32
      %577 = vector.broadcast %cst_130 : f32 to vector<8x128xf32>
      %578 = arith.cmpf ogt, %576, %577 : vector<8x128xf32>
      %cst_131 = arith.constant 1.000000e+00 : f32
      %579 = vector.broadcast %cst_131 : f32 to vector<8x128xf32>
      %580 = arith.select %578, %575, %579 : vector<8x128xi1>, vector<8x128xf32>
      %581 = arith.divf %536, %580 : vector<8x128xf32>
      %582 = arith.mulf %581, %139 : vector<8x128xf32>
      %583 = arith.addf %61, %582 : vector<8x128xf32>
      %584 = arith.mulf %581, %143 : vector<8x128xf32>
      %585 = arith.addf %65, %584 : vector<8x128xf32>
      %586 = arith.subf %73, %97 : vector<8x128xf32>
      %587 = arith.mulf %586, %150 : vector<8x128xf32>
      %588 = arith.subf %77, %101 : vector<8x128xf32>
      %589 = arith.mulf %588, %146 : vector<8x128xf32>
      %590 = arith.subf %587, %589 : vector<8x128xf32>
      %591 = arith.subf %85, %97 : vector<8x128xf32>
      %592 = arith.mulf %591, %150 : vector<8x128xf32>
      %593 = arith.subf %89, %101 : vector<8x128xf32>
      %594 = arith.mulf %593, %146 : vector<8x128xf32>
      %595 = arith.subf %592, %594 : vector<8x128xf32>
      %596 = arith.subf %97, %73 : vector<8x128xf32>
      %597 = arith.mulf %596, %144 : vector<8x128xf32>
      %598 = arith.subf %101, %77 : vector<8x128xf32>
      %599 = arith.mulf %598, %140 : vector<8x128xf32>
      %600 = arith.subf %597, %599 : vector<8x128xf32>
      %601 = arith.subf %109, %73 : vector<8x128xf32>
      %602 = arith.mulf %601, %144 : vector<8x128xf32>
      %603 = arith.subf %113, %77 : vector<8x128xf32>
      %604 = arith.mulf %603, %140 : vector<8x128xf32>
      %605 = arith.subf %602, %604 : vector<8x128xf32>
      %cst_132 = arith.constant 0.000000e+00 : f32
      %606 = vector.broadcast %cst_132 : f32 to vector<8x128xf32>
      %607 = arith.cmpf ogt, %590, %606 : vector<8x128xf32>
      %cst_133 = arith.constant 0.000000e+00 : f32
      %608 = vector.broadcast %cst_133 : f32 to vector<8x128xf32>
      %609 = arith.cmpf olt, %595, %608 : vector<8x128xf32>
      %610 = arith.andi %607, %609 : vector<8x128xi1>
      %cst_134 = arith.constant 0.000000e+00 : f32
      %611 = vector.broadcast %cst_134 : f32 to vector<8x128xf32>
      %612 = arith.cmpf olt, %590, %611 : vector<8x128xf32>
      %cst_135 = arith.constant 0.000000e+00 : f32
      %613 = vector.broadcast %cst_135 : f32 to vector<8x128xf32>
      %614 = arith.cmpf ogt, %595, %613 : vector<8x128xf32>
      %615 = arith.andi %612, %614 : vector<8x128xi1>
      %616 = arith.ori %610, %615 : vector<8x128xi1>
      %cst_136 = arith.constant 0.000000e+00 : f32
      %617 = vector.broadcast %cst_136 : f32 to vector<8x128xf32>
      %618 = arith.cmpf ogt, %600, %617 : vector<8x128xf32>
      %cst_137 = arith.constant 0.000000e+00 : f32
      %619 = vector.broadcast %cst_137 : f32 to vector<8x128xf32>
      %620 = arith.cmpf olt, %605, %619 : vector<8x128xf32>
      %621 = arith.andi %618, %620 : vector<8x128xi1>
      %cst_138 = arith.constant 0.000000e+00 : f32
      %622 = vector.broadcast %cst_138 : f32 to vector<8x128xf32>
      %623 = arith.cmpf olt, %600, %622 : vector<8x128xf32>
      %cst_139 = arith.constant 0.000000e+00 : f32
      %624 = vector.broadcast %cst_139 : f32 to vector<8x128xf32>
      %625 = arith.cmpf ogt, %605, %624 : vector<8x128xf32>
      %626 = arith.andi %623, %625 : vector<8x128xi1>
      %627 = arith.ori %621, %626 : vector<8x128xi1>
      %628 = arith.andi %616, %627 : vector<8x128xi1>
      %629 = arith.subf %590, %595 : vector<8x128xf32>
      %630 = math.absf %629 : vector<8x128xf32>
      %cst_140 = arith.constant 9.99999996E-13 : f32
      %631 = vector.broadcast %cst_140 : f32 to vector<8x128xf32>
      %632 = arith.cmpf ogt, %630, %631 : vector<8x128xf32>
      %cst_141 = arith.constant 1.000000e+00 : f32
      %633 = vector.broadcast %cst_141 : f32 to vector<8x128xf32>
      %634 = arith.select %632, %629, %633 : vector<8x128xi1>, vector<8x128xf32>
      %635 = arith.divf %590, %634 : vector<8x128xf32>
      %636 = arith.mulf %635, %140 : vector<8x128xf32>
      %637 = arith.addf %73, %636 : vector<8x128xf32>
      %638 = arith.mulf %635, %144 : vector<8x128xf32>
      %639 = arith.addf %77, %638 : vector<8x128xf32>
      %640 = arith.subf %73, %109 : vector<8x128xf32>
      %641 = arith.mulf %640, %151 : vector<8x128xf32>
      %642 = arith.subf %77, %113 : vector<8x128xf32>
      %643 = arith.mulf %642, %147 : vector<8x128xf32>
      %644 = arith.subf %641, %643 : vector<8x128xf32>
      %645 = arith.subf %85, %109 : vector<8x128xf32>
      %646 = arith.mulf %645, %151 : vector<8x128xf32>
      %647 = arith.subf %89, %113 : vector<8x128xf32>
      %648 = arith.mulf %647, %147 : vector<8x128xf32>
      %649 = arith.subf %646, %648 : vector<8x128xf32>
      %650 = arith.subf %109, %73 : vector<8x128xf32>
      %651 = arith.mulf %650, %144 : vector<8x128xf32>
      %652 = arith.subf %113, %77 : vector<8x128xf32>
      %653 = arith.mulf %652, %140 : vector<8x128xf32>
      %654 = arith.subf %651, %653 : vector<8x128xf32>
      %655 = arith.subf %121, %73 : vector<8x128xf32>
      %656 = arith.mulf %655, %144 : vector<8x128xf32>
      %657 = arith.subf %125, %77 : vector<8x128xf32>
      %658 = arith.mulf %657, %140 : vector<8x128xf32>
      %659 = arith.subf %656, %658 : vector<8x128xf32>
      %cst_142 = arith.constant 0.000000e+00 : f32
      %660 = vector.broadcast %cst_142 : f32 to vector<8x128xf32>
      %661 = arith.cmpf ogt, %644, %660 : vector<8x128xf32>
      %cst_143 = arith.constant 0.000000e+00 : f32
      %662 = vector.broadcast %cst_143 : f32 to vector<8x128xf32>
      %663 = arith.cmpf olt, %649, %662 : vector<8x128xf32>
      %664 = arith.andi %661, %663 : vector<8x128xi1>
      %cst_144 = arith.constant 0.000000e+00 : f32
      %665 = vector.broadcast %cst_144 : f32 to vector<8x128xf32>
      %666 = arith.cmpf olt, %644, %665 : vector<8x128xf32>
      %cst_145 = arith.constant 0.000000e+00 : f32
      %667 = vector.broadcast %cst_145 : f32 to vector<8x128xf32>
      %668 = arith.cmpf ogt, %649, %667 : vector<8x128xf32>
      %669 = arith.andi %666, %668 : vector<8x128xi1>
      %670 = arith.ori %664, %669 : vector<8x128xi1>
      %cst_146 = arith.constant 0.000000e+00 : f32
      %671 = vector.broadcast %cst_146 : f32 to vector<8x128xf32>
      %672 = arith.cmpf ogt, %654, %671 : vector<8x128xf32>
      %cst_147 = arith.constant 0.000000e+00 : f32
      %673 = vector.broadcast %cst_147 : f32 to vector<8x128xf32>
      %674 = arith.cmpf olt, %659, %673 : vector<8x128xf32>
      %675 = arith.andi %672, %674 : vector<8x128xi1>
      %cst_148 = arith.constant 0.000000e+00 : f32
      %676 = vector.broadcast %cst_148 : f32 to vector<8x128xf32>
      %677 = arith.cmpf olt, %654, %676 : vector<8x128xf32>
      %cst_149 = arith.constant 0.000000e+00 : f32
      %678 = vector.broadcast %cst_149 : f32 to vector<8x128xf32>
      %679 = arith.cmpf ogt, %659, %678 : vector<8x128xf32>
      %680 = arith.andi %677, %679 : vector<8x128xi1>
      %681 = arith.ori %675, %680 : vector<8x128xi1>
      %682 = arith.andi %670, %681 : vector<8x128xi1>
      %683 = arith.subf %644, %649 : vector<8x128xf32>
      %684 = math.absf %683 : vector<8x128xf32>
      %cst_150 = arith.constant 9.99999996E-13 : f32
      %685 = vector.broadcast %cst_150 : f32 to vector<8x128xf32>
      %686 = arith.cmpf ogt, %684, %685 : vector<8x128xf32>
      %cst_151 = arith.constant 1.000000e+00 : f32
      %687 = vector.broadcast %cst_151 : f32 to vector<8x128xf32>
      %688 = arith.select %686, %683, %687 : vector<8x128xi1>, vector<8x128xf32>
      %689 = arith.divf %644, %688 : vector<8x128xf32>
      %690 = arith.mulf %689, %140 : vector<8x128xf32>
      %691 = arith.addf %73, %690 : vector<8x128xf32>
      %692 = arith.mulf %689, %144 : vector<8x128xf32>
      %693 = arith.addf %77, %692 : vector<8x128xf32>
      %694 = arith.subf %73, %121 : vector<8x128xf32>
      %695 = arith.mulf %694, %152 : vector<8x128xf32>
      %696 = arith.subf %77, %125 : vector<8x128xf32>
      %697 = arith.mulf %696, %148 : vector<8x128xf32>
      %698 = arith.subf %695, %697 : vector<8x128xf32>
      %699 = arith.subf %85, %121 : vector<8x128xf32>
      %700 = arith.mulf %699, %152 : vector<8x128xf32>
      %701 = arith.subf %89, %125 : vector<8x128xf32>
      %702 = arith.mulf %701, %148 : vector<8x128xf32>
      %703 = arith.subf %700, %702 : vector<8x128xf32>
      %704 = arith.subf %121, %73 : vector<8x128xf32>
      %705 = arith.mulf %704, %144 : vector<8x128xf32>
      %706 = arith.subf %125, %77 : vector<8x128xf32>
      %707 = arith.mulf %706, %140 : vector<8x128xf32>
      %708 = arith.subf %705, %707 : vector<8x128xf32>
      %709 = arith.subf %133, %73 : vector<8x128xf32>
      %710 = arith.mulf %709, %144 : vector<8x128xf32>
      %711 = arith.subf %137, %77 : vector<8x128xf32>
      %712 = arith.mulf %711, %140 : vector<8x128xf32>
      %713 = arith.subf %710, %712 : vector<8x128xf32>
      %cst_152 = arith.constant 0.000000e+00 : f32
      %714 = vector.broadcast %cst_152 : f32 to vector<8x128xf32>
      %715 = arith.cmpf ogt, %698, %714 : vector<8x128xf32>
      %cst_153 = arith.constant 0.000000e+00 : f32
      %716 = vector.broadcast %cst_153 : f32 to vector<8x128xf32>
      %717 = arith.cmpf olt, %703, %716 : vector<8x128xf32>
      %718 = arith.andi %715, %717 : vector<8x128xi1>
      %cst_154 = arith.constant 0.000000e+00 : f32
      %719 = vector.broadcast %cst_154 : f32 to vector<8x128xf32>
      %720 = arith.cmpf olt, %698, %719 : vector<8x128xf32>
      %cst_155 = arith.constant 0.000000e+00 : f32
      %721 = vector.broadcast %cst_155 : f32 to vector<8x128xf32>
      %722 = arith.cmpf ogt, %703, %721 : vector<8x128xf32>
      %723 = arith.andi %720, %722 : vector<8x128xi1>
      %724 = arith.ori %718, %723 : vector<8x128xi1>
      %cst_156 = arith.constant 0.000000e+00 : f32
      %725 = vector.broadcast %cst_156 : f32 to vector<8x128xf32>
      %726 = arith.cmpf ogt, %708, %725 : vector<8x128xf32>
      %cst_157 = arith.constant 0.000000e+00 : f32
      %727 = vector.broadcast %cst_157 : f32 to vector<8x128xf32>
      %728 = arith.cmpf olt, %713, %727 : vector<8x128xf32>
      %729 = arith.andi %726, %728 : vector<8x128xi1>
      %cst_158 = arith.constant 0.000000e+00 : f32
      %730 = vector.broadcast %cst_158 : f32 to vector<8x128xf32>
      %731 = arith.cmpf olt, %708, %730 : vector<8x128xf32>
      %cst_159 = arith.constant 0.000000e+00 : f32
      %732 = vector.broadcast %cst_159 : f32 to vector<8x128xf32>
      %733 = arith.cmpf ogt, %713, %732 : vector<8x128xf32>
      %734 = arith.andi %731, %733 : vector<8x128xi1>
      %735 = arith.ori %729, %734 : vector<8x128xi1>
      %736 = arith.andi %724, %735 : vector<8x128xi1>
      %737 = arith.subf %698, %703 : vector<8x128xf32>
      %738 = math.absf %737 : vector<8x128xf32>
      %cst_160 = arith.constant 9.99999996E-13 : f32
      %739 = vector.broadcast %cst_160 : f32 to vector<8x128xf32>
      %740 = arith.cmpf ogt, %738, %739 : vector<8x128xf32>
      %cst_161 = arith.constant 1.000000e+00 : f32
      %741 = vector.broadcast %cst_161 : f32 to vector<8x128xf32>
      %742 = arith.select %740, %737, %741 : vector<8x128xi1>, vector<8x128xf32>
      %743 = arith.divf %698, %742 : vector<8x128xf32>
      %744 = arith.mulf %743, %140 : vector<8x128xf32>
      %745 = arith.addf %73, %744 : vector<8x128xf32>
      %746 = arith.mulf %743, %144 : vector<8x128xf32>
      %747 = arith.addf %77, %746 : vector<8x128xf32>
      %748 = arith.subf %73, %133 : vector<8x128xf32>
      %749 = arith.mulf %748, %153 : vector<8x128xf32>
      %750 = arith.subf %77, %137 : vector<8x128xf32>
      %751 = arith.mulf %750, %149 : vector<8x128xf32>
      %752 = arith.subf %749, %751 : vector<8x128xf32>
      %753 = arith.subf %85, %133 : vector<8x128xf32>
      %754 = arith.mulf %753, %153 : vector<8x128xf32>
      %755 = arith.subf %89, %137 : vector<8x128xf32>
      %756 = arith.mulf %755, %149 : vector<8x128xf32>
      %757 = arith.subf %754, %756 : vector<8x128xf32>
      %758 = arith.subf %133, %73 : vector<8x128xf32>
      %759 = arith.mulf %758, %144 : vector<8x128xf32>
      %760 = arith.subf %137, %77 : vector<8x128xf32>
      %761 = arith.mulf %760, %140 : vector<8x128xf32>
      %762 = arith.subf %759, %761 : vector<8x128xf32>
      %763 = arith.subf %97, %73 : vector<8x128xf32>
      %764 = arith.mulf %763, %144 : vector<8x128xf32>
      %765 = arith.subf %101, %77 : vector<8x128xf32>
      %766 = arith.mulf %765, %140 : vector<8x128xf32>
      %767 = arith.subf %764, %766 : vector<8x128xf32>
      %cst_162 = arith.constant 0.000000e+00 : f32
      %768 = vector.broadcast %cst_162 : f32 to vector<8x128xf32>
      %769 = arith.cmpf ogt, %752, %768 : vector<8x128xf32>
      %cst_163 = arith.constant 0.000000e+00 : f32
      %770 = vector.broadcast %cst_163 : f32 to vector<8x128xf32>
      %771 = arith.cmpf olt, %757, %770 : vector<8x128xf32>
      %772 = arith.andi %769, %771 : vector<8x128xi1>
      %cst_164 = arith.constant 0.000000e+00 : f32
      %773 = vector.broadcast %cst_164 : f32 to vector<8x128xf32>
      %774 = arith.cmpf olt, %752, %773 : vector<8x128xf32>
      %cst_165 = arith.constant 0.000000e+00 : f32
      %775 = vector.broadcast %cst_165 : f32 to vector<8x128xf32>
      %776 = arith.cmpf ogt, %757, %775 : vector<8x128xf32>
      %777 = arith.andi %774, %776 : vector<8x128xi1>
      %778 = arith.ori %772, %777 : vector<8x128xi1>
      %cst_166 = arith.constant 0.000000e+00 : f32
      %779 = vector.broadcast %cst_166 : f32 to vector<8x128xf32>
      %780 = arith.cmpf ogt, %762, %779 : vector<8x128xf32>
      %cst_167 = arith.constant 0.000000e+00 : f32
      %781 = vector.broadcast %cst_167 : f32 to vector<8x128xf32>
      %782 = arith.cmpf olt, %767, %781 : vector<8x128xf32>
      %783 = arith.andi %780, %782 : vector<8x128xi1>
      %cst_168 = arith.constant 0.000000e+00 : f32
      %784 = vector.broadcast %cst_168 : f32 to vector<8x128xf32>
      %785 = arith.cmpf olt, %762, %784 : vector<8x128xf32>
      %cst_169 = arith.constant 0.000000e+00 : f32
      %786 = vector.broadcast %cst_169 : f32 to vector<8x128xf32>
      %787 = arith.cmpf ogt, %767, %786 : vector<8x128xf32>
      %788 = arith.andi %785, %787 : vector<8x128xi1>
      %789 = arith.ori %783, %788 : vector<8x128xi1>
      %790 = arith.andi %778, %789 : vector<8x128xi1>
      %791 = arith.subf %752, %757 : vector<8x128xf32>
      %792 = math.absf %791 : vector<8x128xf32>
      %cst_170 = arith.constant 9.99999996E-13 : f32
      %793 = vector.broadcast %cst_170 : f32 to vector<8x128xf32>
      %794 = arith.cmpf ogt, %792, %793 : vector<8x128xf32>
      %cst_171 = arith.constant 1.000000e+00 : f32
      %795 = vector.broadcast %cst_171 : f32 to vector<8x128xf32>
      %796 = arith.select %794, %791, %795 : vector<8x128xi1>, vector<8x128xf32>
      %797 = arith.divf %752, %796 : vector<8x128xf32>
      %798 = arith.mulf %797, %140 : vector<8x128xf32>
      %799 = arith.addf %73, %798 : vector<8x128xf32>
      %800 = arith.mulf %797, %144 : vector<8x128xf32>
      %801 = arith.addf %77, %800 : vector<8x128xf32>
      %802 = arith.subf %85, %97 : vector<8x128xf32>
      %803 = arith.mulf %802, %150 : vector<8x128xf32>
      %804 = arith.subf %89, %101 : vector<8x128xf32>
      %805 = arith.mulf %804, %146 : vector<8x128xf32>
      %806 = arith.subf %803, %805 : vector<8x128xf32>
      %807 = arith.subf %49, %97 : vector<8x128xf32>
      %808 = arith.mulf %807, %150 : vector<8x128xf32>
      %809 = arith.subf %53, %101 : vector<8x128xf32>
      %810 = arith.mulf %809, %146 : vector<8x128xf32>
      %811 = arith.subf %808, %810 : vector<8x128xf32>
      %812 = arith.subf %97, %85 : vector<8x128xf32>
      %813 = arith.mulf %812, %145 : vector<8x128xf32>
      %814 = arith.subf %101, %89 : vector<8x128xf32>
      %815 = arith.mulf %814, %141 : vector<8x128xf32>
      %816 = arith.subf %813, %815 : vector<8x128xf32>
      %817 = arith.subf %109, %85 : vector<8x128xf32>
      %818 = arith.mulf %817, %145 : vector<8x128xf32>
      %819 = arith.subf %113, %89 : vector<8x128xf32>
      %820 = arith.mulf %819, %141 : vector<8x128xf32>
      %821 = arith.subf %818, %820 : vector<8x128xf32>
      %cst_172 = arith.constant 0.000000e+00 : f32
      %822 = vector.broadcast %cst_172 : f32 to vector<8x128xf32>
      %823 = arith.cmpf ogt, %806, %822 : vector<8x128xf32>
      %cst_173 = arith.constant 0.000000e+00 : f32
      %824 = vector.broadcast %cst_173 : f32 to vector<8x128xf32>
      %825 = arith.cmpf olt, %811, %824 : vector<8x128xf32>
      %826 = arith.andi %823, %825 : vector<8x128xi1>
      %cst_174 = arith.constant 0.000000e+00 : f32
      %827 = vector.broadcast %cst_174 : f32 to vector<8x128xf32>
      %828 = arith.cmpf olt, %806, %827 : vector<8x128xf32>
      %cst_175 = arith.constant 0.000000e+00 : f32
      %829 = vector.broadcast %cst_175 : f32 to vector<8x128xf32>
      %830 = arith.cmpf ogt, %811, %829 : vector<8x128xf32>
      %831 = arith.andi %828, %830 : vector<8x128xi1>
      %832 = arith.ori %826, %831 : vector<8x128xi1>
      %cst_176 = arith.constant 0.000000e+00 : f32
      %833 = vector.broadcast %cst_176 : f32 to vector<8x128xf32>
      %834 = arith.cmpf ogt, %816, %833 : vector<8x128xf32>
      %cst_177 = arith.constant 0.000000e+00 : f32
      %835 = vector.broadcast %cst_177 : f32 to vector<8x128xf32>
      %836 = arith.cmpf olt, %821, %835 : vector<8x128xf32>
      %837 = arith.andi %834, %836 : vector<8x128xi1>
      %cst_178 = arith.constant 0.000000e+00 : f32
      %838 = vector.broadcast %cst_178 : f32 to vector<8x128xf32>
      %839 = arith.cmpf olt, %816, %838 : vector<8x128xf32>
      %cst_179 = arith.constant 0.000000e+00 : f32
      %840 = vector.broadcast %cst_179 : f32 to vector<8x128xf32>
      %841 = arith.cmpf ogt, %821, %840 : vector<8x128xf32>
      %842 = arith.andi %839, %841 : vector<8x128xi1>
      %843 = arith.ori %837, %842 : vector<8x128xi1>
      %844 = arith.andi %832, %843 : vector<8x128xi1>
      %845 = arith.subf %806, %811 : vector<8x128xf32>
      %846 = math.absf %845 : vector<8x128xf32>
      %cst_180 = arith.constant 9.99999996E-13 : f32
      %847 = vector.broadcast %cst_180 : f32 to vector<8x128xf32>
      %848 = arith.cmpf ogt, %846, %847 : vector<8x128xf32>
      %cst_181 = arith.constant 1.000000e+00 : f32
      %849 = vector.broadcast %cst_181 : f32 to vector<8x128xf32>
      %850 = arith.select %848, %845, %849 : vector<8x128xi1>, vector<8x128xf32>
      %851 = arith.divf %806, %850 : vector<8x128xf32>
      %852 = arith.mulf %851, %141 : vector<8x128xf32>
      %853 = arith.addf %85, %852 : vector<8x128xf32>
      %854 = arith.mulf %851, %145 : vector<8x128xf32>
      %855 = arith.addf %89, %854 : vector<8x128xf32>
      %856 = arith.subf %85, %109 : vector<8x128xf32>
      %857 = arith.mulf %856, %151 : vector<8x128xf32>
      %858 = arith.subf %89, %113 : vector<8x128xf32>
      %859 = arith.mulf %858, %147 : vector<8x128xf32>
      %860 = arith.subf %857, %859 : vector<8x128xf32>
      %861 = arith.subf %49, %109 : vector<8x128xf32>
      %862 = arith.mulf %861, %151 : vector<8x128xf32>
      %863 = arith.subf %53, %113 : vector<8x128xf32>
      %864 = arith.mulf %863, %147 : vector<8x128xf32>
      %865 = arith.subf %862, %864 : vector<8x128xf32>
      %866 = arith.subf %109, %85 : vector<8x128xf32>
      %867 = arith.mulf %866, %145 : vector<8x128xf32>
      %868 = arith.subf %113, %89 : vector<8x128xf32>
      %869 = arith.mulf %868, %141 : vector<8x128xf32>
      %870 = arith.subf %867, %869 : vector<8x128xf32>
      %871 = arith.subf %121, %85 : vector<8x128xf32>
      %872 = arith.mulf %871, %145 : vector<8x128xf32>
      %873 = arith.subf %125, %89 : vector<8x128xf32>
      %874 = arith.mulf %873, %141 : vector<8x128xf32>
      %875 = arith.subf %872, %874 : vector<8x128xf32>
      %cst_182 = arith.constant 0.000000e+00 : f32
      %876 = vector.broadcast %cst_182 : f32 to vector<8x128xf32>
      %877 = arith.cmpf ogt, %860, %876 : vector<8x128xf32>
      %cst_183 = arith.constant 0.000000e+00 : f32
      %878 = vector.broadcast %cst_183 : f32 to vector<8x128xf32>
      %879 = arith.cmpf olt, %865, %878 : vector<8x128xf32>
      %880 = arith.andi %877, %879 : vector<8x128xi1>
      %cst_184 = arith.constant 0.000000e+00 : f32
      %881 = vector.broadcast %cst_184 : f32 to vector<8x128xf32>
      %882 = arith.cmpf olt, %860, %881 : vector<8x128xf32>
      %cst_185 = arith.constant 0.000000e+00 : f32
      %883 = vector.broadcast %cst_185 : f32 to vector<8x128xf32>
      %884 = arith.cmpf ogt, %865, %883 : vector<8x128xf32>
      %885 = arith.andi %882, %884 : vector<8x128xi1>
      %886 = arith.ori %880, %885 : vector<8x128xi1>
      %cst_186 = arith.constant 0.000000e+00 : f32
      %887 = vector.broadcast %cst_186 : f32 to vector<8x128xf32>
      %888 = arith.cmpf ogt, %870, %887 : vector<8x128xf32>
      %cst_187 = arith.constant 0.000000e+00 : f32
      %889 = vector.broadcast %cst_187 : f32 to vector<8x128xf32>
      %890 = arith.cmpf olt, %875, %889 : vector<8x128xf32>
      %891 = arith.andi %888, %890 : vector<8x128xi1>
      %cst_188 = arith.constant 0.000000e+00 : f32
      %892 = vector.broadcast %cst_188 : f32 to vector<8x128xf32>
      %893 = arith.cmpf olt, %870, %892 : vector<8x128xf32>
      %cst_189 = arith.constant 0.000000e+00 : f32
      %894 = vector.broadcast %cst_189 : f32 to vector<8x128xf32>
      %895 = arith.cmpf ogt, %875, %894 : vector<8x128xf32>
      %896 = arith.andi %893, %895 : vector<8x128xi1>
      %897 = arith.ori %891, %896 : vector<8x128xi1>
      %898 = arith.andi %886, %897 : vector<8x128xi1>
      %899 = arith.subf %860, %865 : vector<8x128xf32>
      %900 = math.absf %899 : vector<8x128xf32>
      %cst_190 = arith.constant 9.99999996E-13 : f32
      %901 = vector.broadcast %cst_190 : f32 to vector<8x128xf32>
      %902 = arith.cmpf ogt, %900, %901 : vector<8x128xf32>
      %cst_191 = arith.constant 1.000000e+00 : f32
      %903 = vector.broadcast %cst_191 : f32 to vector<8x128xf32>
      %904 = arith.select %902, %899, %903 : vector<8x128xi1>, vector<8x128xf32>
      %905 = arith.divf %860, %904 : vector<8x128xf32>
      %906 = arith.mulf %905, %141 : vector<8x128xf32>
      %907 = arith.addf %85, %906 : vector<8x128xf32>
      %908 = arith.mulf %905, %145 : vector<8x128xf32>
      %909 = arith.addf %89, %908 : vector<8x128xf32>
      %910 = arith.subf %85, %121 : vector<8x128xf32>
      %911 = arith.mulf %910, %152 : vector<8x128xf32>
      %912 = arith.subf %89, %125 : vector<8x128xf32>
      %913 = arith.mulf %912, %148 : vector<8x128xf32>
      %914 = arith.subf %911, %913 : vector<8x128xf32>
      %915 = arith.subf %49, %121 : vector<8x128xf32>
      %916 = arith.mulf %915, %152 : vector<8x128xf32>
      %917 = arith.subf %53, %125 : vector<8x128xf32>
      %918 = arith.mulf %917, %148 : vector<8x128xf32>
      %919 = arith.subf %916, %918 : vector<8x128xf32>
      %920 = arith.subf %121, %85 : vector<8x128xf32>
      %921 = arith.mulf %920, %145 : vector<8x128xf32>
      %922 = arith.subf %125, %89 : vector<8x128xf32>
      %923 = arith.mulf %922, %141 : vector<8x128xf32>
      %924 = arith.subf %921, %923 : vector<8x128xf32>
      %925 = arith.subf %133, %85 : vector<8x128xf32>
      %926 = arith.mulf %925, %145 : vector<8x128xf32>
      %927 = arith.subf %137, %89 : vector<8x128xf32>
      %928 = arith.mulf %927, %141 : vector<8x128xf32>
      %929 = arith.subf %926, %928 : vector<8x128xf32>
      %cst_192 = arith.constant 0.000000e+00 : f32
      %930 = vector.broadcast %cst_192 : f32 to vector<8x128xf32>
      %931 = arith.cmpf ogt, %914, %930 : vector<8x128xf32>
      %cst_193 = arith.constant 0.000000e+00 : f32
      %932 = vector.broadcast %cst_193 : f32 to vector<8x128xf32>
      %933 = arith.cmpf olt, %919, %932 : vector<8x128xf32>
      %934 = arith.andi %931, %933 : vector<8x128xi1>
      %cst_194 = arith.constant 0.000000e+00 : f32
      %935 = vector.broadcast %cst_194 : f32 to vector<8x128xf32>
      %936 = arith.cmpf olt, %914, %935 : vector<8x128xf32>
      %cst_195 = arith.constant 0.000000e+00 : f32
      %937 = vector.broadcast %cst_195 : f32 to vector<8x128xf32>
      %938 = arith.cmpf ogt, %919, %937 : vector<8x128xf32>
      %939 = arith.andi %936, %938 : vector<8x128xi1>
      %940 = arith.ori %934, %939 : vector<8x128xi1>
      %cst_196 = arith.constant 0.000000e+00 : f32
      %941 = vector.broadcast %cst_196 : f32 to vector<8x128xf32>
      %942 = arith.cmpf ogt, %924, %941 : vector<8x128xf32>
      %cst_197 = arith.constant 0.000000e+00 : f32
      %943 = vector.broadcast %cst_197 : f32 to vector<8x128xf32>
      %944 = arith.cmpf olt, %929, %943 : vector<8x128xf32>
      %945 = arith.andi %942, %944 : vector<8x128xi1>
      %cst_198 = arith.constant 0.000000e+00 : f32
      %946 = vector.broadcast %cst_198 : f32 to vector<8x128xf32>
      %947 = arith.cmpf olt, %924, %946 : vector<8x128xf32>
      %cst_199 = arith.constant 0.000000e+00 : f32
      %948 = vector.broadcast %cst_199 : f32 to vector<8x128xf32>
      %949 = arith.cmpf ogt, %929, %948 : vector<8x128xf32>
      %950 = arith.andi %947, %949 : vector<8x128xi1>
      %951 = arith.ori %945, %950 : vector<8x128xi1>
      %952 = arith.andi %940, %951 : vector<8x128xi1>
      %953 = arith.subf %914, %919 : vector<8x128xf32>
      %954 = math.absf %953 : vector<8x128xf32>
      %cst_200 = arith.constant 9.99999996E-13 : f32
      %955 = vector.broadcast %cst_200 : f32 to vector<8x128xf32>
      %956 = arith.cmpf ogt, %954, %955 : vector<8x128xf32>
      %cst_201 = arith.constant 1.000000e+00 : f32
      %957 = vector.broadcast %cst_201 : f32 to vector<8x128xf32>
      %958 = arith.select %956, %953, %957 : vector<8x128xi1>, vector<8x128xf32>
      %959 = arith.divf %914, %958 : vector<8x128xf32>
      %960 = arith.mulf %959, %141 : vector<8x128xf32>
      %961 = arith.addf %85, %960 : vector<8x128xf32>
      %962 = arith.mulf %959, %145 : vector<8x128xf32>
      %963 = arith.addf %89, %962 : vector<8x128xf32>
      %964 = arith.subf %85, %133 : vector<8x128xf32>
      %965 = arith.mulf %964, %153 : vector<8x128xf32>
      %966 = arith.subf %89, %137 : vector<8x128xf32>
      %967 = arith.mulf %966, %149 : vector<8x128xf32>
      %968 = arith.subf %965, %967 : vector<8x128xf32>
      %969 = arith.subf %49, %133 : vector<8x128xf32>
      %970 = arith.mulf %969, %153 : vector<8x128xf32>
      %971 = arith.subf %53, %137 : vector<8x128xf32>
      %972 = arith.mulf %971, %149 : vector<8x128xf32>
      %973 = arith.subf %970, %972 : vector<8x128xf32>
      %974 = arith.subf %133, %85 : vector<8x128xf32>
      %975 = arith.mulf %974, %145 : vector<8x128xf32>
      %976 = arith.subf %137, %89 : vector<8x128xf32>
      %977 = arith.mulf %976, %141 : vector<8x128xf32>
      %978 = arith.subf %975, %977 : vector<8x128xf32>
      %979 = arith.subf %97, %85 : vector<8x128xf32>
      %980 = arith.mulf %979, %145 : vector<8x128xf32>
      %981 = arith.subf %101, %89 : vector<8x128xf32>
      %982 = arith.mulf %981, %141 : vector<8x128xf32>
      %983 = arith.subf %980, %982 : vector<8x128xf32>
      %cst_202 = arith.constant 0.000000e+00 : f32
      %984 = vector.broadcast %cst_202 : f32 to vector<8x128xf32>
      %985 = arith.cmpf ogt, %968, %984 : vector<8x128xf32>
      %cst_203 = arith.constant 0.000000e+00 : f32
      %986 = vector.broadcast %cst_203 : f32 to vector<8x128xf32>
      %987 = arith.cmpf olt, %973, %986 : vector<8x128xf32>
      %988 = arith.andi %985, %987 : vector<8x128xi1>
      %cst_204 = arith.constant 0.000000e+00 : f32
      %989 = vector.broadcast %cst_204 : f32 to vector<8x128xf32>
      %990 = arith.cmpf olt, %968, %989 : vector<8x128xf32>
      %cst_205 = arith.constant 0.000000e+00 : f32
      %991 = vector.broadcast %cst_205 : f32 to vector<8x128xf32>
      %992 = arith.cmpf ogt, %973, %991 : vector<8x128xf32>
      %993 = arith.andi %990, %992 : vector<8x128xi1>
      %994 = arith.ori %988, %993 : vector<8x128xi1>
      %cst_206 = arith.constant 0.000000e+00 : f32
      %995 = vector.broadcast %cst_206 : f32 to vector<8x128xf32>
      %996 = arith.cmpf ogt, %978, %995 : vector<8x128xf32>
      %cst_207 = arith.constant 0.000000e+00 : f32
      %997 = vector.broadcast %cst_207 : f32 to vector<8x128xf32>
      %998 = arith.cmpf olt, %983, %997 : vector<8x128xf32>
      %999 = arith.andi %996, %998 : vector<8x128xi1>
      %cst_208 = arith.constant 0.000000e+00 : f32
      %1000 = vector.broadcast %cst_208 : f32 to vector<8x128xf32>
      %1001 = arith.cmpf olt, %978, %1000 : vector<8x128xf32>
      %cst_209 = arith.constant 0.000000e+00 : f32
      %1002 = vector.broadcast %cst_209 : f32 to vector<8x128xf32>
      %1003 = arith.cmpf ogt, %983, %1002 : vector<8x128xf32>
      %1004 = arith.andi %1001, %1003 : vector<8x128xi1>
      %1005 = arith.ori %999, %1004 : vector<8x128xi1>
      %1006 = arith.andi %994, %1005 : vector<8x128xi1>
      %1007 = arith.subf %968, %973 : vector<8x128xf32>
      %1008 = math.absf %1007 : vector<8x128xf32>
      %cst_210 = arith.constant 9.99999996E-13 : f32
      %1009 = vector.broadcast %cst_210 : f32 to vector<8x128xf32>
      %1010 = arith.cmpf ogt, %1008, %1009 : vector<8x128xf32>
      %cst_211 = arith.constant 1.000000e+00 : f32
      %1011 = vector.broadcast %cst_211 : f32 to vector<8x128xf32>
      %1012 = arith.select %1010, %1007, %1011 : vector<8x128xi1>, vector<8x128xf32>
      %1013 = arith.divf %968, %1012 : vector<8x128xf32>
      %1014 = arith.mulf %1013, %141 : vector<8x128xf32>
      %1015 = arith.addf %85, %1014 : vector<8x128xf32>
      %1016 = arith.mulf %1013, %145 : vector<8x128xf32>
      %1017 = arith.addf %89, %1016 : vector<8x128xf32>
      %1018 = arith.subf %49, %23 : vector<8x128xf32>
      %1019 = arith.subf %53, %25 : vector<8x128xf32>
      %1020 = arith.mulf %1018, %31 : vector<8x128xf32>
      %1021 = arith.mulf %1019, %33 : vector<8x128xf32>
      %1022 = arith.addf %1020, %1021 : vector<8x128xf32>
      %cst_212 = arith.constant 0.000000e+00 : f32
      %1023 = vector.broadcast %cst_212 : f32 to vector<8x128xf32>
      %1024 = arith.subf %1023, %1018 : vector<8x128xf32>
      %1025 = arith.mulf %1024, %33 : vector<8x128xf32>
      %1026 = arith.mulf %1019, %31 : vector<8x128xf32>
      %1027 = arith.addf %1025, %1026 : vector<8x128xf32>
      %1028 = math.absf %1022 : vector<8x128xf32>
      %cst_213 = arith.constant 0.00999999977 : f32
      %1029 = vector.broadcast %cst_213 : f32 to vector<8x128xf32>
      %1030 = arith.addf %39, %1029 : vector<8x128xf32>
      %1031 = arith.cmpf olt, %1028, %1030 : vector<8x128xf32>
      %1032 = math.absf %1027 : vector<8x128xf32>
      %cst_214 = arith.constant 0.00999999977 : f32
      %1033 = vector.broadcast %cst_214 : f32 to vector<8x128xf32>
      %1034 = arith.addf %41, %1033 : vector<8x128xf32>
      %1035 = arith.cmpf olt, %1032, %1034 : vector<8x128xf32>
      %1036 = arith.andi %1031, %1035 : vector<8x128xi1>
      %1037 = arith.subf %61, %23 : vector<8x128xf32>
      %1038 = arith.subf %65, %25 : vector<8x128xf32>
      %1039 = arith.mulf %1037, %31 : vector<8x128xf32>
      %1040 = arith.mulf %1038, %33 : vector<8x128xf32>
      %1041 = arith.addf %1039, %1040 : vector<8x128xf32>
      %cst_215 = arith.constant 0.000000e+00 : f32
      %1042 = vector.broadcast %cst_215 : f32 to vector<8x128xf32>
      %1043 = arith.subf %1042, %1037 : vector<8x128xf32>
      %1044 = arith.mulf %1043, %33 : vector<8x128xf32>
      %1045 = arith.mulf %1038, %31 : vector<8x128xf32>
      %1046 = arith.addf %1044, %1045 : vector<8x128xf32>
      %1047 = math.absf %1041 : vector<8x128xf32>
      %cst_216 = arith.constant 0.00999999977 : f32
      %1048 = vector.broadcast %cst_216 : f32 to vector<8x128xf32>
      %1049 = arith.addf %39, %1048 : vector<8x128xf32>
      %1050 = arith.cmpf olt, %1047, %1049 : vector<8x128xf32>
      %1051 = math.absf %1046 : vector<8x128xf32>
      %cst_217 = arith.constant 0.00999999977 : f32
      %1052 = vector.broadcast %cst_217 : f32 to vector<8x128xf32>
      %1053 = arith.addf %41, %1052 : vector<8x128xf32>
      %1054 = arith.cmpf olt, %1051, %1053 : vector<8x128xf32>
      %1055 = arith.andi %1050, %1054 : vector<8x128xi1>
      %1056 = arith.subf %73, %23 : vector<8x128xf32>
      %1057 = arith.subf %77, %25 : vector<8x128xf32>
      %1058 = arith.mulf %1056, %31 : vector<8x128xf32>
      %1059 = arith.mulf %1057, %33 : vector<8x128xf32>
      %1060 = arith.addf %1058, %1059 : vector<8x128xf32>
      %cst_218 = arith.constant 0.000000e+00 : f32
      %1061 = vector.broadcast %cst_218 : f32 to vector<8x128xf32>
      %1062 = arith.subf %1061, %1056 : vector<8x128xf32>
      %1063 = arith.mulf %1062, %33 : vector<8x128xf32>
      %1064 = arith.mulf %1057, %31 : vector<8x128xf32>
      %1065 = arith.addf %1063, %1064 : vector<8x128xf32>
      %1066 = math.absf %1060 : vector<8x128xf32>
      %cst_219 = arith.constant 0.00999999977 : f32
      %1067 = vector.broadcast %cst_219 : f32 to vector<8x128xf32>
      %1068 = arith.addf %39, %1067 : vector<8x128xf32>
      %1069 = arith.cmpf olt, %1066, %1068 : vector<8x128xf32>
      %1070 = math.absf %1065 : vector<8x128xf32>
      %cst_220 = arith.constant 0.00999999977 : f32
      %1071 = vector.broadcast %cst_220 : f32 to vector<8x128xf32>
      %1072 = arith.addf %41, %1071 : vector<8x128xf32>
      %1073 = arith.cmpf olt, %1070, %1072 : vector<8x128xf32>
      %1074 = arith.andi %1069, %1073 : vector<8x128xi1>
      %1075 = arith.subf %85, %23 : vector<8x128xf32>
      %1076 = arith.subf %89, %25 : vector<8x128xf32>
      %1077 = arith.mulf %1075, %31 : vector<8x128xf32>
      %1078 = arith.mulf %1076, %33 : vector<8x128xf32>
      %1079 = arith.addf %1077, %1078 : vector<8x128xf32>
      %cst_221 = arith.constant 0.000000e+00 : f32
      %1080 = vector.broadcast %cst_221 : f32 to vector<8x128xf32>
      %1081 = arith.subf %1080, %1075 : vector<8x128xf32>
      %1082 = arith.mulf %1081, %33 : vector<8x128xf32>
      %1083 = arith.mulf %1076, %31 : vector<8x128xf32>
      %1084 = arith.addf %1082, %1083 : vector<8x128xf32>
      %1085 = math.absf %1079 : vector<8x128xf32>
      %cst_222 = arith.constant 0.00999999977 : f32
      %1086 = vector.broadcast %cst_222 : f32 to vector<8x128xf32>
      %1087 = arith.addf %39, %1086 : vector<8x128xf32>
      %1088 = arith.cmpf olt, %1085, %1087 : vector<8x128xf32>
      %1089 = math.absf %1084 : vector<8x128xf32>
      %cst_223 = arith.constant 0.00999999977 : f32
      %1090 = vector.broadcast %cst_223 : f32 to vector<8x128xf32>
      %1091 = arith.addf %41, %1090 : vector<8x128xf32>
      %1092 = arith.cmpf olt, %1089, %1091 : vector<8x128xf32>
      %1093 = arith.andi %1088, %1092 : vector<8x128xi1>
      %1094 = arith.subf %97, %11 : vector<8x128xf32>
      %1095 = arith.subf %101, %13 : vector<8x128xf32>
      %1096 = arith.mulf %1094, %19 : vector<8x128xf32>
      %1097 = arith.mulf %1095, %21 : vector<8x128xf32>
      %1098 = arith.addf %1096, %1097 : vector<8x128xf32>
      %cst_224 = arith.constant 0.000000e+00 : f32
      %1099 = vector.broadcast %cst_224 : f32 to vector<8x128xf32>
      %1100 = arith.subf %1099, %1094 : vector<8x128xf32>
      %1101 = arith.mulf %1100, %21 : vector<8x128xf32>
      %1102 = arith.mulf %1095, %19 : vector<8x128xf32>
      %1103 = arith.addf %1101, %1102 : vector<8x128xf32>
      %1104 = math.absf %1098 : vector<8x128xf32>
      %cst_225 = arith.constant 0.00999999977 : f32
      %1105 = vector.broadcast %cst_225 : f32 to vector<8x128xf32>
      %1106 = arith.addf %35, %1105 : vector<8x128xf32>
      %1107 = arith.cmpf olt, %1104, %1106 : vector<8x128xf32>
      %1108 = math.absf %1103 : vector<8x128xf32>
      %cst_226 = arith.constant 0.00999999977 : f32
      %1109 = vector.broadcast %cst_226 : f32 to vector<8x128xf32>
      %1110 = arith.addf %37, %1109 : vector<8x128xf32>
      %1111 = arith.cmpf olt, %1108, %1110 : vector<8x128xf32>
      %1112 = arith.andi %1107, %1111 : vector<8x128xi1>
      %1113 = arith.subf %109, %11 : vector<8x128xf32>
      %1114 = arith.subf %113, %13 : vector<8x128xf32>
      %1115 = arith.mulf %1113, %19 : vector<8x128xf32>
      %1116 = arith.mulf %1114, %21 : vector<8x128xf32>
      %1117 = arith.addf %1115, %1116 : vector<8x128xf32>
      %cst_227 = arith.constant 0.000000e+00 : f32
      %1118 = vector.broadcast %cst_227 : f32 to vector<8x128xf32>
      %1119 = arith.subf %1118, %1113 : vector<8x128xf32>
      %1120 = arith.mulf %1119, %21 : vector<8x128xf32>
      %1121 = arith.mulf %1114, %19 : vector<8x128xf32>
      %1122 = arith.addf %1120, %1121 : vector<8x128xf32>
      %1123 = math.absf %1117 : vector<8x128xf32>
      %cst_228 = arith.constant 0.00999999977 : f32
      %1124 = vector.broadcast %cst_228 : f32 to vector<8x128xf32>
      %1125 = arith.addf %35, %1124 : vector<8x128xf32>
      %1126 = arith.cmpf olt, %1123, %1125 : vector<8x128xf32>
      %1127 = math.absf %1122 : vector<8x128xf32>
      %cst_229 = arith.constant 0.00999999977 : f32
      %1128 = vector.broadcast %cst_229 : f32 to vector<8x128xf32>
      %1129 = arith.addf %37, %1128 : vector<8x128xf32>
      %1130 = arith.cmpf olt, %1127, %1129 : vector<8x128xf32>
      %1131 = arith.andi %1126, %1130 : vector<8x128xi1>
      %1132 = arith.subf %121, %11 : vector<8x128xf32>
      %1133 = arith.subf %125, %13 : vector<8x128xf32>
      %1134 = arith.mulf %1132, %19 : vector<8x128xf32>
      %1135 = arith.mulf %1133, %21 : vector<8x128xf32>
      %1136 = arith.addf %1134, %1135 : vector<8x128xf32>
      %cst_230 = arith.constant 0.000000e+00 : f32
      %1137 = vector.broadcast %cst_230 : f32 to vector<8x128xf32>
      %1138 = arith.subf %1137, %1132 : vector<8x128xf32>
      %1139 = arith.mulf %1138, %21 : vector<8x128xf32>
      %1140 = arith.mulf %1133, %19 : vector<8x128xf32>
      %1141 = arith.addf %1139, %1140 : vector<8x128xf32>
      %1142 = math.absf %1136 : vector<8x128xf32>
      %cst_231 = arith.constant 0.00999999977 : f32
      %1143 = vector.broadcast %cst_231 : f32 to vector<8x128xf32>
      %1144 = arith.addf %35, %1143 : vector<8x128xf32>
      %1145 = arith.cmpf olt, %1142, %1144 : vector<8x128xf32>
      %1146 = math.absf %1141 : vector<8x128xf32>
      %cst_232 = arith.constant 0.00999999977 : f32
      %1147 = vector.broadcast %cst_232 : f32 to vector<8x128xf32>
      %1148 = arith.addf %37, %1147 : vector<8x128xf32>
      %1149 = arith.cmpf olt, %1146, %1148 : vector<8x128xf32>
      %1150 = arith.andi %1145, %1149 : vector<8x128xi1>
      %1151 = arith.subf %133, %11 : vector<8x128xf32>
      %1152 = arith.subf %137, %13 : vector<8x128xf32>
      %1153 = arith.mulf %1151, %19 : vector<8x128xf32>
      %1154 = arith.mulf %1152, %21 : vector<8x128xf32>
      %1155 = arith.addf %1153, %1154 : vector<8x128xf32>
      %cst_233 = arith.constant 0.000000e+00 : f32
      %1156 = vector.broadcast %cst_233 : f32 to vector<8x128xf32>
      %1157 = arith.subf %1156, %1151 : vector<8x128xf32>
      %1158 = arith.mulf %1157, %21 : vector<8x128xf32>
      %1159 = arith.mulf %1152, %19 : vector<8x128xf32>
      %1160 = arith.addf %1158, %1159 : vector<8x128xf32>
      %1161 = math.absf %1155 : vector<8x128xf32>
      %cst_234 = arith.constant 0.00999999977 : f32
      %1162 = vector.broadcast %cst_234 : f32 to vector<8x128xf32>
      %1163 = arith.addf %35, %1162 : vector<8x128xf32>
      %1164 = arith.cmpf olt, %1161, %1163 : vector<8x128xf32>
      %1165 = math.absf %1160 : vector<8x128xf32>
      %cst_235 = arith.constant 0.00999999977 : f32
      %1166 = vector.broadcast %cst_235 : f32 to vector<8x128xf32>
      %1167 = arith.addf %37, %1166 : vector<8x128xf32>
      %1168 = arith.cmpf olt, %1165, %1167 : vector<8x128xf32>
      %1169 = arith.andi %1164, %1168 : vector<8x128xi1>
      %1170 = arith.extui %196 : vector<8x128xi1> to vector<8x128xi32>
      %1171 = arith.sitofp %1170 : vector<8x128xi32> to vector<8x128xf32>
      %1172 = arith.extui %250 : vector<8x128xi1> to vector<8x128xi32>
      %1173 = arith.sitofp %1172 : vector<8x128xi32> to vector<8x128xf32>
      %1174 = arith.extui %304 : vector<8x128xi1> to vector<8x128xi32>
      %1175 = arith.sitofp %1174 : vector<8x128xi32> to vector<8x128xf32>
      %1176 = arith.extui %358 : vector<8x128xi1> to vector<8x128xi32>
      %1177 = arith.sitofp %1176 : vector<8x128xi32> to vector<8x128xf32>
      %1178 = arith.extui %412 : vector<8x128xi1> to vector<8x128xi32>
      %1179 = arith.sitofp %1178 : vector<8x128xi32> to vector<8x128xf32>
      %1180 = arith.extui %466 : vector<8x128xi1> to vector<8x128xi32>
      %1181 = arith.sitofp %1180 : vector<8x128xi32> to vector<8x128xf32>
      %1182 = arith.extui %520 : vector<8x128xi1> to vector<8x128xi32>
      %1183 = arith.sitofp %1182 : vector<8x128xi32> to vector<8x128xf32>
      %1184 = arith.extui %574 : vector<8x128xi1> to vector<8x128xi32>
      %1185 = arith.sitofp %1184 : vector<8x128xi32> to vector<8x128xf32>
      %1186 = arith.extui %628 : vector<8x128xi1> to vector<8x128xi32>
      %1187 = arith.sitofp %1186 : vector<8x128xi32> to vector<8x128xf32>
      %1188 = arith.extui %682 : vector<8x128xi1> to vector<8x128xi32>
      %1189 = arith.sitofp %1188 : vector<8x128xi32> to vector<8x128xf32>
      %1190 = arith.extui %736 : vector<8x128xi1> to vector<8x128xi32>
      %1191 = arith.sitofp %1190 : vector<8x128xi32> to vector<8x128xf32>
      %1192 = arith.extui %790 : vector<8x128xi1> to vector<8x128xi32>
      %1193 = arith.sitofp %1192 : vector<8x128xi32> to vector<8x128xf32>
      %1194 = arith.extui %844 : vector<8x128xi1> to vector<8x128xi32>
      %1195 = arith.sitofp %1194 : vector<8x128xi32> to vector<8x128xf32>
      %1196 = arith.extui %898 : vector<8x128xi1> to vector<8x128xi32>
      %1197 = arith.sitofp %1196 : vector<8x128xi32> to vector<8x128xf32>
      %1198 = arith.extui %952 : vector<8x128xi1> to vector<8x128xi32>
      %1199 = arith.sitofp %1198 : vector<8x128xi32> to vector<8x128xf32>
      %1200 = arith.extui %1006 : vector<8x128xi1> to vector<8x128xi32>
      %1201 = arith.sitofp %1200 : vector<8x128xi32> to vector<8x128xf32>
      %1202 = arith.extui %1036 : vector<8x128xi1> to vector<8x128xi32>
      %1203 = arith.sitofp %1202 : vector<8x128xi32> to vector<8x128xf32>
      %1204 = arith.extui %1055 : vector<8x128xi1> to vector<8x128xi32>
      %1205 = arith.sitofp %1204 : vector<8x128xi32> to vector<8x128xf32>
      %1206 = arith.extui %1074 : vector<8x128xi1> to vector<8x128xi32>
      %1207 = arith.sitofp %1206 : vector<8x128xi32> to vector<8x128xf32>
      %1208 = arith.extui %1093 : vector<8x128xi1> to vector<8x128xi32>
      %1209 = arith.sitofp %1208 : vector<8x128xi32> to vector<8x128xf32>
      %1210 = arith.extui %1112 : vector<8x128xi1> to vector<8x128xi32>
      %1211 = arith.sitofp %1210 : vector<8x128xi32> to vector<8x128xf32>
      %1212 = arith.extui %1131 : vector<8x128xi1> to vector<8x128xi32>
      %1213 = arith.sitofp %1212 : vector<8x128xi32> to vector<8x128xf32>
      %1214 = arith.extui %1150 : vector<8x128xi1> to vector<8x128xi32>
      %1215 = arith.sitofp %1214 : vector<8x128xi32> to vector<8x128xf32>
      %1216 = arith.extui %1169 : vector<8x128xi1> to vector<8x128xi32>
      %1217 = arith.sitofp %1216 : vector<8x128xi32> to vector<8x128xf32>
      %1218 = arith.mulf %1171, %205 : vector<8x128xf32>
      %1219 = arith.mulf %1171, %207 : vector<8x128xf32>
      %1220 = arith.addf %1171, %1173 : vector<8x128xf32>
      %1221 = arith.mulf %1173, %259 : vector<8x128xf32>
      %1222 = arith.addf %1218, %1221 : vector<8x128xf32>
      %1223 = arith.mulf %1173, %261 : vector<8x128xf32>
      %1224 = arith.addf %1219, %1223 : vector<8x128xf32>
      %1225 = arith.addf %1220, %1175 : vector<8x128xf32>
      %1226 = arith.mulf %1175, %313 : vector<8x128xf32>
      %1227 = arith.addf %1222, %1226 : vector<8x128xf32>
      %1228 = arith.mulf %1175, %315 : vector<8x128xf32>
      %1229 = arith.addf %1224, %1228 : vector<8x128xf32>
      %1230 = arith.addf %1225, %1177 : vector<8x128xf32>
      %1231 = arith.mulf %1177, %367 : vector<8x128xf32>
      %1232 = arith.addf %1227, %1231 : vector<8x128xf32>
      %1233 = arith.mulf %1177, %369 : vector<8x128xf32>
      %1234 = arith.addf %1229, %1233 : vector<8x128xf32>
      %1235 = arith.addf %1230, %1179 : vector<8x128xf32>
      %1236 = arith.mulf %1179, %421 : vector<8x128xf32>
      %1237 = arith.addf %1232, %1236 : vector<8x128xf32>
      %1238 = arith.mulf %1179, %423 : vector<8x128xf32>
      %1239 = arith.addf %1234, %1238 : vector<8x128xf32>
      %1240 = arith.addf %1235, %1181 : vector<8x128xf32>
      %1241 = arith.mulf %1181, %475 : vector<8x128xf32>
      %1242 = arith.addf %1237, %1241 : vector<8x128xf32>
      %1243 = arith.mulf %1181, %477 : vector<8x128xf32>
      %1244 = arith.addf %1239, %1243 : vector<8x128xf32>
      %1245 = arith.addf %1240, %1183 : vector<8x128xf32>
      %1246 = arith.mulf %1183, %529 : vector<8x128xf32>
      %1247 = arith.addf %1242, %1246 : vector<8x128xf32>
      %1248 = arith.mulf %1183, %531 : vector<8x128xf32>
      %1249 = arith.addf %1244, %1248 : vector<8x128xf32>
      %1250 = arith.addf %1245, %1185 : vector<8x128xf32>
      %1251 = arith.mulf %1185, %583 : vector<8x128xf32>
      %1252 = arith.addf %1247, %1251 : vector<8x128xf32>
      %1253 = arith.mulf %1185, %585 : vector<8x128xf32>
      %1254 = arith.addf %1249, %1253 : vector<8x128xf32>
      %1255 = arith.addf %1250, %1187 : vector<8x128xf32>
      %1256 = arith.mulf %1187, %637 : vector<8x128xf32>
      %1257 = arith.addf %1252, %1256 : vector<8x128xf32>
      %1258 = arith.mulf %1187, %639 : vector<8x128xf32>
      %1259 = arith.addf %1254, %1258 : vector<8x128xf32>
      %1260 = arith.addf %1255, %1189 : vector<8x128xf32>
      %1261 = arith.mulf %1189, %691 : vector<8x128xf32>
      %1262 = arith.addf %1257, %1261 : vector<8x128xf32>
      %1263 = arith.mulf %1189, %693 : vector<8x128xf32>
      %1264 = arith.addf %1259, %1263 : vector<8x128xf32>
      %1265 = arith.addf %1260, %1191 : vector<8x128xf32>
      %1266 = arith.mulf %1191, %745 : vector<8x128xf32>
      %1267 = arith.addf %1262, %1266 : vector<8x128xf32>
      %1268 = arith.mulf %1191, %747 : vector<8x128xf32>
      %1269 = arith.addf %1264, %1268 : vector<8x128xf32>
      %1270 = arith.addf %1265, %1193 : vector<8x128xf32>
      %1271 = arith.mulf %1193, %799 : vector<8x128xf32>
      %1272 = arith.addf %1267, %1271 : vector<8x128xf32>
      %1273 = arith.mulf %1193, %801 : vector<8x128xf32>
      %1274 = arith.addf %1269, %1273 : vector<8x128xf32>
      %1275 = arith.addf %1270, %1195 : vector<8x128xf32>
      %1276 = arith.mulf %1195, %853 : vector<8x128xf32>
      %1277 = arith.addf %1272, %1276 : vector<8x128xf32>
      %1278 = arith.mulf %1195, %855 : vector<8x128xf32>
      %1279 = arith.addf %1274, %1278 : vector<8x128xf32>
      %1280 = arith.addf %1275, %1197 : vector<8x128xf32>
      %1281 = arith.mulf %1197, %907 : vector<8x128xf32>
      %1282 = arith.addf %1277, %1281 : vector<8x128xf32>
      %1283 = arith.mulf %1197, %909 : vector<8x128xf32>
      %1284 = arith.addf %1279, %1283 : vector<8x128xf32>
      %1285 = arith.addf %1280, %1199 : vector<8x128xf32>
      %1286 = arith.mulf %1199, %961 : vector<8x128xf32>
      %1287 = arith.addf %1282, %1286 : vector<8x128xf32>
      %1288 = arith.mulf %1199, %963 : vector<8x128xf32>
      %1289 = arith.addf %1284, %1288 : vector<8x128xf32>
      %1290 = arith.addf %1285, %1201 : vector<8x128xf32>
      %1291 = arith.mulf %1201, %1015 : vector<8x128xf32>
      %1292 = arith.addf %1287, %1291 : vector<8x128xf32>
      %1293 = arith.mulf %1201, %1017 : vector<8x128xf32>
      %1294 = arith.addf %1289, %1293 : vector<8x128xf32>
      %1295 = arith.addf %1290, %1203 : vector<8x128xf32>
      %1296 = arith.mulf %1203, %49 : vector<8x128xf32>
      %1297 = arith.addf %1292, %1296 : vector<8x128xf32>
      %1298 = arith.mulf %1203, %53 : vector<8x128xf32>
      %1299 = arith.addf %1294, %1298 : vector<8x128xf32>
      %1300 = arith.addf %1295, %1205 : vector<8x128xf32>
      %1301 = arith.mulf %1205, %61 : vector<8x128xf32>
      %1302 = arith.addf %1297, %1301 : vector<8x128xf32>
      %1303 = arith.mulf %1205, %65 : vector<8x128xf32>
      %1304 = arith.addf %1299, %1303 : vector<8x128xf32>
      %1305 = arith.addf %1300, %1207 : vector<8x128xf32>
      %1306 = arith.mulf %1207, %73 : vector<8x128xf32>
      %1307 = arith.addf %1302, %1306 : vector<8x128xf32>
      %1308 = arith.mulf %1207, %77 : vector<8x128xf32>
      %1309 = arith.addf %1304, %1308 : vector<8x128xf32>
      %1310 = arith.addf %1305, %1209 : vector<8x128xf32>
      %1311 = arith.mulf %1209, %85 : vector<8x128xf32>
      %1312 = arith.addf %1307, %1311 : vector<8x128xf32>
      %1313 = arith.mulf %1209, %89 : vector<8x128xf32>
      %1314 = arith.addf %1309, %1313 : vector<8x128xf32>
      %1315 = arith.addf %1310, %1211 : vector<8x128xf32>
      %1316 = arith.mulf %1211, %97 : vector<8x128xf32>
      %1317 = arith.addf %1312, %1316 : vector<8x128xf32>
      %1318 = arith.mulf %1211, %101 : vector<8x128xf32>
      %1319 = arith.addf %1314, %1318 : vector<8x128xf32>
      %1320 = arith.addf %1315, %1213 : vector<8x128xf32>
      %1321 = arith.mulf %1213, %109 : vector<8x128xf32>
      %1322 = arith.addf %1317, %1321 : vector<8x128xf32>
      %1323 = arith.mulf %1213, %113 : vector<8x128xf32>
      %1324 = arith.addf %1319, %1323 : vector<8x128xf32>
      %1325 = arith.addf %1320, %1215 : vector<8x128xf32>
      %1326 = arith.mulf %1215, %121 : vector<8x128xf32>
      %1327 = arith.addf %1322, %1326 : vector<8x128xf32>
      %1328 = arith.mulf %1215, %125 : vector<8x128xf32>
      %1329 = arith.addf %1324, %1328 : vector<8x128xf32>
      %1330 = arith.addf %1325, %1217 : vector<8x128xf32>
      %1331 = arith.mulf %1217, %133 : vector<8x128xf32>
      %1332 = arith.addf %1327, %1331 : vector<8x128xf32>
      %1333 = arith.mulf %1217, %137 : vector<8x128xf32>
      %1334 = arith.addf %1329, %1333 : vector<8x128xf32>
      %cst_236 = arith.constant 1.000000e+00 : f32
      %1335 = vector.broadcast %cst_236 : f32 to vector<8x128xf32>
      %1336 = arith.maximumf %1330, %1335 : vector<8x128xf32>
      %1337 = tpu.reciprocal %1336 {approx = true} : vector<8x128xf32> -> vector<8x128xf32>
      %1338 = arith.mulf %1332, %1337 : vector<8x128xf32>
      %1339 = arith.mulf %1334, %1337 : vector<8x128xf32>
      %1340 = arith.subf %205, %1338 : vector<8x128xf32>
      %1341 = arith.subf %207, %1339 : vector<8x128xf32>
      %1342 = math.absf %1340 : vector<8x128xf32>
      %1343 = math.absf %1341 : vector<8x128xf32>
      %1344 = arith.addf %1342, %1343 : vector<8x128xf32>
      %cst_237 = arith.constant 9.99999996E-13 : f32
      %1345 = vector.broadcast %cst_237 : f32 to vector<8x128xf32>
      %1346 = arith.cmpf ogt, %1344, %1345 : vector<8x128xf32>
      %cst_238 = arith.constant 1.000000e+00 : f32
      %1347 = vector.broadcast %cst_238 : f32 to vector<8x128xf32>
      %1348 = arith.select %1346, %1344, %1347 : vector<8x128xi1>, vector<8x128xf32>
      %1349 = tpu.reciprocal %1348 {approx = true} : vector<8x128xf32> -> vector<8x128xf32>
      %1350 = arith.mulf %1340, %1349 : vector<8x128xf32>
      %cst_239 = arith.constant 0.000000e+00 : f32
      %1351 = vector.broadcast %cst_239 : f32 to vector<8x128xf32>
      %1352 = arith.cmpf oge, %1341, %1351 : vector<8x128xf32>
      %cst_240 = arith.constant 1.000000e+00 : f32
      %1353 = vector.broadcast %cst_240 : f32 to vector<8x128xf32>
      %1354 = arith.subf %1353, %1350 : vector<8x128xf32>
      %cst_241 = arith.constant 3.000000e+00 : f32
      %1355 = vector.broadcast %cst_241 : f32 to vector<8x128xf32>
      %1356 = arith.addf %1355, %1350 : vector<8x128xf32>
      %1357 = arith.select %1352, %1354, %1356 : vector<8x128xi1>, vector<8x128xf32>
      %cst_242 = arith.constant 1.000000e+09 : f32
      %1358 = vector.broadcast %cst_242 : f32 to vector<8x128xf32>
      %1359 = arith.select %196, %1357, %1358 : vector<8x128xi1>, vector<8x128xf32>
      %1360 = arith.subf %259, %1338 : vector<8x128xf32>
      %1361 = arith.subf %261, %1339 : vector<8x128xf32>
      %1362 = math.absf %1360 : vector<8x128xf32>
      %1363 = math.absf %1361 : vector<8x128xf32>
      %1364 = arith.addf %1362, %1363 : vector<8x128xf32>
      %cst_243 = arith.constant 9.99999996E-13 : f32
      %1365 = vector.broadcast %cst_243 : f32 to vector<8x128xf32>
      %1366 = arith.cmpf ogt, %1364, %1365 : vector<8x128xf32>
      %cst_244 = arith.constant 1.000000e+00 : f32
      %1367 = vector.broadcast %cst_244 : f32 to vector<8x128xf32>
      %1368 = arith.select %1366, %1364, %1367 : vector<8x128xi1>, vector<8x128xf32>
      %1369 = tpu.reciprocal %1368 {approx = true} : vector<8x128xf32> -> vector<8x128xf32>
      %1370 = arith.mulf %1360, %1369 : vector<8x128xf32>
      %cst_245 = arith.constant 0.000000e+00 : f32
      %1371 = vector.broadcast %cst_245 : f32 to vector<8x128xf32>
      %1372 = arith.cmpf oge, %1361, %1371 : vector<8x128xf32>
      %cst_246 = arith.constant 1.000000e+00 : f32
      %1373 = vector.broadcast %cst_246 : f32 to vector<8x128xf32>
      %1374 = arith.subf %1373, %1370 : vector<8x128xf32>
      %cst_247 = arith.constant 3.000000e+00 : f32
      %1375 = vector.broadcast %cst_247 : f32 to vector<8x128xf32>
      %1376 = arith.addf %1375, %1370 : vector<8x128xf32>
      %1377 = arith.select %1372, %1374, %1376 : vector<8x128xi1>, vector<8x128xf32>
      %cst_248 = arith.constant 1.000000e+09 : f32
      %1378 = vector.broadcast %cst_248 : f32 to vector<8x128xf32>
      %1379 = arith.select %250, %1377, %1378 : vector<8x128xi1>, vector<8x128xf32>
      %1380 = arith.subf %313, %1338 : vector<8x128xf32>
      %1381 = arith.subf %315, %1339 : vector<8x128xf32>
      %1382 = math.absf %1380 : vector<8x128xf32>
      %1383 = math.absf %1381 : vector<8x128xf32>
      %1384 = arith.addf %1382, %1383 : vector<8x128xf32>
      %cst_249 = arith.constant 9.99999996E-13 : f32
      %1385 = vector.broadcast %cst_249 : f32 to vector<8x128xf32>
      %1386 = arith.cmpf ogt, %1384, %1385 : vector<8x128xf32>
      %cst_250 = arith.constant 1.000000e+00 : f32
      %1387 = vector.broadcast %cst_250 : f32 to vector<8x128xf32>
      %1388 = arith.select %1386, %1384, %1387 : vector<8x128xi1>, vector<8x128xf32>
      %1389 = tpu.reciprocal %1388 {approx = true} : vector<8x128xf32> -> vector<8x128xf32>
      %1390 = arith.mulf %1380, %1389 : vector<8x128xf32>
      %cst_251 = arith.constant 0.000000e+00 : f32
      %1391 = vector.broadcast %cst_251 : f32 to vector<8x128xf32>
      %1392 = arith.cmpf oge, %1381, %1391 : vector<8x128xf32>
      %cst_252 = arith.constant 1.000000e+00 : f32
      %1393 = vector.broadcast %cst_252 : f32 to vector<8x128xf32>
      %1394 = arith.subf %1393, %1390 : vector<8x128xf32>
      %cst_253 = arith.constant 3.000000e+00 : f32
      %1395 = vector.broadcast %cst_253 : f32 to vector<8x128xf32>
      %1396 = arith.addf %1395, %1390 : vector<8x128xf32>
      %1397 = arith.select %1392, %1394, %1396 : vector<8x128xi1>, vector<8x128xf32>
      %cst_254 = arith.constant 1.000000e+09 : f32
      %1398 = vector.broadcast %cst_254 : f32 to vector<8x128xf32>
      %1399 = arith.select %304, %1397, %1398 : vector<8x128xi1>, vector<8x128xf32>
      %1400 = arith.subf %367, %1338 : vector<8x128xf32>
      %1401 = arith.subf %369, %1339 : vector<8x128xf32>
      %1402 = math.absf %1400 : vector<8x128xf32>
      %1403 = math.absf %1401 : vector<8x128xf32>
      %1404 = arith.addf %1402, %1403 : vector<8x128xf32>
      %cst_255 = arith.constant 9.99999996E-13 : f32
      %1405 = vector.broadcast %cst_255 : f32 to vector<8x128xf32>
      %1406 = arith.cmpf ogt, %1404, %1405 : vector<8x128xf32>
      %cst_256 = arith.constant 1.000000e+00 : f32
      %1407 = vector.broadcast %cst_256 : f32 to vector<8x128xf32>
      %1408 = arith.select %1406, %1404, %1407 : vector<8x128xi1>, vector<8x128xf32>
      %1409 = tpu.reciprocal %1408 {approx = true} : vector<8x128xf32> -> vector<8x128xf32>
      %1410 = arith.mulf %1400, %1409 : vector<8x128xf32>
      %cst_257 = arith.constant 0.000000e+00 : f32
      %1411 = vector.broadcast %cst_257 : f32 to vector<8x128xf32>
      %1412 = arith.cmpf oge, %1401, %1411 : vector<8x128xf32>
      %cst_258 = arith.constant 1.000000e+00 : f32
      %1413 = vector.broadcast %cst_258 : f32 to vector<8x128xf32>
      %1414 = arith.subf %1413, %1410 : vector<8x128xf32>
      %cst_259 = arith.constant 3.000000e+00 : f32
      %1415 = vector.broadcast %cst_259 : f32 to vector<8x128xf32>
      %1416 = arith.addf %1415, %1410 : vector<8x128xf32>
      %1417 = arith.select %1412, %1414, %1416 : vector<8x128xi1>, vector<8x128xf32>
      %cst_260 = arith.constant 1.000000e+09 : f32
      %1418 = vector.broadcast %cst_260 : f32 to vector<8x128xf32>
      %1419 = arith.select %358, %1417, %1418 : vector<8x128xi1>, vector<8x128xf32>
      %1420 = arith.subf %421, %1338 : vector<8x128xf32>
      %1421 = arith.subf %423, %1339 : vector<8x128xf32>
      %1422 = math.absf %1420 : vector<8x128xf32>
      %1423 = math.absf %1421 : vector<8x128xf32>
      %1424 = arith.addf %1422, %1423 : vector<8x128xf32>
      %cst_261 = arith.constant 9.99999996E-13 : f32
      %1425 = vector.broadcast %cst_261 : f32 to vector<8x128xf32>
      %1426 = arith.cmpf ogt, %1424, %1425 : vector<8x128xf32>
      %cst_262 = arith.constant 1.000000e+00 : f32
      %1427 = vector.broadcast %cst_262 : f32 to vector<8x128xf32>
      %1428 = arith.select %1426, %1424, %1427 : vector<8x128xi1>, vector<8x128xf32>
      %1429 = tpu.reciprocal %1428 {approx = true} : vector<8x128xf32> -> vector<8x128xf32>
      %1430 = arith.mulf %1420, %1429 : vector<8x128xf32>
      %cst_263 = arith.constant 0.000000e+00 : f32
      %1431 = vector.broadcast %cst_263 : f32 to vector<8x128xf32>
      %1432 = arith.cmpf oge, %1421, %1431 : vector<8x128xf32>
      %cst_264 = arith.constant 1.000000e+00 : f32
      %1433 = vector.broadcast %cst_264 : f32 to vector<8x128xf32>
      %1434 = arith.subf %1433, %1430 : vector<8x128xf32>
      %cst_265 = arith.constant 3.000000e+00 : f32
      %1435 = vector.broadcast %cst_265 : f32 to vector<8x128xf32>
      %1436 = arith.addf %1435, %1430 : vector<8x128xf32>
      %1437 = arith.select %1432, %1434, %1436 : vector<8x128xi1>, vector<8x128xf32>
      %cst_266 = arith.constant 1.000000e+09 : f32
      %1438 = vector.broadcast %cst_266 : f32 to vector<8x128xf32>
      %1439 = arith.select %412, %1437, %1438 : vector<8x128xi1>, vector<8x128xf32>
      %1440 = arith.subf %475, %1338 : vector<8x128xf32>
      %1441 = arith.subf %477, %1339 : vector<8x128xf32>
      %1442 = math.absf %1440 : vector<8x128xf32>
      %1443 = math.absf %1441 : vector<8x128xf32>
      %1444 = arith.addf %1442, %1443 : vector<8x128xf32>
      %cst_267 = arith.constant 9.99999996E-13 : f32
      %1445 = vector.broadcast %cst_267 : f32 to vector<8x128xf32>
      %1446 = arith.cmpf ogt, %1444, %1445 : vector<8x128xf32>
      %cst_268 = arith.constant 1.000000e+00 : f32
      %1447 = vector.broadcast %cst_268 : f32 to vector<8x128xf32>
      %1448 = arith.select %1446, %1444, %1447 : vector<8x128xi1>, vector<8x128xf32>
      %1449 = tpu.reciprocal %1448 {approx = true} : vector<8x128xf32> -> vector<8x128xf32>
      %1450 = arith.mulf %1440, %1449 : vector<8x128xf32>
      %cst_269 = arith.constant 0.000000e+00 : f32
      %1451 = vector.broadcast %cst_269 : f32 to vector<8x128xf32>
      %1452 = arith.cmpf oge, %1441, %1451 : vector<8x128xf32>
      %cst_270 = arith.constant 1.000000e+00 : f32
      %1453 = vector.broadcast %cst_270 : f32 to vector<8x128xf32>
      %1454 = arith.subf %1453, %1450 : vector<8x128xf32>
      %cst_271 = arith.constant 3.000000e+00 : f32
      %1455 = vector.broadcast %cst_271 : f32 to vector<8x128xf32>
      %1456 = arith.addf %1455, %1450 : vector<8x128xf32>
      %1457 = arith.select %1452, %1454, %1456 : vector<8x128xi1>, vector<8x128xf32>
      %cst_272 = arith.constant 1.000000e+09 : f32
      %1458 = vector.broadcast %cst_272 : f32 to vector<8x128xf32>
      %1459 = arith.select %466, %1457, %1458 : vector<8x128xi1>, vector<8x128xf32>
      %1460 = arith.subf %529, %1338 : vector<8x128xf32>
      %1461 = arith.subf %531, %1339 : vector<8x128xf32>
      %1462 = math.absf %1460 : vector<8x128xf32>
      %1463 = math.absf %1461 : vector<8x128xf32>
      %1464 = arith.addf %1462, %1463 : vector<8x128xf32>
      %cst_273 = arith.constant 9.99999996E-13 : f32
      %1465 = vector.broadcast %cst_273 : f32 to vector<8x128xf32>
      %1466 = arith.cmpf ogt, %1464, %1465 : vector<8x128xf32>
      %cst_274 = arith.constant 1.000000e+00 : f32
      %1467 = vector.broadcast %cst_274 : f32 to vector<8x128xf32>
      %1468 = arith.select %1466, %1464, %1467 : vector<8x128xi1>, vector<8x128xf32>
      %1469 = tpu.reciprocal %1468 {approx = true} : vector<8x128xf32> -> vector<8x128xf32>
      %1470 = arith.mulf %1460, %1469 : vector<8x128xf32>
      %cst_275 = arith.constant 0.000000e+00 : f32
      %1471 = vector.broadcast %cst_275 : f32 to vector<8x128xf32>
      %1472 = arith.cmpf oge, %1461, %1471 : vector<8x128xf32>
      %cst_276 = arith.constant 1.000000e+00 : f32
      %1473 = vector.broadcast %cst_276 : f32 to vector<8x128xf32>
      %1474 = arith.subf %1473, %1470 : vector<8x128xf32>
      %cst_277 = arith.constant 3.000000e+00 : f32
      %1475 = vector.broadcast %cst_277 : f32 to vector<8x128xf32>
      %1476 = arith.addf %1475, %1470 : vector<8x128xf32>
      %1477 = arith.select %1472, %1474, %1476 : vector<8x128xi1>, vector<8x128xf32>
      %cst_278 = arith.constant 1.000000e+09 : f32
      %1478 = vector.broadcast %cst_278 : f32 to vector<8x128xf32>
      %1479 = arith.select %520, %1477, %1478 : vector<8x128xi1>, vector<8x128xf32>
      %1480 = arith.subf %583, %1338 : vector<8x128xf32>
      %1481 = arith.subf %585, %1339 : vector<8x128xf32>
      %1482 = math.absf %1480 : vector<8x128xf32>
      %1483 = math.absf %1481 : vector<8x128xf32>
      %1484 = arith.addf %1482, %1483 : vector<8x128xf32>
      %cst_279 = arith.constant 9.99999996E-13 : f32
      %1485 = vector.broadcast %cst_279 : f32 to vector<8x128xf32>
      %1486 = arith.cmpf ogt, %1484, %1485 : vector<8x128xf32>
      %cst_280 = arith.constant 1.000000e+00 : f32
      %1487 = vector.broadcast %cst_280 : f32 to vector<8x128xf32>
      %1488 = arith.select %1486, %1484, %1487 : vector<8x128xi1>, vector<8x128xf32>
      %1489 = tpu.reciprocal %1488 {approx = true} : vector<8x128xf32> -> vector<8x128xf32>
      %1490 = arith.mulf %1480, %1489 : vector<8x128xf32>
      %cst_281 = arith.constant 0.000000e+00 : f32
      %1491 = vector.broadcast %cst_281 : f32 to vector<8x128xf32>
      %1492 = arith.cmpf oge, %1481, %1491 : vector<8x128xf32>
      %cst_282 = arith.constant 1.000000e+00 : f32
      %1493 = vector.broadcast %cst_282 : f32 to vector<8x128xf32>
      %1494 = arith.subf %1493, %1490 : vector<8x128xf32>
      %cst_283 = arith.constant 3.000000e+00 : f32
      %1495 = vector.broadcast %cst_283 : f32 to vector<8x128xf32>
      %1496 = arith.addf %1495, %1490 : vector<8x128xf32>
      %1497 = arith.select %1492, %1494, %1496 : vector<8x128xi1>, vector<8x128xf32>
      %cst_284 = arith.constant 1.000000e+09 : f32
      %1498 = vector.broadcast %cst_284 : f32 to vector<8x128xf32>
      %1499 = arith.select %574, %1497, %1498 : vector<8x128xi1>, vector<8x128xf32>
      %1500 = arith.subf %637, %1338 : vector<8x128xf32>
      %1501 = arith.subf %639, %1339 : vector<8x128xf32>
      %1502 = math.absf %1500 : vector<8x128xf32>
      %1503 = math.absf %1501 : vector<8x128xf32>
      %1504 = arith.addf %1502, %1503 : vector<8x128xf32>
      %cst_285 = arith.constant 9.99999996E-13 : f32
      %1505 = vector.broadcast %cst_285 : f32 to vector<8x128xf32>
      %1506 = arith.cmpf ogt, %1504, %1505 : vector<8x128xf32>
      %cst_286 = arith.constant 1.000000e+00 : f32
      %1507 = vector.broadcast %cst_286 : f32 to vector<8x128xf32>
      %1508 = arith.select %1506, %1504, %1507 : vector<8x128xi1>, vector<8x128xf32>
      %1509 = tpu.reciprocal %1508 {approx = true} : vector<8x128xf32> -> vector<8x128xf32>
      %1510 = arith.mulf %1500, %1509 : vector<8x128xf32>
      %cst_287 = arith.constant 0.000000e+00 : f32
      %1511 = vector.broadcast %cst_287 : f32 to vector<8x128xf32>
      %1512 = arith.cmpf oge, %1501, %1511 : vector<8x128xf32>
      %cst_288 = arith.constant 1.000000e+00 : f32
      %1513 = vector.broadcast %cst_288 : f32 to vector<8x128xf32>
      %1514 = arith.subf %1513, %1510 : vector<8x128xf32>
      %cst_289 = arith.constant 3.000000e+00 : f32
      %1515 = vector.broadcast %cst_289 : f32 to vector<8x128xf32>
      %1516 = arith.addf %1515, %1510 : vector<8x128xf32>
      %1517 = arith.select %1512, %1514, %1516 : vector<8x128xi1>, vector<8x128xf32>
      %cst_290 = arith.constant 1.000000e+09 : f32
      %1518 = vector.broadcast %cst_290 : f32 to vector<8x128xf32>
      %1519 = arith.select %628, %1517, %1518 : vector<8x128xi1>, vector<8x128xf32>
      %1520 = arith.subf %691, %1338 : vector<8x128xf32>
      %1521 = arith.subf %693, %1339 : vector<8x128xf32>
      %1522 = math.absf %1520 : vector<8x128xf32>
      %1523 = math.absf %1521 : vector<8x128xf32>
      %1524 = arith.addf %1522, %1523 : vector<8x128xf32>
      %cst_291 = arith.constant 9.99999996E-13 : f32
      %1525 = vector.broadcast %cst_291 : f32 to vector<8x128xf32>
      %1526 = arith.cmpf ogt, %1524, %1525 : vector<8x128xf32>
      %cst_292 = arith.constant 1.000000e+00 : f32
      %1527 = vector.broadcast %cst_292 : f32 to vector<8x128xf32>
      %1528 = arith.select %1526, %1524, %1527 : vector<8x128xi1>, vector<8x128xf32>
      %1529 = tpu.reciprocal %1528 {approx = true} : vector<8x128xf32> -> vector<8x128xf32>
      %1530 = arith.mulf %1520, %1529 : vector<8x128xf32>
      %cst_293 = arith.constant 0.000000e+00 : f32
      %1531 = vector.broadcast %cst_293 : f32 to vector<8x128xf32>
      %1532 = arith.cmpf oge, %1521, %1531 : vector<8x128xf32>
      %cst_294 = arith.constant 1.000000e+00 : f32
      %1533 = vector.broadcast %cst_294 : f32 to vector<8x128xf32>
      %1534 = arith.subf %1533, %1530 : vector<8x128xf32>
      %cst_295 = arith.constant 3.000000e+00 : f32
      %1535 = vector.broadcast %cst_295 : f32 to vector<8x128xf32>
      %1536 = arith.addf %1535, %1530 : vector<8x128xf32>
      %1537 = arith.select %1532, %1534, %1536 : vector<8x128xi1>, vector<8x128xf32>
      %cst_296 = arith.constant 1.000000e+09 : f32
      %1538 = vector.broadcast %cst_296 : f32 to vector<8x128xf32>
      %1539 = arith.select %682, %1537, %1538 : vector<8x128xi1>, vector<8x128xf32>
      %1540 = arith.subf %745, %1338 : vector<8x128xf32>
      %1541 = arith.subf %747, %1339 : vector<8x128xf32>
      %1542 = math.absf %1540 : vector<8x128xf32>
      %1543 = math.absf %1541 : vector<8x128xf32>
      %1544 = arith.addf %1542, %1543 : vector<8x128xf32>
      %cst_297 = arith.constant 9.99999996E-13 : f32
      %1545 = vector.broadcast %cst_297 : f32 to vector<8x128xf32>
      %1546 = arith.cmpf ogt, %1544, %1545 : vector<8x128xf32>
      %cst_298 = arith.constant 1.000000e+00 : f32
      %1547 = vector.broadcast %cst_298 : f32 to vector<8x128xf32>
      %1548 = arith.select %1546, %1544, %1547 : vector<8x128xi1>, vector<8x128xf32>
      %1549 = tpu.reciprocal %1548 {approx = true} : vector<8x128xf32> -> vector<8x128xf32>
      %1550 = arith.mulf %1540, %1549 : vector<8x128xf32>
      %cst_299 = arith.constant 0.000000e+00 : f32
      %1551 = vector.broadcast %cst_299 : f32 to vector<8x128xf32>
      %1552 = arith.cmpf oge, %1541, %1551 : vector<8x128xf32>
      %cst_300 = arith.constant 1.000000e+00 : f32
      %1553 = vector.broadcast %cst_300 : f32 to vector<8x128xf32>
      %1554 = arith.subf %1553, %1550 : vector<8x128xf32>
      %cst_301 = arith.constant 3.000000e+00 : f32
      %1555 = vector.broadcast %cst_301 : f32 to vector<8x128xf32>
      %1556 = arith.addf %1555, %1550 : vector<8x128xf32>
      %1557 = arith.select %1552, %1554, %1556 : vector<8x128xi1>, vector<8x128xf32>
      %cst_302 = arith.constant 1.000000e+09 : f32
      %1558 = vector.broadcast %cst_302 : f32 to vector<8x128xf32>
      %1559 = arith.select %736, %1557, %1558 : vector<8x128xi1>, vector<8x128xf32>
      %1560 = arith.subf %799, %1338 : vector<8x128xf32>
      %1561 = arith.subf %801, %1339 : vector<8x128xf32>
      %1562 = math.absf %1560 : vector<8x128xf32>
      %1563 = math.absf %1561 : vector<8x128xf32>
      %1564 = arith.addf %1562, %1563 : vector<8x128xf32>
      %cst_303 = arith.constant 9.99999996E-13 : f32
      %1565 = vector.broadcast %cst_303 : f32 to vector<8x128xf32>
      %1566 = arith.cmpf ogt, %1564, %1565 : vector<8x128xf32>
      %cst_304 = arith.constant 1.000000e+00 : f32
      %1567 = vector.broadcast %cst_304 : f32 to vector<8x128xf32>
      %1568 = arith.select %1566, %1564, %1567 : vector<8x128xi1>, vector<8x128xf32>
      %1569 = tpu.reciprocal %1568 {approx = true} : vector<8x128xf32> -> vector<8x128xf32>
      %1570 = arith.mulf %1560, %1569 : vector<8x128xf32>
      %cst_305 = arith.constant 0.000000e+00 : f32
      %1571 = vector.broadcast %cst_305 : f32 to vector<8x128xf32>
      %1572 = arith.cmpf oge, %1561, %1571 : vector<8x128xf32>
      %cst_306 = arith.constant 1.000000e+00 : f32
      %1573 = vector.broadcast %cst_306 : f32 to vector<8x128xf32>
      %1574 = arith.subf %1573, %1570 : vector<8x128xf32>
      %cst_307 = arith.constant 3.000000e+00 : f32
      %1575 = vector.broadcast %cst_307 : f32 to vector<8x128xf32>
      %1576 = arith.addf %1575, %1570 : vector<8x128xf32>
      %1577 = arith.select %1572, %1574, %1576 : vector<8x128xi1>, vector<8x128xf32>
      %cst_308 = arith.constant 1.000000e+09 : f32
      %1578 = vector.broadcast %cst_308 : f32 to vector<8x128xf32>
      %1579 = arith.select %790, %1577, %1578 : vector<8x128xi1>, vector<8x128xf32>
      %1580 = arith.subf %853, %1338 : vector<8x128xf32>
      %1581 = arith.subf %855, %1339 : vector<8x128xf32>
      %1582 = math.absf %1580 : vector<8x128xf32>
      %1583 = math.absf %1581 : vector<8x128xf32>
      %1584 = arith.addf %1582, %1583 : vector<8x128xf32>
      %cst_309 = arith.constant 9.99999996E-13 : f32
      %1585 = vector.broadcast %cst_309 : f32 to vector<8x128xf32>
      %1586 = arith.cmpf ogt, %1584, %1585 : vector<8x128xf32>
      %cst_310 = arith.constant 1.000000e+00 : f32
      %1587 = vector.broadcast %cst_310 : f32 to vector<8x128xf32>
      %1588 = arith.select %1586, %1584, %1587 : vector<8x128xi1>, vector<8x128xf32>
      %1589 = tpu.reciprocal %1588 {approx = true} : vector<8x128xf32> -> vector<8x128xf32>
      %1590 = arith.mulf %1580, %1589 : vector<8x128xf32>
      %cst_311 = arith.constant 0.000000e+00 : f32
      %1591 = vector.broadcast %cst_311 : f32 to vector<8x128xf32>
      %1592 = arith.cmpf oge, %1581, %1591 : vector<8x128xf32>
      %cst_312 = arith.constant 1.000000e+00 : f32
      %1593 = vector.broadcast %cst_312 : f32 to vector<8x128xf32>
      %1594 = arith.subf %1593, %1590 : vector<8x128xf32>
      %cst_313 = arith.constant 3.000000e+00 : f32
      %1595 = vector.broadcast %cst_313 : f32 to vector<8x128xf32>
      %1596 = arith.addf %1595, %1590 : vector<8x128xf32>
      %1597 = arith.select %1592, %1594, %1596 : vector<8x128xi1>, vector<8x128xf32>
      %cst_314 = arith.constant 1.000000e+09 : f32
      %1598 = vector.broadcast %cst_314 : f32 to vector<8x128xf32>
      %1599 = arith.select %844, %1597, %1598 : vector<8x128xi1>, vector<8x128xf32>
      %1600 = arith.subf %907, %1338 : vector<8x128xf32>
      %1601 = arith.subf %909, %1339 : vector<8x128xf32>
      %1602 = math.absf %1600 : vector<8x128xf32>
      %1603 = math.absf %1601 : vector<8x128xf32>
      %1604 = arith.addf %1602, %1603 : vector<8x128xf32>
      %cst_315 = arith.constant 9.99999996E-13 : f32
      %1605 = vector.broadcast %cst_315 : f32 to vector<8x128xf32>
      %1606 = arith.cmpf ogt, %1604, %1605 : vector<8x128xf32>
      %cst_316 = arith.constant 1.000000e+00 : f32
      %1607 = vector.broadcast %cst_316 : f32 to vector<8x128xf32>
      %1608 = arith.select %1606, %1604, %1607 : vector<8x128xi1>, vector<8x128xf32>
      %1609 = tpu.reciprocal %1608 {approx = true} : vector<8x128xf32> -> vector<8x128xf32>
      %1610 = arith.mulf %1600, %1609 : vector<8x128xf32>
      %cst_317 = arith.constant 0.000000e+00 : f32
      %1611 = vector.broadcast %cst_317 : f32 to vector<8x128xf32>
      %1612 = arith.cmpf oge, %1601, %1611 : vector<8x128xf32>
      %cst_318 = arith.constant 1.000000e+00 : f32
      %1613 = vector.broadcast %cst_318 : f32 to vector<8x128xf32>
      %1614 = arith.subf %1613, %1610 : vector<8x128xf32>
      %cst_319 = arith.constant 3.000000e+00 : f32
      %1615 = vector.broadcast %cst_319 : f32 to vector<8x128xf32>
      %1616 = arith.addf %1615, %1610 : vector<8x128xf32>
      %1617 = arith.select %1612, %1614, %1616 : vector<8x128xi1>, vector<8x128xf32>
      %cst_320 = arith.constant 1.000000e+09 : f32
      %1618 = vector.broadcast %cst_320 : f32 to vector<8x128xf32>
      %1619 = arith.select %898, %1617, %1618 : vector<8x128xi1>, vector<8x128xf32>
      %1620 = arith.subf %961, %1338 : vector<8x128xf32>
      %1621 = arith.subf %963, %1339 : vector<8x128xf32>
      %1622 = math.absf %1620 : vector<8x128xf32>
      %1623 = math.absf %1621 : vector<8x128xf32>
      %1624 = arith.addf %1622, %1623 : vector<8x128xf32>
      %cst_321 = arith.constant 9.99999996E-13 : f32
      %1625 = vector.broadcast %cst_321 : f32 to vector<8x128xf32>
      %1626 = arith.cmpf ogt, %1624, %1625 : vector<8x128xf32>
      %cst_322 = arith.constant 1.000000e+00 : f32
      %1627 = vector.broadcast %cst_322 : f32 to vector<8x128xf32>
      %1628 = arith.select %1626, %1624, %1627 : vector<8x128xi1>, vector<8x128xf32>
      %1629 = tpu.reciprocal %1628 {approx = true} : vector<8x128xf32> -> vector<8x128xf32>
      %1630 = arith.mulf %1620, %1629 : vector<8x128xf32>
      %cst_323 = arith.constant 0.000000e+00 : f32
      %1631 = vector.broadcast %cst_323 : f32 to vector<8x128xf32>
      %1632 = arith.cmpf oge, %1621, %1631 : vector<8x128xf32>
      %cst_324 = arith.constant 1.000000e+00 : f32
      %1633 = vector.broadcast %cst_324 : f32 to vector<8x128xf32>
      %1634 = arith.subf %1633, %1630 : vector<8x128xf32>
      %cst_325 = arith.constant 3.000000e+00 : f32
      %1635 = vector.broadcast %cst_325 : f32 to vector<8x128xf32>
      %1636 = arith.addf %1635, %1630 : vector<8x128xf32>
      %1637 = arith.select %1632, %1634, %1636 : vector<8x128xi1>, vector<8x128xf32>
      %cst_326 = arith.constant 1.000000e+09 : f32
      %1638 = vector.broadcast %cst_326 : f32 to vector<8x128xf32>
      %1639 = arith.select %952, %1637, %1638 : vector<8x128xi1>, vector<8x128xf32>
      %1640 = arith.subf %1015, %1338 : vector<8x128xf32>
      %1641 = arith.subf %1017, %1339 : vector<8x128xf32>
      %1642 = math.absf %1640 : vector<8x128xf32>
      %1643 = math.absf %1641 : vector<8x128xf32>
      %1644 = arith.addf %1642, %1643 : vector<8x128xf32>
      %cst_327 = arith.constant 9.99999996E-13 : f32
      %1645 = vector.broadcast %cst_327 : f32 to vector<8x128xf32>
      %1646 = arith.cmpf ogt, %1644, %1645 : vector<8x128xf32>
      %cst_328 = arith.constant 1.000000e+00 : f32
      %1647 = vector.broadcast %cst_328 : f32 to vector<8x128xf32>
      %1648 = arith.select %1646, %1644, %1647 : vector<8x128xi1>, vector<8x128xf32>
      %1649 = tpu.reciprocal %1648 {approx = true} : vector<8x128xf32> -> vector<8x128xf32>
      %1650 = arith.mulf %1640, %1649 : vector<8x128xf32>
      %cst_329 = arith.constant 0.000000e+00 : f32
      %1651 = vector.broadcast %cst_329 : f32 to vector<8x128xf32>
      %1652 = arith.cmpf oge, %1641, %1651 : vector<8x128xf32>
      %cst_330 = arith.constant 1.000000e+00 : f32
      %1653 = vector.broadcast %cst_330 : f32 to vector<8x128xf32>
      %1654 = arith.subf %1653, %1650 : vector<8x128xf32>
      %cst_331 = arith.constant 3.000000e+00 : f32
      %1655 = vector.broadcast %cst_331 : f32 to vector<8x128xf32>
      %1656 = arith.addf %1655, %1650 : vector<8x128xf32>
      %1657 = arith.select %1652, %1654, %1656 : vector<8x128xi1>, vector<8x128xf32>
      %cst_332 = arith.constant 1.000000e+09 : f32
      %1658 = vector.broadcast %cst_332 : f32 to vector<8x128xf32>
      %1659 = arith.select %1006, %1657, %1658 : vector<8x128xi1>, vector<8x128xf32>
      %1660 = arith.subf %49, %1338 : vector<8x128xf32>
      %1661 = arith.subf %53, %1339 : vector<8x128xf32>
      %1662 = math.absf %1660 : vector<8x128xf32>
      %1663 = math.absf %1661 : vector<8x128xf32>
      %1664 = arith.addf %1662, %1663 : vector<8x128xf32>
      %cst_333 = arith.constant 9.99999996E-13 : f32
      %1665 = vector.broadcast %cst_333 : f32 to vector<8x128xf32>
      %1666 = arith.cmpf ogt, %1664, %1665 : vector<8x128xf32>
      %cst_334 = arith.constant 1.000000e+00 : f32
      %1667 = vector.broadcast %cst_334 : f32 to vector<8x128xf32>
      %1668 = arith.select %1666, %1664, %1667 : vector<8x128xi1>, vector<8x128xf32>
      %1669 = tpu.reciprocal %1668 {approx = true} : vector<8x128xf32> -> vector<8x128xf32>
      %1670 = arith.mulf %1660, %1669 : vector<8x128xf32>
      %cst_335 = arith.constant 0.000000e+00 : f32
      %1671 = vector.broadcast %cst_335 : f32 to vector<8x128xf32>
      %1672 = arith.cmpf oge, %1661, %1671 : vector<8x128xf32>
      %cst_336 = arith.constant 1.000000e+00 : f32
      %1673 = vector.broadcast %cst_336 : f32 to vector<8x128xf32>
      %1674 = arith.subf %1673, %1670 : vector<8x128xf32>
      %cst_337 = arith.constant 3.000000e+00 : f32
      %1675 = vector.broadcast %cst_337 : f32 to vector<8x128xf32>
      %1676 = arith.addf %1675, %1670 : vector<8x128xf32>
      %1677 = arith.select %1672, %1674, %1676 : vector<8x128xi1>, vector<8x128xf32>
      %cst_338 = arith.constant 1.000000e+09 : f32
      %1678 = vector.broadcast %cst_338 : f32 to vector<8x128xf32>
      %1679 = arith.select %1036, %1677, %1678 : vector<8x128xi1>, vector<8x128xf32>
      %1680 = arith.subf %61, %1338 : vector<8x128xf32>
      %1681 = arith.subf %65, %1339 : vector<8x128xf32>
      %1682 = math.absf %1680 : vector<8x128xf32>
      %1683 = math.absf %1681 : vector<8x128xf32>
      %1684 = arith.addf %1682, %1683 : vector<8x128xf32>
      %cst_339 = arith.constant 9.99999996E-13 : f32
      %1685 = vector.broadcast %cst_339 : f32 to vector<8x128xf32>
      %1686 = arith.cmpf ogt, %1684, %1685 : vector<8x128xf32>
      %cst_340 = arith.constant 1.000000e+00 : f32
      %1687 = vector.broadcast %cst_340 : f32 to vector<8x128xf32>
      %1688 = arith.select %1686, %1684, %1687 : vector<8x128xi1>, vector<8x128xf32>
      %1689 = tpu.reciprocal %1688 {approx = true} : vector<8x128xf32> -> vector<8x128xf32>
      %1690 = arith.mulf %1680, %1689 : vector<8x128xf32>
      %cst_341 = arith.constant 0.000000e+00 : f32
      %1691 = vector.broadcast %cst_341 : f32 to vector<8x128xf32>
      %1692 = arith.cmpf oge, %1681, %1691 : vector<8x128xf32>
      %cst_342 = arith.constant 1.000000e+00 : f32
      %1693 = vector.broadcast %cst_342 : f32 to vector<8x128xf32>
      %1694 = arith.subf %1693, %1690 : vector<8x128xf32>
      %cst_343 = arith.constant 3.000000e+00 : f32
      %1695 = vector.broadcast %cst_343 : f32 to vector<8x128xf32>
      %1696 = arith.addf %1695, %1690 : vector<8x128xf32>
      %1697 = arith.select %1692, %1694, %1696 : vector<8x128xi1>, vector<8x128xf32>
      %cst_344 = arith.constant 1.000000e+09 : f32
      %1698 = vector.broadcast %cst_344 : f32 to vector<8x128xf32>
      %1699 = arith.select %1055, %1697, %1698 : vector<8x128xi1>, vector<8x128xf32>
      %1700 = arith.subf %73, %1338 : vector<8x128xf32>
      %1701 = arith.subf %77, %1339 : vector<8x128xf32>
      %1702 = math.absf %1700 : vector<8x128xf32>
      %1703 = math.absf %1701 : vector<8x128xf32>
      %1704 = arith.addf %1702, %1703 : vector<8x128xf32>
      %cst_345 = arith.constant 9.99999996E-13 : f32
      %1705 = vector.broadcast %cst_345 : f32 to vector<8x128xf32>
      %1706 = arith.cmpf ogt, %1704, %1705 : vector<8x128xf32>
      %cst_346 = arith.constant 1.000000e+00 : f32
      %1707 = vector.broadcast %cst_346 : f32 to vector<8x128xf32>
      %1708 = arith.select %1706, %1704, %1707 : vector<8x128xi1>, vector<8x128xf32>
      %1709 = tpu.reciprocal %1708 {approx = true} : vector<8x128xf32> -> vector<8x128xf32>
      %1710 = arith.mulf %1700, %1709 : vector<8x128xf32>
      %cst_347 = arith.constant 0.000000e+00 : f32
      %1711 = vector.broadcast %cst_347 : f32 to vector<8x128xf32>
      %1712 = arith.cmpf oge, %1701, %1711 : vector<8x128xf32>
      %cst_348 = arith.constant 1.000000e+00 : f32
      %1713 = vector.broadcast %cst_348 : f32 to vector<8x128xf32>
      %1714 = arith.subf %1713, %1710 : vector<8x128xf32>
      %cst_349 = arith.constant 3.000000e+00 : f32
      %1715 = vector.broadcast %cst_349 : f32 to vector<8x128xf32>
      %1716 = arith.addf %1715, %1710 : vector<8x128xf32>
      %1717 = arith.select %1712, %1714, %1716 : vector<8x128xi1>, vector<8x128xf32>
      %cst_350 = arith.constant 1.000000e+09 : f32
      %1718 = vector.broadcast %cst_350 : f32 to vector<8x128xf32>
      %1719 = arith.select %1074, %1717, %1718 : vector<8x128xi1>, vector<8x128xf32>
      %1720 = arith.subf %85, %1338 : vector<8x128xf32>
      %1721 = arith.subf %89, %1339 : vector<8x128xf32>
      %1722 = math.absf %1720 : vector<8x128xf32>
      %1723 = math.absf %1721 : vector<8x128xf32>
      %1724 = arith.addf %1722, %1723 : vector<8x128xf32>
      %cst_351 = arith.constant 9.99999996E-13 : f32
      %1725 = vector.broadcast %cst_351 : f32 to vector<8x128xf32>
      %1726 = arith.cmpf ogt, %1724, %1725 : vector<8x128xf32>
      %cst_352 = arith.constant 1.000000e+00 : f32
      %1727 = vector.broadcast %cst_352 : f32 to vector<8x128xf32>
      %1728 = arith.select %1726, %1724, %1727 : vector<8x128xi1>, vector<8x128xf32>
      %1729 = tpu.reciprocal %1728 {approx = true} : vector<8x128xf32> -> vector<8x128xf32>
      %1730 = arith.mulf %1720, %1729 : vector<8x128xf32>
      %cst_353 = arith.constant 0.000000e+00 : f32
      %1731 = vector.broadcast %cst_353 : f32 to vector<8x128xf32>
      %1732 = arith.cmpf oge, %1721, %1731 : vector<8x128xf32>
      %cst_354 = arith.constant 1.000000e+00 : f32
      %1733 = vector.broadcast %cst_354 : f32 to vector<8x128xf32>
      %1734 = arith.subf %1733, %1730 : vector<8x128xf32>
      %cst_355 = arith.constant 3.000000e+00 : f32
      %1735 = vector.broadcast %cst_355 : f32 to vector<8x128xf32>
      %1736 = arith.addf %1735, %1730 : vector<8x128xf32>
      %1737 = arith.select %1732, %1734, %1736 : vector<8x128xi1>, vector<8x128xf32>
      %cst_356 = arith.constant 1.000000e+09 : f32
      %1738 = vector.broadcast %cst_356 : f32 to vector<8x128xf32>
      %1739 = arith.select %1093, %1737, %1738 : vector<8x128xi1>, vector<8x128xf32>
      %1740 = arith.subf %97, %1338 : vector<8x128xf32>
      %1741 = arith.subf %101, %1339 : vector<8x128xf32>
      %1742 = math.absf %1740 : vector<8x128xf32>
      %1743 = math.absf %1741 : vector<8x128xf32>
      %1744 = arith.addf %1742, %1743 : vector<8x128xf32>
      %cst_357 = arith.constant 9.99999996E-13 : f32
      %1745 = vector.broadcast %cst_357 : f32 to vector<8x128xf32>
      %1746 = arith.cmpf ogt, %1744, %1745 : vector<8x128xf32>
      %cst_358 = arith.constant 1.000000e+00 : f32
      %1747 = vector.broadcast %cst_358 : f32 to vector<8x128xf32>
      %1748 = arith.select %1746, %1744, %1747 : vector<8x128xi1>, vector<8x128xf32>
      %1749 = tpu.reciprocal %1748 {approx = true} : vector<8x128xf32> -> vector<8x128xf32>
      %1750 = arith.mulf %1740, %1749 : vector<8x128xf32>
      %cst_359 = arith.constant 0.000000e+00 : f32
      %1751 = vector.broadcast %cst_359 : f32 to vector<8x128xf32>
      %1752 = arith.cmpf oge, %1741, %1751 : vector<8x128xf32>
      %cst_360 = arith.constant 1.000000e+00 : f32
      %1753 = vector.broadcast %cst_360 : f32 to vector<8x128xf32>
      %1754 = arith.subf %1753, %1750 : vector<8x128xf32>
      %cst_361 = arith.constant 3.000000e+00 : f32
      %1755 = vector.broadcast %cst_361 : f32 to vector<8x128xf32>
      %1756 = arith.addf %1755, %1750 : vector<8x128xf32>
      %1757 = arith.select %1752, %1754, %1756 : vector<8x128xi1>, vector<8x128xf32>
      %cst_362 = arith.constant 1.000000e+09 : f32
      %1758 = vector.broadcast %cst_362 : f32 to vector<8x128xf32>
      %1759 = arith.select %1112, %1757, %1758 : vector<8x128xi1>, vector<8x128xf32>
      %1760 = arith.subf %109, %1338 : vector<8x128xf32>
      %1761 = arith.subf %113, %1339 : vector<8x128xf32>
      %1762 = math.absf %1760 : vector<8x128xf32>
      %1763 = math.absf %1761 : vector<8x128xf32>
      %1764 = arith.addf %1762, %1763 : vector<8x128xf32>
      %cst_363 = arith.constant 9.99999996E-13 : f32
      %1765 = vector.broadcast %cst_363 : f32 to vector<8x128xf32>
      %1766 = arith.cmpf ogt, %1764, %1765 : vector<8x128xf32>
      %cst_364 = arith.constant 1.000000e+00 : f32
      %1767 = vector.broadcast %cst_364 : f32 to vector<8x128xf32>
      %1768 = arith.select %1766, %1764, %1767 : vector<8x128xi1>, vector<8x128xf32>
      %1769 = tpu.reciprocal %1768 {approx = true} : vector<8x128xf32> -> vector<8x128xf32>
      %1770 = arith.mulf %1760, %1769 : vector<8x128xf32>
      %cst_365 = arith.constant 0.000000e+00 : f32
      %1771 = vector.broadcast %cst_365 : f32 to vector<8x128xf32>
      %1772 = arith.cmpf oge, %1761, %1771 : vector<8x128xf32>
      %cst_366 = arith.constant 1.000000e+00 : f32
      %1773 = vector.broadcast %cst_366 : f32 to vector<8x128xf32>
      %1774 = arith.subf %1773, %1770 : vector<8x128xf32>
      %cst_367 = arith.constant 3.000000e+00 : f32
      %1775 = vector.broadcast %cst_367 : f32 to vector<8x128xf32>
      %1776 = arith.addf %1775, %1770 : vector<8x128xf32>
      %1777 = arith.select %1772, %1774, %1776 : vector<8x128xi1>, vector<8x128xf32>
      %cst_368 = arith.constant 1.000000e+09 : f32
      %1778 = vector.broadcast %cst_368 : f32 to vector<8x128xf32>
      %1779 = arith.select %1131, %1777, %1778 : vector<8x128xi1>, vector<8x128xf32>
      %1780 = arith.subf %121, %1338 : vector<8x128xf32>
      %1781 = arith.subf %125, %1339 : vector<8x128xf32>
      %1782 = math.absf %1780 : vector<8x128xf32>
      %1783 = math.absf %1781 : vector<8x128xf32>
      %1784 = arith.addf %1782, %1783 : vector<8x128xf32>
      %cst_369 = arith.constant 9.99999996E-13 : f32
      %1785 = vector.broadcast %cst_369 : f32 to vector<8x128xf32>
      %1786 = arith.cmpf ogt, %1784, %1785 : vector<8x128xf32>
      %cst_370 = arith.constant 1.000000e+00 : f32
      %1787 = vector.broadcast %cst_370 : f32 to vector<8x128xf32>
      %1788 = arith.select %1786, %1784, %1787 : vector<8x128xi1>, vector<8x128xf32>
      %1789 = tpu.reciprocal %1788 {approx = true} : vector<8x128xf32> -> vector<8x128xf32>
      %1790 = arith.mulf %1780, %1789 : vector<8x128xf32>
      %cst_371 = arith.constant 0.000000e+00 : f32
      %1791 = vector.broadcast %cst_371 : f32 to vector<8x128xf32>
      %1792 = arith.cmpf oge, %1781, %1791 : vector<8x128xf32>
      %cst_372 = arith.constant 1.000000e+00 : f32
      %1793 = vector.broadcast %cst_372 : f32 to vector<8x128xf32>
      %1794 = arith.subf %1793, %1790 : vector<8x128xf32>
      %cst_373 = arith.constant 3.000000e+00 : f32
      %1795 = vector.broadcast %cst_373 : f32 to vector<8x128xf32>
      %1796 = arith.addf %1795, %1790 : vector<8x128xf32>
      %1797 = arith.select %1792, %1794, %1796 : vector<8x128xi1>, vector<8x128xf32>
      %cst_374 = arith.constant 1.000000e+09 : f32
      %1798 = vector.broadcast %cst_374 : f32 to vector<8x128xf32>
      %1799 = arith.select %1150, %1797, %1798 : vector<8x128xi1>, vector<8x128xf32>
      %1800 = arith.subf %133, %1338 : vector<8x128xf32>
      %1801 = arith.subf %137, %1339 : vector<8x128xf32>
      %1802 = math.absf %1800 : vector<8x128xf32>
      %1803 = math.absf %1801 : vector<8x128xf32>
      %1804 = arith.addf %1802, %1803 : vector<8x128xf32>
      %cst_375 = arith.constant 9.99999996E-13 : f32
      %1805 = vector.broadcast %cst_375 : f32 to vector<8x128xf32>
      %1806 = arith.cmpf ogt, %1804, %1805 : vector<8x128xf32>
      %cst_376 = arith.constant 1.000000e+00 : f32
      %1807 = vector.broadcast %cst_376 : f32 to vector<8x128xf32>
      %1808 = arith.select %1806, %1804, %1807 : vector<8x128xi1>, vector<8x128xf32>
      %1809 = tpu.reciprocal %1808 {approx = true} : vector<8x128xf32> -> vector<8x128xf32>
      %1810 = arith.mulf %1800, %1809 : vector<8x128xf32>
      %cst_377 = arith.constant 0.000000e+00 : f32
      %1811 = vector.broadcast %cst_377 : f32 to vector<8x128xf32>
      %1812 = arith.cmpf oge, %1801, %1811 : vector<8x128xf32>
      %cst_378 = arith.constant 1.000000e+00 : f32
      %1813 = vector.broadcast %cst_378 : f32 to vector<8x128xf32>
      %1814 = arith.subf %1813, %1810 : vector<8x128xf32>
      %cst_379 = arith.constant 3.000000e+00 : f32
      %1815 = vector.broadcast %cst_379 : f32 to vector<8x128xf32>
      %1816 = arith.addf %1815, %1810 : vector<8x128xf32>
      %1817 = arith.select %1812, %1814, %1816 : vector<8x128xi1>, vector<8x128xf32>
      %cst_380 = arith.constant 1.000000e+09 : f32
      %1818 = vector.broadcast %cst_380 : f32 to vector<8x128xf32>
      %1819 = arith.select %1169, %1817, %1818 : vector<8x128xi1>, vector<8x128xf32>
      %1820 = arith.cmpf olt, %1379, %1359 : vector<8x128xf32>
      %1821 = arith.select %1820, %1379, %1359 : vector<8x128xi1>, vector<8x128xf32>
      %1822 = arith.select %1820, %1359, %1379 : vector<8x128xi1>, vector<8x128xf32>
      %1823 = arith.select %1820, %259, %205 : vector<8x128xi1>, vector<8x128xf32>
      %1824 = arith.select %1820, %205, %259 : vector<8x128xi1>, vector<8x128xf32>
      %1825 = arith.select %1820, %261, %207 : vector<8x128xi1>, vector<8x128xf32>
      %1826 = arith.select %1820, %207, %261 : vector<8x128xi1>, vector<8x128xf32>
      %1827 = arith.cmpf olt, %1419, %1399 : vector<8x128xf32>
      %1828 = arith.select %1827, %1419, %1399 : vector<8x128xi1>, vector<8x128xf32>
      %1829 = arith.select %1827, %1399, %1419 : vector<8x128xi1>, vector<8x128xf32>
      %1830 = arith.select %1827, %367, %313 : vector<8x128xi1>, vector<8x128xf32>
      %1831 = arith.select %1827, %313, %367 : vector<8x128xi1>, vector<8x128xf32>
      %1832 = arith.select %1827, %369, %315 : vector<8x128xi1>, vector<8x128xf32>
      %1833 = arith.select %1827, %315, %369 : vector<8x128xi1>, vector<8x128xf32>
      %1834 = arith.cmpf olt, %1828, %1821 : vector<8x128xf32>
      %1835 = arith.select %1834, %1828, %1821 : vector<8x128xi1>, vector<8x128xf32>
      %1836 = arith.select %1834, %1821, %1828 : vector<8x128xi1>, vector<8x128xf32>
      %1837 = arith.select %1834, %1830, %1823 : vector<8x128xi1>, vector<8x128xf32>
      %1838 = arith.select %1834, %1823, %1830 : vector<8x128xi1>, vector<8x128xf32>
      %1839 = arith.select %1834, %1832, %1825 : vector<8x128xi1>, vector<8x128xf32>
      %1840 = arith.select %1834, %1825, %1832 : vector<8x128xi1>, vector<8x128xf32>
      %1841 = arith.cmpf olt, %1829, %1822 : vector<8x128xf32>
      %1842 = arith.select %1841, %1829, %1822 : vector<8x128xi1>, vector<8x128xf32>
      %1843 = arith.select %1841, %1822, %1829 : vector<8x128xi1>, vector<8x128xf32>
      %1844 = arith.select %1841, %1831, %1824 : vector<8x128xi1>, vector<8x128xf32>
      %1845 = arith.select %1841, %1824, %1831 : vector<8x128xi1>, vector<8x128xf32>
      %1846 = arith.select %1841, %1833, %1826 : vector<8x128xi1>, vector<8x128xf32>
      %1847 = arith.select %1841, %1826, %1833 : vector<8x128xi1>, vector<8x128xf32>
      %1848 = arith.cmpf olt, %1836, %1842 : vector<8x128xf32>
      %1849 = arith.select %1848, %1836, %1842 : vector<8x128xi1>, vector<8x128xf32>
      %1850 = arith.select %1848, %1842, %1836 : vector<8x128xi1>, vector<8x128xf32>
      %1851 = arith.select %1848, %1838, %1844 : vector<8x128xi1>, vector<8x128xf32>
      %1852 = arith.select %1848, %1844, %1838 : vector<8x128xi1>, vector<8x128xf32>
      %1853 = arith.select %1848, %1840, %1846 : vector<8x128xi1>, vector<8x128xf32>
      %1854 = arith.select %1848, %1846, %1840 : vector<8x128xi1>, vector<8x128xf32>
      %1855 = arith.cmpf olt, %1459, %1439 : vector<8x128xf32>
      %1856 = arith.select %1855, %1459, %1439 : vector<8x128xi1>, vector<8x128xf32>
      %1857 = arith.select %1855, %1439, %1459 : vector<8x128xi1>, vector<8x128xf32>
      %1858 = arith.select %1855, %475, %421 : vector<8x128xi1>, vector<8x128xf32>
      %1859 = arith.select %1855, %421, %475 : vector<8x128xi1>, vector<8x128xf32>
      %1860 = arith.select %1855, %477, %423 : vector<8x128xi1>, vector<8x128xf32>
      %1861 = arith.select %1855, %423, %477 : vector<8x128xi1>, vector<8x128xf32>
      %1862 = arith.cmpf olt, %1499, %1479 : vector<8x128xf32>
      %1863 = arith.select %1862, %1499, %1479 : vector<8x128xi1>, vector<8x128xf32>
      %1864 = arith.select %1862, %1479, %1499 : vector<8x128xi1>, vector<8x128xf32>
      %1865 = arith.select %1862, %583, %529 : vector<8x128xi1>, vector<8x128xf32>
      %1866 = arith.select %1862, %529, %583 : vector<8x128xi1>, vector<8x128xf32>
      %1867 = arith.select %1862, %585, %531 : vector<8x128xi1>, vector<8x128xf32>
      %1868 = arith.select %1862, %531, %585 : vector<8x128xi1>, vector<8x128xf32>
      %1869 = arith.cmpf olt, %1863, %1856 : vector<8x128xf32>
      %1870 = arith.select %1869, %1863, %1856 : vector<8x128xi1>, vector<8x128xf32>
      %1871 = arith.select %1869, %1856, %1863 : vector<8x128xi1>, vector<8x128xf32>
      %1872 = arith.select %1869, %1865, %1858 : vector<8x128xi1>, vector<8x128xf32>
      %1873 = arith.select %1869, %1858, %1865 : vector<8x128xi1>, vector<8x128xf32>
      %1874 = arith.select %1869, %1867, %1860 : vector<8x128xi1>, vector<8x128xf32>
      %1875 = arith.select %1869, %1860, %1867 : vector<8x128xi1>, vector<8x128xf32>
      %1876 = arith.cmpf olt, %1864, %1857 : vector<8x128xf32>
      %1877 = arith.select %1876, %1864, %1857 : vector<8x128xi1>, vector<8x128xf32>
      %1878 = arith.select %1876, %1857, %1864 : vector<8x128xi1>, vector<8x128xf32>
      %1879 = arith.select %1876, %1866, %1859 : vector<8x128xi1>, vector<8x128xf32>
      %1880 = arith.select %1876, %1859, %1866 : vector<8x128xi1>, vector<8x128xf32>
      %1881 = arith.select %1876, %1868, %1861 : vector<8x128xi1>, vector<8x128xf32>
      %1882 = arith.select %1876, %1861, %1868 : vector<8x128xi1>, vector<8x128xf32>
      %1883 = arith.cmpf olt, %1871, %1877 : vector<8x128xf32>
      %1884 = arith.select %1883, %1871, %1877 : vector<8x128xi1>, vector<8x128xf32>
      %1885 = arith.select %1883, %1877, %1871 : vector<8x128xi1>, vector<8x128xf32>
      %1886 = arith.select %1883, %1873, %1879 : vector<8x128xi1>, vector<8x128xf32>
      %1887 = arith.select %1883, %1879, %1873 : vector<8x128xi1>, vector<8x128xf32>
      %1888 = arith.select %1883, %1875, %1881 : vector<8x128xi1>, vector<8x128xf32>
      %1889 = arith.select %1883, %1881, %1875 : vector<8x128xi1>, vector<8x128xf32>
      %1890 = arith.cmpf olt, %1870, %1835 : vector<8x128xf32>
      %1891 = arith.select %1890, %1870, %1835 : vector<8x128xi1>, vector<8x128xf32>
      %1892 = arith.select %1890, %1835, %1870 : vector<8x128xi1>, vector<8x128xf32>
      %1893 = arith.select %1890, %1872, %1837 : vector<8x128xi1>, vector<8x128xf32>
      %1894 = arith.select %1890, %1837, %1872 : vector<8x128xi1>, vector<8x128xf32>
      %1895 = arith.select %1890, %1874, %1839 : vector<8x128xi1>, vector<8x128xf32>
      %1896 = arith.select %1890, %1839, %1874 : vector<8x128xi1>, vector<8x128xf32>
      %1897 = arith.cmpf olt, %1885, %1850 : vector<8x128xf32>
      %1898 = arith.select %1897, %1885, %1850 : vector<8x128xi1>, vector<8x128xf32>
      %1899 = arith.select %1897, %1850, %1885 : vector<8x128xi1>, vector<8x128xf32>
      %1900 = arith.select %1897, %1887, %1852 : vector<8x128xi1>, vector<8x128xf32>
      %1901 = arith.select %1897, %1852, %1887 : vector<8x128xi1>, vector<8x128xf32>
      %1902 = arith.select %1897, %1889, %1854 : vector<8x128xi1>, vector<8x128xf32>
      %1903 = arith.select %1897, %1854, %1889 : vector<8x128xi1>, vector<8x128xf32>
      %1904 = arith.cmpf olt, %1892, %1898 : vector<8x128xf32>
      %1905 = arith.select %1904, %1892, %1898 : vector<8x128xi1>, vector<8x128xf32>
      %1906 = arith.select %1904, %1898, %1892 : vector<8x128xi1>, vector<8x128xf32>
      %1907 = arith.select %1904, %1894, %1900 : vector<8x128xi1>, vector<8x128xf32>
      %1908 = arith.select %1904, %1900, %1894 : vector<8x128xi1>, vector<8x128xf32>
      %1909 = arith.select %1904, %1896, %1902 : vector<8x128xi1>, vector<8x128xf32>
      %1910 = arith.select %1904, %1902, %1896 : vector<8x128xi1>, vector<8x128xf32>
      %1911 = arith.cmpf olt, %1884, %1849 : vector<8x128xf32>
      %1912 = arith.select %1911, %1884, %1849 : vector<8x128xi1>, vector<8x128xf32>
      %1913 = arith.select %1911, %1849, %1884 : vector<8x128xi1>, vector<8x128xf32>
      %1914 = arith.select %1911, %1886, %1851 : vector<8x128xi1>, vector<8x128xf32>
      %1915 = arith.select %1911, %1851, %1886 : vector<8x128xi1>, vector<8x128xf32>
      %1916 = arith.select %1911, %1888, %1853 : vector<8x128xi1>, vector<8x128xf32>
      %1917 = arith.select %1911, %1853, %1888 : vector<8x128xi1>, vector<8x128xf32>
      %1918 = arith.cmpf olt, %1878, %1843 : vector<8x128xf32>
      %1919 = arith.select %1918, %1878, %1843 : vector<8x128xi1>, vector<8x128xf32>
      %1920 = arith.select %1918, %1843, %1878 : vector<8x128xi1>, vector<8x128xf32>
      %1921 = arith.select %1918, %1880, %1845 : vector<8x128xi1>, vector<8x128xf32>
      %1922 = arith.select %1918, %1845, %1880 : vector<8x128xi1>, vector<8x128xf32>
      %1923 = arith.select %1918, %1882, %1847 : vector<8x128xi1>, vector<8x128xf32>
      %1924 = arith.select %1918, %1847, %1882 : vector<8x128xi1>, vector<8x128xf32>
      %1925 = arith.cmpf olt, %1913, %1919 : vector<8x128xf32>
      %1926 = arith.select %1925, %1913, %1919 : vector<8x128xi1>, vector<8x128xf32>
      %1927 = arith.select %1925, %1919, %1913 : vector<8x128xi1>, vector<8x128xf32>
      %1928 = arith.select %1925, %1915, %1921 : vector<8x128xi1>, vector<8x128xf32>
      %1929 = arith.select %1925, %1921, %1915 : vector<8x128xi1>, vector<8x128xf32>
      %1930 = arith.select %1925, %1917, %1923 : vector<8x128xi1>, vector<8x128xf32>
      %1931 = arith.select %1925, %1923, %1917 : vector<8x128xi1>, vector<8x128xf32>
      %1932 = arith.cmpf olt, %1905, %1912 : vector<8x128xf32>
      %1933 = arith.select %1932, %1905, %1912 : vector<8x128xi1>, vector<8x128xf32>
      %1934 = arith.select %1932, %1912, %1905 : vector<8x128xi1>, vector<8x128xf32>
      %1935 = arith.select %1932, %1907, %1914 : vector<8x128xi1>, vector<8x128xf32>
      %1936 = arith.select %1932, %1914, %1907 : vector<8x128xi1>, vector<8x128xf32>
      %1937 = arith.select %1932, %1909, %1916 : vector<8x128xi1>, vector<8x128xf32>
      %1938 = arith.select %1932, %1916, %1909 : vector<8x128xi1>, vector<8x128xf32>
      %1939 = arith.cmpf olt, %1906, %1926 : vector<8x128xf32>
      %1940 = arith.select %1939, %1906, %1926 : vector<8x128xi1>, vector<8x128xf32>
      %1941 = arith.select %1939, %1926, %1906 : vector<8x128xi1>, vector<8x128xf32>
      %1942 = arith.select %1939, %1908, %1928 : vector<8x128xi1>, vector<8x128xf32>
      %1943 = arith.select %1939, %1928, %1908 : vector<8x128xi1>, vector<8x128xf32>
      %1944 = arith.select %1939, %1910, %1930 : vector<8x128xi1>, vector<8x128xf32>
      %1945 = arith.select %1939, %1930, %1910 : vector<8x128xi1>, vector<8x128xf32>
      %1946 = arith.cmpf olt, %1899, %1927 : vector<8x128xf32>
      %1947 = arith.select %1946, %1899, %1927 : vector<8x128xi1>, vector<8x128xf32>
      %1948 = arith.select %1946, %1927, %1899 : vector<8x128xi1>, vector<8x128xf32>
      %1949 = arith.select %1946, %1901, %1929 : vector<8x128xi1>, vector<8x128xf32>
      %1950 = arith.select %1946, %1929, %1901 : vector<8x128xi1>, vector<8x128xf32>
      %1951 = arith.select %1946, %1903, %1931 : vector<8x128xi1>, vector<8x128xf32>
      %1952 = arith.select %1946, %1931, %1903 : vector<8x128xi1>, vector<8x128xf32>
      %1953 = arith.cmpf olt, %1539, %1519 : vector<8x128xf32>
      %1954 = arith.select %1953, %1539, %1519 : vector<8x128xi1>, vector<8x128xf32>
      %1955 = arith.select %1953, %1519, %1539 : vector<8x128xi1>, vector<8x128xf32>
      %1956 = arith.select %1953, %691, %637 : vector<8x128xi1>, vector<8x128xf32>
      %1957 = arith.select %1953, %637, %691 : vector<8x128xi1>, vector<8x128xf32>
      %1958 = arith.select %1953, %693, %639 : vector<8x128xi1>, vector<8x128xf32>
      %1959 = arith.select %1953, %639, %693 : vector<8x128xi1>, vector<8x128xf32>
      %1960 = arith.cmpf olt, %1579, %1559 : vector<8x128xf32>
      %1961 = arith.select %1960, %1579, %1559 : vector<8x128xi1>, vector<8x128xf32>
      %1962 = arith.select %1960, %1559, %1579 : vector<8x128xi1>, vector<8x128xf32>
      %1963 = arith.select %1960, %799, %745 : vector<8x128xi1>, vector<8x128xf32>
      %1964 = arith.select %1960, %745, %799 : vector<8x128xi1>, vector<8x128xf32>
      %1965 = arith.select %1960, %801, %747 : vector<8x128xi1>, vector<8x128xf32>
      %1966 = arith.select %1960, %747, %801 : vector<8x128xi1>, vector<8x128xf32>
      %1967 = arith.cmpf olt, %1961, %1954 : vector<8x128xf32>
      %1968 = arith.select %1967, %1961, %1954 : vector<8x128xi1>, vector<8x128xf32>
      %1969 = arith.select %1967, %1954, %1961 : vector<8x128xi1>, vector<8x128xf32>
      %1970 = arith.select %1967, %1963, %1956 : vector<8x128xi1>, vector<8x128xf32>
      %1971 = arith.select %1967, %1956, %1963 : vector<8x128xi1>, vector<8x128xf32>
      %1972 = arith.select %1967, %1965, %1958 : vector<8x128xi1>, vector<8x128xf32>
      %1973 = arith.select %1967, %1958, %1965 : vector<8x128xi1>, vector<8x128xf32>
      %1974 = arith.cmpf olt, %1962, %1955 : vector<8x128xf32>
      %1975 = arith.select %1974, %1962, %1955 : vector<8x128xi1>, vector<8x128xf32>
      %1976 = arith.select %1974, %1955, %1962 : vector<8x128xi1>, vector<8x128xf32>
      %1977 = arith.select %1974, %1964, %1957 : vector<8x128xi1>, vector<8x128xf32>
      %1978 = arith.select %1974, %1957, %1964 : vector<8x128xi1>, vector<8x128xf32>
      %1979 = arith.select %1974, %1966, %1959 : vector<8x128xi1>, vector<8x128xf32>
      %1980 = arith.select %1974, %1959, %1966 : vector<8x128xi1>, vector<8x128xf32>
      %1981 = arith.cmpf olt, %1969, %1975 : vector<8x128xf32>
      %1982 = arith.select %1981, %1969, %1975 : vector<8x128xi1>, vector<8x128xf32>
      %1983 = arith.select %1981, %1975, %1969 : vector<8x128xi1>, vector<8x128xf32>
      %1984 = arith.select %1981, %1971, %1977 : vector<8x128xi1>, vector<8x128xf32>
      %1985 = arith.select %1981, %1977, %1971 : vector<8x128xi1>, vector<8x128xf32>
      %1986 = arith.select %1981, %1973, %1979 : vector<8x128xi1>, vector<8x128xf32>
      %1987 = arith.select %1981, %1979, %1973 : vector<8x128xi1>, vector<8x128xf32>
      %1988 = arith.cmpf olt, %1619, %1599 : vector<8x128xf32>
      %1989 = arith.select %1988, %1619, %1599 : vector<8x128xi1>, vector<8x128xf32>
      %1990 = arith.select %1988, %1599, %1619 : vector<8x128xi1>, vector<8x128xf32>
      %1991 = arith.select %1988, %907, %853 : vector<8x128xi1>, vector<8x128xf32>
      %1992 = arith.select %1988, %853, %907 : vector<8x128xi1>, vector<8x128xf32>
      %1993 = arith.select %1988, %909, %855 : vector<8x128xi1>, vector<8x128xf32>
      %1994 = arith.select %1988, %855, %909 : vector<8x128xi1>, vector<8x128xf32>
      %1995 = arith.cmpf olt, %1659, %1639 : vector<8x128xf32>
      %1996 = arith.select %1995, %1659, %1639 : vector<8x128xi1>, vector<8x128xf32>
      %1997 = arith.select %1995, %1639, %1659 : vector<8x128xi1>, vector<8x128xf32>
      %1998 = arith.select %1995, %1015, %961 : vector<8x128xi1>, vector<8x128xf32>
      %1999 = arith.select %1995, %961, %1015 : vector<8x128xi1>, vector<8x128xf32>
      %2000 = arith.select %1995, %1017, %963 : vector<8x128xi1>, vector<8x128xf32>
      %2001 = arith.select %1995, %963, %1017 : vector<8x128xi1>, vector<8x128xf32>
      %2002 = arith.cmpf olt, %1996, %1989 : vector<8x128xf32>
      %2003 = arith.select %2002, %1996, %1989 : vector<8x128xi1>, vector<8x128xf32>
      %2004 = arith.select %2002, %1989, %1996 : vector<8x128xi1>, vector<8x128xf32>
      %2005 = arith.select %2002, %1998, %1991 : vector<8x128xi1>, vector<8x128xf32>
      %2006 = arith.select %2002, %1991, %1998 : vector<8x128xi1>, vector<8x128xf32>
      %2007 = arith.select %2002, %2000, %1993 : vector<8x128xi1>, vector<8x128xf32>
      %2008 = arith.select %2002, %1993, %2000 : vector<8x128xi1>, vector<8x128xf32>
      %2009 = arith.cmpf olt, %1997, %1990 : vector<8x128xf32>
      %2010 = arith.select %2009, %1997, %1990 : vector<8x128xi1>, vector<8x128xf32>
      %2011 = arith.select %2009, %1990, %1997 : vector<8x128xi1>, vector<8x128xf32>
      %2012 = arith.select %2009, %1999, %1992 : vector<8x128xi1>, vector<8x128xf32>
      %2013 = arith.select %2009, %1992, %1999 : vector<8x128xi1>, vector<8x128xf32>
      %2014 = arith.select %2009, %2001, %1994 : vector<8x128xi1>, vector<8x128xf32>
      %2015 = arith.select %2009, %1994, %2001 : vector<8x128xi1>, vector<8x128xf32>
      %2016 = arith.cmpf olt, %2004, %2010 : vector<8x128xf32>
      %2017 = arith.select %2016, %2004, %2010 : vector<8x128xi1>, vector<8x128xf32>
      %2018 = arith.select %2016, %2010, %2004 : vector<8x128xi1>, vector<8x128xf32>
      %2019 = arith.select %2016, %2006, %2012 : vector<8x128xi1>, vector<8x128xf32>
      %2020 = arith.select %2016, %2012, %2006 : vector<8x128xi1>, vector<8x128xf32>
      %2021 = arith.select %2016, %2008, %2014 : vector<8x128xi1>, vector<8x128xf32>
      %2022 = arith.select %2016, %2014, %2008 : vector<8x128xi1>, vector<8x128xf32>
      %2023 = arith.cmpf olt, %2003, %1968 : vector<8x128xf32>
      %2024 = arith.select %2023, %2003, %1968 : vector<8x128xi1>, vector<8x128xf32>
      %2025 = arith.select %2023, %1968, %2003 : vector<8x128xi1>, vector<8x128xf32>
      %2026 = arith.select %2023, %2005, %1970 : vector<8x128xi1>, vector<8x128xf32>
      %2027 = arith.select %2023, %1970, %2005 : vector<8x128xi1>, vector<8x128xf32>
      %2028 = arith.select %2023, %2007, %1972 : vector<8x128xi1>, vector<8x128xf32>
      %2029 = arith.select %2023, %1972, %2007 : vector<8x128xi1>, vector<8x128xf32>
      %2030 = arith.cmpf olt, %2018, %1983 : vector<8x128xf32>
      %2031 = arith.select %2030, %2018, %1983 : vector<8x128xi1>, vector<8x128xf32>
      %2032 = arith.select %2030, %1983, %2018 : vector<8x128xi1>, vector<8x128xf32>
      %2033 = arith.select %2030, %2020, %1985 : vector<8x128xi1>, vector<8x128xf32>
      %2034 = arith.select %2030, %1985, %2020 : vector<8x128xi1>, vector<8x128xf32>
      %2035 = arith.select %2030, %2022, %1987 : vector<8x128xi1>, vector<8x128xf32>
      %2036 = arith.select %2030, %1987, %2022 : vector<8x128xi1>, vector<8x128xf32>
      %2037 = arith.cmpf olt, %2025, %2031 : vector<8x128xf32>
      %2038 = arith.select %2037, %2025, %2031 : vector<8x128xi1>, vector<8x128xf32>
      %2039 = arith.select %2037, %2031, %2025 : vector<8x128xi1>, vector<8x128xf32>
      %2040 = arith.select %2037, %2027, %2033 : vector<8x128xi1>, vector<8x128xf32>
      %2041 = arith.select %2037, %2033, %2027 : vector<8x128xi1>, vector<8x128xf32>
      %2042 = arith.select %2037, %2029, %2035 : vector<8x128xi1>, vector<8x128xf32>
      %2043 = arith.select %2037, %2035, %2029 : vector<8x128xi1>, vector<8x128xf32>
      %2044 = arith.cmpf olt, %2017, %1982 : vector<8x128xf32>
      %2045 = arith.select %2044, %2017, %1982 : vector<8x128xi1>, vector<8x128xf32>
      %2046 = arith.select %2044, %1982, %2017 : vector<8x128xi1>, vector<8x128xf32>
      %2047 = arith.select %2044, %2019, %1984 : vector<8x128xi1>, vector<8x128xf32>
      %2048 = arith.select %2044, %1984, %2019 : vector<8x128xi1>, vector<8x128xf32>
      %2049 = arith.select %2044, %2021, %1986 : vector<8x128xi1>, vector<8x128xf32>
      %2050 = arith.select %2044, %1986, %2021 : vector<8x128xi1>, vector<8x128xf32>
      %2051 = arith.cmpf olt, %2011, %1976 : vector<8x128xf32>
      %2052 = arith.select %2051, %2011, %1976 : vector<8x128xi1>, vector<8x128xf32>
      %2053 = arith.select %2051, %1976, %2011 : vector<8x128xi1>, vector<8x128xf32>
      %2054 = arith.select %2051, %2013, %1978 : vector<8x128xi1>, vector<8x128xf32>
      %2055 = arith.select %2051, %1978, %2013 : vector<8x128xi1>, vector<8x128xf32>
      %2056 = arith.select %2051, %2015, %1980 : vector<8x128xi1>, vector<8x128xf32>
      %2057 = arith.select %2051, %1980, %2015 : vector<8x128xi1>, vector<8x128xf32>
      %2058 = arith.cmpf olt, %2046, %2052 : vector<8x128xf32>
      %2059 = arith.select %2058, %2046, %2052 : vector<8x128xi1>, vector<8x128xf32>
      %2060 = arith.select %2058, %2052, %2046 : vector<8x128xi1>, vector<8x128xf32>
      %2061 = arith.select %2058, %2048, %2054 : vector<8x128xi1>, vector<8x128xf32>
      %2062 = arith.select %2058, %2054, %2048 : vector<8x128xi1>, vector<8x128xf32>
      %2063 = arith.select %2058, %2050, %2056 : vector<8x128xi1>, vector<8x128xf32>
      %2064 = arith.select %2058, %2056, %2050 : vector<8x128xi1>, vector<8x128xf32>
      %2065 = arith.cmpf olt, %2038, %2045 : vector<8x128xf32>
      %2066 = arith.select %2065, %2038, %2045 : vector<8x128xi1>, vector<8x128xf32>
      %2067 = arith.select %2065, %2045, %2038 : vector<8x128xi1>, vector<8x128xf32>
      %2068 = arith.select %2065, %2040, %2047 : vector<8x128xi1>, vector<8x128xf32>
      %2069 = arith.select %2065, %2047, %2040 : vector<8x128xi1>, vector<8x128xf32>
      %2070 = arith.select %2065, %2042, %2049 : vector<8x128xi1>, vector<8x128xf32>
      %2071 = arith.select %2065, %2049, %2042 : vector<8x128xi1>, vector<8x128xf32>
      %2072 = arith.cmpf olt, %2039, %2059 : vector<8x128xf32>
      %2073 = arith.select %2072, %2039, %2059 : vector<8x128xi1>, vector<8x128xf32>
      %2074 = arith.select %2072, %2059, %2039 : vector<8x128xi1>, vector<8x128xf32>
      %2075 = arith.select %2072, %2041, %2061 : vector<8x128xi1>, vector<8x128xf32>
      %2076 = arith.select %2072, %2061, %2041 : vector<8x128xi1>, vector<8x128xf32>
      %2077 = arith.select %2072, %2043, %2063 : vector<8x128xi1>, vector<8x128xf32>
      %2078 = arith.select %2072, %2063, %2043 : vector<8x128xi1>, vector<8x128xf32>
      %2079 = arith.cmpf olt, %2032, %2060 : vector<8x128xf32>
      %2080 = arith.select %2079, %2032, %2060 : vector<8x128xi1>, vector<8x128xf32>
      %2081 = arith.select %2079, %2060, %2032 : vector<8x128xi1>, vector<8x128xf32>
      %2082 = arith.select %2079, %2034, %2062 : vector<8x128xi1>, vector<8x128xf32>
      %2083 = arith.select %2079, %2062, %2034 : vector<8x128xi1>, vector<8x128xf32>
      %2084 = arith.select %2079, %2036, %2064 : vector<8x128xi1>, vector<8x128xf32>
      %2085 = arith.select %2079, %2064, %2036 : vector<8x128xi1>, vector<8x128xf32>
      %2086 = arith.cmpf olt, %2024, %1891 : vector<8x128xf32>
      %2087 = arith.select %2086, %2024, %1891 : vector<8x128xi1>, vector<8x128xf32>
      %2088 = arith.select %2086, %1891, %2024 : vector<8x128xi1>, vector<8x128xf32>
      %2089 = arith.select %2086, %2026, %1893 : vector<8x128xi1>, vector<8x128xf32>
      %2090 = arith.select %2086, %1893, %2026 : vector<8x128xi1>, vector<8x128xf32>
      %2091 = arith.select %2086, %2028, %1895 : vector<8x128xi1>, vector<8x128xf32>
      %2092 = arith.select %2086, %1895, %2028 : vector<8x128xi1>, vector<8x128xf32>
      %2093 = arith.cmpf olt, %2074, %1941 : vector<8x128xf32>
      %2094 = arith.select %2093, %2074, %1941 : vector<8x128xi1>, vector<8x128xf32>
      %2095 = arith.select %2093, %1941, %2074 : vector<8x128xi1>, vector<8x128xf32>
      %2096 = arith.select %2093, %2076, %1943 : vector<8x128xi1>, vector<8x128xf32>
      %2097 = arith.select %2093, %1943, %2076 : vector<8x128xi1>, vector<8x128xf32>
      %2098 = arith.select %2093, %2078, %1945 : vector<8x128xi1>, vector<8x128xf32>
      %2099 = arith.select %2093, %1945, %2078 : vector<8x128xi1>, vector<8x128xf32>
      %2100 = arith.cmpf olt, %2088, %2094 : vector<8x128xf32>
      %2101 = arith.select %2100, %2088, %2094 : vector<8x128xi1>, vector<8x128xf32>
      %2102 = arith.select %2100, %2094, %2088 : vector<8x128xi1>, vector<8x128xf32>
      %2103 = arith.select %2100, %2090, %2096 : vector<8x128xi1>, vector<8x128xf32>
      %2104 = arith.select %2100, %2096, %2090 : vector<8x128xi1>, vector<8x128xf32>
      %2105 = arith.select %2100, %2092, %2098 : vector<8x128xi1>, vector<8x128xf32>
      %2106 = arith.select %2100, %2098, %2092 : vector<8x128xi1>, vector<8x128xf32>
      %2107 = arith.cmpf olt, %2067, %1934 : vector<8x128xf32>
      %2108 = arith.select %2107, %2067, %1934 : vector<8x128xi1>, vector<8x128xf32>
      %2109 = arith.select %2107, %1934, %2067 : vector<8x128xi1>, vector<8x128xf32>
      %2110 = arith.select %2107, %2069, %1936 : vector<8x128xi1>, vector<8x128xf32>
      %2111 = arith.select %2107, %1936, %2069 : vector<8x128xi1>, vector<8x128xf32>
      %2112 = arith.select %2107, %2071, %1938 : vector<8x128xi1>, vector<8x128xf32>
      %2113 = arith.select %2107, %1938, %2071 : vector<8x128xi1>, vector<8x128xf32>
      %2114 = arith.cmpf olt, %2081, %1948 : vector<8x128xf32>
      %2115 = arith.select %2114, %2081, %1948 : vector<8x128xi1>, vector<8x128xf32>
      %2116 = arith.select %2114, %1948, %2081 : vector<8x128xi1>, vector<8x128xf32>
      %2117 = arith.select %2114, %2083, %1950 : vector<8x128xi1>, vector<8x128xf32>
      %2118 = arith.select %2114, %1950, %2083 : vector<8x128xi1>, vector<8x128xf32>
      %2119 = arith.select %2114, %2085, %1952 : vector<8x128xi1>, vector<8x128xf32>
      %2120 = arith.select %2114, %1952, %2085 : vector<8x128xi1>, vector<8x128xf32>
      %2121 = arith.cmpf olt, %2109, %2115 : vector<8x128xf32>
      %2122 = arith.select %2121, %2109, %2115 : vector<8x128xi1>, vector<8x128xf32>
      %2123 = arith.select %2121, %2115, %2109 : vector<8x128xi1>, vector<8x128xf32>
      %2124 = arith.select %2121, %2111, %2117 : vector<8x128xi1>, vector<8x128xf32>
      %2125 = arith.select %2121, %2117, %2111 : vector<8x128xi1>, vector<8x128xf32>
      %2126 = arith.select %2121, %2113, %2119 : vector<8x128xi1>, vector<8x128xf32>
      %2127 = arith.select %2121, %2119, %2113 : vector<8x128xi1>, vector<8x128xf32>
      %2128 = arith.cmpf olt, %2101, %2108 : vector<8x128xf32>
      %2129 = arith.select %2128, %2101, %2108 : vector<8x128xi1>, vector<8x128xf32>
      %2130 = arith.select %2128, %2108, %2101 : vector<8x128xi1>, vector<8x128xf32>
      %2131 = arith.select %2128, %2103, %2110 : vector<8x128xi1>, vector<8x128xf32>
      %2132 = arith.select %2128, %2110, %2103 : vector<8x128xi1>, vector<8x128xf32>
      %2133 = arith.select %2128, %2105, %2112 : vector<8x128xi1>, vector<8x128xf32>
      %2134 = arith.select %2128, %2112, %2105 : vector<8x128xi1>, vector<8x128xf32>
      %2135 = arith.cmpf olt, %2102, %2122 : vector<8x128xf32>
      %2136 = arith.select %2135, %2102, %2122 : vector<8x128xi1>, vector<8x128xf32>
      %2137 = arith.select %2135, %2122, %2102 : vector<8x128xi1>, vector<8x128xf32>
      %2138 = arith.select %2135, %2104, %2124 : vector<8x128xi1>, vector<8x128xf32>
      %2139 = arith.select %2135, %2124, %2104 : vector<8x128xi1>, vector<8x128xf32>
      %2140 = arith.select %2135, %2106, %2126 : vector<8x128xi1>, vector<8x128xf32>
      %2141 = arith.select %2135, %2126, %2106 : vector<8x128xi1>, vector<8x128xf32>
      %2142 = arith.cmpf olt, %2095, %2123 : vector<8x128xf32>
      %2143 = arith.select %2142, %2095, %2123 : vector<8x128xi1>, vector<8x128xf32>
      %2144 = arith.select %2142, %2123, %2095 : vector<8x128xi1>, vector<8x128xf32>
      %2145 = arith.select %2142, %2097, %2125 : vector<8x128xi1>, vector<8x128xf32>
      %2146 = arith.select %2142, %2125, %2097 : vector<8x128xi1>, vector<8x128xf32>
      %2147 = arith.select %2142, %2099, %2127 : vector<8x128xi1>, vector<8x128xf32>
      %2148 = arith.select %2142, %2127, %2099 : vector<8x128xi1>, vector<8x128xf32>
      %2149 = arith.cmpf olt, %2066, %1933 : vector<8x128xf32>
      %2150 = arith.select %2149, %2066, %1933 : vector<8x128xi1>, vector<8x128xf32>
      %2151 = arith.select %2149, %1933, %2066 : vector<8x128xi1>, vector<8x128xf32>
      %2152 = arith.select %2149, %2068, %1935 : vector<8x128xi1>, vector<8x128xf32>
      %2153 = arith.select %2149, %1935, %2068 : vector<8x128xi1>, vector<8x128xf32>
      %2154 = arith.select %2149, %2070, %1937 : vector<8x128xi1>, vector<8x128xf32>
      %2155 = arith.select %2149, %1937, %2070 : vector<8x128xi1>, vector<8x128xf32>
      %2156 = arith.cmpf olt, %2080, %1947 : vector<8x128xf32>
      %2157 = arith.select %2156, %2080, %1947 : vector<8x128xi1>, vector<8x128xf32>
      %2158 = arith.select %2156, %1947, %2080 : vector<8x128xi1>, vector<8x128xf32>
      %2159 = arith.select %2156, %2082, %1949 : vector<8x128xi1>, vector<8x128xf32>
      %2160 = arith.select %2156, %1949, %2082 : vector<8x128xi1>, vector<8x128xf32>
      %2161 = arith.select %2156, %2084, %1951 : vector<8x128xi1>, vector<8x128xf32>
      %2162 = arith.select %2156, %1951, %2084 : vector<8x128xi1>, vector<8x128xf32>
      %2163 = arith.cmpf olt, %2151, %2157 : vector<8x128xf32>
      %2164 = arith.select %2163, %2151, %2157 : vector<8x128xi1>, vector<8x128xf32>
      %2165 = arith.select %2163, %2157, %2151 : vector<8x128xi1>, vector<8x128xf32>
      %2166 = arith.select %2163, %2153, %2159 : vector<8x128xi1>, vector<8x128xf32>
      %2167 = arith.select %2163, %2159, %2153 : vector<8x128xi1>, vector<8x128xf32>
      %2168 = arith.select %2163, %2155, %2161 : vector<8x128xi1>, vector<8x128xf32>
      %2169 = arith.select %2163, %2161, %2155 : vector<8x128xi1>, vector<8x128xf32>
      %2170 = arith.cmpf olt, %2073, %1940 : vector<8x128xf32>
      %2171 = arith.select %2170, %2073, %1940 : vector<8x128xi1>, vector<8x128xf32>
      %2172 = arith.select %2170, %1940, %2073 : vector<8x128xi1>, vector<8x128xf32>
      %2173 = arith.select %2170, %2075, %1942 : vector<8x128xi1>, vector<8x128xf32>
      %2174 = arith.select %2170, %1942, %2075 : vector<8x128xi1>, vector<8x128xf32>
      %2175 = arith.select %2170, %2077, %1944 : vector<8x128xi1>, vector<8x128xf32>
      %2176 = arith.select %2170, %1944, %2077 : vector<8x128xi1>, vector<8x128xf32>
      %2177 = arith.cmpf olt, %2053, %1920 : vector<8x128xf32>
      %2178 = arith.select %2177, %2053, %1920 : vector<8x128xi1>, vector<8x128xf32>
      %2179 = arith.select %2177, %1920, %2053 : vector<8x128xi1>, vector<8x128xf32>
      %2180 = arith.select %2177, %2055, %1922 : vector<8x128xi1>, vector<8x128xf32>
      %2181 = arith.select %2177, %1922, %2055 : vector<8x128xi1>, vector<8x128xf32>
      %2182 = arith.select %2177, %2057, %1924 : vector<8x128xi1>, vector<8x128xf32>
      %2183 = arith.select %2177, %1924, %2057 : vector<8x128xi1>, vector<8x128xf32>
      %2184 = arith.cmpf olt, %2172, %2178 : vector<8x128xf32>
      %2185 = arith.select %2184, %2172, %2178 : vector<8x128xi1>, vector<8x128xf32>
      %2186 = arith.select %2184, %2178, %2172 : vector<8x128xi1>, vector<8x128xf32>
      %2187 = arith.select %2184, %2174, %2180 : vector<8x128xi1>, vector<8x128xf32>
      %2188 = arith.select %2184, %2180, %2174 : vector<8x128xi1>, vector<8x128xf32>
      %2189 = arith.select %2184, %2176, %2182 : vector<8x128xi1>, vector<8x128xf32>
      %2190 = arith.select %2184, %2182, %2176 : vector<8x128xi1>, vector<8x128xf32>
      %2191 = arith.cmpf olt, %2164, %2171 : vector<8x128xf32>
      %2192 = arith.select %2191, %2164, %2171 : vector<8x128xi1>, vector<8x128xf32>
      %2193 = arith.select %2191, %2171, %2164 : vector<8x128xi1>, vector<8x128xf32>
      %2194 = arith.select %2191, %2166, %2173 : vector<8x128xi1>, vector<8x128xf32>
      %2195 = arith.select %2191, %2173, %2166 : vector<8x128xi1>, vector<8x128xf32>
      %2196 = arith.select %2191, %2168, %2175 : vector<8x128xi1>, vector<8x128xf32>
      %2197 = arith.select %2191, %2175, %2168 : vector<8x128xi1>, vector<8x128xf32>
      %2198 = arith.cmpf olt, %2165, %2185 : vector<8x128xf32>
      %2199 = arith.select %2198, %2165, %2185 : vector<8x128xi1>, vector<8x128xf32>
      %2200 = arith.select %2198, %2185, %2165 : vector<8x128xi1>, vector<8x128xf32>
      %2201 = arith.select %2198, %2167, %2187 : vector<8x128xi1>, vector<8x128xf32>
      %2202 = arith.select %2198, %2187, %2167 : vector<8x128xi1>, vector<8x128xf32>
      %2203 = arith.select %2198, %2169, %2189 : vector<8x128xi1>, vector<8x128xf32>
      %2204 = arith.select %2198, %2189, %2169 : vector<8x128xi1>, vector<8x128xf32>
      %2205 = arith.cmpf olt, %2158, %2186 : vector<8x128xf32>
      %2206 = arith.select %2205, %2158, %2186 : vector<8x128xi1>, vector<8x128xf32>
      %2207 = arith.select %2205, %2186, %2158 : vector<8x128xi1>, vector<8x128xf32>
      %2208 = arith.select %2205, %2160, %2188 : vector<8x128xi1>, vector<8x128xf32>
      %2209 = arith.select %2205, %2188, %2160 : vector<8x128xi1>, vector<8x128xf32>
      %2210 = arith.select %2205, %2162, %2190 : vector<8x128xi1>, vector<8x128xf32>
      %2211 = arith.select %2205, %2190, %2162 : vector<8x128xi1>, vector<8x128xf32>
      %2212 = arith.cmpf olt, %2129, %2150 : vector<8x128xf32>
      %2213 = arith.select %2212, %2129, %2150 : vector<8x128xi1>, vector<8x128xf32>
      %2214 = arith.select %2212, %2150, %2129 : vector<8x128xi1>, vector<8x128xf32>
      %2215 = arith.select %2212, %2131, %2152 : vector<8x128xi1>, vector<8x128xf32>
      %2216 = arith.select %2212, %2152, %2131 : vector<8x128xi1>, vector<8x128xf32>
      %2217 = arith.select %2212, %2133, %2154 : vector<8x128xi1>, vector<8x128xf32>
      %2218 = arith.select %2212, %2154, %2133 : vector<8x128xi1>, vector<8x128xf32>
      %2219 = arith.cmpf olt, %2130, %2192 : vector<8x128xf32>
      %2220 = arith.select %2219, %2130, %2192 : vector<8x128xi1>, vector<8x128xf32>
      %2221 = arith.select %2219, %2192, %2130 : vector<8x128xi1>, vector<8x128xf32>
      %2222 = arith.select %2219, %2132, %2194 : vector<8x128xi1>, vector<8x128xf32>
      %2223 = arith.select %2219, %2194, %2132 : vector<8x128xi1>, vector<8x128xf32>
      %2224 = arith.select %2219, %2134, %2196 : vector<8x128xi1>, vector<8x128xf32>
      %2225 = arith.select %2219, %2196, %2134 : vector<8x128xi1>, vector<8x128xf32>
      %2226 = arith.cmpf olt, %2136, %2193 : vector<8x128xf32>
      %2227 = arith.select %2226, %2136, %2193 : vector<8x128xi1>, vector<8x128xf32>
      %2228 = arith.select %2226, %2193, %2136 : vector<8x128xi1>, vector<8x128xf32>
      %2229 = arith.select %2226, %2138, %2195 : vector<8x128xi1>, vector<8x128xf32>
      %2230 = arith.select %2226, %2195, %2138 : vector<8x128xi1>, vector<8x128xf32>
      %2231 = arith.select %2226, %2140, %2197 : vector<8x128xi1>, vector<8x128xf32>
      %2232 = arith.select %2226, %2197, %2140 : vector<8x128xi1>, vector<8x128xf32>
      %2233 = arith.cmpf olt, %2137, %2199 : vector<8x128xf32>
      %2234 = arith.select %2233, %2137, %2199 : vector<8x128xi1>, vector<8x128xf32>
      %2235 = arith.select %2233, %2199, %2137 : vector<8x128xi1>, vector<8x128xf32>
      %2236 = arith.select %2233, %2139, %2201 : vector<8x128xi1>, vector<8x128xf32>
      %2237 = arith.select %2233, %2201, %2139 : vector<8x128xi1>, vector<8x128xf32>
      %2238 = arith.select %2233, %2141, %2203 : vector<8x128xi1>, vector<8x128xf32>
      %2239 = arith.select %2233, %2203, %2141 : vector<8x128xi1>, vector<8x128xf32>
      %2240 = arith.cmpf olt, %2143, %2200 : vector<8x128xf32>
      %2241 = arith.select %2240, %2143, %2200 : vector<8x128xi1>, vector<8x128xf32>
      %2242 = arith.select %2240, %2200, %2143 : vector<8x128xi1>, vector<8x128xf32>
      %2243 = arith.select %2240, %2145, %2202 : vector<8x128xi1>, vector<8x128xf32>
      %2244 = arith.select %2240, %2202, %2145 : vector<8x128xi1>, vector<8x128xf32>
      %2245 = arith.select %2240, %2147, %2204 : vector<8x128xi1>, vector<8x128xf32>
      %2246 = arith.select %2240, %2204, %2147 : vector<8x128xi1>, vector<8x128xf32>
      %2247 = arith.cmpf olt, %2144, %2206 : vector<8x128xf32>
      %2248 = arith.select %2247, %2144, %2206 : vector<8x128xi1>, vector<8x128xf32>
      %2249 = arith.select %2247, %2206, %2144 : vector<8x128xi1>, vector<8x128xf32>
      %2250 = arith.select %2247, %2146, %2208 : vector<8x128xi1>, vector<8x128xf32>
      %2251 = arith.select %2247, %2208, %2146 : vector<8x128xi1>, vector<8x128xf32>
      %2252 = arith.select %2247, %2148, %2210 : vector<8x128xi1>, vector<8x128xf32>
      %2253 = arith.select %2247, %2210, %2148 : vector<8x128xi1>, vector<8x128xf32>
      %2254 = arith.cmpf olt, %2116, %2207 : vector<8x128xf32>
      %2255 = arith.select %2254, %2116, %2207 : vector<8x128xi1>, vector<8x128xf32>
      %2256 = arith.select %2254, %2207, %2116 : vector<8x128xi1>, vector<8x128xf32>
      %2257 = arith.select %2254, %2118, %2209 : vector<8x128xi1>, vector<8x128xf32>
      %2258 = arith.select %2254, %2209, %2118 : vector<8x128xi1>, vector<8x128xf32>
      %2259 = arith.select %2254, %2120, %2211 : vector<8x128xi1>, vector<8x128xf32>
      %2260 = arith.select %2254, %2211, %2120 : vector<8x128xi1>, vector<8x128xf32>
      %2261 = arith.cmpf olt, %1699, %1679 : vector<8x128xf32>
      %2262 = arith.select %2261, %1699, %1679 : vector<8x128xi1>, vector<8x128xf32>
      %2263 = arith.select %2261, %1679, %1699 : vector<8x128xi1>, vector<8x128xf32>
      %2264 = arith.select %2261, %61, %49 : vector<8x128xi1>, vector<8x128xf32>
      %2265 = arith.select %2261, %49, %61 : vector<8x128xi1>, vector<8x128xf32>
      %2266 = arith.select %2261, %65, %53 : vector<8x128xi1>, vector<8x128xf32>
      %2267 = arith.select %2261, %53, %65 : vector<8x128xi1>, vector<8x128xf32>
      %2268 = arith.cmpf olt, %1739, %1719 : vector<8x128xf32>
      %2269 = arith.select %2268, %1739, %1719 : vector<8x128xi1>, vector<8x128xf32>
      %2270 = arith.select %2268, %1719, %1739 : vector<8x128xi1>, vector<8x128xf32>
      %2271 = arith.select %2268, %85, %73 : vector<8x128xi1>, vector<8x128xf32>
      %2272 = arith.select %2268, %73, %85 : vector<8x128xi1>, vector<8x128xf32>
      %2273 = arith.select %2268, %89, %77 : vector<8x128xi1>, vector<8x128xf32>
      %2274 = arith.select %2268, %77, %89 : vector<8x128xi1>, vector<8x128xf32>
      %2275 = arith.cmpf olt, %2269, %2262 : vector<8x128xf32>
      %2276 = arith.select %2275, %2269, %2262 : vector<8x128xi1>, vector<8x128xf32>
      %2277 = arith.select %2275, %2262, %2269 : vector<8x128xi1>, vector<8x128xf32>
      %2278 = arith.select %2275, %2271, %2264 : vector<8x128xi1>, vector<8x128xf32>
      %2279 = arith.select %2275, %2264, %2271 : vector<8x128xi1>, vector<8x128xf32>
      %2280 = arith.select %2275, %2273, %2266 : vector<8x128xi1>, vector<8x128xf32>
      %2281 = arith.select %2275, %2266, %2273 : vector<8x128xi1>, vector<8x128xf32>
      %2282 = arith.cmpf olt, %2270, %2263 : vector<8x128xf32>
      %2283 = arith.select %2282, %2270, %2263 : vector<8x128xi1>, vector<8x128xf32>
      %2284 = arith.select %2282, %2263, %2270 : vector<8x128xi1>, vector<8x128xf32>
      %2285 = arith.select %2282, %2272, %2265 : vector<8x128xi1>, vector<8x128xf32>
      %2286 = arith.select %2282, %2265, %2272 : vector<8x128xi1>, vector<8x128xf32>
      %2287 = arith.select %2282, %2274, %2267 : vector<8x128xi1>, vector<8x128xf32>
      %2288 = arith.select %2282, %2267, %2274 : vector<8x128xi1>, vector<8x128xf32>
      %2289 = arith.cmpf olt, %2277, %2283 : vector<8x128xf32>
      %2290 = arith.select %2289, %2277, %2283 : vector<8x128xi1>, vector<8x128xf32>
      %2291 = arith.select %2289, %2283, %2277 : vector<8x128xi1>, vector<8x128xf32>
      %2292 = arith.select %2289, %2279, %2285 : vector<8x128xi1>, vector<8x128xf32>
      %2293 = arith.select %2289, %2285, %2279 : vector<8x128xi1>, vector<8x128xf32>
      %2294 = arith.select %2289, %2281, %2287 : vector<8x128xi1>, vector<8x128xf32>
      %2295 = arith.select %2289, %2287, %2281 : vector<8x128xi1>, vector<8x128xf32>
      %2296 = arith.cmpf olt, %1779, %1759 : vector<8x128xf32>
      %2297 = arith.select %2296, %1779, %1759 : vector<8x128xi1>, vector<8x128xf32>
      %2298 = arith.select %2296, %1759, %1779 : vector<8x128xi1>, vector<8x128xf32>
      %2299 = arith.select %2296, %109, %97 : vector<8x128xi1>, vector<8x128xf32>
      %2300 = arith.select %2296, %97, %109 : vector<8x128xi1>, vector<8x128xf32>
      %2301 = arith.select %2296, %113, %101 : vector<8x128xi1>, vector<8x128xf32>
      %2302 = arith.select %2296, %101, %113 : vector<8x128xi1>, vector<8x128xf32>
      %2303 = arith.cmpf olt, %1819, %1799 : vector<8x128xf32>
      %2304 = arith.select %2303, %1819, %1799 : vector<8x128xi1>, vector<8x128xf32>
      %2305 = arith.select %2303, %1799, %1819 : vector<8x128xi1>, vector<8x128xf32>
      %2306 = arith.select %2303, %133, %121 : vector<8x128xi1>, vector<8x128xf32>
      %2307 = arith.select %2303, %121, %133 : vector<8x128xi1>, vector<8x128xf32>
      %2308 = arith.select %2303, %137, %125 : vector<8x128xi1>, vector<8x128xf32>
      %2309 = arith.select %2303, %125, %137 : vector<8x128xi1>, vector<8x128xf32>
      %2310 = arith.cmpf olt, %2304, %2297 : vector<8x128xf32>
      %2311 = arith.select %2310, %2304, %2297 : vector<8x128xi1>, vector<8x128xf32>
      %2312 = arith.select %2310, %2297, %2304 : vector<8x128xi1>, vector<8x128xf32>
      %2313 = arith.select %2310, %2306, %2299 : vector<8x128xi1>, vector<8x128xf32>
      %2314 = arith.select %2310, %2299, %2306 : vector<8x128xi1>, vector<8x128xf32>
      %2315 = arith.select %2310, %2308, %2301 : vector<8x128xi1>, vector<8x128xf32>
      %2316 = arith.select %2310, %2301, %2308 : vector<8x128xi1>, vector<8x128xf32>
      %2317 = arith.cmpf olt, %2305, %2298 : vector<8x128xf32>
      %2318 = arith.select %2317, %2305, %2298 : vector<8x128xi1>, vector<8x128xf32>
      %2319 = arith.select %2317, %2298, %2305 : vector<8x128xi1>, vector<8x128xf32>
      %2320 = arith.select %2317, %2307, %2300 : vector<8x128xi1>, vector<8x128xf32>
      %2321 = arith.select %2317, %2300, %2307 : vector<8x128xi1>, vector<8x128xf32>
      %2322 = arith.select %2317, %2309, %2302 : vector<8x128xi1>, vector<8x128xf32>
      %2323 = arith.select %2317, %2302, %2309 : vector<8x128xi1>, vector<8x128xf32>
      %2324 = arith.cmpf olt, %2312, %2318 : vector<8x128xf32>
      %2325 = arith.select %2324, %2312, %2318 : vector<8x128xi1>, vector<8x128xf32>
      %2326 = arith.select %2324, %2318, %2312 : vector<8x128xi1>, vector<8x128xf32>
      %2327 = arith.select %2324, %2314, %2320 : vector<8x128xi1>, vector<8x128xf32>
      %2328 = arith.select %2324, %2320, %2314 : vector<8x128xi1>, vector<8x128xf32>
      %2329 = arith.select %2324, %2316, %2322 : vector<8x128xi1>, vector<8x128xf32>
      %2330 = arith.select %2324, %2322, %2316 : vector<8x128xi1>, vector<8x128xf32>
      %2331 = arith.cmpf olt, %2311, %2276 : vector<8x128xf32>
      %2332 = arith.select %2331, %2311, %2276 : vector<8x128xi1>, vector<8x128xf32>
      %2333 = arith.select %2331, %2276, %2311 : vector<8x128xi1>, vector<8x128xf32>
      %2334 = arith.select %2331, %2313, %2278 : vector<8x128xi1>, vector<8x128xf32>
      %2335 = arith.select %2331, %2278, %2313 : vector<8x128xi1>, vector<8x128xf32>
      %2336 = arith.select %2331, %2315, %2280 : vector<8x128xi1>, vector<8x128xf32>
      %2337 = arith.select %2331, %2280, %2315 : vector<8x128xi1>, vector<8x128xf32>
      %2338 = arith.cmpf olt, %2326, %2291 : vector<8x128xf32>
      %2339 = arith.select %2338, %2326, %2291 : vector<8x128xi1>, vector<8x128xf32>
      %2340 = arith.select %2338, %2291, %2326 : vector<8x128xi1>, vector<8x128xf32>
      %2341 = arith.select %2338, %2328, %2293 : vector<8x128xi1>, vector<8x128xf32>
      %2342 = arith.select %2338, %2293, %2328 : vector<8x128xi1>, vector<8x128xf32>
      %2343 = arith.select %2338, %2330, %2295 : vector<8x128xi1>, vector<8x128xf32>
      %2344 = arith.select %2338, %2295, %2330 : vector<8x128xi1>, vector<8x128xf32>
      %2345 = arith.cmpf olt, %2333, %2339 : vector<8x128xf32>
      %2346 = arith.select %2345, %2333, %2339 : vector<8x128xi1>, vector<8x128xf32>
      %2347 = arith.select %2345, %2339, %2333 : vector<8x128xi1>, vector<8x128xf32>
      %2348 = arith.select %2345, %2335, %2341 : vector<8x128xi1>, vector<8x128xf32>
      %2349 = arith.select %2345, %2341, %2335 : vector<8x128xi1>, vector<8x128xf32>
      %2350 = arith.select %2345, %2337, %2343 : vector<8x128xi1>, vector<8x128xf32>
      %2351 = arith.select %2345, %2343, %2337 : vector<8x128xi1>, vector<8x128xf32>
      %2352 = arith.cmpf olt, %2325, %2290 : vector<8x128xf32>
      %2353 = arith.select %2352, %2325, %2290 : vector<8x128xi1>, vector<8x128xf32>
      %2354 = arith.select %2352, %2290, %2325 : vector<8x128xi1>, vector<8x128xf32>
      %2355 = arith.select %2352, %2327, %2292 : vector<8x128xi1>, vector<8x128xf32>
      %2356 = arith.select %2352, %2292, %2327 : vector<8x128xi1>, vector<8x128xf32>
      %2357 = arith.select %2352, %2329, %2294 : vector<8x128xi1>, vector<8x128xf32>
      %2358 = arith.select %2352, %2294, %2329 : vector<8x128xi1>, vector<8x128xf32>
      %2359 = arith.cmpf olt, %2319, %2284 : vector<8x128xf32>
      %2360 = arith.select %2359, %2319, %2284 : vector<8x128xi1>, vector<8x128xf32>
      %2361 = arith.select %2359, %2284, %2319 : vector<8x128xi1>, vector<8x128xf32>
      %2362 = arith.select %2359, %2321, %2286 : vector<8x128xi1>, vector<8x128xf32>
      %2363 = arith.select %2359, %2286, %2321 : vector<8x128xi1>, vector<8x128xf32>
      %2364 = arith.select %2359, %2323, %2288 : vector<8x128xi1>, vector<8x128xf32>
      %2365 = arith.select %2359, %2288, %2323 : vector<8x128xi1>, vector<8x128xf32>
      %2366 = arith.cmpf olt, %2354, %2360 : vector<8x128xf32>
      %2367 = arith.select %2366, %2354, %2360 : vector<8x128xi1>, vector<8x128xf32>
      %2368 = arith.select %2366, %2360, %2354 : vector<8x128xi1>, vector<8x128xf32>
      %2369 = arith.select %2366, %2356, %2362 : vector<8x128xi1>, vector<8x128xf32>
      %2370 = arith.select %2366, %2362, %2356 : vector<8x128xi1>, vector<8x128xf32>
      %2371 = arith.select %2366, %2358, %2364 : vector<8x128xi1>, vector<8x128xf32>
      %2372 = arith.select %2366, %2364, %2358 : vector<8x128xi1>, vector<8x128xf32>
      %2373 = arith.cmpf olt, %2346, %2353 : vector<8x128xf32>
      %2374 = arith.select %2373, %2346, %2353 : vector<8x128xi1>, vector<8x128xf32>
      %2375 = arith.select %2373, %2353, %2346 : vector<8x128xi1>, vector<8x128xf32>
      %2376 = arith.select %2373, %2348, %2355 : vector<8x128xi1>, vector<8x128xf32>
      %2377 = arith.select %2373, %2355, %2348 : vector<8x128xi1>, vector<8x128xf32>
      %2378 = arith.select %2373, %2350, %2357 : vector<8x128xi1>, vector<8x128xf32>
      %2379 = arith.select %2373, %2357, %2350 : vector<8x128xi1>, vector<8x128xf32>
      %2380 = arith.cmpf olt, %2347, %2367 : vector<8x128xf32>
      %2381 = arith.select %2380, %2347, %2367 : vector<8x128xi1>, vector<8x128xf32>
      %2382 = arith.select %2380, %2367, %2347 : vector<8x128xi1>, vector<8x128xf32>
      %2383 = arith.select %2380, %2349, %2369 : vector<8x128xi1>, vector<8x128xf32>
      %2384 = arith.select %2380, %2369, %2349 : vector<8x128xi1>, vector<8x128xf32>
      %2385 = arith.select %2380, %2351, %2371 : vector<8x128xi1>, vector<8x128xf32>
      %2386 = arith.select %2380, %2371, %2351 : vector<8x128xi1>, vector<8x128xf32>
      %2387 = arith.cmpf olt, %2340, %2368 : vector<8x128xf32>
      %2388 = arith.select %2387, %2340, %2368 : vector<8x128xi1>, vector<8x128xf32>
      %2389 = arith.select %2387, %2368, %2340 : vector<8x128xi1>, vector<8x128xf32>
      %2390 = arith.select %2387, %2342, %2370 : vector<8x128xi1>, vector<8x128xf32>
      %2391 = arith.select %2387, %2370, %2342 : vector<8x128xi1>, vector<8x128xf32>
      %2392 = arith.select %2387, %2344, %2372 : vector<8x128xi1>, vector<8x128xf32>
      %2393 = arith.select %2387, %2372, %2344 : vector<8x128xi1>, vector<8x128xf32>
      %2394 = arith.cmpf olt, %2382, %2375 : vector<8x128xf32>
      %2395 = arith.select %2394, %2382, %2375 : vector<8x128xi1>, vector<8x128xf32>
      %2396 = arith.select %2394, %2375, %2382 : vector<8x128xi1>, vector<8x128xf32>
      %2397 = arith.select %2394, %2384, %2377 : vector<8x128xi1>, vector<8x128xf32>
      %2398 = arith.select %2394, %2377, %2384 : vector<8x128xi1>, vector<8x128xf32>
      %2399 = arith.select %2394, %2386, %2379 : vector<8x128xi1>, vector<8x128xf32>
      %2400 = arith.select %2394, %2379, %2386 : vector<8x128xi1>, vector<8x128xf32>
      %2401 = arith.cmpf olt, %2388, %2381 : vector<8x128xf32>
      %2402 = arith.select %2401, %2388, %2381 : vector<8x128xi1>, vector<8x128xf32>
      %2403 = arith.select %2401, %2381, %2388 : vector<8x128xi1>, vector<8x128xf32>
      %2404 = arith.select %2401, %2390, %2383 : vector<8x128xi1>, vector<8x128xf32>
      %2405 = arith.select %2401, %2383, %2390 : vector<8x128xi1>, vector<8x128xf32>
      %2406 = arith.select %2401, %2392, %2385 : vector<8x128xi1>, vector<8x128xf32>
      %2407 = arith.select %2401, %2385, %2392 : vector<8x128xi1>, vector<8x128xf32>
      %2408 = arith.cmpf olt, %2395, %2374 : vector<8x128xf32>
      %2409 = arith.select %2408, %2395, %2374 : vector<8x128xi1>, vector<8x128xf32>
      %2410 = arith.select %2408, %2374, %2395 : vector<8x128xi1>, vector<8x128xf32>
      %2411 = arith.select %2408, %2397, %2376 : vector<8x128xi1>, vector<8x128xf32>
      %2412 = arith.select %2408, %2376, %2397 : vector<8x128xi1>, vector<8x128xf32>
      %2413 = arith.select %2408, %2399, %2378 : vector<8x128xi1>, vector<8x128xf32>
      %2414 = arith.select %2408, %2378, %2399 : vector<8x128xi1>, vector<8x128xf32>
      %2415 = arith.cmpf olt, %2396, %2402 : vector<8x128xf32>
      %2416 = arith.select %2415, %2396, %2402 : vector<8x128xi1>, vector<8x128xf32>
      %2417 = arith.select %2415, %2402, %2396 : vector<8x128xi1>, vector<8x128xf32>
      %2418 = arith.select %2415, %2398, %2404 : vector<8x128xi1>, vector<8x128xf32>
      %2419 = arith.select %2415, %2404, %2398 : vector<8x128xi1>, vector<8x128xf32>
      %2420 = arith.select %2415, %2400, %2406 : vector<8x128xi1>, vector<8x128xf32>
      %2421 = arith.select %2415, %2406, %2400 : vector<8x128xi1>, vector<8x128xf32>
      %2422 = arith.cmpf olt, %2389, %2403 : vector<8x128xf32>
      %2423 = arith.select %2422, %2389, %2403 : vector<8x128xi1>, vector<8x128xf32>
      %2424 = arith.select %2422, %2403, %2389 : vector<8x128xi1>, vector<8x128xf32>
      %2425 = arith.select %2422, %2391, %2405 : vector<8x128xi1>, vector<8x128xf32>
      %2426 = arith.select %2422, %2405, %2391 : vector<8x128xi1>, vector<8x128xf32>
      %2427 = arith.select %2422, %2393, %2407 : vector<8x128xi1>, vector<8x128xf32>
      %2428 = arith.select %2422, %2407, %2393 : vector<8x128xi1>, vector<8x128xf32>
      %2429 = arith.cmpf olt, %2332, %2087 : vector<8x128xf32>
      %2430 = arith.select %2429, %2087, %2332 : vector<8x128xi1>, vector<8x128xf32>
      %2431 = arith.select %2429, %2334, %2089 : vector<8x128xi1>, vector<8x128xf32>
      %2432 = arith.select %2429, %2089, %2334 : vector<8x128xi1>, vector<8x128xf32>
      %2433 = arith.select %2429, %2336, %2091 : vector<8x128xi1>, vector<8x128xf32>
      %2434 = arith.select %2429, %2091, %2336 : vector<8x128xi1>, vector<8x128xf32>
      %2435 = arith.cmpf olt, %2430, %2235 : vector<8x128xf32>
      %2436 = arith.select %2435, %2430, %2235 : vector<8x128xi1>, vector<8x128xf32>
      %2437 = arith.select %2435, %2235, %2430 : vector<8x128xi1>, vector<8x128xf32>
      %2438 = arith.select %2435, %2432, %2237 : vector<8x128xi1>, vector<8x128xf32>
      %2439 = arith.select %2435, %2237, %2432 : vector<8x128xi1>, vector<8x128xf32>
      %2440 = arith.select %2435, %2434, %2239 : vector<8x128xi1>, vector<8x128xf32>
      %2441 = arith.select %2435, %2239, %2434 : vector<8x128xi1>, vector<8x128xf32>
      %2442 = arith.cmpf olt, %2417, %2221 : vector<8x128xf32>
      %2443 = arith.select %2442, %2417, %2221 : vector<8x128xi1>, vector<8x128xf32>
      %2444 = arith.select %2442, %2221, %2417 : vector<8x128xi1>, vector<8x128xf32>
      %2445 = arith.select %2442, %2419, %2223 : vector<8x128xi1>, vector<8x128xf32>
      %2446 = arith.select %2442, %2223, %2419 : vector<8x128xi1>, vector<8x128xf32>
      %2447 = arith.select %2442, %2421, %2225 : vector<8x128xi1>, vector<8x128xf32>
      %2448 = arith.select %2442, %2225, %2421 : vector<8x128xi1>, vector<8x128xf32>
      %2449 = arith.cmpf olt, %2444, %2249 : vector<8x128xf32>
      %2450 = arith.select %2449, %2444, %2249 : vector<8x128xi1>, vector<8x128xf32>
      %2451 = arith.select %2449, %2249, %2444 : vector<8x128xi1>, vector<8x128xf32>
      %2452 = arith.select %2449, %2446, %2251 : vector<8x128xi1>, vector<8x128xf32>
      %2453 = arith.select %2449, %2251, %2446 : vector<8x128xi1>, vector<8x128xf32>
      %2454 = arith.select %2449, %2448, %2253 : vector<8x128xi1>, vector<8x128xf32>
      %2455 = arith.select %2449, %2253, %2448 : vector<8x128xi1>, vector<8x128xf32>
      %2456 = arith.cmpf olt, %2436, %2443 : vector<8x128xf32>
      %2457 = arith.select %2456, %2436, %2443 : vector<8x128xi1>, vector<8x128xf32>
      %2458 = arith.select %2456, %2443, %2436 : vector<8x128xi1>, vector<8x128xf32>
      %2459 = arith.select %2456, %2438, %2445 : vector<8x128xi1>, vector<8x128xf32>
      %2460 = arith.select %2456, %2445, %2438 : vector<8x128xi1>, vector<8x128xf32>
      %2461 = arith.select %2456, %2440, %2447 : vector<8x128xi1>, vector<8x128xf32>
      %2462 = arith.select %2456, %2447, %2440 : vector<8x128xi1>, vector<8x128xf32>
      %2463 = arith.cmpf olt, %2437, %2450 : vector<8x128xf32>
      %2464 = arith.select %2463, %2437, %2450 : vector<8x128xi1>, vector<8x128xf32>
      %2465 = arith.select %2463, %2450, %2437 : vector<8x128xi1>, vector<8x128xf32>
      %2466 = arith.select %2463, %2439, %2452 : vector<8x128xi1>, vector<8x128xf32>
      %2467 = arith.select %2463, %2452, %2439 : vector<8x128xi1>, vector<8x128xf32>
      %2468 = arith.select %2463, %2441, %2454 : vector<8x128xi1>, vector<8x128xf32>
      %2469 = arith.select %2463, %2454, %2441 : vector<8x128xi1>, vector<8x128xf32>
      %2470 = arith.cmpf olt, %2410, %2214 : vector<8x128xf32>
      %2471 = arith.select %2470, %2410, %2214 : vector<8x128xi1>, vector<8x128xf32>
      %2472 = arith.select %2470, %2214, %2410 : vector<8x128xi1>, vector<8x128xf32>
      %2473 = arith.select %2470, %2412, %2216 : vector<8x128xi1>, vector<8x128xf32>
      %2474 = arith.select %2470, %2216, %2412 : vector<8x128xi1>, vector<8x128xf32>
      %2475 = arith.select %2470, %2414, %2218 : vector<8x128xi1>, vector<8x128xf32>
      %2476 = arith.select %2470, %2218, %2414 : vector<8x128xi1>, vector<8x128xf32>
      %2477 = arith.cmpf olt, %2472, %2242 : vector<8x128xf32>
      %2478 = arith.select %2477, %2472, %2242 : vector<8x128xi1>, vector<8x128xf32>
      %2479 = arith.select %2477, %2242, %2472 : vector<8x128xi1>, vector<8x128xf32>
      %2480 = arith.select %2477, %2474, %2244 : vector<8x128xi1>, vector<8x128xf32>
      %2481 = arith.select %2477, %2244, %2474 : vector<8x128xi1>, vector<8x128xf32>
      %2482 = arith.select %2477, %2476, %2246 : vector<8x128xi1>, vector<8x128xf32>
      %2483 = arith.select %2477, %2246, %2476 : vector<8x128xi1>, vector<8x128xf32>
      %2484 = arith.cmpf olt, %2424, %2228 : vector<8x128xf32>
      %2485 = arith.select %2484, %2424, %2228 : vector<8x128xi1>, vector<8x128xf32>
      %2486 = arith.select %2484, %2228, %2424 : vector<8x128xi1>, vector<8x128xf32>
      %2487 = arith.select %2484, %2426, %2230 : vector<8x128xi1>, vector<8x128xf32>
      %2488 = arith.select %2484, %2230, %2426 : vector<8x128xi1>, vector<8x128xf32>
      %2489 = arith.select %2484, %2428, %2232 : vector<8x128xi1>, vector<8x128xf32>
      %2490 = arith.select %2484, %2232, %2428 : vector<8x128xi1>, vector<8x128xf32>
      %2491 = arith.cmpf olt, %2486, %2256 : vector<8x128xf32>
      %2492 = arith.select %2491, %2486, %2256 : vector<8x128xi1>, vector<8x128xf32>
      %2493 = arith.select %2491, %2256, %2486 : vector<8x128xi1>, vector<8x128xf32>
      %2494 = arith.select %2491, %2488, %2258 : vector<8x128xi1>, vector<8x128xf32>
      %2495 = arith.select %2491, %2258, %2488 : vector<8x128xi1>, vector<8x128xf32>
      %2496 = arith.select %2491, %2490, %2260 : vector<8x128xi1>, vector<8x128xf32>
      %2497 = arith.select %2491, %2260, %2490 : vector<8x128xi1>, vector<8x128xf32>
      %2498 = arith.cmpf olt, %2478, %2485 : vector<8x128xf32>
      %2499 = arith.select %2498, %2478, %2485 : vector<8x128xi1>, vector<8x128xf32>
      %2500 = arith.select %2498, %2485, %2478 : vector<8x128xi1>, vector<8x128xf32>
      %2501 = arith.select %2498, %2480, %2487 : vector<8x128xi1>, vector<8x128xf32>
      %2502 = arith.select %2498, %2487, %2480 : vector<8x128xi1>, vector<8x128xf32>
      %2503 = arith.select %2498, %2482, %2489 : vector<8x128xi1>, vector<8x128xf32>
      %2504 = arith.select %2498, %2489, %2482 : vector<8x128xi1>, vector<8x128xf32>
      %2505 = arith.cmpf olt, %2479, %2492 : vector<8x128xf32>
      %2506 = arith.select %2505, %2479, %2492 : vector<8x128xi1>, vector<8x128xf32>
      %2507 = arith.select %2505, %2492, %2479 : vector<8x128xi1>, vector<8x128xf32>
      %2508 = arith.select %2505, %2481, %2494 : vector<8x128xi1>, vector<8x128xf32>
      %2509 = arith.select %2505, %2494, %2481 : vector<8x128xi1>, vector<8x128xf32>
      %2510 = arith.select %2505, %2483, %2496 : vector<8x128xi1>, vector<8x128xf32>
      %2511 = arith.select %2505, %2496, %2483 : vector<8x128xi1>, vector<8x128xf32>
      %2512 = arith.cmpf olt, %2457, %2471 : vector<8x128xf32>
      %2513 = arith.select %2512, %2457, %2471 : vector<8x128xi1>, vector<8x128xf32>
      %2514 = arith.select %2512, %2471, %2457 : vector<8x128xi1>, vector<8x128xf32>
      %2515 = arith.select %2512, %2459, %2473 : vector<8x128xi1>, vector<8x128xf32>
      %2516 = arith.select %2512, %2473, %2459 : vector<8x128xi1>, vector<8x128xf32>
      %2517 = arith.select %2512, %2461, %2475 : vector<8x128xi1>, vector<8x128xf32>
      %2518 = arith.select %2512, %2475, %2461 : vector<8x128xi1>, vector<8x128xf32>
      %2519 = arith.cmpf olt, %2458, %2499 : vector<8x128xf32>
      %2520 = arith.select %2519, %2458, %2499 : vector<8x128xi1>, vector<8x128xf32>
      %2521 = arith.select %2519, %2499, %2458 : vector<8x128xi1>, vector<8x128xf32>
      %2522 = arith.select %2519, %2460, %2501 : vector<8x128xi1>, vector<8x128xf32>
      %2523 = arith.select %2519, %2501, %2460 : vector<8x128xi1>, vector<8x128xf32>
      %2524 = arith.select %2519, %2462, %2503 : vector<8x128xi1>, vector<8x128xf32>
      %2525 = arith.select %2519, %2503, %2462 : vector<8x128xi1>, vector<8x128xf32>
      %2526 = arith.cmpf olt, %2464, %2500 : vector<8x128xf32>
      %2527 = arith.select %2526, %2464, %2500 : vector<8x128xi1>, vector<8x128xf32>
      %2528 = arith.select %2526, %2500, %2464 : vector<8x128xi1>, vector<8x128xf32>
      %2529 = arith.select %2526, %2466, %2502 : vector<8x128xi1>, vector<8x128xf32>
      %2530 = arith.select %2526, %2502, %2466 : vector<8x128xi1>, vector<8x128xf32>
      %2531 = arith.select %2526, %2468, %2504 : vector<8x128xi1>, vector<8x128xf32>
      %2532 = arith.select %2526, %2504, %2468 : vector<8x128xi1>, vector<8x128xf32>
      %2533 = arith.cmpf olt, %2465, %2506 : vector<8x128xf32>
      %2534 = arith.select %2533, %2465, %2506 : vector<8x128xi1>, vector<8x128xf32>
      %2535 = arith.select %2533, %2506, %2465 : vector<8x128xi1>, vector<8x128xf32>
      %2536 = arith.select %2533, %2467, %2508 : vector<8x128xi1>, vector<8x128xf32>
      %2537 = arith.select %2533, %2508, %2467 : vector<8x128xi1>, vector<8x128xf32>
      %2538 = arith.select %2533, %2469, %2510 : vector<8x128xi1>, vector<8x128xf32>
      %2539 = arith.select %2533, %2510, %2469 : vector<8x128xi1>, vector<8x128xf32>
      %2540 = arith.cmpf olt, %2451, %2507 : vector<8x128xf32>
      %2541 = arith.select %2540, %2451, %2507 : vector<8x128xi1>, vector<8x128xf32>
      %2542 = arith.select %2540, %2507, %2451 : vector<8x128xi1>, vector<8x128xf32>
      %2543 = arith.select %2540, %2453, %2509 : vector<8x128xi1>, vector<8x128xf32>
      %2544 = arith.select %2540, %2509, %2453 : vector<8x128xi1>, vector<8x128xf32>
      %2545 = arith.select %2540, %2455, %2511 : vector<8x128xi1>, vector<8x128xf32>
      %2546 = arith.select %2540, %2511, %2455 : vector<8x128xi1>, vector<8x128xf32>
      %2547 = arith.cmpf olt, %2409, %2213 : vector<8x128xf32>
      %2548 = arith.select %2547, %2409, %2213 : vector<8x128xi1>, vector<8x128xf32>
      %2549 = arith.select %2547, %2213, %2409 : vector<8x128xi1>, vector<8x128xf32>
      %2550 = arith.select %2547, %2411, %2215 : vector<8x128xi1>, vector<8x128xf32>
      %2551 = arith.select %2547, %2215, %2411 : vector<8x128xi1>, vector<8x128xf32>
      %2552 = arith.select %2547, %2413, %2217 : vector<8x128xi1>, vector<8x128xf32>
      %2553 = arith.select %2547, %2217, %2413 : vector<8x128xi1>, vector<8x128xf32>
      %2554 = arith.cmpf olt, %2549, %2241 : vector<8x128xf32>
      %2555 = arith.select %2554, %2549, %2241 : vector<8x128xi1>, vector<8x128xf32>
      %2556 = arith.select %2554, %2241, %2549 : vector<8x128xi1>, vector<8x128xf32>
      %2557 = arith.select %2554, %2551, %2243 : vector<8x128xi1>, vector<8x128xf32>
      %2558 = arith.select %2554, %2243, %2551 : vector<8x128xi1>, vector<8x128xf32>
      %2559 = arith.select %2554, %2553, %2245 : vector<8x128xi1>, vector<8x128xf32>
      %2560 = arith.select %2554, %2245, %2553 : vector<8x128xi1>, vector<8x128xf32>
      %2561 = arith.cmpf olt, %2423, %2227 : vector<8x128xf32>
      %2562 = arith.select %2561, %2423, %2227 : vector<8x128xi1>, vector<8x128xf32>
      %2563 = arith.select %2561, %2227, %2423 : vector<8x128xi1>, vector<8x128xf32>
      %2564 = arith.select %2561, %2425, %2229 : vector<8x128xi1>, vector<8x128xf32>
      %2565 = arith.select %2561, %2229, %2425 : vector<8x128xi1>, vector<8x128xf32>
      %2566 = arith.select %2561, %2427, %2231 : vector<8x128xi1>, vector<8x128xf32>
      %2567 = arith.select %2561, %2231, %2427 : vector<8x128xi1>, vector<8x128xf32>
      %2568 = arith.cmpf olt, %2563, %2255 : vector<8x128xf32>
      %2569 = arith.select %2568, %2563, %2255 : vector<8x128xi1>, vector<8x128xf32>
      %2570 = arith.select %2568, %2255, %2563 : vector<8x128xi1>, vector<8x128xf32>
      %2571 = arith.select %2568, %2565, %2257 : vector<8x128xi1>, vector<8x128xf32>
      %2572 = arith.select %2568, %2257, %2565 : vector<8x128xi1>, vector<8x128xf32>
      %2573 = arith.select %2568, %2567, %2259 : vector<8x128xi1>, vector<8x128xf32>
      %2574 = arith.select %2568, %2259, %2567 : vector<8x128xi1>, vector<8x128xf32>
      %2575 = arith.cmpf olt, %2555, %2562 : vector<8x128xf32>
      %2576 = arith.select %2575, %2555, %2562 : vector<8x128xi1>, vector<8x128xf32>
      %2577 = arith.select %2575, %2562, %2555 : vector<8x128xi1>, vector<8x128xf32>
      %2578 = arith.select %2575, %2557, %2564 : vector<8x128xi1>, vector<8x128xf32>
      %2579 = arith.select %2575, %2564, %2557 : vector<8x128xi1>, vector<8x128xf32>
      %2580 = arith.select %2575, %2559, %2566 : vector<8x128xi1>, vector<8x128xf32>
      %2581 = arith.select %2575, %2566, %2559 : vector<8x128xi1>, vector<8x128xf32>
      %2582 = arith.cmpf olt, %2556, %2569 : vector<8x128xf32>
      %2583 = arith.select %2582, %2556, %2569 : vector<8x128xi1>, vector<8x128xf32>
      %2584 = arith.select %2582, %2569, %2556 : vector<8x128xi1>, vector<8x128xf32>
      %2585 = arith.select %2582, %2558, %2571 : vector<8x128xi1>, vector<8x128xf32>
      %2586 = arith.select %2582, %2571, %2558 : vector<8x128xi1>, vector<8x128xf32>
      %2587 = arith.select %2582, %2560, %2573 : vector<8x128xi1>, vector<8x128xf32>
      %2588 = arith.select %2582, %2573, %2560 : vector<8x128xi1>, vector<8x128xf32>
      %2589 = arith.cmpf olt, %2416, %2220 : vector<8x128xf32>
      %2590 = arith.select %2589, %2416, %2220 : vector<8x128xi1>, vector<8x128xf32>
      %2591 = arith.select %2589, %2220, %2416 : vector<8x128xi1>, vector<8x128xf32>
      %2592 = arith.select %2589, %2418, %2222 : vector<8x128xi1>, vector<8x128xf32>
      %2593 = arith.select %2589, %2222, %2418 : vector<8x128xi1>, vector<8x128xf32>
      %2594 = arith.select %2589, %2420, %2224 : vector<8x128xi1>, vector<8x128xf32>
      %2595 = arith.select %2589, %2224, %2420 : vector<8x128xi1>, vector<8x128xf32>
      %2596 = arith.cmpf olt, %2591, %2248 : vector<8x128xf32>
      %2597 = arith.select %2596, %2591, %2248 : vector<8x128xi1>, vector<8x128xf32>
      %2598 = arith.select %2596, %2248, %2591 : vector<8x128xi1>, vector<8x128xf32>
      %2599 = arith.select %2596, %2593, %2250 : vector<8x128xi1>, vector<8x128xf32>
      %2600 = arith.select %2596, %2250, %2593 : vector<8x128xi1>, vector<8x128xf32>
      %2601 = arith.select %2596, %2595, %2252 : vector<8x128xi1>, vector<8x128xf32>
      %2602 = arith.select %2596, %2252, %2595 : vector<8x128xi1>, vector<8x128xf32>
      %2603 = arith.cmpf olt, %2361, %2234 : vector<8x128xf32>
      %2604 = arith.select %2603, %2361, %2234 : vector<8x128xi1>, vector<8x128xf32>
      %2605 = arith.select %2603, %2234, %2361 : vector<8x128xi1>, vector<8x128xf32>
      %2606 = arith.select %2603, %2363, %2236 : vector<8x128xi1>, vector<8x128xf32>
      %2607 = arith.select %2603, %2236, %2363 : vector<8x128xi1>, vector<8x128xf32>
      %2608 = arith.select %2603, %2365, %2238 : vector<8x128xi1>, vector<8x128xf32>
      %2609 = arith.select %2603, %2238, %2365 : vector<8x128xi1>, vector<8x128xf32>
      %2610 = arith.cmpf olt, %2605, %2179 : vector<8x128xf32>
      %2611 = arith.select %2610, %2605, %2179 : vector<8x128xi1>, vector<8x128xf32>
      %2612 = arith.select %2610, %2607, %2181 : vector<8x128xi1>, vector<8x128xf32>
      %2613 = arith.select %2610, %2181, %2607 : vector<8x128xi1>, vector<8x128xf32>
      %2614 = arith.select %2610, %2609, %2183 : vector<8x128xi1>, vector<8x128xf32>
      %2615 = arith.select %2610, %2183, %2609 : vector<8x128xi1>, vector<8x128xf32>
      %2616 = arith.cmpf olt, %2597, %2604 : vector<8x128xf32>
      %2617 = arith.select %2616, %2597, %2604 : vector<8x128xi1>, vector<8x128xf32>
      %2618 = arith.select %2616, %2604, %2597 : vector<8x128xi1>, vector<8x128xf32>
      %2619 = arith.select %2616, %2599, %2606 : vector<8x128xi1>, vector<8x128xf32>
      %2620 = arith.select %2616, %2606, %2599 : vector<8x128xi1>, vector<8x128xf32>
      %2621 = arith.select %2616, %2601, %2608 : vector<8x128xi1>, vector<8x128xf32>
      %2622 = arith.select %2616, %2608, %2601 : vector<8x128xi1>, vector<8x128xf32>
      %2623 = arith.cmpf olt, %2598, %2611 : vector<8x128xf32>
      %2624 = arith.select %2623, %2598, %2611 : vector<8x128xi1>, vector<8x128xf32>
      %2625 = arith.select %2623, %2611, %2598 : vector<8x128xi1>, vector<8x128xf32>
      %2626 = arith.select %2623, %2600, %2612 : vector<8x128xi1>, vector<8x128xf32>
      %2627 = arith.select %2623, %2612, %2600 : vector<8x128xi1>, vector<8x128xf32>
      %2628 = arith.select %2623, %2602, %2614 : vector<8x128xi1>, vector<8x128xf32>
      %2629 = arith.select %2623, %2614, %2602 : vector<8x128xi1>, vector<8x128xf32>
      %2630 = arith.cmpf olt, %2576, %2590 : vector<8x128xf32>
      %2631 = arith.select %2630, %2576, %2590 : vector<8x128xi1>, vector<8x128xf32>
      %2632 = arith.select %2630, %2590, %2576 : vector<8x128xi1>, vector<8x128xf32>
      %2633 = arith.select %2630, %2578, %2592 : vector<8x128xi1>, vector<8x128xf32>
      %2634 = arith.select %2630, %2592, %2578 : vector<8x128xi1>, vector<8x128xf32>
      %2635 = arith.select %2630, %2580, %2594 : vector<8x128xi1>, vector<8x128xf32>
      %2636 = arith.select %2630, %2594, %2580 : vector<8x128xi1>, vector<8x128xf32>
      %2637 = arith.cmpf olt, %2577, %2617 : vector<8x128xf32>
      %2638 = arith.select %2637, %2577, %2617 : vector<8x128xi1>, vector<8x128xf32>
      %2639 = arith.select %2637, %2617, %2577 : vector<8x128xi1>, vector<8x128xf32>
      %2640 = arith.select %2637, %2579, %2619 : vector<8x128xi1>, vector<8x128xf32>
      %2641 = arith.select %2637, %2619, %2579 : vector<8x128xi1>, vector<8x128xf32>
      %2642 = arith.select %2637, %2581, %2621 : vector<8x128xi1>, vector<8x128xf32>
      %2643 = arith.select %2637, %2621, %2581 : vector<8x128xi1>, vector<8x128xf32>
      %2644 = arith.cmpf olt, %2583, %2618 : vector<8x128xf32>
      %2645 = arith.select %2644, %2583, %2618 : vector<8x128xi1>, vector<8x128xf32>
      %2646 = arith.select %2644, %2618, %2583 : vector<8x128xi1>, vector<8x128xf32>
      %2647 = arith.select %2644, %2585, %2620 : vector<8x128xi1>, vector<8x128xf32>
      %2648 = arith.select %2644, %2620, %2585 : vector<8x128xi1>, vector<8x128xf32>
      %2649 = arith.select %2644, %2587, %2622 : vector<8x128xi1>, vector<8x128xf32>
      %2650 = arith.select %2644, %2622, %2587 : vector<8x128xi1>, vector<8x128xf32>
      %2651 = arith.cmpf olt, %2584, %2624 : vector<8x128xf32>
      %2652 = arith.select %2651, %2584, %2624 : vector<8x128xi1>, vector<8x128xf32>
      %2653 = arith.select %2651, %2624, %2584 : vector<8x128xi1>, vector<8x128xf32>
      %2654 = arith.select %2651, %2586, %2626 : vector<8x128xi1>, vector<8x128xf32>
      %2655 = arith.select %2651, %2626, %2586 : vector<8x128xi1>, vector<8x128xf32>
      %2656 = arith.select %2651, %2588, %2628 : vector<8x128xi1>, vector<8x128xf32>
      %2657 = arith.select %2651, %2628, %2588 : vector<8x128xi1>, vector<8x128xf32>
      %2658 = arith.cmpf olt, %2570, %2625 : vector<8x128xf32>
      %2659 = arith.select %2658, %2570, %2625 : vector<8x128xi1>, vector<8x128xf32>
      %2660 = arith.select %2658, %2625, %2570 : vector<8x128xi1>, vector<8x128xf32>
      %2661 = arith.select %2658, %2572, %2627 : vector<8x128xi1>, vector<8x128xf32>
      %2662 = arith.select %2658, %2627, %2572 : vector<8x128xi1>, vector<8x128xf32>
      %2663 = arith.select %2658, %2574, %2629 : vector<8x128xi1>, vector<8x128xf32>
      %2664 = arith.select %2658, %2629, %2574 : vector<8x128xi1>, vector<8x128xf32>
      %2665 = arith.cmpf olt, %2513, %2548 : vector<8x128xf32>
      %2666 = arith.select %2665, %2515, %2550 : vector<8x128xi1>, vector<8x128xf32>
      %2667 = arith.select %2665, %2550, %2515 : vector<8x128xi1>, vector<8x128xf32>
      %2668 = arith.select %2665, %2517, %2552 : vector<8x128xi1>, vector<8x128xf32>
      %2669 = arith.select %2665, %2552, %2517 : vector<8x128xi1>, vector<8x128xf32>
      %2670 = arith.cmpf olt, %2514, %2631 : vector<8x128xf32>
      %2671 = arith.select %2670, %2516, %2633 : vector<8x128xi1>, vector<8x128xf32>
      %2672 = arith.select %2670, %2633, %2516 : vector<8x128xi1>, vector<8x128xf32>
      %2673 = arith.select %2670, %2518, %2635 : vector<8x128xi1>, vector<8x128xf32>
      %2674 = arith.select %2670, %2635, %2518 : vector<8x128xi1>, vector<8x128xf32>
      %2675 = arith.cmpf olt, %2520, %2632 : vector<8x128xf32>
      %2676 = arith.select %2675, %2522, %2634 : vector<8x128xi1>, vector<8x128xf32>
      %2677 = arith.select %2675, %2634, %2522 : vector<8x128xi1>, vector<8x128xf32>
      %2678 = arith.select %2675, %2524, %2636 : vector<8x128xi1>, vector<8x128xf32>
      %2679 = arith.select %2675, %2636, %2524 : vector<8x128xi1>, vector<8x128xf32>
      %2680 = arith.cmpf olt, %2521, %2638 : vector<8x128xf32>
      %2681 = arith.select %2680, %2523, %2640 : vector<8x128xi1>, vector<8x128xf32>
      %2682 = arith.select %2680, %2640, %2523 : vector<8x128xi1>, vector<8x128xf32>
      %2683 = arith.select %2680, %2525, %2642 : vector<8x128xi1>, vector<8x128xf32>
      %2684 = arith.select %2680, %2642, %2525 : vector<8x128xi1>, vector<8x128xf32>
      %2685 = arith.cmpf olt, %2527, %2639 : vector<8x128xf32>
      %2686 = arith.select %2685, %2529, %2641 : vector<8x128xi1>, vector<8x128xf32>
      %2687 = arith.select %2685, %2641, %2529 : vector<8x128xi1>, vector<8x128xf32>
      %2688 = arith.select %2685, %2531, %2643 : vector<8x128xi1>, vector<8x128xf32>
      %2689 = arith.select %2685, %2643, %2531 : vector<8x128xi1>, vector<8x128xf32>
      %2690 = arith.cmpf olt, %2528, %2645 : vector<8x128xf32>
      %2691 = arith.select %2690, %2530, %2647 : vector<8x128xi1>, vector<8x128xf32>
      %2692 = arith.select %2690, %2647, %2530 : vector<8x128xi1>, vector<8x128xf32>
      %2693 = arith.select %2690, %2532, %2649 : vector<8x128xi1>, vector<8x128xf32>
      %2694 = arith.select %2690, %2649, %2532 : vector<8x128xi1>, vector<8x128xf32>
      %2695 = arith.cmpf olt, %2534, %2646 : vector<8x128xf32>
      %2696 = arith.select %2695, %2536, %2648 : vector<8x128xi1>, vector<8x128xf32>
      %2697 = arith.select %2695, %2648, %2536 : vector<8x128xi1>, vector<8x128xf32>
      %2698 = arith.select %2695, %2538, %2650 : vector<8x128xi1>, vector<8x128xf32>
      %2699 = arith.select %2695, %2650, %2538 : vector<8x128xi1>, vector<8x128xf32>
      %2700 = arith.cmpf olt, %2535, %2652 : vector<8x128xf32>
      %2701 = arith.select %2700, %2537, %2654 : vector<8x128xi1>, vector<8x128xf32>
      %2702 = arith.select %2700, %2654, %2537 : vector<8x128xi1>, vector<8x128xf32>
      %2703 = arith.select %2700, %2539, %2656 : vector<8x128xi1>, vector<8x128xf32>
      %2704 = arith.select %2700, %2656, %2539 : vector<8x128xi1>, vector<8x128xf32>
      %2705 = arith.cmpf olt, %2541, %2653 : vector<8x128xf32>
      %2706 = arith.select %2705, %2543, %2655 : vector<8x128xi1>, vector<8x128xf32>
      %2707 = arith.select %2705, %2655, %2543 : vector<8x128xi1>, vector<8x128xf32>
      %2708 = arith.select %2705, %2545, %2657 : vector<8x128xi1>, vector<8x128xf32>
      %2709 = arith.select %2705, %2657, %2545 : vector<8x128xi1>, vector<8x128xf32>
      %2710 = arith.cmpf olt, %2542, %2659 : vector<8x128xf32>
      %2711 = arith.select %2710, %2544, %2661 : vector<8x128xi1>, vector<8x128xf32>
      %2712 = arith.select %2710, %2661, %2544 : vector<8x128xi1>, vector<8x128xf32>
      %2713 = arith.select %2710, %2546, %2663 : vector<8x128xi1>, vector<8x128xf32>
      %2714 = arith.select %2710, %2663, %2546 : vector<8x128xi1>, vector<8x128xf32>
      %2715 = arith.cmpf olt, %2493, %2660 : vector<8x128xf32>
      %2716 = arith.select %2715, %2495, %2662 : vector<8x128xi1>, vector<8x128xf32>
      %2717 = arith.select %2715, %2662, %2495 : vector<8x128xi1>, vector<8x128xf32>
      %2718 = arith.select %2715, %2497, %2664 : vector<8x128xi1>, vector<8x128xf32>
      %2719 = arith.select %2715, %2664, %2497 : vector<8x128xi1>, vector<8x128xf32>
      %cst_381 = arith.constant 0.000000e+00 : f32
      %2720 = vector.broadcast %cst_381 : f32 to vector<8x128xf32>
      %cst_382 = arith.constant 1.000000e+00 : f32
      %2721 = vector.broadcast %cst_382 : f32 to vector<8x128xf32>
      %2722 = arith.cmpf ogt, %1330, %2721 : vector<8x128xf32>
      %2723 = arith.mulf %2431, %2668 : vector<8x128xf32>
      %2724 = arith.mulf %2666, %2433 : vector<8x128xf32>
      %2725 = arith.subf %2723, %2724 : vector<8x128xf32>
      %cst_383 = arith.constant 0.000000e+00 : f32
      %2726 = vector.broadcast %cst_383 : f32 to vector<8x128xf32>
      %2727 = arith.select %2722, %2725, %2726 : vector<8x128xi1>, vector<8x128xf32>
      %2728 = arith.addf %2720, %2727 : vector<8x128xf32>
      %cst_384 = arith.constant 2.000000e+00 : f32
      %2729 = vector.broadcast %cst_384 : f32 to vector<8x128xf32>
      %2730 = arith.cmpf ogt, %1330, %2729 : vector<8x128xf32>
      %2731 = arith.mulf %2666, %2669 : vector<8x128xf32>
      %2732 = arith.mulf %2667, %2668 : vector<8x128xf32>
      %2733 = arith.subf %2731, %2732 : vector<8x128xf32>
      %cst_385 = arith.constant 0.000000e+00 : f32
      %2734 = vector.broadcast %cst_385 : f32 to vector<8x128xf32>
      %2735 = arith.select %2730, %2733, %2734 : vector<8x128xi1>, vector<8x128xf32>
      %2736 = arith.addf %2728, %2735 : vector<8x128xf32>
      %cst_386 = arith.constant 3.000000e+00 : f32
      %2737 = vector.broadcast %cst_386 : f32 to vector<8x128xf32>
      %2738 = arith.cmpf ogt, %1330, %2737 : vector<8x128xf32>
      %2739 = arith.mulf %2667, %2673 : vector<8x128xf32>
      %2740 = arith.mulf %2671, %2669 : vector<8x128xf32>
      %2741 = arith.subf %2739, %2740 : vector<8x128xf32>
      %cst_387 = arith.constant 0.000000e+00 : f32
      %2742 = vector.broadcast %cst_387 : f32 to vector<8x128xf32>
      %2743 = arith.select %2738, %2741, %2742 : vector<8x128xi1>, vector<8x128xf32>
      %2744 = arith.addf %2736, %2743 : vector<8x128xf32>
      %cst_388 = arith.constant 4.000000e+00 : f32
      %2745 = vector.broadcast %cst_388 : f32 to vector<8x128xf32>
      %2746 = arith.cmpf ogt, %1330, %2745 : vector<8x128xf32>
      %2747 = arith.mulf %2671, %2674 : vector<8x128xf32>
      %2748 = arith.mulf %2672, %2673 : vector<8x128xf32>
      %2749 = arith.subf %2747, %2748 : vector<8x128xf32>
      %cst_389 = arith.constant 0.000000e+00 : f32
      %2750 = vector.broadcast %cst_389 : f32 to vector<8x128xf32>
      %2751 = arith.select %2746, %2749, %2750 : vector<8x128xi1>, vector<8x128xf32>
      %2752 = arith.addf %2744, %2751 : vector<8x128xf32>
      %cst_390 = arith.constant 5.000000e+00 : f32
      %2753 = vector.broadcast %cst_390 : f32 to vector<8x128xf32>
      %2754 = arith.cmpf ogt, %1330, %2753 : vector<8x128xf32>
      %2755 = arith.mulf %2672, %2678 : vector<8x128xf32>
      %2756 = arith.mulf %2676, %2674 : vector<8x128xf32>
      %2757 = arith.subf %2755, %2756 : vector<8x128xf32>
      %cst_391 = arith.constant 0.000000e+00 : f32
      %2758 = vector.broadcast %cst_391 : f32 to vector<8x128xf32>
      %2759 = arith.select %2754, %2757, %2758 : vector<8x128xi1>, vector<8x128xf32>
      %2760 = arith.addf %2752, %2759 : vector<8x128xf32>
      %cst_392 = arith.constant 6.000000e+00 : f32
      %2761 = vector.broadcast %cst_392 : f32 to vector<8x128xf32>
      %2762 = arith.cmpf ogt, %1330, %2761 : vector<8x128xf32>
      %2763 = arith.mulf %2676, %2679 : vector<8x128xf32>
      %2764 = arith.mulf %2677, %2678 : vector<8x128xf32>
      %2765 = arith.subf %2763, %2764 : vector<8x128xf32>
      %cst_393 = arith.constant 0.000000e+00 : f32
      %2766 = vector.broadcast %cst_393 : f32 to vector<8x128xf32>
      %2767 = arith.select %2762, %2765, %2766 : vector<8x128xi1>, vector<8x128xf32>
      %2768 = arith.addf %2760, %2767 : vector<8x128xf32>
      %cst_394 = arith.constant 7.000000e+00 : f32
      %2769 = vector.broadcast %cst_394 : f32 to vector<8x128xf32>
      %2770 = arith.cmpf ogt, %1330, %2769 : vector<8x128xf32>
      %2771 = arith.mulf %2677, %2683 : vector<8x128xf32>
      %2772 = arith.mulf %2681, %2679 : vector<8x128xf32>
      %2773 = arith.subf %2771, %2772 : vector<8x128xf32>
      %cst_395 = arith.constant 0.000000e+00 : f32
      %2774 = vector.broadcast %cst_395 : f32 to vector<8x128xf32>
      %2775 = arith.select %2770, %2773, %2774 : vector<8x128xi1>, vector<8x128xf32>
      %2776 = arith.addf %2768, %2775 : vector<8x128xf32>
      %cst_396 = arith.constant 8.000000e+00 : f32
      %2777 = vector.broadcast %cst_396 : f32 to vector<8x128xf32>
      %2778 = arith.cmpf ogt, %1330, %2777 : vector<8x128xf32>
      %2779 = arith.mulf %2681, %2684 : vector<8x128xf32>
      %2780 = arith.mulf %2682, %2683 : vector<8x128xf32>
      %2781 = arith.subf %2779, %2780 : vector<8x128xf32>
      %cst_397 = arith.constant 0.000000e+00 : f32
      %2782 = vector.broadcast %cst_397 : f32 to vector<8x128xf32>
      %2783 = arith.select %2778, %2781, %2782 : vector<8x128xi1>, vector<8x128xf32>
      %2784 = arith.addf %2776, %2783 : vector<8x128xf32>
      %cst_398 = arith.constant 9.000000e+00 : f32
      %2785 = vector.broadcast %cst_398 : f32 to vector<8x128xf32>
      %2786 = arith.cmpf ogt, %1330, %2785 : vector<8x128xf32>
      %2787 = arith.mulf %2682, %2688 : vector<8x128xf32>
      %2788 = arith.mulf %2686, %2684 : vector<8x128xf32>
      %2789 = arith.subf %2787, %2788 : vector<8x128xf32>
      %cst_399 = arith.constant 0.000000e+00 : f32
      %2790 = vector.broadcast %cst_399 : f32 to vector<8x128xf32>
      %2791 = arith.select %2786, %2789, %2790 : vector<8x128xi1>, vector<8x128xf32>
      %2792 = arith.addf %2784, %2791 : vector<8x128xf32>
      %cst_400 = arith.constant 1.000000e+01 : f32
      %2793 = vector.broadcast %cst_400 : f32 to vector<8x128xf32>
      %2794 = arith.cmpf ogt, %1330, %2793 : vector<8x128xf32>
      %2795 = arith.mulf %2686, %2689 : vector<8x128xf32>
      %2796 = arith.mulf %2687, %2688 : vector<8x128xf32>
      %2797 = arith.subf %2795, %2796 : vector<8x128xf32>
      %cst_401 = arith.constant 0.000000e+00 : f32
      %2798 = vector.broadcast %cst_401 : f32 to vector<8x128xf32>
      %2799 = arith.select %2794, %2797, %2798 : vector<8x128xi1>, vector<8x128xf32>
      %2800 = arith.addf %2792, %2799 : vector<8x128xf32>
      %cst_402 = arith.constant 1.100000e+01 : f32
      %2801 = vector.broadcast %cst_402 : f32 to vector<8x128xf32>
      %2802 = arith.cmpf ogt, %1330, %2801 : vector<8x128xf32>
      %2803 = arith.mulf %2687, %2693 : vector<8x128xf32>
      %2804 = arith.mulf %2691, %2689 : vector<8x128xf32>
      %2805 = arith.subf %2803, %2804 : vector<8x128xf32>
      %cst_403 = arith.constant 0.000000e+00 : f32
      %2806 = vector.broadcast %cst_403 : f32 to vector<8x128xf32>
      %2807 = arith.select %2802, %2805, %2806 : vector<8x128xi1>, vector<8x128xf32>
      %2808 = arith.addf %2800, %2807 : vector<8x128xf32>
      %cst_404 = arith.constant 1.200000e+01 : f32
      %2809 = vector.broadcast %cst_404 : f32 to vector<8x128xf32>
      %2810 = arith.cmpf ogt, %1330, %2809 : vector<8x128xf32>
      %2811 = arith.mulf %2691, %2694 : vector<8x128xf32>
      %2812 = arith.mulf %2692, %2693 : vector<8x128xf32>
      %2813 = arith.subf %2811, %2812 : vector<8x128xf32>
      %cst_405 = arith.constant 0.000000e+00 : f32
      %2814 = vector.broadcast %cst_405 : f32 to vector<8x128xf32>
      %2815 = arith.select %2810, %2813, %2814 : vector<8x128xi1>, vector<8x128xf32>
      %2816 = arith.addf %2808, %2815 : vector<8x128xf32>
      %cst_406 = arith.constant 1.300000e+01 : f32
      %2817 = vector.broadcast %cst_406 : f32 to vector<8x128xf32>
      %2818 = arith.cmpf ogt, %1330, %2817 : vector<8x128xf32>
      %2819 = arith.mulf %2692, %2698 : vector<8x128xf32>
      %2820 = arith.mulf %2696, %2694 : vector<8x128xf32>
      %2821 = arith.subf %2819, %2820 : vector<8x128xf32>
      %cst_407 = arith.constant 0.000000e+00 : f32
      %2822 = vector.broadcast %cst_407 : f32 to vector<8x128xf32>
      %2823 = arith.select %2818, %2821, %2822 : vector<8x128xi1>, vector<8x128xf32>
      %2824 = arith.addf %2816, %2823 : vector<8x128xf32>
      %cst_408 = arith.constant 1.400000e+01 : f32
      %2825 = vector.broadcast %cst_408 : f32 to vector<8x128xf32>
      %2826 = arith.cmpf ogt, %1330, %2825 : vector<8x128xf32>
      %2827 = arith.mulf %2696, %2699 : vector<8x128xf32>
      %2828 = arith.mulf %2697, %2698 : vector<8x128xf32>
      %2829 = arith.subf %2827, %2828 : vector<8x128xf32>
      %cst_409 = arith.constant 0.000000e+00 : f32
      %2830 = vector.broadcast %cst_409 : f32 to vector<8x128xf32>
      %2831 = arith.select %2826, %2829, %2830 : vector<8x128xi1>, vector<8x128xf32>
      %2832 = arith.addf %2824, %2831 : vector<8x128xf32>
      %cst_410 = arith.constant 1.500000e+01 : f32
      %2833 = vector.broadcast %cst_410 : f32 to vector<8x128xf32>
      %2834 = arith.cmpf ogt, %1330, %2833 : vector<8x128xf32>
      %2835 = arith.mulf %2697, %2703 : vector<8x128xf32>
      %2836 = arith.mulf %2701, %2699 : vector<8x128xf32>
      %2837 = arith.subf %2835, %2836 : vector<8x128xf32>
      %cst_411 = arith.constant 0.000000e+00 : f32
      %2838 = vector.broadcast %cst_411 : f32 to vector<8x128xf32>
      %2839 = arith.select %2834, %2837, %2838 : vector<8x128xi1>, vector<8x128xf32>
      %2840 = arith.addf %2832, %2839 : vector<8x128xf32>
      %cst_412 = arith.constant 1.600000e+01 : f32
      %2841 = vector.broadcast %cst_412 : f32 to vector<8x128xf32>
      %2842 = arith.cmpf ogt, %1330, %2841 : vector<8x128xf32>
      %2843 = arith.mulf %2701, %2704 : vector<8x128xf32>
      %2844 = arith.mulf %2702, %2703 : vector<8x128xf32>
      %2845 = arith.subf %2843, %2844 : vector<8x128xf32>
      %cst_413 = arith.constant 0.000000e+00 : f32
      %2846 = vector.broadcast %cst_413 : f32 to vector<8x128xf32>
      %2847 = arith.select %2842, %2845, %2846 : vector<8x128xi1>, vector<8x128xf32>
      %2848 = arith.addf %2840, %2847 : vector<8x128xf32>
      %cst_414 = arith.constant 1.700000e+01 : f32
      %2849 = vector.broadcast %cst_414 : f32 to vector<8x128xf32>
      %2850 = arith.cmpf ogt, %1330, %2849 : vector<8x128xf32>
      %2851 = arith.mulf %2702, %2708 : vector<8x128xf32>
      %2852 = arith.mulf %2706, %2704 : vector<8x128xf32>
      %2853 = arith.subf %2851, %2852 : vector<8x128xf32>
      %cst_415 = arith.constant 0.000000e+00 : f32
      %2854 = vector.broadcast %cst_415 : f32 to vector<8x128xf32>
      %2855 = arith.select %2850, %2853, %2854 : vector<8x128xi1>, vector<8x128xf32>
      %2856 = arith.addf %2848, %2855 : vector<8x128xf32>
      %cst_416 = arith.constant 1.800000e+01 : f32
      %2857 = vector.broadcast %cst_416 : f32 to vector<8x128xf32>
      %2858 = arith.cmpf ogt, %1330, %2857 : vector<8x128xf32>
      %2859 = arith.mulf %2706, %2709 : vector<8x128xf32>
      %2860 = arith.mulf %2707, %2708 : vector<8x128xf32>
      %2861 = arith.subf %2859, %2860 : vector<8x128xf32>
      %cst_417 = arith.constant 0.000000e+00 : f32
      %2862 = vector.broadcast %cst_417 : f32 to vector<8x128xf32>
      %2863 = arith.select %2858, %2861, %2862 : vector<8x128xi1>, vector<8x128xf32>
      %2864 = arith.addf %2856, %2863 : vector<8x128xf32>
      %cst_418 = arith.constant 1.900000e+01 : f32
      %2865 = vector.broadcast %cst_418 : f32 to vector<8x128xf32>
      %2866 = arith.cmpf ogt, %1330, %2865 : vector<8x128xf32>
      %2867 = arith.mulf %2707, %2713 : vector<8x128xf32>
      %2868 = arith.mulf %2711, %2709 : vector<8x128xf32>
      %2869 = arith.subf %2867, %2868 : vector<8x128xf32>
      %cst_419 = arith.constant 0.000000e+00 : f32
      %2870 = vector.broadcast %cst_419 : f32 to vector<8x128xf32>
      %2871 = arith.select %2866, %2869, %2870 : vector<8x128xi1>, vector<8x128xf32>
      %2872 = arith.addf %2864, %2871 : vector<8x128xf32>
      %cst_420 = arith.constant 2.000000e+01 : f32
      %2873 = vector.broadcast %cst_420 : f32 to vector<8x128xf32>
      %2874 = arith.cmpf ogt, %1330, %2873 : vector<8x128xf32>
      %2875 = arith.mulf %2711, %2714 : vector<8x128xf32>
      %2876 = arith.mulf %2712, %2713 : vector<8x128xf32>
      %2877 = arith.subf %2875, %2876 : vector<8x128xf32>
      %cst_421 = arith.constant 0.000000e+00 : f32
      %2878 = vector.broadcast %cst_421 : f32 to vector<8x128xf32>
      %2879 = arith.select %2874, %2877, %2878 : vector<8x128xi1>, vector<8x128xf32>
      %2880 = arith.addf %2872, %2879 : vector<8x128xf32>
      %cst_422 = arith.constant 2.100000e+01 : f32
      %2881 = vector.broadcast %cst_422 : f32 to vector<8x128xf32>
      %2882 = arith.cmpf ogt, %1330, %2881 : vector<8x128xf32>
      %2883 = arith.mulf %2712, %2718 : vector<8x128xf32>
      %2884 = arith.mulf %2716, %2714 : vector<8x128xf32>
      %2885 = arith.subf %2883, %2884 : vector<8x128xf32>
      %cst_423 = arith.constant 0.000000e+00 : f32
      %2886 = vector.broadcast %cst_423 : f32 to vector<8x128xf32>
      %2887 = arith.select %2882, %2885, %2886 : vector<8x128xi1>, vector<8x128xf32>
      %2888 = arith.addf %2880, %2887 : vector<8x128xf32>
      %cst_424 = arith.constant 2.200000e+01 : f32
      %2889 = vector.broadcast %cst_424 : f32 to vector<8x128xf32>
      %2890 = arith.cmpf ogt, %1330, %2889 : vector<8x128xf32>
      %2891 = arith.mulf %2716, %2719 : vector<8x128xf32>
      %2892 = arith.mulf %2717, %2718 : vector<8x128xf32>
      %2893 = arith.subf %2891, %2892 : vector<8x128xf32>
      %cst_425 = arith.constant 0.000000e+00 : f32
      %2894 = vector.broadcast %cst_425 : f32 to vector<8x128xf32>
      %2895 = arith.select %2890, %2893, %2894 : vector<8x128xi1>, vector<8x128xf32>
      %2896 = arith.addf %2888, %2895 : vector<8x128xf32>
      %cst_426 = arith.constant 2.300000e+01 : f32
      %2897 = vector.broadcast %cst_426 : f32 to vector<8x128xf32>
      %2898 = arith.cmpf ogt, %1330, %2897 : vector<8x128xf32>
      %2899 = arith.mulf %2717, %2615 : vector<8x128xf32>
      %2900 = arith.mulf %2613, %2719 : vector<8x128xf32>
      %2901 = arith.subf %2899, %2900 : vector<8x128xf32>
      %cst_427 = arith.constant 0.000000e+00 : f32
      %2902 = vector.broadcast %cst_427 : f32 to vector<8x128xf32>
      %2903 = arith.select %2898, %2901, %2902 : vector<8x128xi1>, vector<8x128xf32>
      %2904 = arith.addf %2896, %2903 : vector<8x128xf32>
      %cst_428 = arith.constant 2.000000e+00 : f32
      %2905 = vector.broadcast %cst_428 : f32 to vector<8x128xf32>
      %2906 = arith.cmpf oeq, %1330, %2905 : vector<8x128xf32>
      %2907 = arith.select %2906, %2666, %2431 : vector<8x128xi1>, vector<8x128xf32>
      %2908 = arith.select %2906, %2668, %2433 : vector<8x128xi1>, vector<8x128xf32>
      %cst_429 = arith.constant 3.000000e+00 : f32
      %2909 = vector.broadcast %cst_429 : f32 to vector<8x128xf32>
      %2910 = arith.cmpf oeq, %1330, %2909 : vector<8x128xf32>
      %2911 = arith.select %2910, %2667, %2907 : vector<8x128xi1>, vector<8x128xf32>
      %2912 = arith.select %2910, %2669, %2908 : vector<8x128xi1>, vector<8x128xf32>
      %cst_430 = arith.constant 4.000000e+00 : f32
      %2913 = vector.broadcast %cst_430 : f32 to vector<8x128xf32>
      %2914 = arith.cmpf oeq, %1330, %2913 : vector<8x128xf32>
      %2915 = arith.select %2914, %2671, %2911 : vector<8x128xi1>, vector<8x128xf32>
      %2916 = arith.select %2914, %2673, %2912 : vector<8x128xi1>, vector<8x128xf32>
      %cst_431 = arith.constant 5.000000e+00 : f32
      %2917 = vector.broadcast %cst_431 : f32 to vector<8x128xf32>
      %2918 = arith.cmpf oeq, %1330, %2917 : vector<8x128xf32>
      %2919 = arith.select %2918, %2672, %2915 : vector<8x128xi1>, vector<8x128xf32>
      %2920 = arith.select %2918, %2674, %2916 : vector<8x128xi1>, vector<8x128xf32>
      %cst_432 = arith.constant 6.000000e+00 : f32
      %2921 = vector.broadcast %cst_432 : f32 to vector<8x128xf32>
      %2922 = arith.cmpf oeq, %1330, %2921 : vector<8x128xf32>
      %2923 = arith.select %2922, %2676, %2919 : vector<8x128xi1>, vector<8x128xf32>
      %2924 = arith.select %2922, %2678, %2920 : vector<8x128xi1>, vector<8x128xf32>
      %cst_433 = arith.constant 7.000000e+00 : f32
      %2925 = vector.broadcast %cst_433 : f32 to vector<8x128xf32>
      %2926 = arith.cmpf oeq, %1330, %2925 : vector<8x128xf32>
      %2927 = arith.select %2926, %2677, %2923 : vector<8x128xi1>, vector<8x128xf32>
      %2928 = arith.select %2926, %2679, %2924 : vector<8x128xi1>, vector<8x128xf32>
      %cst_434 = arith.constant 8.000000e+00 : f32
      %2929 = vector.broadcast %cst_434 : f32 to vector<8x128xf32>
      %2930 = arith.cmpf oeq, %1330, %2929 : vector<8x128xf32>
      %2931 = arith.select %2930, %2681, %2927 : vector<8x128xi1>, vector<8x128xf32>
      %2932 = arith.select %2930, %2683, %2928 : vector<8x128xi1>, vector<8x128xf32>
      %cst_435 = arith.constant 9.000000e+00 : f32
      %2933 = vector.broadcast %cst_435 : f32 to vector<8x128xf32>
      %2934 = arith.cmpf oeq, %1330, %2933 : vector<8x128xf32>
      %2935 = arith.select %2934, %2682, %2931 : vector<8x128xi1>, vector<8x128xf32>
      %2936 = arith.select %2934, %2684, %2932 : vector<8x128xi1>, vector<8x128xf32>
      %cst_436 = arith.constant 1.000000e+01 : f32
      %2937 = vector.broadcast %cst_436 : f32 to vector<8x128xf32>
      %2938 = arith.cmpf oeq, %1330, %2937 : vector<8x128xf32>
      %2939 = arith.select %2938, %2686, %2935 : vector<8x128xi1>, vector<8x128xf32>
      %2940 = arith.select %2938, %2688, %2936 : vector<8x128xi1>, vector<8x128xf32>
      %cst_437 = arith.constant 1.100000e+01 : f32
      %2941 = vector.broadcast %cst_437 : f32 to vector<8x128xf32>
      %2942 = arith.cmpf oeq, %1330, %2941 : vector<8x128xf32>
      %2943 = arith.select %2942, %2687, %2939 : vector<8x128xi1>, vector<8x128xf32>
      %2944 = arith.select %2942, %2689, %2940 : vector<8x128xi1>, vector<8x128xf32>
      %cst_438 = arith.constant 1.200000e+01 : f32
      %2945 = vector.broadcast %cst_438 : f32 to vector<8x128xf32>
      %2946 = arith.cmpf oeq, %1330, %2945 : vector<8x128xf32>
      %2947 = arith.select %2946, %2691, %2943 : vector<8x128xi1>, vector<8x128xf32>
      %2948 = arith.select %2946, %2693, %2944 : vector<8x128xi1>, vector<8x128xf32>
      %cst_439 = arith.constant 1.300000e+01 : f32
      %2949 = vector.broadcast %cst_439 : f32 to vector<8x128xf32>
      %2950 = arith.cmpf oeq, %1330, %2949 : vector<8x128xf32>
      %2951 = arith.select %2950, %2692, %2947 : vector<8x128xi1>, vector<8x128xf32>
      %2952 = arith.select %2950, %2694, %2948 : vector<8x128xi1>, vector<8x128xf32>
      %cst_440 = arith.constant 1.400000e+01 : f32
      %2953 = vector.broadcast %cst_440 : f32 to vector<8x128xf32>
      %2954 = arith.cmpf oeq, %1330, %2953 : vector<8x128xf32>
      %2955 = arith.select %2954, %2696, %2951 : vector<8x128xi1>, vector<8x128xf32>
      %2956 = arith.select %2954, %2698, %2952 : vector<8x128xi1>, vector<8x128xf32>
      %cst_441 = arith.constant 1.500000e+01 : f32
      %2957 = vector.broadcast %cst_441 : f32 to vector<8x128xf32>
      %2958 = arith.cmpf oeq, %1330, %2957 : vector<8x128xf32>
      %2959 = arith.select %2958, %2697, %2955 : vector<8x128xi1>, vector<8x128xf32>
      %2960 = arith.select %2958, %2699, %2956 : vector<8x128xi1>, vector<8x128xf32>
      %cst_442 = arith.constant 1.600000e+01 : f32
      %2961 = vector.broadcast %cst_442 : f32 to vector<8x128xf32>
      %2962 = arith.cmpf oeq, %1330, %2961 : vector<8x128xf32>
      %2963 = arith.select %2962, %2701, %2959 : vector<8x128xi1>, vector<8x128xf32>
      %2964 = arith.select %2962, %2703, %2960 : vector<8x128xi1>, vector<8x128xf32>
      %cst_443 = arith.constant 1.700000e+01 : f32
      %2965 = vector.broadcast %cst_443 : f32 to vector<8x128xf32>
      %2966 = arith.cmpf oeq, %1330, %2965 : vector<8x128xf32>
      %2967 = arith.select %2966, %2702, %2963 : vector<8x128xi1>, vector<8x128xf32>
      %2968 = arith.select %2966, %2704, %2964 : vector<8x128xi1>, vector<8x128xf32>
      %cst_444 = arith.constant 1.800000e+01 : f32
      %2969 = vector.broadcast %cst_444 : f32 to vector<8x128xf32>
      %2970 = arith.cmpf oeq, %1330, %2969 : vector<8x128xf32>
      %2971 = arith.select %2970, %2706, %2967 : vector<8x128xi1>, vector<8x128xf32>
      %2972 = arith.select %2970, %2708, %2968 : vector<8x128xi1>, vector<8x128xf32>
      %cst_445 = arith.constant 1.900000e+01 : f32
      %2973 = vector.broadcast %cst_445 : f32 to vector<8x128xf32>
      %2974 = arith.cmpf oeq, %1330, %2973 : vector<8x128xf32>
      %2975 = arith.select %2974, %2707, %2971 : vector<8x128xi1>, vector<8x128xf32>
      %2976 = arith.select %2974, %2709, %2972 : vector<8x128xi1>, vector<8x128xf32>
      %cst_446 = arith.constant 2.000000e+01 : f32
      %2977 = vector.broadcast %cst_446 : f32 to vector<8x128xf32>
      %2978 = arith.cmpf oeq, %1330, %2977 : vector<8x128xf32>
      %2979 = arith.select %2978, %2711, %2975 : vector<8x128xi1>, vector<8x128xf32>
      %2980 = arith.select %2978, %2713, %2976 : vector<8x128xi1>, vector<8x128xf32>
      %cst_447 = arith.constant 2.100000e+01 : f32
      %2981 = vector.broadcast %cst_447 : f32 to vector<8x128xf32>
      %2982 = arith.cmpf oeq, %1330, %2981 : vector<8x128xf32>
      %2983 = arith.select %2982, %2712, %2979 : vector<8x128xi1>, vector<8x128xf32>
      %2984 = arith.select %2982, %2714, %2980 : vector<8x128xi1>, vector<8x128xf32>
      %cst_448 = arith.constant 2.200000e+01 : f32
      %2985 = vector.broadcast %cst_448 : f32 to vector<8x128xf32>
      %2986 = arith.cmpf oeq, %1330, %2985 : vector<8x128xf32>
      %2987 = arith.select %2986, %2716, %2983 : vector<8x128xi1>, vector<8x128xf32>
      %2988 = arith.select %2986, %2718, %2984 : vector<8x128xi1>, vector<8x128xf32>
      %cst_449 = arith.constant 2.300000e+01 : f32
      %2989 = vector.broadcast %cst_449 : f32 to vector<8x128xf32>
      %2990 = arith.cmpf oeq, %1330, %2989 : vector<8x128xf32>
      %2991 = arith.select %2990, %2717, %2987 : vector<8x128xi1>, vector<8x128xf32>
      %2992 = arith.select %2990, %2719, %2988 : vector<8x128xi1>, vector<8x128xf32>
      %cst_450 = arith.constant 2.400000e+01 : f32
      %2993 = vector.broadcast %cst_450 : f32 to vector<8x128xf32>
      %2994 = arith.cmpf oeq, %1330, %2993 : vector<8x128xf32>
      %2995 = arith.select %2994, %2613, %2991 : vector<8x128xi1>, vector<8x128xf32>
      %2996 = arith.select %2994, %2615, %2992 : vector<8x128xi1>, vector<8x128xf32>
      %2997 = arith.mulf %2995, %2433 : vector<8x128xf32>
      %2998 = arith.mulf %2431, %2996 : vector<8x128xf32>
      %2999 = arith.subf %2997, %2998 : vector<8x128xf32>
      %3000 = arith.addf %2904, %2999 : vector<8x128xf32>
      %cst_451 = arith.constant 3.000000e+00 : f32
      %3001 = vector.broadcast %cst_451 : f32 to vector<8x128xf32>
      %3002 = arith.cmpf oge, %1330, %3001 : vector<8x128xf32>
      %3003 = math.absf %3000 : vector<8x128xf32>
      %cst_452 = arith.constant 5.000000e-01 : f32
      %3004 = vector.broadcast %cst_452 : f32 to vector<8x128xf32>
      %3005 = arith.mulf %3004, %3003 : vector<8x128xf32>
      %cst_453 = arith.constant 0.000000e+00 : f32
      %3006 = vector.broadcast %cst_453 : f32 to vector<8x128xf32>
      %3007 = arith.select %3002, %3005, %3006 : vector<8x128xi1>, vector<8x128xf32>
      %c2 = arith.constant 2 : index
      %c0_454 = arith.constant 0 : index
      %c0_455 = arith.constant 0 : index
      %3008 = vector.load %arg4[%c2, %c0_454, %c0_455] : memref<8x8x128xf32, #tpu.memory_space<vmem>>, vector<1x8x128xf32>
      %3009 = vector.shape_cast %3008 : vector<1x8x128xf32> to vector<8x128xf32>
      %c5 = arith.constant 5 : index
      %c0_456 = arith.constant 0 : index
      %c0_457 = arith.constant 0 : index
      %3010 = vector.load %arg4[%c5, %c0_456, %c0_457] : memref<8x8x128xf32, #tpu.memory_space<vmem>>, vector<1x8x128xf32>
      %3011 = vector.shape_cast %3010 : vector<1x8x128xf32> to vector<8x128xf32>
      %c2_458 = arith.constant 2 : index
      %c0_459 = arith.constant 0 : index
      %c0_460 = arith.constant 0 : index
      %3012 = vector.load %arg5[%c2_458, %c0_459, %c0_460] : memref<8x8x128xf32, #tpu.memory_space<vmem>>, vector<1x8x128xf32>
      %3013 = vector.shape_cast %3012 : vector<1x8x128xf32> to vector<8x128xf32>
      %c5_461 = arith.constant 5 : index
      %c0_462 = arith.constant 0 : index
      %c0_463 = arith.constant 0 : index
      %3014 = vector.load %arg5[%c5_461, %c0_462, %c0_463] : memref<8x8x128xf32, #tpu.memory_space<vmem>>, vector<1x8x128xf32>
      %3015 = vector.shape_cast %3014 : vector<1x8x128xf32> to vector<8x128xf32>
      %cst_464 = arith.constant 5.000000e-01 : f32
      %3016 = vector.broadcast %cst_464 : f32 to vector<8x128xf32>
      %3017 = arith.mulf %3011, %3016 : vector<8x128xf32>
      %3018 = arith.addf %3009, %3017 : vector<8x128xf32>
      %cst_465 = arith.constant 5.000000e-01 : f32
      %3019 = vector.broadcast %cst_465 : f32 to vector<8x128xf32>
      %3020 = arith.mulf %3015, %3019 : vector<8x128xf32>
      %3021 = arith.addf %3013, %3020 : vector<8x128xf32>
      %3022 = arith.minimumf %3018, %3021 : vector<8x128xf32>
      %cst_466 = arith.constant 5.000000e-01 : f32
      %3023 = vector.broadcast %cst_466 : f32 to vector<8x128xf32>
      %3024 = arith.mulf %3011, %3023 : vector<8x128xf32>
      %3025 = arith.subf %3009, %3024 : vector<8x128xf32>
      %cst_467 = arith.constant 5.000000e-01 : f32
      %3026 = vector.broadcast %cst_467 : f32 to vector<8x128xf32>
      %3027 = arith.mulf %3015, %3026 : vector<8x128xf32>
      %3028 = arith.subf %3013, %3027 : vector<8x128xf32>
      %3029 = arith.maximumf %3025, %3028 : vector<8x128xf32>
      %3030 = arith.subf %3022, %3029 : vector<8x128xf32>
      %cst_468 = arith.constant 0.000000e+00 : f32
      %3031 = vector.broadcast %cst_468 : f32 to vector<8x128xf32>
      %3032 = arith.maximumf %3030, %3031 : vector<8x128xf32>
      %3033 = arith.mulf %3007, %3032 : vector<8x128xf32>
      %c3_469 = arith.constant 3 : index
      %c0_470 = arith.constant 0 : index
      %c0_471 = arith.constant 0 : index
      %3034 = vector.load %arg4[%c3_469, %c0_470, %c0_471] : memref<8x8x128xf32, #tpu.memory_space<vmem>>, vector<1x8x128xf32>
      %3035 = vector.shape_cast %3034 : vector<1x8x128xf32> to vector<8x128xf32>
      %c4_472 = arith.constant 4 : index
      %c0_473 = arith.constant 0 : index
      %c0_474 = arith.constant 0 : index
      %3036 = vector.load %arg4[%c4_472, %c0_473, %c0_474] : memref<8x8x128xf32, #tpu.memory_space<vmem>>, vector<1x8x128xf32>
      %3037 = vector.shape_cast %3036 : vector<1x8x128xf32> to vector<8x128xf32>
      %3038 = arith.mulf %3035, %3037 : vector<8x128xf32>
      %3039 = arith.mulf %3038, %3011 : vector<8x128xf32>
      %c3_475 = arith.constant 3 : index
      %c0_476 = arith.constant 0 : index
      %c0_477 = arith.constant 0 : index
      %3040 = vector.load %arg5[%c3_475, %c0_476, %c0_477] : memref<8x8x128xf32, #tpu.memory_space<vmem>>, vector<1x8x128xf32>
      %3041 = vector.shape_cast %3040 : vector<1x8x128xf32> to vector<8x128xf32>
      %c4_478 = arith.constant 4 : index
      %c0_479 = arith.constant 0 : index
      %c0_480 = arith.constant 0 : index
      %3042 = vector.load %arg5[%c4_478, %c0_479, %c0_480] : memref<8x8x128xf32, #tpu.memory_space<vmem>>, vector<1x8x128xf32>
      %3043 = vector.shape_cast %3042 : vector<1x8x128xf32> to vector<8x128xf32>
      %3044 = arith.mulf %3041, %3043 : vector<8x128xf32>
      %3045 = arith.mulf %3044, %3015 : vector<8x128xf32>
      %3046 = arith.addf %3039, %3045 : vector<8x128xf32>
      %3047 = arith.subf %3046, %3033 : vector<8x128xf32>
      %cst_481 = arith.constant 9.99999997E-7 : f32
      %3048 = vector.broadcast %cst_481 : f32 to vector<8x128xf32>
      %3049 = arith.maximumf %3047, %3048 : vector<8x128xf32>
      %3050 = tpu.reciprocal %3049 {approx = true} : vector<8x128xf32> -> vector<8x128xf32>
      %3051 = arith.mulf %3033, %3050 : vector<8x128xf32>
      %cst_482 = arith.constant 2.000000e+00 : f32
      %3052 = vector.broadcast %cst_482 : f32 to vector<8x128xf32>
      %3053 = arith.mulf %3052, %3051 : vector<8x128xf32>
      %cst_483 = arith.constant 1.000000e+00 : f32
      %3054 = vector.broadcast %cst_483 : f32 to vector<8x128xf32>
      %3055 = arith.subf %3053, %3054 : vector<8x128xf32>
      %c0_484 = arith.constant 0 : index
      %c0_485 = arith.constant 0 : index
      %3056 = vector.load %arg3[%c0_484, %c0_485] : memref<8x128xf32, #tpu.memory_space<vmem>>, vector<8x128xf32>
      %c0_486 = arith.constant 0 : index
      %c0_487 = arith.constant 0 : index
      %3057 = vector.load %arg2[%c0_486, %c0_487] : memref<8x128xf32, #tpu.memory_space<vmem>>, vector<8x128xf32>
      %3058 = arith.subf %3057, %3055 : vector<8x128xf32>
      %3059 = math.absf %3058 : vector<8x128xf32>
      %3060 = arith.mulf %3056, %3059 : vector<8x128xf32>
      %c0_488 = arith.constant 0 : index
      %c0_489 = arith.constant 0 : index
      %3061 = vector.load %arg6[%c0_488, %c0_489] : memref<8x128xf32, #tpu.memory_space<vmem>>, vector<8x128xf32>
      tpu.vector_store %arg6[%c0_488, %c0_489], %3060 {strides = array<i32>} : memref<8x128xf32, #tpu.memory_space<vmem>>, vector<8x128xf32>,
    } else {
    }
    return
  }
  func.func @transform_0(%arg0: i32, %arg1: memref<1xi32, #tpu.memory_space<smem>>) -> (i32, i32) {
    %c0_i32 = arith.constant 0 : i32
    %c0_i32_0 = arith.constant 0 : i32
    return %c0_i32, %arg0 : i32, i32
  }
  func.func @transform_1(%arg0: i32, %arg1: memref<1xi32, #tpu.memory_space<smem>>) -> (i32, i32) {
    %c0_i32 = arith.constant 0 : i32
    %c0_i32_0 = arith.constant 0 : i32
    return %c0_i32, %arg0 : i32, i32
  }
  func.func @transform_2(%arg0: i32, %arg1: memref<1xi32, #tpu.memory_space<smem>>) -> (i32, i32, i32) {
    %c0_i32 = arith.constant 0 : i32
    %c0_i32_0 = arith.constant 0 : i32
    %c0_i32_1 = arith.constant 0 : i32
    return %c0_i32, %c0_i32_0, %arg0 : i32, i32, i32
  }
  func.func @transform_3(%arg0: i32, %arg1: memref<1xi32, #tpu.memory_space<smem>>) -> (i32, i32, i32) {
    %c0_i32 = arith.constant 0 : i32
    %c0_i32_0 = arith.constant 0 : i32
    %c0_i32_1 = arith.constant 0 : i32
    return %c0_i32, %c0_i32_0, %arg0 : i32, i32, i32
  }
  func.func @transform_4(%arg0: i32, %arg1: memref<1xi32, #tpu.memory_space<smem>>) -> (i32, i32) {
    %c0_i32 = arith.constant 0 : i32
    %c0_i32_0 = arith.constant 0 : i32
    return %c0_i32, %arg0 : i32, i32
  }
}

</mosaic_0001>

<bundles_post_ra>
// kernel: tpu_custom_call.1
= control target key start
LH: loop header
LB: loop body
LE: loop exit
PB: predicated region body
PF: predicated region fallthrough
CT: control target
= control target key end

     0   :  { %s7533_s0 = inlined_call_operand.<no memory space> [shape: s32[1], index: 0, kind: input, shape index: {}]   ;;  %s7534_s1 = inlined_call_operand.hbm [shape: f32[8,128], index: 1, kind: input, shape index: {}]   ;;  %s7535_s2 = inlined_call_operand.hbm [shape: f32[8,128], index: 2, kind: input, shape index: {}]   ;;  %s7536_s3 = inlined_call_operand.hbm [shape: f32[8,8,128], index: 3, kind: input, shape index: {}]   ;;  %s7537_s4 = inlined_call_operand.hbm [shape: f32[8,8,128], index: 4, kind: input, shape index: {}]   ;;  %s7538_s5 = inlined_call_operand.hbm [shape: f32[8,128], index: 5, kind: output, shape index: {}]  }
   0x1   :  { %10 = sst [smem:[#allocation3]] %s7533_s0 }
   0x2   :  { %11 = vsyncpa [#allocation5], 0 }
   0x3   :  { %12 = vsyncpa [#allocation8], 0 }
   0x4   :  { %13 = vsyncpa [#allocation11], 0 }
   0x5   :  { %14 = vsyncpa [#allocation6], 0  ;;  %s2691_s20 = smov [#allocation7]   ;;  %s2692_s22 = smov [#allocation4]  }
   0x6   :  { %s31_s21 = sshll.u32 %s2691_s20, 4  ;;  %s21_s23 = sshll.u32 %s2692_s22, 4  ;;  %s32_s21 = int_to_ptr.vmem [resolvable:$true] %s31_s21  ;;  %s22_s23 = int_to_ptr.vmem [resolvable:$true] %s21_s23 }
   0x7   :  { %s2591_s24 = scalar_lea.vmem %s32_s21, 128  ;;  %p2596_p1 = scmp.lt.s32.totalorder %s32_s21, %s32_s21 }
   0x8   :  { %p2592_p0 = scmp.ne.s32.totalorder %s32_s21, %s2591_s24  ;;  %p2597_p2 = scmp.lt.s32.totalorder %s2591_s24, %s2591_s24 }
   0xa   :  { %p2598_p3 = por %p2597_p2, %p2596_p1 }
   0xc   :  { %p2599_p4 = pnand %p2598_p3, %p2592_p0 }
   0xe   :  { %2602 = shalt.err (!%p2599_p4)
}
   0xf   :  { %34 = dma.hbm_to_vmem [thread:$0]  %s7535_s2, 128, %s32_s21, [#allocation8]  }
  0x10   :  { %s2611_s0 = scalar_lea.vmem %s22_s23, 128  ;;  %p2616_p6 = scmp.lt.s32.totalorder %s22_s23, %s22_s23 }
  0x11   :  { %p2612_p5 = scmp.ne.s32.totalorder %s22_s23, %s2611_s0  ;;  %p2617_p7 = scmp.lt.s32.totalorder %s2611_s0, %s2611_s0 }
  0x13   :  { %p2618_p8 = por %p2617_p7, %p2616_p6 }
  0x15   :  { %p2619_p9 = pnand %p2618_p8, %p2612_p5 }
  0x17   :  { %2622 = shalt.err (!%p2619_p9)
}
  0x18   :  { %24 = dma.hbm_to_vmem [thread:$0]  %s7534_s1, 128, %s22_s23, [#allocation5]  }
  0x19   :  { %s2693_s29 = smov [#allocation9]  }
  0x1a   :  { %s40_s30 = sshll.u32 %s2693_s29, 4  ;;  %s41_s30 = int_to_ptr.vmem [resolvable:$true] %s40_s30 }
  0x1b   :  { %s2631_s6 = scalar_lea.vmem %s41_s30, 1024  ;;  %p2636_p11 = scmp.lt.s32.totalorder %s41_s30, %s41_s30 }
  0x1c   :  { %p2632_p10 = scmp.ne.s32.totalorder %s41_s30, %s2631_s6  ;;  %p2637_p12 = scmp.lt.s32.totalorder %s2631_s6, %s2631_s6 }
  0x1e   :  { %p2638_p13 = por %p2637_p12, %p2636_p11 }
  0x20   :  { %p2639_p0 = pnand %p2638_p13, %p2632_p10 }
  0x22   :  { %2642 = shalt.err (!%p2639_p0)
}
  0x23   :  { %s2694_s2 = smov 128   ;;  %s2695_s7 = smov 8  }
  0x24   :  { %46 = dma.hbm_to_vmem [thread:$0]  %s7536_s3, 1024, %s41_s30, [#allocation8], %s2694_s2, %s2694_s2, %s2695_s7  }
  0x25   :  { %s2696_s10 = smov [#allocation10]  }
  0x26   :  { %s52_s11 = sshll.u32 %s2696_s10, 4  ;;  %s53_s11 = int_to_ptr.vmem [resolvable:$true] %s52_s11 }
  0x27   :  { %s2651_s1 = scalar_lea.vmem %s53_s11, 1024  ;;  %p2656_p2 = scmp.lt.s32.totalorder %s53_s11, %s53_s11 }
  0x28   :  { %p2652_p1 = scmp.ne.s32.totalorder %s53_s11, %s2651_s1  ;;  %p2657_p3 = scmp.lt.s32.totalorder %s2651_s1, %s2651_s1 }
  0x2a   :  { %p2658_p4 = por %p2657_p3, %p2656_p2 }
  0x2c   :  { %p2659_p5 = pnand %p2658_p4, %p2652_p1 }
  0x2e   :  { %2662 = shalt.err (!%p2659_p5)
}
  0x2f   :  { %58 = dma.hbm_to_vmem [thread:$0]  %s7537_s4, 1024, %s53_s11, [#allocation11], %s2694_s2, %s2694_s2, %s2695_s7  }
  0x30   :  { %2683 = dma.done.wait [#allocation5], 128  }
  0x31   :  { %2684 = vsyncadd [#allocation5], 4294967168 }
  0x32   :  { %2685 = dma.done.wait [#allocation8], 1152  }
  0x33   :  { %2686 = vsyncadd [#allocation8], 4294966144 }
  0x34   :  { %2687 = dma.done.wait [#allocation11], 1024  }
  0x35   :  { %2688 = vsyncadd [#allocation11], 4294966272  ;;  %s71_s3 = sld [smem:[#allocation3]] }
  0x3b   :  { %p2453_p6 = scmp.ne.s32.totalorder %s71_s3, 0 }
  0x3d   :  { %75 = sbr.rel (%p2453_p6) target bundleno = 68 (0x44), region = 37 }
  0x42   :  { %v2697_v0 = vmov 0.0  }
  0x43   :  { %76 = vst [vmem:[#allocation12] sm:$0xff] %v2697_v0 }
  0x44 PF:  { %s77_s14 = sld [smem:[#allocation3]] }
  0x4a   :  { %p2454_p7 = scmp.le.s32.totalorder %s77_s14, 0 }
  0x4c   :  { %81 = sbr.rel (%p2454_p7) target bundleno = 771 (0x303), region = 41 }
  0x51   :  { %v86_v1 = vld [vmem:[#allocation9 + $0x18] sm:$0xff]  ;;  %v99_v5 = vld [vmem:[#allocation10 + $0x20] sm:$0xff]  ;;  %v2749_v7 = vld [vmem:[#allocation9 + $0x30] sm:$0xff] }
  0x52   :  { %v97_v2 = vld [vmem:[#allocation10 + $0x18] sm:$0xff]  ;;  %v2745_v3 = vmul.f32 0.5, %v86_v1  ;;  %v88_v6 = vld [vmem:[#allocation9 + $0x20] sm:$0xff]  ;;  %v2753_v9 = vld [vmem:[#allocation10 + $0x30] sm:$0xff]  ;;  %v2759_v13 = vmul.f32 0.5, %v99_v5 }
  0x53   :  { %v2747_v4 = vmul.f32 0.5, %v97_v2  ;;  %v2751_v8 = vld [vmem:[#allocation9 + $0x38] sm:$0xff]  ;;  %7919 = vst [vmem:[#allocation19_spill] sm:$0xff] %v2753_v9  ;;  %v2761_v14 = vmul.f32 0.5, %v88_v6  ;;  %v82_v17 = vld [vmem:[#allocation9] sm:$0xff]  ;;  %v84_v18 = vld [vmem:[#allocation9 + $0x8] sm:$0xff] }
  0x54   :  { %7917 = vst [vmem:[#allocation17_spill] sm:$0xff] %v2745_v3  ;;  %v2755_v10 = vld [vmem:[#allocation10 + $0x38] sm:$0xff]  ;;  %v116_v11 = vmul.f32 -1.0, %v2745_v3  ;;  %7921 = vst [vmem:[#allocation21_spill] sm:$0xff] %v2759_v13  ;;  %v108_v15 = vmul.f32 %v2745_v3, %v2749_v7  ;;  %v112_v16 = vmul.f32 %v2745_v3, %v2751_v8  ;;  %v2771_v21 = vld [vmem:[#allocation10] sm:$0xff]  ;;  %v145_v27 = vmul.f32 -1.0, %v2759_v13 }
  0x55   :  { %7918 = vst [vmem:[#allocation18_spill] sm:$0xff] %v2747_v4  ;;  %7920 = vst [vmem:[#allocation20_spill] sm:$0xff] %v2755_v10  ;;  %v138_v12 = vmul.f32 -1.0, %v2747_v4  ;;  %v130_v19 = vmul.f32 %v2747_v4, %v2753_v9  ;;  %v134_v20 = vmul.f32 %v2747_v4, %v2755_v10  ;;  %v2773_v22 = vld [vmem:[#allocation10 + $0x8] sm:$0xff]  ;;  %v110_v29 = vmul.f32 %v2761_v14, %v2751_v8 }
  0x56   :  { %7922 = vst [vmem:[#allocation22_spill] sm:$0xff] %v2761_v14  ;;  %7923 = vst [vmem:[#allocation23_spill] sm:$0xff] %v2771_v21  ;;  %v117_v23 = vmul.f32 %v116_v11, %v2749_v7  ;;  %v120_v24 = vmul.f32 %v116_v11, %v2751_v8  ;;  %v2780_v28 = vadd.f32 %v108_v15, %v82_v17  ;;  %v123_v52 = vmul.f32 -1.0, %v2761_v14 }
  0x57   :  { %7924 = vst [vmem:[#allocation24_spill] sm:$0xff] %v2773_v22  ;;  %v139_v25 = vmul.f32 %v138_v12, %v2753_v9  ;;  %v142_v26 = vmul.f32 %v138_v12, %v2755_v10  ;;  %v2784_v30 = vadd.f32 %v112_v16, %v84_v18  ;;  %v114_v31 = vmul.f32 %v2761_v14, %v2749_v7 }
  0x58   :  { %v131_v32 = vadd.f32 %v130_v19, %v2771_v21  ;;  %v132_v33 = vmul.f32 %v2759_v13, %v2755_v10  ;;  %v135_v34 = vadd.f32 %v134_v20, %v2773_v22  ;;  %v136_v35 = vmul.f32 %v2759_v13, %v2753_v9 }
  0x59   :  { %v118_v36 = vadd.f32 %v117_v23, %v82_v17  ;;  %v121_v37 = vadd.f32 %v120_v24, %v84_v18  ;;  %v140_v38 = vadd.f32 %v139_v25, %v2771_v21  ;;  %v143_v39 = vadd.f32 %v142_v26, %v2773_v22 }
  0x5a   :  { %v146_v40 = vmul.f32 %v145_v27, %v2755_v10  ;;  %v148_v41 = vmul.f32 %v145_v27, %v2753_v9  ;;  %v2799_v42 = vsub.f32 %v2780_v28, %v110_v29  ;;  %v2802_v43 = vadd.f32 %v114_v31, %v2784_v30 }
  0x5b   :  { %v2804_v44 = vsub.f32 %v131_v32, %v132_v33  ;;  %v2806_v45 = vadd.f32 %v136_v35, %v135_v34  ;;  %v2808_v46 = vsub.f32 %v118_v36, %v110_v29  ;;  %v2810_v47 = vadd.f32 %v121_v37, %v114_v31 }
  0x5c   :  { %7925 = vst [vmem:[#allocation25_spill] sm:$0xff] %v2799_v42  ;;  %7926 = vst [vmem:[#allocation26_spill] sm:$0xff] %v2802_v43  ;;  %v2812_v48 = vsub.f32 %v140_v38, %v132_v33  ;;  %v2814_v49 = vadd.f32 %v143_v39, %v136_v35  ;;  %v2816_v50 = vsub.f32 %v140_v38, %v146_v40 }
  0x5d   :  { %7927 = vst [vmem:[#allocation27_spill] sm:$0xff] %v2804_v44  ;;  %7928 = vst [vmem:[#allocation28_spill] sm:$0xff] %v2806_v45  ;;  %v2818_v51 = vadd.f32 %v148_v41, %v143_v39  ;;  %v168_v53 = vsub.f32 %v2799_v42, %v2804_v44  ;;  %v170_v54 = vsub.f32 %v2802_v43, %v2806_v45 }
  0x5e   :  { %7929 = vst [vmem:[#allocation29_spill] sm:$0xff] %v2808_v46  ;;  %7930 = vst [vmem:[#allocation30_spill] sm:$0xff] %v2810_v47  ;;  %v2827_v55 = vsub.f32 %v2812_v48, %v2804_v44  ;;  %v2831_v56 = vsub.f32 %v2814_v49, %v2806_v45  ;;  %v173_v57 = vsub.f32 %v2808_v46, %v2804_v44 }
  0x5f   :  { %7931 = vst [vmem:[#allocation31_spill] sm:$0xff] %v2812_v48  ;;  %7932 = vst [vmem:[#allocation32_spill] sm:$0xff] %v2814_v49  ;;  %v175_v58 = vsub.f32 %v2810_v47, %v2806_v45  ;;  %v2837_v59 = vsub.f32 %v131_v32, %v146_v40  ;;  %v2839_v60 = vadd.f32 %v148_v41, %v135_v34 }
  0x60   :  { %7933 = vst [vmem:[#allocation33_spill] sm:$0xff] %v2816_v50  ;;  %7934 = vst [vmem:[#allocation34_spill] sm:$0xff] %v2818_v51  ;;  %v2843_v61 = vsub.f32 %v2816_v50, %v2812_v48  ;;  %v2847_v62 = vsub.f32 %v2818_v51, %v2814_v49  ;;  %v213_v63 = vsub.f32 %v2799_v42, %v2812_v48 }
  0x61   :  { %7935 = vst [vmem:[#allocation35_spill] sm:$0xff] %v2837_v59  ;;  %7936 = vst [vmem:[#allocation36_spill] sm:$0xff] %v2839_v60  ;;  %v215_v0 = vsub.f32 %v2802_v43, %v2814_v49  ;;  %v218_v1 = vsub.f32 %v2808_v46, %v2812_v48  ;;  %v220_v2 = vsub.f32 %v2810_v47, %v2814_v49 }
  0x62   :  { %v169_v5 = vmul.f32 %v168_v53, %v2831_v56  ;;  %v171_v6 = vmul.f32 %v170_v54, %v2827_v55  ;;  %v174_v11 = vmul.f32 %v173_v57, %v2831_v56  ;;  %v176_v12 = vmul.f32 %v175_v58, %v2827_v55 }
  0x63   :  { %v124_v15 = vmul.f32 %v123_v52, %v2751_v8  ;;  %v126_v16 = vmul.f32 %v123_v52, %v2749_v7  ;;  %v2865_v17 = vsub.f32 %v2837_v59, %v2816_v50  ;;  %v2869_v18 = vsub.f32 %v2839_v60, %v2818_v51 }
  0x64   :  { %v214_v19 = vmul.f32 %v213_v63, %v2847_v62  ;;  %v216_v20 = vmul.f32 %v215_v0, %v2843_v61  ;;  %v219_v23 = vmul.f32 %v218_v1, %v2847_v62  ;;  %v221_v24 = vmul.f32 %v220_v2, %v2843_v61 }
  0x65   :  { %v251_v8 = vsub.f32 %v2799_v42, %v2816_v50  ;;  %v253_v7 = vsub.f32 %v2802_v43, %v2818_v51  ;;  %v256_v25 = vsub.f32 %v2808_v46, %v2816_v50  ;;  %v258_v26 = vsub.f32 %v2810_v47, %v2818_v51 }
  0x66   :  { %v2885_v27 = vsub.f32 %v2804_v44, %v2837_v59  ;;  %v2889_v29 = vsub.f32 %v2806_v45, %v2839_v60  ;;  %v2891_v31 = vsub.f32 %v169_v5, %v171_v6  ;;  %v2893_v32 = vsub.f32 %v174_v11, %v176_v12 }
  0x67   :  { %v289_v33 = vsub.f32 %v2799_v42, %v2837_v59  ;;  %v291_v34 = vsub.f32 %v2802_v43, %v2839_v60  ;;  %v294_v35 = vsub.f32 %v2808_v46, %v2837_v59  ;;  %v296_v38 = vsub.f32 %v2810_v47, %v2839_v60 }
  0x68   :  { %7937 = vst [vmem:[#allocation37_spill] sm:$0xff] %v2891_v31  ;;  %7938 = vst [vmem:[#allocation38_spill] sm:$0xff] %v2893_v32  ;;  %v2903_v39 = vsub.f32 %v118_v36, %v124_v15  ;;  %v2905_v40 = vadd.f32 %v126_v16, %v121_v37  ;;  %v2907_v41 = vsub.f32 %v214_v19, %v216_v20  ;;  %vm7591_vm11 = vcmp.gt.f32.partialorder %v2891_v31, 0.0 }
  0x69   :  { %v2909_v52 = vsub.f32 %v219_v23, %v221_v24  ;;  %v252_v53 = vmul.f32 %v251_v8, %v2869_v18  ;;  %v254_v54 = vmul.f32 %v253_v7, %v2865_v17  ;;  %v257_v57 = vmul.f32 %v256_v25, %v2869_v18 }
  0x6a   :  { %7939 = vst [vmem:[#allocation39_spill] sm:$0xff] %v2903_v39  ;;  %7940 = vst [vmem:[#allocation40_spill] sm:$0xff] %v2905_v40  ;;  %v259_v58 = vmul.f32 %v258_v26, %v2865_v17  ;;  %v203_v63 = vsub.f32 %v2891_v31, %v2893_v32  ;;  %v290_v36 = vmul.f32 %v289_v33, %v2889_v29  ;;  %vm7592_vm13 = vcmp.lt.f32.partialorder %v2891_v31, 0.0 }
  0x6b   :  { %7941 = vst [vmem:[#allocation41_spill] sm:$0xff] %v2907_v41  ;;  %7942 = vst [vmem:[#allocation42_spill] sm:$0xff] %v2909_v52  ;;  %v292_v37 = vmul.f32 %v291_v34, %v2885_v27  ;;  %v295_v0 = vmul.f32 %v294_v35, %v2889_v29  ;;  %v297_v1 = vmul.f32 %v296_v38, %v2885_v27 }
  0x6c   :  { %v241_v2 = vsub.f32 %v2907_v41, %v2909_v52  ;;  %v2923_v5 = vsub.f32 %v252_v53, %v254_v54  ;;  %v2925_v6 = vsub.f32 %v257_v57, %v259_v58  ;;  %v320_v11 = vsub.f32 %v2903_v39, %v2804_v44 }
  0x6d   :  { %v322_v12 = vsub.f32 %v2905_v40, %v2806_v45  ;;  %v204_v19 = vand.u32 2147483647, %v203_v63  ;;  %v2931_v20 = vsub.f32 %v290_v36, %v292_v37  ;;  %v2933_v23 = vsub.f32 %v295_v0, %v297_v1 }
  0x6e   :  { %7943 = vst [vmem:[#allocation43_spill] sm:$0xff] %v2923_v5  ;;  %7944 = vst [vmem:[#allocation44_spill] sm:$0xff] %v2925_v6  ;;  %v242_v24 = vand.u32 2147483647, %v241_v2  ;;  %v279_v8 = vsub.f32 %v2923_v5, %v2925_v6  ;;  %v321_v7 = vmul.f32 %v320_v11, %v2831_v56  ;;  %v2940_v26 = vsub.f32 %v2780_v28, %v124_v15 }
  0x6f   :  { %7945 = vst [vmem:[#allocation45_spill] sm:$0xff] %v2931_v20  ;;  %7946 = vst [vmem:[#allocation46_spill] sm:$0xff] %v2933_v23  ;;  %v323_v25 = vmul.f32 %v322_v12, %v2827_v55  ;;  %vm2942_vm0 = vcmp.gt.f32.partialorder %v204_v19, 1e-12  ;;  %v358_v34 = vsub.f32 %v2903_v39, %v2812_v48  ;;  %v360_v35 = vsub.f32 %v2905_v40, %v2814_v49 }
  0x70   :  { %7947 = vst [vmem:[#allocation47_spill] sm:$0xff] %v2940_v26  ;;  %v2951_v38 = vadd.f32 %v126_v16, %v2784_v30  ;;  %v2955_v53 = vsub.f32 %v2808_v46, %v2799_v42  ;;  %v2959_v28 = vsub.f32 %v2903_v39, %v2808_v46  ;;  %v310_v15 = vsub.f32 %v2931_v20, %v2933_v23 }
  0x71   :  { %v2965_v54 = vsub.f32 %v2940_v26, %v2903_v39  ;;  %v2969_v57 = vsub.f32 %v2799_v42, %v2940_v26  ;;  %v389_v30 = vsub.f32 %v2903_v39, %v2816_v50  ;;  %v391_v16 = vsub.f32 %v2905_v40, %v2818_v51 }
  0x72   :  { %7950 = vst [vmem:[#allocation48_spill] sm:$0xff] %v2951_v38  ;;  %v206_v58 = vsel %vm2942_vm0, %v203_v63, 1.0  ;;  %vm2977_vm1 = vcmp.gt.f32.partialorder %v242_v24, 1e-12  ;;  %v280_v37 = vand.u32 2147483647, %v279_v8  ;;  %v2981_v0 = vsub.f32 %v321_v7, %v323_v25 }
  0x73   :  { %7951 = vst [vmem:[#allocation49_spill] sm:$0xff] %v2965_v54  ;;  %7952 = vst [vmem:[#allocation50_spill] sm:$0xff] %v2969_v57  ;;  %v359_v1 = vmul.f32 %v358_v34, %v2847_v62  ;;  %v361_v11 = vmul.f32 %v360_v35, %v2843_v61  ;;  %v420_v12 = vsub.f32 %v2903_v39, %v2837_v59  ;;  %v311_v25 = vand.u32 2147483647, %v310_v15 }
  0x74   :  { %v422_v19 = vsub.f32 %v2905_v40, %v2839_v60  ;;  %v2991_v63 = vsub.f32 %v2810_v47, %v2802_v43  ;;  %v2995_v24 = vsub.f32 %v2905_v40, %v2810_v47  ;;  %v178_v7 = vsub.f32 %v2804_v44, %v2799_v42 }
  0x75   :  { %2489 = vrcp.f32 %v206_v58  ;;  %v244_v33 = vsel %vm2977_vm1, %v241_v2, 1.0  ;;  %v390_v34 = vmul.f32 %v389_v30, %v2869_v18  ;;  %v392_v35 = vmul.f32 %v391_v16, %v2865_v17 }
  0x76   :  { %v180_v14 = vsub.f32 %v2806_v45, %v2802_v43  ;;  %v183_v3 = vsub.f32 %v2812_v48, %v2799_v42  ;;  %v185_v13 = vsub.f32 %v2814_v49, %v2802_v43  ;;  %v348_v4 = vsub.f32 %v2893_v32, %v2981_v0 }
  0x77   :  { %vm3011_vm2 = vcmp.gt.f32.partialorder %v280_v37, 1e-12  ;;  %v3015_v2 = vsub.f32 %v359_v1, %v361_v11  ;;  %v421_v30 = vmul.f32 %v420_v12, %v2889_v29  ;;  %v423_v16 = vmul.f32 %v422_v19, %v2885_v27 }
  0x78   :  { %v223_v36 = vsub.f32 %v2816_v50, %v2799_v42  ;;  %v225_v10 = vsub.f32 %v2818_v51, %v2802_v43  ;;  %2491 = vrcp.f32 %v244_v33  ;;  %vm3023_vm3 = vcmp.gt.f32.partialorder %v311_v25, 1e-12 }
  0x79   :  { %v3029_v37 = vsub.f32 %v2951_v38, %v2905_v40  ;;  %v3033_v1 = vsub.f32 %v2802_v43, %v2951_v38  ;;  %v179_v11 = vmul.f32 %v178_v7, %v2991_v63  ;;  %v3036_v12 = vsub.f32 %v390_v34, %v392_v35 }
  0x7a   :  { %v181_v19 = vmul.f32 %v180_v14, %v2955_v53  ;;  %v184_v33 = vmul.f32 %v183_v3, %v2991_v63  ;;  %v282_v25 = vsel %vm3011_vm2, %v279_v8, 1.0  ;;  %v349_v22 = vand.u32 2147483647, %v348_v4 }
  0x7b   :  { %7959 = vst [vmem:[#allocation51_spill] sm:$0xff] %v3029_v37  ;;  %7960 = vst [vmem:[#allocation52_spill] sm:$0xff] %v3033_v1  ;;  %v186_v21 = vmul.f32 %v185_v13, %v2955_v53  ;;  %v313_v57 = vsel %vm3023_vm3, %v310_v15, 1.0  ;;  %v379_v1 = vsub.f32 %v2909_v52, %v3015_v2  ;;  %v3047_v54 = vsub.f32 %v421_v30, %v423_v16 }
  0x7c   :  { %7961 = vst [vmem:[#allocation53_spill] sm:$0xff] %v3036_v12  ;;  %v224_v7 = vmul.f32 %v223_v36, %v2991_v63  ;;  %v226_v14 = vmul.f32 %v225_v10, %v2955_v53  ;;  %v261_v3 = vsub.f32 %v2837_v59, %v2799_v42  ;;  %v263_v8 = vsub.f32 %v2839_v60, %v2802_v43 }
  0x7d   :  { %7962 = vst [vmem:[#allocation54_spill] sm:$0xff] %v3047_v54  ;;  %2493 = vrcp.f32 %v282_v25  ;;  %v410_v9 = vsub.f32 %v2925_v6, %v3036_v12  ;;  %v444_v13 = vsub.f32 %v2940_v26, %v2804_v44  ;;  %v446_v15 = vsub.f32 %v2951_v38, %v2806_v45 }
  0x7e   :  { %2495 = vrcp.f32 %v313_v57  ;;  %vm3061_vm4 = vcmp.gt.f32.partialorder %v349_v22, 1e-12  ;;  %v482_v10 = vsub.f32 %v2940_v26, %v2812_v48  ;;  %v484_v35 = vsub.f32 %v2951_v38, %v2814_v49 }
  0x7f   :  { %v380_v58 = vand.u32 2147483647, %v379_v1  ;;  %v434_v30 = vsub.f32 %v2933_v23, %v3047_v54  ;;  %v513_v16 = vsub.f32 %v2940_v26, %v2816_v50  ;;  %v515_v57 = vsub.f32 %v2951_v38, %v2818_v51 }
  0x80   :  { %v262_v22 = vmul.f32 %v261_v3, %v2991_v63  ;;  %v264_v36 = vmul.f32 %v263_v8, %v2955_v53  ;;  %v325_v25 = vsub.f32 %v2804_v44, %v2808_v46  ;;  %v327_v6 = vsub.f32 %v2806_v45, %v2810_v47 }
  0x81   :  { %v351_v37 = vsel %vm3061_vm4, %v348_v4, 1.0  ;;  %v411_v23 = vand.u32 2147483647, %v410_v9  ;;  %v445_v52 = vmul.f32 %v444_v13, %v2831_v56  ;;  %v447_v32 = vmul.f32 %v446_v15, %v2827_v55 }
  0x82   :  { %v2490_v40 = vpop.eup %2489  ;;  %v3085_v39 = vsub.f32 %v179_v11, %v181_v19  ;;  %v3087_v3 = vsub.f32 %v184_v33, %v186_v21  ;;  %v483_v8 = vmul.f32 %v482_v10, %v2847_v62  ;;  %v485_v44 = vmul.f32 %v484_v35, %v2843_v61 }
  0x83   :  { %vm3091_vm5 = vcmp.gt.f32.partialorder %v380_v58, 1e-12  ;;  %v435_v34 = vand.u32 2147483647, %v434_v30  ;;  %v514_v4 = vmul.f32 %v513_v16, %v2869_v18  ;;  %v516_v56 = vmul.f32 %v515_v57, %v2865_v17 }
  0x84   :  { %v3097_v13 = vsub.f32 %v224_v7, %v226_v14  ;;  %v3099_v55 = vsub.f32 %v262_v22, %v264_v36  ;;  %v326_v21 = vmul.f32 %v325_v25, %v2995_v24  ;;  %2497 = vrcp.f32 %v351_v37 }
  0x85   :  { %v2492_v11 = vpop.eup %2491  ;;  %v208_v62 = vmul.f32 %v2490_v40, %v2891_v31  ;;  %v328_v61 = vmul.f32 %v327_v6, %v2959_v28  ;;  %vm3104_vm6 = vcmp.gt.f32.partialorder %v411_v23, 1e-12  ;;  %v3108_v33 = vsub.f32 %v445_v52, %v447_v32 }
  0x86   :  { %v330_v17 = vsub.f32 %v2812_v48, %v2808_v46  ;;  %v332_v18 = vsub.f32 %v2814_v49, %v2810_v47  ;;  %v382_v37 = vsel %vm3091_vm5, %v379_v1, 1.0  ;;  %v3116_v7 = vsub.f32 %v483_v8, %v485_v44 }
  0x87   :  { %v363_v40 = vsub.f32 %v2816_v50, %v2808_v46  ;;  %vm3120_vm7 = vcmp.gt.f32.partialorder %v435_v34, 1e-12  ;;  %v3124_v32 = vsub.f32 %v514_v4, %v516_v56  ;;  %v544_v52 = vsub.f32 %v2940_v26, %v2837_v59 }
  0x88   :  { %v246_v23 = vmul.f32 %v2492_v11, %v2907_v41  ;;  %v365_v54 = vsub.f32 %v2818_v51, %v2810_v47  ;;  %v413_v44 = vsel %vm3104_vm6, %v410_v9, 1.0  ;;  %v546_v1 = vsub.f32 %v2951_v38, %v2839_v60 }
  0x89   :  { %7971 = vst [vmem:[#allocation55_spill] sm:$0xff] %v3124_v32  ;;  %v209_v14 = vmul.f32 %v208_v62, %v2955_v53  ;;  %v211_v15 = vmul.f32 %v208_v62, %v2991_v63  ;;  %2499 = vrcp.f32 %v382_v37  ;;  %v3139_v10 = vsub.f32 %v2981_v0, %v3108_v33 }
  0x8a   :  { %v2494_v35 = vpop.eup %2493  ;;  %v437_v58 = vsel %vm3120_vm7, %v434_v30, 1.0  ;;  %v3145_v16 = vsub.f32 %v3015_v2, %v3116_v7  ;;  %v545_v9 = vmul.f32 %v544_v52, %v2889_v29  ;;  %v547_v57 = vmul.f32 %v546_v1, %v2885_v27 }
  0x8b   :  { %v2496_v22 = vpop.eup %2495  ;;  %v331_v36 = vmul.f32 %v330_v17, %v2995_v24  ;;  %v333_v25 = vmul.f32 %v332_v18, %v2959_v28  ;;  %2501 = vrcp.f32 %v413_v44  ;;  %v3153_v8 = vsub.f32 %v3036_v12, %v3124_v32 }
  0x8c   :  { %v247_v30 = vmul.f32 %v246_v23, %v2955_v53  ;;  %v364_v34 = vmul.f32 %v363_v40, %v2995_v24  ;;  %v366_v4 = vmul.f32 %v365_v54, %v2959_v28  ;;  %v394_v29 = vsub.f32 %v2837_v59, %v2808_v46 }
  0x8d   :  { %v284_v27 = vmul.f32 %v2494_v35, %v2923_v5  ;;  %v396_v56 = vsub.f32 %v2839_v60, %v2810_v47  ;;  %2503 = vrcp.f32 %v437_v58  ;;  %v473_v11 = vand.u32 2147483647, %v3139_v10 }
  0x8e   :  { %v249_v62 = vmul.f32 %v246_v23, %v2991_v63  ;;  %v315_v19 = vmul.f32 %v2496_v22, %v2931_v20  ;;  %v504_v17 = vand.u32 2147483647, %v3145_v16  ;;  %v3167_v18 = vsub.f32 %v545_v9, %v547_v57  ;;  %v7981_v22 = vld [vmem:[#allocation54_spill] sm:$0xff] }
  0x8f   :  { %v3170_v37 = vadd.f32 %v209_v14, %v2799_v42  ;;  %v3173_v40 = vadd.f32 %v211_v15, %v2802_v43  ;;  %v3175_v6 = vsub.f32 %v326_v21, %v328_v61  ;;  %v535_v52 = vand.u32 2147483647, %v3153_v8  ;;  %v7994_v21 = vld [vmem:[#allocation49_spill] sm:$0xff] }
  0x90   :  { %7972 = vst [vmem:[#allocation56_spill] sm:$0xff] %v3167_v18  ;;  %v3179_v54 = vadd.f32 %v247_v30, %v2799_v42  ;;  %v3181_v23 = vsub.f32 %v331_v36, %v333_v25  ;;  %v3183_v44 = vsub.f32 %v364_v34, %v366_v4  ;;  %v395_v1 = vmul.f32 %v394_v29, %v2995_v24  ;;  %v7982_v30 = vld [vmem:[#allocation39_spill] sm:$0xff]  ;;  %v7984_v29 = vld [vmem:[#allocation40_spill] sm:$0xff] }
  0x91   :  { %7973 = vst [vmem:[#allocation57_spill] sm:$0xff] %v3170_v37  ;;  %7974 = vst [vmem:[#allocation58_spill] sm:$0xff] %v3173_v40  ;;  %v2498_v35 = vpop.eup %2497  ;;  %v285_v14 = vmul.f32 %v284_v27, %v2955_v53  ;;  %v287_v58 = vmul.f32 %v284_v27, %v2991_v63  ;;  %v397_v15 = vmul.f32 %v396_v56, %v2959_v28  ;;  %vm3189_vm8 = vcmp.gt.f32.partialorder %v473_v11, 1e-12  ;;  %v7983_v34 = vld [vmem:[#allocation27_spill] sm:$0xff] }
  0x92   :  { %7975 = vst [vmem:[#allocation59_spill] sm:$0xff] %v3179_v54  ;;  %v3194_v61 = vadd.f32 %v249_v62, %v2802_v43  ;;  %v316_v9 = vmul.f32 %v315_v19, %v2955_v53  ;;  %vm3197_vm9 = vcmp.gt.f32.partialorder %v504_v17, 1e-12  ;;  %v3203_v36 = vsub.f32 %v7981_v22, %v3167_v18  ;;  %v7987_v53 = vld [vmem:[#allocation38_spill] sm:$0xff] }
  0x93   :  { %v318_v25 = vmul.f32 %v315_v19, %v2991_v63  ;;  %v449_v4 = vsub.f32 %v7983_v34, %v7982_v30  ;;  %v451_v27 = vsub.f32 %v2806_v45, %v7984_v29  ;;  %vm3210_vm10 = vcmp.gt.f32.partialorder %v535_v52, 1e-12 }
  0x94   :  { %7978 = vst [vmem:[#allocation60_spill] sm:$0xff] %v3194_v61  ;;  %v353_v11 = vmul.f32 %v2498_v35, %v7987_v53  ;;  %v454_v62 = vsub.f32 %v2812_v48, %v7982_v30  ;;  %v456_v17 = vsub.f32 %v2814_v49, %v7984_v29  ;;  %v475_v63 = vsel %vm3189_vm8, %v3139_v10, 1.0 }
  0x95   :  { %v3223_v19 = vadd.f32 %v285_v14, %v2799_v42  ;;  %v3226_v52 = vadd.f32 %v287_v58, %v2802_v43  ;;  %v3228_v61 = vsub.f32 %v395_v1, %v397_v15  ;;  %v506_v35 = vsel %vm3197_vm9, %v3145_v16, 1.0  ;;  %v7991_v16 = vld [vmem:[#allocation42_spill] sm:$0xff]  ;;  %v7993_v1 = vld [vmem:[#allocation51_spill] sm:$0xff] }
  0x96   :  { %v2500_v54 = vpop.eup %2499  ;;  %v3234_v40 = vadd.f32 %v316_v9, %v2799_v42  ;;  %v537_v10 = vsel %vm3210_vm10, %v3153_v8, 1.0  ;;  %v559_v14 = vand.u32 2147483647, %v3203_v36  ;;  %v3242_v58 = vsub.f32 %v3108_v33, %v2891_v31 }
  0x97   :  { %7988 = vst [vmem:[#allocation54_spill] sm:$0xff] %v3223_v19  ;;  %7989 = vst [vmem:[#allocation38_spill] sm:$0xff] %v3226_v52  ;;  %vm7593_vm12 = vcmp.lt.f32.partialorder %v7987_v53, 0.0  ;;  %vm7594_vm14 = vcmp.gt.f32.partialorder %v7987_v53, 0.0  ;;  %vm7595_vm15 = vcmp.gt.f32.partialorder %v3085_v39, 0.0  ;;  %vm196_vm0 = vcmp.lt.f32.partialorder %v3087_v3, 0.0 }
  0x98   :  { %7990 = vst [vmem:[#allocation61_spill] sm:$0xff] %v3234_v40  ;;  %v3258_v8 = vadd.f32 %v318_v25, %v2802_v43  ;;  %v450_v15 = vmul.f32 %v449_v4, %v7993_v1  ;;  %v452_v9 = vmul.f32 %v451_v27, %v7994_v21  ;;  %2505 = vrcp.f32 %v475_v63  ;;  %v2502_v57 = vpop.eup %2501  ;;  %v7995_v19 = vld [vmem:[#allocation44_spill] sm:$0xff]  ;;  %v7996_v25 = vld [vmem:[#allocation46_spill] sm:$0xff]  ;;  %vm3371_vm3 = vmand %vm7592_vm13, %vm7594_vm14 }
  0x99   :  { %v354_v56 = vmul.f32 %v353_v11, %v2959_v28  ;;  %v455_v40 = vmul.f32 %v454_v62, %v7993_v1  ;;  %v457_v52 = vmul.f32 %v456_v17, %v7994_v21  ;;  %2507 = vrcp.f32 %v506_v35 }
  0x9a   :  { %7992 = vst [vmem:[#allocation42_spill] sm:$0xff] %v3258_v8  ;;  %vm7609_vm10 = vcmp.lt.f32.partialorder %v7995_v19, 0.0  ;;  %v487_v4 = vsub.f32 %v2816_v50, %v7982_v30  ;;  %v489_v27 = vsub.f32 %v2818_v51, %v7984_v29  ;;  %2509 = vrcp.f32 %v537_v10  ;;  %v2504_v17 = vpop.eup %2503 }
  0x9b   :  { %v3282_v62 = vsub.f32 %v3116_v7, %v2907_v41  ;;  %v384_v63 = vmul.f32 %v2500_v54, %v7991_v16  ;;  %vm3285_vm8 = vcmp.gt.f32.partialorder %v559_v14, 1e-12  ;;  %v590_v8 = vand.u32 2147483647, %v3242_v58 }
  0x9c   :  { %v3292_v37 = vsub.f32 %v3124_v32, %v2923_v5  ;;  %v356_v54 = vmul.f32 %v353_v11, %v2995_v24  ;;  %v415_v10 = vmul.f32 %v2502_v57, %v7995_v19  ;;  %v3300_v14 = vsub.f32 %v450_v15, %v452_v9 }
  0x9d   :  { %v3304_v43 = vsub.f32 %v3167_v18, %v2931_v20  ;;  %v3309_v32 = vadd.f32 %v354_v56, %v2808_v46  ;;  %v3311_v51 = vsub.f32 %v455_v40, %v457_v52  ;;  %v518_v11 = vsub.f32 %v2837_v59, %v7982_v30 }
  0x9e   :  { %v520_v15 = vsub.f32 %v2839_v60, %v7984_v29  ;;  %v439_v9 = vmul.f32 %v2504_v17, %v7996_v25  ;;  %v488_v57 = vmul.f32 %v487_v4, %v7993_v1  ;;  %v561_v40 = vsel %vm3285_vm8, %v3203_v36, 1.0  ;;  %vm3363_vm8 = vmand %vm7591_vm11, %vm7593_vm12 }
  0x9f   :  { %7999 = vst [vmem:[#allocation51_spill] sm:$0xff] %v3309_v32  ;;  %v614_v52 = vand.u32 2147483647, %v3282_v62  ;;  %v385_v56 = vmul.f32 %v384_v63, %v2959_v28  ;;  %v490_v32 = vmul.f32 %v489_v27, %v7994_v21  ;;  %vm3329_vm4 = vcmp.gt.f32.partialorder %v590_v8, 1e-12 }
  0xa0   :  { %v638_v17 = vand.u32 2147483647, %v3292_v37  ;;  %v387_v4 = vmul.f32 %v384_v63, %v2995_v24  ;;  %v416_v36 = vmul.f32 %v415_v10, %v2959_v28  ;;  %v418_v35 = vmul.f32 %v415_v10, %v2995_v24 }
  0xa1   :  { %v655_v27 = vand.u32 2147483647, %v3304_v43  ;;  %v3342_v8 = vadd.f32 %v356_v54, %v2810_v47  ;;  %v519_v29 = vmul.f32 %v518_v11, %v7993_v1  ;;  %v521_v63 = vmul.f32 %v520_v15, %v7994_v21 }
  0xa2   :  { %2511 = vrcp.f32 %v561_v40  ;;  %v440_v30 = vmul.f32 %v439_v9, %v2959_v28  ;;  %v568_v10 = vsub.f32 %v7983_v34, %v2940_v26  ;;  %v592_v54 = vsel %vm3329_vm4, %v3242_v58, 1.0  ;;  %vm3379_vm4 = vmand %vm7595_vm15, %vm196_vm0 }
  0xa3   :  { %8002 = vst [vmem:[#allocation49_spill] sm:$0xff] %v3342_v8  ;;  %vm3355_vm2 = vcmp.gt.f32.partialorder %v614_v52, 1e-12  ;;  %v8005_v11 = vmov 0  ;;  %v8007_v28 = vmov 0  ;;  %vm8011_vm11 = vcmp.gt.f32.partialorder %v3087_v3, 0.0 }
  0xa4   :  { %v8006_v11 = vsel %vm3363_vm8, 4294967295, %v8005_v11  ;;  %v8008_v28 = vsel %vm3371_vm3, 4294967295, %v8007_v28  ;;  %vm8012_vm6 = vcmp.lt.f32.partialorder %v3085_v39, 0.0  ;;  %v8013_v58 = vmov 0 }
  0xa5   :  { %vm3387_vm1 = vmand %vm8012_vm6, %vm8011_vm11  ;;  %vm8015_vm13 = vcmp.lt.f32.partialorder %v7991_v16, 0.0  ;;  %vm8016_vm12 = vcmp.gt.f32.partialorder %v2907_v41, 0.0  ;;  %v8017_v15 = vmov 0  ;;  %vm8020_vm15 = vcmp.gt.f32.partialorder %v7991_v16, 0.0 }
  0xa6   :  { %v8014_v58 = vsel %vm3387_vm1, 4294967295, %v8013_v58  ;;  %vm3395_vm14 = vmand %vm8016_vm12, %vm8015_vm13  ;;  %vm8021_vm7 = vcmp.lt.f32.partialorder %v2907_v41, 0.0  ;;  %v8022_v40 = vmov 0  ;;  %vm8025_vm11 = vcmp.lt.f32.partialorder %v3097_v13, 0.0 }
  0xa7   :  { %v8018_v15 = vsel %vm3395_vm14, 4294967295, %v8017_v15  ;;  %vm3403_vm5 = vmand %vm8021_vm7, %vm8020_vm15  ;;  %vm8026_vm6 = vcmp.gt.f32.partialorder %v3087_v3, 0.0  ;;  %v8027_v52 = vmov 0  ;;  %v3416_v31 = vadd.f32 %v385_v56, %v2808_v46  ;;  %v2506_v3 = vpop.eup %2505 }
  0xa8   :  { %8019 = vst [vmem:[#allocation44_spill] sm:$0xff] %v8018_v15  ;;  %v8023_v40 = vsel %vm3403_vm5, 4294967295, %v8022_v40  ;;  %vm3411_vm9 = vmand %vm8026_vm6, %vm8025_vm11  ;;  %v3418_v34 = vsub.f32 %v488_v57, %v490_v32  ;;  %v570_v41 = vsub.f32 %v2806_v45, %v2951_v38  ;;  %vm3422_vm12 = vcmp.gt.f32.partialorder %v638_v17, 1e-12  ;;  %v8090_v15 = vld [vmem:[#allocation23_spill] sm:$0xff] }
  0xa9   :  { %8024 = vst [vmem:[#allocation46_spill] sm:$0xff] %v8023_v40  ;;  %v8028_v52 = vsel %vm3411_vm9, 4294967295, %v8027_v52  ;;  %8030 = vst [vmem:[#allocation63_spill] sm:$0xff] %v3416_v31  ;;  %vm8033_vm13 = vcmp.gt.f32.partialorder %v3097_v13, 0.0  ;;  %v8034_v40 = vmov 0  ;;  %v3435_v56 = vadd.f32 %v387_v4, %v2810_v47 }
  0xaa   :  { %8029 = vst [vmem:[#allocation62_spill] sm:$0xff] %v8028_v52  ;;  %vm3430_vm15 = vmand %vm196_vm0, %vm8033_vm13  ;;  %v3438_v32 = vadd.f32 %v416_v36, %v2808_v46  ;;  %v3441_v57 = vadd.f32 %v418_v35, %v2810_v47  ;;  %vm3444_vm11 = vcmp.gt.f32.partialorder %v655_v27, 1e-12  ;;  %vm8042_vm0 = vcmp.gt.f32.partialorder %v2923_v5, 0.0 }
  0xab   :  { %v8035_v40 = vsel %vm3430_vm15, 4294967295, %v8034_v40  ;;  %8037 = vst [vmem:[#allocation65_spill] sm:$0xff] %v3435_v56  ;;  %vm3452_vm6 = vmand %vm8042_vm0, %vm7609_vm10  ;;  %v8043_v4 = vmov 0  ;;  %vm8045_vm13 = vcmp.gt.f32.partialorder %v7995_v19, 0.0  ;;  %vm8046_vm9 = vcmp.lt.f32.partialorder %v2923_v5, 0.0  ;;  %v2508_v5 = vpop.eup %2507 }
  0xac   :  { %8036 = vst [vmem:[#allocation64_spill] sm:$0xff] %v8035_v40  ;;  %8038 = vst [vmem:[#allocation66_spill] sm:$0xff] %v3438_v32  ;;  %v8044_v4 = vsel %vm3452_vm6, 4294967295, %v8043_v4  ;;  %v8047_v36 = vmov 0  ;;  %vm8049_vm7 = vcmp.lt.f32.partialorder %v3099_v55, 0.0  ;;  %vm8050_vm14 = vcmp.gt.f32.partialorder %v3097_v13, 0.0 }
  0xad   :  { %8039 = vst [vmem:[#allocation67_spill] sm:$0xff] %v3441_v57  ;;  %vm3460_vm15 = vmand %vm8046_vm9, %vm8045_vm13  ;;  %v8051_v35 = vmov 0  ;;  %vm8053_vm0 = vcmp.gt.f32.partialorder %v3099_v55, 0.0  ;;  %vm8054_vm10 = vcmp.lt.f32.partialorder %v3097_v13, 0.0  ;;  %v8055_v27 = vmov 0 }
  0xae   :  { %v8048_v36 = vsel %vm3460_vm15, 4294967295, %v8047_v36  ;;  %vm3468_vm5 = vmand %vm8050_vm14, %vm8049_vm7  ;;  %vm8057_vm9 = vcmp.lt.f32.partialorder %v7996_v25, 0.0  ;;  %vm8058_vm13 = vcmp.gt.f32.partialorder %v2931_v20, 0.0  ;;  %v8059_v57 = vmov 0 }
  0xaf   :  { %v8052_v35 = vsel %vm3468_vm5, 4294967295, %v8051_v35  ;;  %vm3476_vm6 = vmand %vm8054_vm10, %vm8053_vm0  ;;  %vm8062_vm14 = vcmp.gt.f32.partialorder %v7996_v25, 0.0  ;;  %vm8063_vm7 = vcmp.lt.f32.partialorder %v2931_v20, 0.0  ;;  %v8064_v32 = vmov 0 }
  0xb0   :  { %v8056_v27 = vsel %vm3476_vm6, 4294967295, %v8055_v27  ;;  %vm3484_vm15 = vmand %vm8058_vm13, %vm8057_vm9  ;;  %vm8067_vm10 = vcmp.lt.f32.partialorder %v3085_v39, 0.0  ;;  %v8068_v13 = vmov 0  ;;  %v442_v56 = vmul.f32 %v439_v9, %v2995_v24  ;;  %v8268_v18 = vld [vmem:[#allocation46_spill] sm:$0xff] }
  0xb1   :  { %v8060_v57 = vsel %vm3484_vm15, 4294967295, %v8059_v57  ;;  %vm3492_vm5 = vmand %vm8063_vm7, %vm8062_vm14  ;;  %v3506_v31 = vsub.f32 %v519_v29, %v521_v63  ;;  %2513 = vrcp.f32 %v592_v54  ;;  %v616_v20 = vsel %vm3355_vm2, %v3282_v62, 1.0  ;;  %v8076_v29 = vld [vmem:[#allocation52_spill] sm:$0xff]  ;;  %v8089_v63 = vld [vmem:[#allocation50_spill] sm:$0xff] }
  0xb2   :  { %8061 = vst [vmem:[#allocation68_spill] sm:$0xff] %v8060_v57  ;;  %v8065_v32 = vsel %vm3492_vm5, 4294967295, %v8064_v32  ;;  %vm3500_vm6 = vmand %vm8053_vm0, %vm8067_vm10  ;;  %vm8070_vm13 = vcmp.gt.f32.partialorder %v3085_v39, 0.0  ;;  %vm8071_vm14 = vcmp.lt.f32.partialorder %v3099_v55, 0.0  ;;  %v8072_v45 = vmov 0  ;;  %v2510_v55 = vpop.eup %2509 }
  0xb3   :  { %8066 = vst [vmem:[#allocation69_spill] sm:$0xff] %v8065_v32  ;;  %v8069_v13 = vsel %vm3500_vm6, 4294967295, %v8068_v13  ;;  %vm3515_vm7 = vmand %vm8071_vm14, %vm8070_vm13  ;;  %v3520_v24 = vadd.f32 %v440_v30, %v2808_v46  ;;  %v569_v9 = vmul.f32 %v568_v10, %v8076_v29  ;;  %v573_v62 = vsub.f32 %v2812_v48, %v2940_v26  ;;  %v8186_v32 = vld [vmem:[#allocation56_spill] sm:$0xff] }
  0xb4   :  { %v8073_v45 = vsel %vm3515_vm7, 4294967295, %v8072_v45  ;;  %v640_v39 = vsel %vm3422_vm12, %v3292_v37, 1.0  ;;  %vm8077_vm2 = vcmp.lt.f32.partialorder %v2981_v0, 0.0  ;;  %vm8078_vm13 = vcmp.gt.f32.partialorder %v7987_v53, 0.0 }
  0xb5   :  { %8074 = vst [vmem:[#allocation70_spill] sm:$0xff] %v8073_v45  ;;  %8075 = vst [vmem:[#allocation71_spill] sm:$0xff] %v3520_v24  ;;  %v8079_v30 = vmov 0  ;;  %vm8081_vm10 = vcmp.gt.f32.partialorder %v2981_v0, 0.0  ;;  %vm8082_vm0 = vcmp.lt.f32.partialorder %v7987_v53, 0.0  ;;  %v8083_v8 = vmov 0 }
  0xb6   :  { %vm3534_vm14 = vmand %vm8078_vm13, %vm8077_vm2  ;;  %vm8085_vm6 = vcmp.lt.f32.partialorder %v3181_v23, 0.0  ;;  %vm8086_vm12 = vcmp.gt.f32.partialorder %v3175_v6, 0.0  ;;  %v8087_v37 = vmov 0  ;;  %v571_v10 = vmul.f32 %v570_v41, %v8089_v63 }
  0xb7   :  { %v8080_v30 = vsel %vm3534_vm14, 4294967295, %v8079_v30  ;;  %vm3542_vm9 = vmand %vm8082_vm0, %vm8081_vm10  ;;  %v575_v53 = vsub.f32 %v2814_v49, %v2951_v38  ;;  %v657_v54 = vsel %vm3444_vm11, %v3304_v43, 1.0  ;;  %v664_v24 = vsub.f32 %v2799_v42, %v8090_v15  ;;  %v8095_v43 = vld [vmem:[#allocation34_spill] sm:$0xff] }
  0xb8   :  { %v8084_v8 = vsel %vm3542_vm9, 4294967295, %v8083_v8  ;;  %vm3550_vm7 = vmand %vm8086_vm12, %vm8085_vm6  ;;  %vm8091_vm6 = vcmp.gt.f32.partialorder %v3181_v23, 0.0  ;;  %vm8092_vm10 = vcmp.lt.f32.partialorder %v3175_v6, 0.0  ;;  %v8093_v48 = vmov 0 }
  0xb9   :  { %v8088_v37 = vsel %vm3550_vm7, 4294967295, %v8087_v37  ;;  %vm3568_vm0 = vmand %vm8092_vm10, %vm8091_vm6  ;;  %v477_v41 = vmul.f32 %v2506_v3, %v2981_v0  ;;  %v599_v49 = vsub.f32 %v2816_v50, %v2940_v26  ;;  %v601_v17 = vsub.f32 %v8095_v43, %v2951_v38 }
  0xba   :  { %v8094_v48 = vsel %vm3568_vm0, 4294967295, %v8093_v48  ;;  %2515 = vrcp.f32 %v616_v20  ;;  %vm8096_vm11 = vcmp.lt.f32.partialorder %v3015_v2, 0.0  ;;  %vm8097_vm2 = vcmp.gt.f32.partialorder %v7991_v16, 0.0 }
  0xbb   :  { %vm3582_vm13 = vmand %vm8097_vm2, %vm8096_vm11  ;;  %v8098_v42 = vmov 0  ;;  %vm8101_vm6 = vcmp.gt.f32.partialorder %v3015_v2, 0.0  ;;  %vm8102_vm10 = vcmp.lt.f32.partialorder %v7991_v16, 0.0  ;;  %v8103_v3 = vmov 0 }
  0xbc   :  { %v8099_v42 = vsel %vm3582_vm13, 4294967295, %v8098_v42  ;;  %vm3590_vm12 = vmand %vm8102_vm10, %vm8101_vm6  ;;  %vm8106_vm7 = vcmp.lt.f32.partialorder %v3183_v44, 0.0  ;;  %vm8107_vm0 = vcmp.gt.f32.partialorder %v3181_v23, 0.0  ;;  %v8108_v20 = vmov 0 }
  0xbd   :  { %8100 = vst [vmem:[#allocation23_spill] sm:$0xff] %v8099_v42  ;;  %v8104_v3 = vsel %vm3590_vm12, 4294967295, %v8103_v3  ;;  %vm3598_vm14 = vmand %vm8107_vm0, %vm8106_vm7  ;;  %v508_v43 = vmul.f32 %v2508_v5, %v3015_v2  ;;  %v623_v50 = vsub.f32 %v2837_v59, %v2940_v26  ;;  %v625_v16 = vsub.f32 %v2839_v60, %v2951_v38  ;;  %v8117_v59 = vld [vmem:[#allocation24_spill] sm:$0xff] }
  0xbe   :  { %8105 = vst [vmem:[#allocation72_spill] sm:$0xff] %v8104_v3  ;;  %v8109_v20 = vsel %vm3598_vm14, 4294967295, %v8108_v20  ;;  %2517 = vrcp.f32 %v640_v39  ;;  %vm8111_vm11 = vcmp.gt.f32.partialorder %v3183_v44, 0.0  ;;  %vm8112_vm6 = vcmp.lt.f32.partialorder %v3181_v23, 0.0  ;;  %v8118_v3 = vld [vmem:[#allocation26_spill] sm:$0xff] }
  0xbf   :  { %8110 = vst [vmem:[#allocation73_spill] sm:$0xff] %v8109_v20  ;;  %vm3612_vm10 = vmand %vm8112_vm6, %vm8111_vm11  ;;  %v8113_v42 = vmov 0  ;;  %v3617_v20 = vadd.f32 %v442_v56, %v2810_v47  ;;  %v539_v5 = vmul.f32 %v2510_v55, %v3036_v12  ;;  %2519 = vrcp.f32 %v657_v54 }
  0xc0   :  { %v8114_v42 = vsel %vm3612_vm10, 4294967295, %v8113_v42  ;;  %v665_v60 = vsub.f32 %v8118_v3, %v8117_v59  ;;  %vm8119_vm0 = vcmp.lt.f32.partialorder %v3036_v12, 0.0  ;;  %vm8120_vm2 = vcmp.gt.f32.partialorder %v7995_v19, 0.0 }
  0xc1   :  { %8115 = vst [vmem:[#allocation74_spill] sm:$0xff] %v8114_v42  ;;  %8116 = vst [vmem:[#allocation75_spill] sm:$0xff] %v3617_v20  ;;  %v8121_v23 = vmov 0  ;;  %vm8124_vm11 = vcmp.gt.f32.partialorder %v3036_v12, 0.0  ;;  %vm8125_vm6 = vcmp.lt.f32.partialorder %v7995_v19, 0.0  ;;  %v8126_v56 = vmov 0 }
  0xc2   :  { %vm3627_vm14 = vmand %vm8120_vm2, %vm8119_vm0  ;;  %vm8129_vm7 = vcmp.lt.f32.partialorder %v3228_v61, 0.0  ;;  %vm8130_vm13 = vcmp.gt.f32.partialorder %v3183_v44, 0.0  ;;  %v8131_v39 = vmov 0  ;;  %v3648_v55 = vsub.f32 %v569_v9, %v571_v10 }
  0xc3   :  { %v8122_v23 = vsel %vm3627_vm14, 4294967295, %v8121_v23  ;;  %vm3635_vm10 = vmand %vm8125_vm6, %vm8124_vm11  ;;  %v574_v54 = vmul.f32 %v573_v62, %v8076_v29  ;;  %v576_v19 = vmul.f32 %v575_v53, %v8089_v63  ;;  %v669_v3 = vsub.f32 0.0, %v664_v24 }
  0xc4   :  { %8123 = vst [vmem:[#allocation24_spill] sm:$0xff] %v8122_v23  ;;  %v8127_v56 = vsel %vm3635_vm10, 4294967295, %v8126_v56  ;;  %vm3643_vm12 = vmand %vm8130_vm13, %vm8129_vm7  ;;  %vm8134_vm0 = vcmp.gt.f32.partialorder %v3228_v61, 0.0  ;;  %vm8135_vm11 = vcmp.lt.f32.partialorder %v3183_v44, 0.0  ;;  %v8136_v20 = vmov 0 }
  0xc5   :  { %8128 = vst [vmem:[#allocation76_spill] sm:$0xff] %v8127_v56  ;;  %v8132_v39 = vsel %vm3643_vm12, 4294967295, %v8131_v39  ;;  %vm3656_vm6 = vmand %vm8135_vm11, %vm8134_vm0  ;;  %v478_v12 = vmul.f32 %v477_v41, %v7994_v21  ;;  %v480_v38 = vmul.f32 %v477_v41, %v7993_v1  ;;  %v600_v9 = vmul.f32 %v599_v49, %v8076_v29 }
  0xc6   :  { %8133 = vst [vmem:[#allocation77_spill] sm:$0xff] %v8132_v39  ;;  %v8137_v20 = vsel %vm3656_vm6, 4294967295, %v8136_v20  ;;  %v8139_v39 = vld [vmem:[#allocation55_spill] sm:$0xff]  ;;  %v602_v62 = vmul.f32 %v601_v17, %v8089_v63  ;;  %vm8140_vm7 = vcmp.lt.f32.partialorder %v7981_v22, 0.0  ;;  %vm8141_vm2 = vcmp.gt.f32.partialorder %v7996_v25, 0.0 }
  0xc7   :  { %8138 = vst [vmem:[#allocation78_spill] sm:$0xff] %v8137_v20  ;;  %vm3669_vm12 = vmand %vm8141_vm2, %vm8140_vm7  ;;  %v8142_v44 = vmov 0  ;;  %vm8145_vm0 = vcmp.gt.f32.partialorder %v7981_v22, 0.0  ;;  %vm8146_vm11 = vcmp.lt.f32.partialorder %v7996_v25, 0.0  ;;  %v8147_v10 = vmov 0  ;;  %v8240_v20 = vld [vmem:[#allocation53_spill] sm:$0xff] }
  0xc8   :  { %v8143_v44 = vsel %vm3669_vm12, 4294967295, %v8142_v44  ;;  %vm3677_vm6 = vmand %vm8146_vm11, %vm8145_vm0  ;;  %vm8150_vm13 = vcmp.lt.f32.partialorder %v3175_v6, 0.0  ;;  %vm8151_vm14 = vcmp.gt.f32.partialorder %v3228_v61, 0.0  ;;  %v8152_v49 = vmov 0 }
  0xc9   :  { %8144 = vst [vmem:[#allocation55_spill] sm:$0xff] %v8143_v44  ;;  %v8148_v10 = vsel %vm3677_vm6, 4294967295, %v8147_v10  ;;  %vm3685_vm10 = vmand %vm8151_vm14, %vm8150_vm13  ;;  %v509_v53 = vmul.f32 %v508_v43, %v7994_v21  ;;  %v511_v41 = vmul.f32 %v508_v43, %v7993_v1  ;;  %v624_v25 = vmul.f32 %v623_v50, %v8076_v29  ;;  %v2512_v44 = vpop.eup %2511  ;;  %v8167_v43 = vld [vmem:[#allocation20_spill] sm:$0xff] }
  0xca   :  { %8149 = vst [vmem:[#allocation79_spill] sm:$0xff] %v8148_v10  ;;  %v8153_v49 = vsel %vm3685_vm10, 4294967295, %v8152_v49  ;;  %v626_v17 = vmul.f32 %v625_v16, %v8089_v63  ;;  %vm8161_vm6 = vcmp.gt.f32.partialorder %v3175_v6, 0.0  ;;  %vm8162_vm9 = vcmp.lt.f32.partialorder %v3228_v61, 0.0  ;;  %v8166_v63 = vld [vmem:[#allocation19_spill] sm:$0xff] }
  0xcb   :  { %8154 = vst [vmem:[#allocation80_spill] sm:$0xff] %v8153_v49  ;;  %vm3714_vm7 = vmand %vm8162_vm9, %vm8161_vm6  ;;  %v8163_v50 = vmov 0  ;;  %v540_v16 = vmul.f32 %v539_v5, %v7994_v21  ;;  %v542_v29 = vmul.f32 %v539_v5, %v7993_v1  ;;  %v666_v49 = vmul.f32 %v664_v24, %v8166_v63 }
  0xcc   :  { %v8164_v50 = vsel %vm3714_vm7, 4294967295, %v8163_v50  ;;  %v667_v40 = vmul.f32 %v665_v60, %v8167_v43  ;;  %vm8168_vm11 = vcmp.lt.f32.partialorder %v3108_v33, 0.0  ;;  %vm8169_vm12 = vcmp.gt.f32.partialorder %v2981_v0, 0.0 }
  0xcd   :  { %8165 = vst [vmem:[#allocation81_spill] sm:$0xff] %v8164_v50  ;;  %vm3727_vm13 = vmand %vm8169_vm12, %vm8168_vm11  ;;  %v8170_v6 = vmov 0  ;;  %v3732_v61 = vsub.f32 %v574_v54, %v576_v19  ;;  %v670_v52 = vmul.f32 %v669_v3, %v8167_v43  ;;  %v671_v5 = vmul.f32 %v665_v60, %v8166_v63  ;;  %v8182_v3 = vld [vmem:[#allocation39_spill] sm:$0xff]  ;;  %v8184_v19 = vld [vmem:[#allocation40_spill] sm:$0xff] }
  0xce   :  { %v8171_v6 = vsel %vm3727_vm13, 4294967295, %v8170_v6  ;;  %v680_v24 = vsub.f32 %v2808_v46, %v8090_v15  ;;  %vm8178_vm8 = vcmp.gt.f32.partialorder %v3108_v33, 0.0  ;;  %vm8179_vm1 = vcmp.lt.f32.partialorder %v2981_v0, 0.0  ;;  %v8261_v50 = vld [vmem:[#allocation62_spill] sm:$0xff] }
  0xcf   :  { %vm3758_vm0 = vmand %vm8179_vm1, %vm8178_vm8  ;;  %v8180_v60 = vmov 0  ;;  %v3763_v54 = vadd.f32 %v478_v12, %v8182_v3  ;;  %v3766_v46 = vadd.f32 %v480_v38, %v8184_v19  ;;  %v681_v57 = vsub.f32 %v2810_v47, %v8117_v59 }
  0xd0   :  { %v8181_v60 = vsel %vm3758_vm0, 4294967295, %v8180_v60  ;;  %v694_v45 = vsub.f32 %v8182_v3, %v8090_v15  ;;  %vm8187_vm3 = vcmp.lt.f32.partialorder %v3311_v51, 0.0  ;;  %vm8188_vm1 = vcmp.gt.f32.partialorder %v3300_v14, 0.0 }
  0xd1   :  { %8183 = vst [vmem:[#allocation19_spill] sm:$0xff] %v3763_v54  ;;  %8185 = vst [vmem:[#allocation20_spill] sm:$0xff] %v3766_v46  ;;  %v8189_v0 = vmov 0  ;;  %v3782_v12 = vadd.f32 %v509_v53, %v8182_v3  ;;  %v563_v38 = vmul.f32 %v2512_v44, %v7981_v22  ;;  %v3786_v46 = vsub.f32 %v600_v9, %v602_v62  ;;  %v2514_v54 = vpop.eup %2513 }
  0xd2   :  { %vm3777_vm8 = vmand %vm8188_vm1, %vm8187_vm3  ;;  %v3788_v47 = vsub.f32 %v624_v25, %v626_v17  ;;  %vm8197_vm10 = vcmp.gt.f32.partialorder %v3311_v51, 0.0  ;;  %vm8198_vm13 = vcmp.lt.f32.partialorder %v3300_v14, 0.0  ;;  %v8199_v9 = vmov 0 }
  0xd3   :  { %v8190_v0 = vsel %vm3777_vm8, 4294967295, %v8189_v0  ;;  %8191 = vst [vmem:[#allocation56_spill] sm:$0xff] %v3782_v12  ;;  %vm3802_vm6 = vmand %vm8198_vm13, %vm8197_vm10  ;;  %v3807_v62 = vadd.f32 %v511_v41, %v8184_v19  ;;  %v3810_v44 = vadd.f32 %v540_v16, %v8182_v3  ;;  %v3813_v53 = vadd.f32 %v542_v29, %v8184_v19 }
  0xd4   :  { %8192 = vst [vmem:[#allocation82_spill] sm:$0xff] %v3788_v47  ;;  %v8200_v9 = vsel %vm3802_vm6, 4294967295, %v8199_v9  ;;  %v3815_v25 = vadd.f32 %v667_v40, %v666_v49  ;;  %vm8205_vm3 = vcmp.lt.f32.partialorder %v3116_v7, 0.0  ;;  %vm8206_vm2 = vcmp.gt.f32.partialorder %v3015_v2, 0.0  ;;  %v8215_v49 = vld [vmem:[#allocation73_spill] sm:$0xff] }
  0xd5   :  { %8201 = vst [vmem:[#allocation83_spill] sm:$0xff] %v3807_v62  ;;  %8202 = vst [vmem:[#allocation84_spill] sm:$0xff] %v3810_v44  ;;  %v8207_v17 = vmov 0  ;;  %v3825_v12 = vadd.f32 %v671_v5, %v670_v52  ;;  %v685_v41 = vsub.f32 0.0, %v680_v24  ;;  %v695_v16 = vsub.f32 %v8184_v19, %v8117_v59  ;;  %v8221_v5 = vld [vmem:[#allocation18_spill] sm:$0xff] }
  0xd6   :  { %8203 = vst [vmem:[#allocation85_spill] sm:$0xff] %v3813_v53  ;;  %8204 = vst [vmem:[#allocation86_spill] sm:$0xff] %v3815_v25  ;;  %v708_v29 = vsub.f32 %v2940_v26, %v8090_v15  ;;  %vm8217_vm15 = vcmp.gt.f32.partialorder %v3116_v7, 0.0  ;;  %v8219_v52 = vmov 0  ;;  %v3848_v15 = vadd.f32 0.01, %v8221_v5  ;;  %v2516_v53 = vpop.eup %2515 }
  0xd7   :  { %vm3821_vm9 = vmand %vm8206_vm2, %vm8205_vm3  ;;  %8209 = vst [vmem:[#allocation87_spill] sm:$0xff] %v3825_v12  ;;  %v682_v44 = vmul.f32 %v680_v24, %v8166_v63  ;;  %v683_v62 = vmul.f32 %v681_v57, %v8167_v43  ;;  %v699_v47 = vsub.f32 0.0, %v694_v45  ;;  %vm8223_vm5 = vcmp.lt.f32.partialorder %v3418_v34, 0.0  ;;  %v2518_v43 = vpop.eup %2517 }
  0xd8   :  { %v8208_v17 = vsel %vm3821_vm9, 4294967295, %v8207_v17  ;;  %vm8218_vm9 = vcmp.lt.f32.partialorder %v3015_v2, 0.0  ;;  %8222 = vst [vmem:[#allocation73_spill] sm:$0xff] %v3848_v15  ;;  %vm8224_vm3 = vcmp.gt.f32.partialorder %v3311_v51, 0.0  ;;  %v8225_v40 = vmov 0  ;;  %v8227_v15 = vld [vmem:[#allocation21_spill] sm:$0xff]  ;;  %v2520_v23 = vpop.eup %2519 }
  0xd9   :  { %vm3843_vm14 = vmand %vm8218_vm9, %vm8217_vm15  ;;  %v564_v2 = vmul.f32 %v563_v38, %v7994_v21  ;;  %v566_v42 = vmul.f32 %v563_v38, %v7993_v1  ;;  %v594_v5 = vmul.f32 %v2514_v54, %v3108_v33  ;;  %v3864_v63 = vadd.f32 0.01, %v8227_v15  ;;  %v2573_v54 = vld [vmem:[#allocation10 + $0x30] sm:$0xff] }
  0xda   :  { %v8220_v52 = vsel %vm3843_vm14, 4294967295, %v8219_v52  ;;  %vm3856_vm10 = vmand %vm8224_vm3, %vm8223_vm5  ;;  %vm8234_vm2 = vcmp.gt.f32.partialorder %v3418_v34, 0.0  ;;  %v8236_v1 = vmov 0  ;;  %v687_v38 = vmul.f32 %v2573_v54, %v681_v57  ;;  %v2574_v57 = vld [vmem:[#allocation10 + $0x38] sm:$0xff] }
  0xdb   :  { %v8226_v40 = vsel %vm3856_vm10, 4294967295, %v8225_v40  ;;  %8228 = vst [vmem:[#allocation18_spill] sm:$0xff] %v3864_v63  ;;  %vm8235_vm10 = vcmp.lt.f32.partialorder %v3311_v51, 0.0  ;;  %v696_v15 = vmul.f32 %v2573_v54, %v694_v45  ;;  %v8238_v63 = vld [vmem:[#allocation48_spill] sm:$0xff]  ;;  %vm8239_vm13 = vcmp.lt.f32.partialorder %v8139_v39, 0.0 }
  0xdc   :  { %vm3878_vm14 = vmand %vm8235_vm10, %vm8234_vm2  ;;  %v709_v56 = vsub.f32 %v8238_v63, %v8117_v59  ;;  %vm8241_vm1 = vcmp.gt.f32.partialorder %v8240_v20, 0.0  ;;  %v8242_v24 = vmov 0  ;;  %v686_v45 = vmul.f32 %v2574_v57, %v685_v41  ;;  %v8247_v63 = vld [vmem:[#allocation80_spill] sm:$0xff] }
  0xdd   :  { %v8237_v1 = vsel %vm3878_vm14, 4294967295, %v8236_v1  ;;  %vm3889_vm15 = vmand %vm8241_vm1, %vm8239_vm13  ;;  %v697_v21 = vmul.f32 %v2574_v57, %v695_v16  ;;  %v713_v25 = vsub.f32 0.0, %v708_v29  ;;  %vm8249_vm10 = vcmp.gt.f32.partialorder %v8139_v39, 0.0 }
  0xde   :  { %v8243_v24 = vsel %vm3889_vm15, 4294967295, %v8242_v24  ;;  %vm8250_vm2 = vcmp.lt.f32.partialorder %v8240_v20, 0.0  ;;  %v8251_v51 = vmov 0  ;;  %v618_v41 = vmul.f32 %v2516_v53, %v3116_v7 }
  0xdf   :  { %vm3908_vm15 = vmand %vm8250_vm2, %vm8249_vm10  ;;  %v3915_v12 = vadd.f32 %v683_v62, %v682_v44  ;;  %v700_v10 = vmul.f32 %v2574_v57, %v699_v47  ;;  %v701_v59 = vmul.f32 %v2573_v54, %v695_v16  ;;  %vm8253_vm3 = vnez %v8014_v58  ;;  %v8263_v62 = vld [vmem:[#allocation64_spill] sm:$0xff]  ;;  %v8280_v44 = vld [vmem:[#allocation50_spill] sm:$0xff] }
  0xe0   :  { %v8252_v51 = vsel %vm3908_vm15, 4294967295, %v8251_v51  ;;  %vm8254_vm13 = vmor %vm3379_vm4, %vm8253_vm3  ;;  %vm8255_vm10 = vnez %v8006_v11  ;;  %vm8256_vm2 = vnez %v8008_v28  ;;  %v8258_v20 = vmov 0  ;;  %v8266_v47 = vld [vmem:[#allocation44_spill] sm:$0xff] }
  0xe1   :  { %vm8257_vm9 = vmor %vm8255_vm10, %vm8256_vm2  ;;  %vm8262_vm14 = vnez %v8261_v50  ;;  %vm8264_vm12 = vnez %v8263_v62  ;;  %vm8267_vm1 = vnez %v8266_v47  ;;  %vm8269_vm15 = vnez %v8268_v18 }
  0xe2   :  { %vm3927_vm5 = vmand %vm8257_vm9, %vm8254_vm13  ;;  %v8271_v58 = vmov 0  ;;  %vm8274_vm3 = vcmp.lt.f32.partialorder %v3506_v31, 0.0  ;;  %vm8275_vm9 = vcmp.gt.f32.partialorder %v3418_v34, 0.0  ;;  %v3954_v28 = vadd.f32 %v564_v2, %v8182_v3  ;;  %v8286_v2 = vld [vmem:[#allocation52_spill] sm:$0xff] }
  0xe3   :  { %v8259_v20 = vsel %vm3927_vm5, 4294967295, %v8258_v20  ;;  %vm8265_vm7 = vmor %vm8262_vm14, %vm8264_vm12  ;;  %v3957_v50 = vadd.f32 %v566_v42, %v8184_v19  ;;  %v595_v53 = vmul.f32 %v594_v5, %v8280_v44  ;;  %v642_v16 = vmul.f32 %v2518_v43, %v8139_v39 }
  0xe4   :  { %8260 = vst [vmem:[#allocation21_spill] sm:$0xff] %v8259_v20  ;;  %vm8270_vm11 = vmor %vm8267_vm1, %vm8269_vm15  ;;  %vm8283_vm15 = vcmp.lt.f32.partialorder %v3418_v34, 0.0  ;;  %v597_v43 = vmul.f32 %v594_v5, %v8286_v2  ;;  %v659_v62 = vmul.f32 %v2520_v23, %v8186_v32  ;;  %v710_v47 = vmul.f32 %v2573_v54, %v708_v29  ;;  %v8297_v5 = vld [vmem:[#allocation70_spill] sm:$0xff]  ;;  %v8300_v23 = vld [vmem:[#allocation68_spill] sm:$0xff] }
  0xe5   :  { %vm3941_vm4 = vmand %vm8270_vm11, %vm8265_vm7  ;;  %8278 = vst [vmem:[#allocation80_spill] sm:$0xff] %v3954_v28  ;;  %vm8282_vm11 = vcmp.gt.f32.partialorder %v3506_v31, 0.0  ;;  %v711_v18 = vmul.f32 %v2574_v57, %v709_v56  ;;  %vm8287_vm10 = vnez %v8052_v35  ;;  %vm8288_vm2 = vnez %v8056_v27  ;;  %v8302_v35 = vld [vmem:[#allocation69_spill] sm:$0xff] }
  0xe6   :  { %v8272_v58 = vsel %vm3941_vm4, 4294967295, %v8271_v58  ;;  %vm3949_vm13 = vmand %vm8275_vm9, %vm8274_vm3  ;;  %8279 = vst [vmem:[#allocation62_spill] sm:$0xff] %v3957_v50  ;;  %vm8290_vm9 = vnez %v8044_v4  ;;  %vm8291_vm14 = vnez %v8048_v36  ;;  %v8293_v34 = vmov 0 }
  0xe7   :  { %8273 = vst [vmem:[#allocation53_spill] sm:$0xff] %v8272_v58  ;;  %vm3973_vm1 = vmand %vm8283_vm15, %vm8282_vm11  ;;  %vm8296_vm15 = vnez %v8069_v13  ;;  %vm8298_vm0 = vnez %v8297_v5  ;;  %vm8301_vm6 = vnez %v8300_v23  ;;  %vm8303_vm8 = vnez %v8302_v35 }
  0xe8   :  { %vm8289_vm3 = vmor %vm8287_vm10, %vm8288_vm2  ;;  %v8305_v27 = vmov 0  ;;  %v8310_v4 = vmov 0  ;;  %v4016_v36 = vadd.f32 %v687_v38, %v686_v45  ;;  %v4018_v13 = vadd.f32 %v697_v21, %v696_v15  ;;  %v8320_v15 = vld [vmem:[#allocation27_spill] sm:$0xff]  ;;  %v8335_v45 = vld [vmem:[#allocation28_spill] sm:$0xff] }
  0xe9   :  { %vm8292_vm12 = vmor %vm8290_vm9, %vm8291_vm14  ;;  %vm8308_vm14 = vcmp.lt.f32.partialorder %v8186_v32, 0.0  ;;  %v714_v29 = vmul.f32 %v2574_v57, %v713_v25  ;;  %v715_v5 = vmul.f32 %v2573_v54, %v709_v56  ;;  %v8318_v38 = vmov 0  ;;  %v4041_v54 = vld [vmem:[#allocation9] sm:$0xff] }
  0xea   :  { %vm3989_vm11 = vmand %vm8292_vm12, %vm8289_vm3  ;;  %vm8309_vm12 = vcmp.gt.f32.partialorder %v7981_v22, 0.0  ;;  %v619_v56 = vmul.f32 %v618_v41, %v8280_v44  ;;  %v621_v25 = vmul.f32 %v618_v41, %v8286_v2  ;;  %v4039_v21 = vadd.f32 %v701_v59, %v700_v10 }
  0xeb   :  { %v8294_v34 = vsel %vm3989_vm11, 4294967295, %v8293_v34  ;;  %vm8299_vm7 = vmor %vm8296_vm15, %vm8298_vm0  ;;  %vm8316_vm15 = vcmp.gt.f32.partialorder %v8186_v32, 0.0  ;;  %v722_v57 = vsub.f32 %v8320_v15, %v4041_v54  ;;  %vm8324_vm9 = vnez %v8080_v30 }
  0xec   :  { %8295 = vst [vmem:[#allocation64_spill] sm:$0xff] %v8294_v34  ;;  %vm8304_vm4 = vmor %vm8301_vm6, %vm8303_vm8  ;;  %vm8321_vm8 = vnez %v8088_v37  ;;  %vm8325_vm3 = vnez %v8084_v8  ;;  %v8332_v10 = vmov 0  ;;  %v643_v30 = vmul.f32 %v642_v16, %v8280_v44  ;;  %v4072_v37 = vld [vmem:[#allocation9 + $0x8] sm:$0xff] }
  0xed   :  { %vm4003_vm10 = vmand %vm8304_vm4, %vm8299_vm7  ;;  %vm8330_vm4 = vcmp.lt.f32.partialorder %v3300_v14, 0.0  ;;  %vm8331_vm7 = vcmp.gt.f32.partialorder %v3506_v31, 0.0  ;;  %v723_v59 = vsub.f32 %v8335_v45, %v4072_v37  ;;  %v8340_v41 = vmov 0  ;;  %v8343_v45 = vld [vmem:[#allocation74_spill] sm:$0xff] }
  0xee   :  { %v8306_v27 = vsel %vm4003_vm10, 4294967295, %v8305_v27  ;;  %vm4011_vm2 = vmand %vm8309_vm12, %vm8308_vm14  ;;  %vm8317_vm14 = vcmp.lt.f32.partialorder %v7981_v22, 0.0  ;;  %v8327_v22 = vmov 0  ;;  %v660_v23 = vmul.f32 %v659_v62, %v8280_v44 }
  0xef   :  { %8307 = vst [vmem:[#allocation44_spill] sm:$0xff] %v8306_v27  ;;  %v8311_v4 = vsel %vm4011_vm2, 4294967295, %v8310_v4  ;;  %vm4032_vm12 = vmand %vm8317_vm14, %vm8316_vm15  ;;  %vm8322_vm15 = vnez %v8094_v48  ;;  %v4068_v48 = vadd.f32 %v595_v53, %v2940_v26  ;;  %v645_v53 = vmul.f32 %v642_v16, %v8286_v2  ;;  %v8354_v16 = vld [vmem:[#allocation37_spill] sm:$0xff] }
  0xf0   :  { %v8319_v38 = vsel %vm4032_vm12, 4294967295, %v8318_v38  ;;  %vm8323_vm14 = vmor %vm8321_vm8, %vm8322_vm15  ;;  %v662_v35 = vmul.f32 %v659_v62, %v8286_v2  ;;  %v4091_v8 = vadd.f32 %v711_v18, %v710_v47  ;;  %vm8342_vm15 = vnez %v8215_v49  ;;  %v8359_v49 = vld [vmem:[#allocation48_spill] sm:$0xff]  ;;  %v8368_v47 = vld [vmem:[#allocation77_spill] sm:$0xff] }
  0xf1   :  { %vm8326_vm0 = vmor %vm8324_vm9, %vm8325_vm3  ;;  %8334 = vst [vmem:[#allocation50_spill] sm:$0xff] %v4068_v48  ;;  %v8351_v15 = vmov 0  ;;  %vm8356_vm11 = vcmp.gt.f32.partialorder %v3108_v33, 0.0  ;;  %v8357_v44 = vmov 0  ;;  %v4116_v2 = vadd.f32 %v597_v43, %v8359_v49 }
  0xf2   :  { %vm4055_vm6 = vmand %vm8326_vm0, %vm8323_vm14  ;;  %vm8344_vm14 = vnez %v8343_v45  ;;  %v4120_v18 = vadd.f32 %v715_v5, %v714_v29  ;;  %v8364_v45 = vmov 0  ;;  %v4134_v43 = vadd.f32 %v621_v25, %v8359_v49  ;;  %v8370_v29 = vld [vmem:[#allocation78_spill] sm:$0xff]  ;;  %v8373_v5 = vld [vmem:[#allocation24_spill] sm:$0xff] }
  0xf3   :  { %v8328_v22 = vsel %vm4055_vm6, 4294967295, %v8327_v22  ;;  %vm4063_vm10 = vmand %vm8331_vm7, %vm8330_vm4  ;;  %vm8338_vm4 = vcmp.gt.f32.partialorder %v3300_v14, 0.0  ;;  %vm8339_vm7 = vcmp.lt.f32.partialorder %v3506_v31, 0.0  ;;  %v8346_v14 = vld [vmem:[#allocation23_spill] sm:$0xff]  ;;  %v8348_v31 = vld [vmem:[#allocation72_spill] sm:$0xff]  ;;  %vm8355_vm6 = vcmp.lt.f32.partialorder %v8354_v16, 0.0 }
  0xf4   :  { %8329 = vst [vmem:[#allocation46_spill] sm:$0xff] %v8328_v22  ;;  %v8333_v10 = vsel %vm4063_vm10, 4294967295, %v8332_v10  ;;  %vm4084_vm9 = vmand %vm8339_vm7, %vm8338_vm4  ;;  %vm8347_vm3 = vnez %v8346_v14  ;;  %vm8349_vm4 = vnez %v8348_v31  ;;  %v4131_v14 = vadd.f32 %v619_v56, %v2940_v26  ;;  %v4158_v25 = vld [vmem:[#allocation9 + $0x30] sm:$0xff] }
  0xf5   :  { %v8341_v41 = vsel %vm4084_vm9, 4294967295, %v8340_v41  ;;  %vm8345_vm8 = vmor %vm8342_vm15, %vm8344_vm14  ;;  %8360 = vst [vmem:[#allocation70_spill] sm:$0xff] %v4116_v2  ;;  %v727_v62 = vsub.f32 0.0, %v722_v57  ;;  %v4156_v56 = vadd.f32 %v643_v30, %v2940_v26  ;;  %v4185_v30 = vadd.f32 %v645_v53, %v8359_v49 }
  0xf6   :  { %vm8350_vm7 = vmor %vm8347_vm3, %vm8349_vm4  ;;  %8361 = vst [vmem:[#allocation68_spill] sm:$0xff] %v4120_v18  ;;  %vm8362_vm3 = vcmp.gt.f32.partialorder %v8354_v16, 0.0  ;;  %vm8374_vm4 = vnez %v8373_v5  ;;  %v8378_v16 = vmov 0  ;;  %v4191_v19 = vadd.f32 %v662_v35, %v8359_v49  ;;  %v8410_v49 = vld [vmem:[#allocation41_spill] sm:$0xff] }
  0xf7   :  { %vm4103_vm0 = vmand %vm8350_vm7, %vm8345_vm8  ;;  %vm8363_vm8 = vcmp.lt.f32.partialorder %v3108_v33, 0.0  ;;  %8366 = vst [vmem:[#allocation69_spill] sm:$0xff] %v4131_v14  ;;  %v8375_v33 = vld [vmem:[#allocation76_spill] sm:$0xff]  ;;  %v8396_v14 = vld [vmem:[#allocation79_spill] sm:$0xff]  ;;  %v8399_v53 = vmov 0  ;;  %vm8402_vm9 = vcmp.gt.f32.partialorder %v3732_v61, 0.0  ;;  %v729_v35 = vmul.f32 %v4158_v25, %v723_v59 }
  0xf8   :  { %v8352_v15 = vsel %vm4103_vm0, 4294967295, %v8351_v15  ;;  %vm4111_vm5 = vmand %vm8356_vm11, %vm8355_vm6  ;;  %8367 = vst [vmem:[#allocation74_spill] sm:$0xff] %v4134_v43  ;;  %vm8369_vm11 = vnez %v8368_v47  ;;  %vm8371_vm6 = vnez %v8370_v29  ;;  %vm8376_vm7 = vnez %v8375_v33  ;;  %v4161_v29 = vld [vmem:[#allocation9 + $0x38] sm:$0xff] }
  0xf9   :  { %8353 = vst [vmem:[#allocation52_spill] sm:$0xff] %v8352_v15  ;;  %v8358_v44 = vsel %vm4111_vm5, 4294967295, %v8357_v44  ;;  %vm4126_vm15 = vmand %vm8363_vm8, %vm8362_vm3  ;;  %v724_v47 = vmul.f32 %v4158_v25, %v722_v57  ;;  %v725_v5 = vmul.f32 %v4161_v29, %v723_v59  ;;  %v8382_v33 = vld [vmem:[#allocation31_spill] sm:$0xff]  ;;  %vm8403_vm10 = vcmp.lt.f32.partialorder %v3648_v55, 0.0 }
  0xfa   :  { %v8365_v45 = vsel %vm4126_vm15, 4294967295, %v8364_v45  ;;  %vm8372_vm14 = vmor %vm8369_vm11, %vm8371_vm6  ;;  %8381 = vst [vmem:[#allocation72_spill] sm:$0xff] %v4156_v56  ;;  %v4166_v31 = vsub.f32 %v8382_v33, %v4041_v54  ;;  %v4188_v33 = vadd.f32 %v660_v23, %v2940_v26  ;;  %v8391_v56 = vld [vmem:[#allocation81_spill] sm:$0xff]  ;;  %v8394_v43 = vld [vmem:[#allocation55_spill] sm:$0xff]  ;;  %v7739_v59 = vmov 0.0  }
  0xfb   :  { %vm8377_vm3 = vmor %vm8374_vm4, %vm8376_vm7  ;;  %vm8384_vm4 = vcmp.gt.f32.partialorder %v3648_v55, 0.0  ;;  %8387 = vst [vmem:[#allocation37_spill] sm:$0xff] %v4185_v30  ;;  %vm8392_vm11 = vnez %v8391_v56  ;;  %v8408_v56 = vld [vmem:[#allocation22_spill] sm:$0xff]  ;;  %v8415_v23 = vld [vmem:[#allocation32_spill] sm:$0xff]  ;;  %vm8428_vm15 = vcmp.lt.f32.partialorder %v3116_v7, 0.0 }
  0xfc   :  { %vm4147_vm8 = vmand %vm8377_vm3, %vm8372_vm14  ;;  %vm8383_vm14 = vcmp.lt.f32.partialorder %v3732_v61, 0.0  ;;  %8388 = vst [vmem:[#allocation77_spill] sm:$0xff] %v4188_v33  ;;  %vm8390_vm3 = vnez %v8247_v63  ;;  %v4226_v3 = vadd.f32 0.01, %v8408_v56  ;;  %v739_v33 = vsub.f32 %v8415_v23, %v4072_v37  ;;  %v8441_v23 = vld [vmem:[#allocation58_spill] sm:$0xff] }
  0xfd   :  { %v8379_v16 = vsel %vm4147_vm8, 4294967295, %v8378_v16  ;;  %vm4180_vm7 = vmand %vm8384_vm4, %vm8383_vm14  ;;  %8389 = vst [vmem:[#allocation78_spill] sm:$0xff] %v4191_v19  ;;  %vm8395_vm14 = vnez %v8394_v43  ;;  %vm8397_vm4 = vnez %v8396_v14  ;;  %v8406_v14 = vld [vmem:[#allocation17_spill] sm:$0xff]  ;;  %v728_v19 = vmul.f32 %v4161_v29, %v727_v62 }
  0xfe   :  { %8380 = vst [vmem:[#allocation23_spill] sm:$0xff] %v8379_v16  ;;  %vm8393_vm6 = vmor %vm8390_vm3, %vm8392_vm11  ;;  %v4223_v43 = vadd.f32 0.01, %v8406_v14  ;;  %vm8412_vm11 = vcmp.gt.f32.partialorder %v3116_v7, 0.0  ;;  %vm8418_vm3 = vnez %v8190_v0  ;;  %v8424_v62 = vmov 0  ;;  %v8431_v0 = vld [vmem:[#allocation82_spill] sm:$0xff] }
  0xff   :  { %vm8398_vm0 = vmor %vm8395_vm14, %vm8397_vm4  ;;  %8409 = vst [vmem:[#allocation81_spill] sm:$0xff] %v4226_v3  ;;  %vm8419_vm14 = vnez %v8200_v9  ;;  %v4268_v9 = vadd.f32 %v725_v5, %v724_v47  ;;  %v8435_v7 = vmov 0  ;;  %v8440_v5 = vld [vmem:[#allocation57_spill] sm:$0xff]  ;;  %v8457_v3 = vld [vmem:[#allocation54_spill] sm:$0xff]  ;;  %v8582_v26 = vand.u32 2147483647, %v4091_v8 }
 0x100   :  { %vm4204_vm12 = vmand %vm8398_vm0, %vm8393_vm6  ;;  %8407 = vst [vmem:[#allocation76_spill] sm:$0xff] %v4223_v43  ;;  %vm8411_vm0 = vcmp.lt.f32.partialorder %v8410_v49, 0.0  ;;  %v8458_v43 = vld [vmem:[#allocation34_spill] sm:$0xff] }
 0x101   :  { %v8400_v53 = vsel %vm4204_vm12, 4294967295, %v8399_v53  ;;  %vm4216_vm8 = vmand %vm8403_vm10, %vm8402_vm9  ;;  %vm8416_vm10 = vnez %v8259_v20  ;;  %vm8417_vm9 = vnez %v8272_v58  ;;  %v8432_v58 = vld [vmem:[#allocation33_spill] sm:$0xff]  ;;  %v4327_v2 = vsub.f32 %v8458_v43, %v4072_v37 }
 0x102   :  { %8401 = vst [vmem:[#allocation24_spill] sm:$0xff] %v8400_v53  ;;  %vm4232_vm6 = vmand %vm8412_vm11, %vm8411_vm0  ;;  %v2455_v14 = vsel %vm8416_vm10, 1.0, %v7739_v59  ;;  %v2456_v56 = vsel %vm8417_vm9, 1.0, %v7739_v59  ;;  %vm8421_vm0 = vnez %v8171_v6  ;;  %vm8422_vm11 = vnez %v8181_v60 }
 0x103   :  { %vm8420_vm4 = vmor %vm8418_vm3, %vm8419_vm14  ;;  %vm8427_vm10 = vcmp.gt.f32.partialorder %v8410_v49, 0.0  ;;  %v4272_v6 = vmul.f32 %v4158_v25, %v4166_v31  ;;  %v743_v60 = vsub.f32 0.0, %v4166_v31  ;;  %v4277_v20 = vsub.f32 %v8432_v58, %v4041_v54 }
 0x104   :  { %vm8423_vm2 = vmor %vm8421_vm0, %vm8422_vm11  ;;  %v8437_v49 = vmov 0.0   ;;  %vm8438_vm14 = vnez %v8294_v34  ;;  %v828_v58 = vmul.f32 %v2455_v14, %v8440_v5  ;;  %v829_v30 = vmul.f32 %v2455_v14, %v8441_v23  ;;  %v8456_v5 = vld [vmem:[#allocation60_spill] sm:$0xff] }
 0x105   :  { %vm4255_vm12 = vmand %vm8423_vm2, %vm8420_vm4  ;;  %vm8433_vm2 = vcmp.lt.f32.partialorder %v3786_v46, 0.0  ;;  %v2457_v47 = vsel %vm8438_vm14, 1.0, %v8437_v49  ;;  %vm8439_vm4 = vnez %v8306_v27  ;;  %vm8442_vm0 = vnez %v8226_v40 }
 0x106   :  { %v8425_v62 = vsel %vm4255_vm12, 4294967295, %v8424_v62  ;;  %vm4263_vm5 = vmand %vm8428_vm15, %vm8427_vm10  ;;  %vm8434_vm15 = vcmp.gt.f32.partialorder %v3732_v61, 0.0  ;;  %v2458_v31 = vsel %vm8439_vm4, 1.0, %v8437_v49  ;;  %vm8443_vm11 = vnez %v8237_v1  ;;  %v8455_v1 = vld [vmem:[#allocation59_spill] sm:$0xff] }
 0x107   :  { %8426 = vst [vmem:[#allocation55_spill] sm:$0xff] %v8425_v62  ;;  %vm4283_vm10 = vmand %vm8434_vm15, %vm8433_vm2  ;;  %vm8445_vm15 = vnez %v8208_v17  ;;  %vm8446_vm3 = vnez %v8220_v52  ;;  %v8448_v34 = vmov 0  ;;  %vm8451_vm4 = vcmp.gt.f32.partialorder %v3786_v46, 0.0 }
 0x108   :  { %v8436_v7 = vsel %vm4283_vm10, 4294967295, %v8435_v7  ;;  %vm8444_vm2 = vmor %vm8442_vm0, %vm8443_vm11  ;;  %vm8452_vm14 = vcmp.lt.f32.partialorder %v3732_v61, 0.0  ;;  %v830_v40 = vadd.f32 %v2456_v56, %v2455_v14  ;;  %v831_v23 = vmul.f32 %v2456_v56, %v8455_v1  ;;  %v8460_v14 = vld [vmem:[#allocation38_spill] sm:$0xff]  ;;  %v8461_v1 = vld [vmem:[#allocation61_spill] sm:$0xff] }
 0x109   :  { %vm8447_vm9 = vmor %vm8445_vm15, %vm8446_vm3  ;;  %v833_v17 = vmul.f32 %v2456_v56, %v8456_v5  ;;  %v836_v52 = vmul.f32 %v2457_v47, %v8457_v3  ;;  %vm8459_vm3 = vnez %v8328_v22  ;;  %v838_v48 = vmul.f32 %v2457_v47, %v8460_v14  ;;  %v8469_v14 = vld [vmem:[#allocation42_spill] sm:$0xff]  ;;  %v8472_v5 = vld [vmem:[#allocation51_spill] sm:$0xff] }
 0x10a   :  { %vm4306_vm12 = vmand %vm8447_vm9, %vm8444_vm2  ;;  %v2459_v61 = vsel %vm8459_vm3, 1.0, %v8437_v49  ;;  %v841_v18 = vmul.f32 %v2458_v31, %v8461_v1  ;;  %vm8464_vm0 = vnez %v8252_v51  ;;  %v8466_v56 = vmov 0 }
 0x10b   :  { %v8449_v34 = vsel %vm4306_vm12, 4294967295, %v8448_v34  ;;  %vm4314_vm10 = vmand %vm8452_vm14, %vm8451_vm4  ;;  %vm8463_vm4 = vnez %v8243_v24  ;;  %v832_v22 = vadd.f32 %v831_v23, %v828_v58  ;;  %v834_v1 = vadd.f32 %v833_v17, %v829_v30  ;;  %v8473_v58 = vld [vmem:[#allocation43_spill] sm:$0xff] }
 0x10c   :  { %8450 = vst [vmem:[#allocation79_spill] sm:$0xff] %v8449_v34  ;;  %vm8462_vm14 = vmor %vm3949_vm13, %vm3973_vm1  ;;  %v835_v11 = vadd.f32 %v2457_v47, %v830_v40  ;;  %v843_v42 = vmul.f32 %v2458_v31, %v8469_v14  ;;  %vm8470_vm13 = vnez %v8436_v7  ;;  %v4357_v24 = vadd.f32 %v729_v35, %v728_v19  ;;  %v8478_v35 = vld [vmem:[#allocation49_spill] sm:$0xff] }
 0x10d   :  { %vm8465_vm11 = vmor %vm8463_vm4, %vm8464_vm0  ;;  %v741_v51 = vmul.f32 %v4161_v29, %v739_v33  ;;  %v846_v43 = vmul.f32 %v2459_v61, %v8472_v5  ;;  %vm8474_vm4 = vcmp.lt.f32.partialorder %v8473_v58, 0.0  ;;  %vm8475_vm0 = vcmp.gt.f32.partialorder %v8139_v39, 0.0 }
 0x10e   :  { %vm4344_vm2 = vmand %vm8465_vm11, %vm8462_vm14  ;;  %vm8471_vm14 = vnez %v8352_v15  ;;  %v8476_v30 = vmov 0  ;;  %v837_v23 = vadd.f32 %v836_v52, %v832_v22  ;;  %v839_v47 = vadd.f32 %v838_v48, %v834_v1  ;;  %v8484_v48 = vld [vmem:[#allocation63_spill] sm:$0xff]  ;;  %v8494_v52 = vld [vmem:[#allocation65_spill] sm:$0xff] }
 0x10f   :  { %v8467_v56 = vsel %vm4344_vm2, 4294967295, %v8466_v56  ;;  %v2460_v3 = vsel %vm8471_vm14, 1.0, %v8437_v49  ;;  %vm4368_vm11 = vmand %vm8475_vm0, %vm8474_vm4  ;;  %v840_v19 = vadd.f32 %v2458_v31, %v835_v11  ;;  %v848_v40 = vmul.f32 %v2459_v61, %v8478_v35 }
 0x110   :  { %8468 = vst [vmem:[#allocation17_spill] sm:$0xff] %v8467_v56  ;;  %v8477_v30 = vsel %vm4368_vm11, 4294967295, %v8476_v30  ;;  %vm8479_vm15 = vcmp.gt.f32.partialorder %v8473_v58, 0.0  ;;  %vm8480_vm1 = vcmp.lt.f32.partialorder %v8139_v39, 0.0  ;;  %v744_v15 = vmul.f32 %v4161_v29, %v743_v60 }
 0x111   :  { %vm4377_vm9 = vmand %vm8480_vm1, %vm8479_vm15  ;;  %v745_v5 = vmul.f32 %v4158_v25, %v739_v33  ;;  %vm8483_vm4 = vnez %v8379_v16  ;;  %v851_v31 = vmul.f32 %v2460_v3, %v8484_v48  ;;  %vm8485_vm0 = vnez %v8333_v10 }
 0x112   :  { %v2461_v22 = vsel %vm8483_vm4, 1.0, %v8437_v49  ;;  %vm8486_vm14 = vnez %v8341_v41  ;;  %vm8488_vm15 = vnez %v8311_v4  ;;  %vm8489_vm1 = vnez %v8319_v38  ;;  %vm8495_vm4 = vmor %vm4180_vm7, %vm4216_vm8  ;;  %v8527_v38 = vld [vmem:[#allocation73_spill] sm:$0xff] }
 0x113   :  { %vm8487_vm3 = vmor %vm8485_vm0, %vm8486_vm14  ;;  %v8491_v39 = vmov 0  ;;  %v842_v33 = vadd.f32 %v841_v18, %v837_v23  ;;  %v844_v60 = vadd.f32 %v843_v42, %v839_v47  ;;  %v845_v1 = vadd.f32 %v2459_v61, %v840_v19  ;;  %v8503_v18 = vld [vmem:[#allocation66_spill] sm:$0xff]  ;;  %v8510_v61 = vld [vmem:[#allocation67_spill] sm:$0xff] }
 0x114   :  { %vm8490_vm2 = vmor %vm8488_vm15, %vm8489_vm1  ;;  %v853_v11 = vmul.f32 %v2460_v3, %v8494_v52  ;;  %vm8496_vm14 = vnez %v8358_v44  ;;  %vm8497_vm0 = vnez %v8365_v45  ;;  %v8499_v4 = vmov 0 }
 0x115   :  { %vm4397_vm12 = vmand %vm8490_vm2, %vm8487_vm3  ;;  %v754_v10 = vmul.f32 %v4158_v25, %v4277_v20  ;;  %vm8502_vm3 = vnez %v8400_v53  ;;  %v856_v57 = vmul.f32 %v2461_v22, %v8503_v18  ;;  %v8506_v44 = vmov 0 }
 0x116   :  { %v8492_v39 = vsel %vm4397_vm12, 4294967295, %v8491_v39  ;;  %vm8498_vm11 = vmor %vm8496_vm14, %vm8497_vm0  ;;  %v2462_v41 = vsel %vm8502_vm3, 1.0, %v8437_v49  ;;  %v847_v45 = vadd.f32 %v846_v43, %v842_v33  ;;  %v849_v63 = vadd.f32 %v848_v40, %v844_v60  ;;  %v8521_v33 = vld [vmem:[#allocation75_spill] sm:$0xff] }
 0x117   :  { %8493 = vst [vmem:[#allocation22_spill] sm:$0xff] %v8492_v39  ;;  %vm4412_vm15 = vmand %vm8498_vm11, %vm8495_vm4  ;;  %vm8509_vm11 = vnez %v8477_v30  ;;  %v850_v7 = vadd.f32 %v2460_v3, %v845_v1  ;;  %v858_v27 = vmul.f32 %v2461_v22, %v8510_v61  ;;  %v755_v59 = vmul.f32 %v4161_v29, %v4327_v2  ;;  %v8516_v3 = vld [vmem:[#allocation71_spill] sm:$0xff]  ;;  %v8586_v30 = vld [vmem:[#allocation68_spill] sm:$0xff] }
 0x118   :  { %v8500_v4 = vsel %vm4412_vm15, 4294967295, %v8499_v4  ;;  %vm8504_vm8 = vmor %vm8470_vm13, %vm4314_vm10  ;;  %vm8511_vm10 = vcmp.lt.f32.partialorder %v8431_v0, 0.0  ;;  %vm8512_vm13 = vcmp.gt.f32.partialorder %v3786_v46, 0.0  ;;  %v757_v42 = vsub.f32 0.0, %v4277_v20  ;;  %v8522_v20 = vld [vmem:[#allocation45_spill] sm:$0xff] }
 0x119   :  { %8501 = vst [vmem:[#allocation41_spill] sm:$0xff] %v8500_v4  ;;  %vm8505_vm7 = vmor %vm4232_vm6, %vm4263_vm5  ;;  %vm8515_vm5 = vnez %v8425_v62  ;;  %v861_v58 = vmul.f32 %v2462_v41, %v8516_v3  ;;  %vm8517_vm6 = vcmp.gt.f32.partialorder %v8431_v0, 0.0  ;;  %vm8518_vm14 = vcmp.lt.f32.partialorder %v3786_v46, 0.0  ;;  %v8528_v62 = vld [vmem:[#allocation86_spill] sm:$0xff]  ;;  %v8545_v3 = vld [vmem:[#allocation20_spill] sm:$0xff] }
 0x11a   :  { %vm4433_vm2 = vmand %vm8505_vm7, %vm8504_vm8  ;;  %v2463_v43 = vsel %vm8515_vm5, 1.0, %v8437_v49  ;;  %v852_v47 = vadd.f32 %v851_v31, %v847_v45  ;;  %v854_v19 = vadd.f32 %v853_v11, %v849_v63  ;;  %v855_v40 = vadd.f32 %v2461_v22, %v850_v7  ;;  %v8533_v31 = vld [vmem:[#allocation18_spill] sm:$0xff]  ;;  %v8534_v11 = vld [vmem:[#allocation87_spill] sm:$0xff] }
 0x11b   :  { %v8507_v44 = vsel %vm4433_vm2, 4294967295, %v8506_v44  ;;  %vm4446_vm1 = vmand %vm8512_vm13, %vm8511_vm10  ;;  %v863_v60 = vmul.f32 %v2462_v41, %v8521_v33  ;;  %vm8523_vm8 = vcmp.lt.f32.partialorder %v8522_v20, 0.0  ;;  %vm8524_vm7 = vcmp.gt.f32.partialorder %v8186_v32, 0.0  ;;  %v8603_v1 = vld [vmem:[#allocation81_spill] sm:$0xff]  ;;  %v8610_v4 = vld [vmem:[#allocation72_spill] sm:$0xff] }
 0x11c   :  { %8508 = vst [vmem:[#allocation82_spill] sm:$0xff] %v8507_v44  ;;  %vm4461_vm0 = vmand %vm8518_vm14, %vm8517_vm6  ;;  %v8529_v46 = vand.u32 2147483647, %v8528_v62  ;;  %v8530_v53 = vmov 0  ;;  %v8535_v22 = vand.u32 2147483647, %v8534_v11  ;;  %v4490_v7 = vadd.f32 %v741_v51, %v4272_v6 }
 0x11d   :  { %vm4470_vm10 = vmand %vm8524_vm7, %vm8523_vm8  ;;  %v8536_v45 = vmov 0  ;;  %v734_v63 = vand.u32 2147483647, %v4357_v24  ;;  %vm8539_vm14 = vnez %v8449_v34  ;;  %vm8541_vm8 = vcmp.gt.f32.partialorder %v8522_v20, 0.0 }
 0x11e   :  { %vm4477_vm13 = vcmp.lt.f32.partialorder %v8529_v46, %v8527_v38  ;;  %vm4484_vm6 = vcmp.lt.f32.partialorder %v8535_v22, %v8533_v31  ;;  %v2464_v62 = vsel %vm8539_vm14, 1.0, %v8437_v49  ;;  %v8540_v46 = vld [vmem:[#allocation19_spill] sm:$0xff]  ;;  %vm8542_vm7 = vcmp.lt.f32.partialorder %v8186_v32, 0.0 }
 0x11f   :  { %v8531_v53 = vsel %vm4477_vm13, 4294967295, %v8530_v53  ;;  %v8537_v45 = vsel %vm4484_vm6, 4294967295, %v8536_v45  ;;  %v866_v16 = vmul.f32 %v2463_v43, %v8540_v46  ;;  %vm4500_vm4 = vmand %vm8542_vm7, %vm8541_vm8  ;;  %v857_v22 = vadd.f32 %v856_v57, %v852_v47 }
 0x120   :  { %8532 = vst [vmem:[#allocation43_spill] sm:$0xff] %v8531_v53  ;;  %8538 = vst [vmem:[#allocation45_spill] sm:$0xff] %v8537_v45  ;;  %v859_v33 = vadd.f32 %v858_v27, %v854_v19  ;;  %v860_v24 = vadd.f32 %v2462_v41, %v855_v40  ;;  %v868_v6 = vmul.f32 %v2463_v43, %v8545_v3  ;;  %vm8546_vm5 = vcmp.lt.f32.partialorder %v3648_v55, 0.0  ;;  %v8559_v19 = vld [vmem:[#allocation56_spill] sm:$0xff] }
 0x121   :  { %vm8547_vm3 = vcmp.gt.f32.partialorder %v8431_v0, 0.0  ;;  %v8550_v32 = vand.u32 2147483647, %v3915_v12  ;;  %v8551_v20 = vmov 0  ;;  %v8554_v41 = vand.u32 2147483647, %v4016_v36 }
 0x122   :  { %vm4509_vm14 = vmand %vm8547_vm3, %vm8546_vm5  ;;  %v8555_v57 = vmov 0  ;;  %v4527_v27 = vadd.f32 %v745_v5, %v744_v15  ;;  %v759_v47 = vmul.f32 %v4158_v25, %v4327_v2  ;;  %vm8558_vm3 = vnez %v8467_v56 }
 0x123   :  { %vm4516_vm8 = vcmp.lt.f32.partialorder %v8550_v32, %v8527_v38  ;;  %vm4523_vm7 = vcmp.lt.f32.partialorder %v8554_v41, %v8533_v31  ;;  %v2465_v12 = vsel %vm8558_vm3, 1.0, %v8437_v49  ;;  %v871_v40 = vmul.f32 %v2464_v62, %v8559_v19  ;;  %v8564_v41 = vld [vmem:[#allocation83_spill] sm:$0xff]  ;;  %v8566_v19 = vld [vmem:[#allocation84_spill] sm:$0xff] }
 0x124   :  { %v8552_v20 = vsel %vm4516_vm8, 4294967295, %v8551_v20  ;;  %v8556_v57 = vsel %vm4523_vm7, 4294967295, %v8555_v57  ;;  %vm8560_vm5 = vcmp.gt.f32.partialorder %v3648_v55, 0.0  ;;  %vm8561_vm8 = vcmp.lt.f32.partialorder %v8431_v0, 0.0  ;;  %v8565_v55 = vld [vmem:[#allocation35_spill] sm:$0xff] }
 0x125   :  { %8553 = vst [vmem:[#allocation73_spill] sm:$0xff] %v8552_v20  ;;  %8557 = vst [vmem:[#allocation86_spill] sm:$0xff] %v8556_v57  ;;  %v862_v32 = vadd.f32 %v861_v58, %v857_v22  ;;  %v864_v15 = vadd.f32 %v863_v60, %v859_v33  ;;  %v865_v5 = vadd.f32 %v2463_v43, %v860_v24  ;;  %v2466_v0 = vsel %vm4397_vm12, 1.0, %v8437_v49  ;;  %v8567_v22 = vld [vmem:[#allocation85_spill] sm:$0xff] }
 0x126   :  { %vm4539_vm13 = vmand %vm8561_vm8, %vm8560_vm5  ;;  %v873_v34 = vmul.f32 %v2464_v62, %v8564_v41  ;;  %v4548_v2 = vadd.f32 %v755_v59, %v754_v10  ;;  %v766_v56 = vsub.f32 %v8565_v55, %v4041_v54  ;;  %v876_v58 = vmul.f32 %v2465_v12, %v8566_v19 }
 0x127   :  { %v867_v43 = vadd.f32 %v866_v16, %v862_v32  ;;  %v869_v33 = vadd.f32 %v868_v6, %v864_v15  ;;  %v870_v60 = vadd.f32 %v2464_v62, %v865_v5  ;;  %v878_v10 = vmul.f32 %v2465_v12, %v8567_v22  ;;  %v8576_v6 = vld [vmem:[#allocation36_spill] sm:$0xff]  ;;  %vm8577_vm5 = vmor %vm4446_vm1, %vm4461_vm0 }
 0x128   :  { %v8568_v54 = vand.u32 2147483647, %v4018_v13  ;;  %v8569_v59 = vmov 0  ;;  %v8572_v24 = vand.u32 2147483647, %v4039_v21  ;;  %v8573_v16 = vmov 0  ;;  %vm8578_vm12 = vmor %vm8509_vm11, %vm4377_vm9 }
 0x129   :  { %v758_v62 = vmul.f32 %v4161_v29, %v757_v42  ;;  %v767_v32 = vsub.f32 %v8576_v6, %v4072_v37  ;;  %v2467_v13 = vsel %vm4412_vm15, 1.0, %v8437_v49  ;;  %v881_v15 = vmul.f32 %v2466_v0, %v3954_v28  ;;  %vm8593_vm11 = vmor %vm4470_vm10, %vm4500_vm4 }
 0x12a   :  { %vm4568_vm3 = vcmp.lt.f32.partialorder %v8568_v54, %v8527_v38  ;;  %vm4575_vm8 = vcmp.lt.f32.partialorder %v8572_v24, %v8533_v31  ;;  %v8579_v21 = vmov 0  ;;  %v872_v37 = vadd.f32 %v871_v40, %v867_v43  ;;  %v8591_v43 = vld [vmem:[#allocation50_spill] sm:$0xff] }
 0x12b   :  { %v8570_v59 = vsel %vm4568_vm3, 4294967295, %v8569_v59  ;;  %v8574_v16 = vsel %vm4575_vm8, 4294967295, %v8573_v16  ;;  %vm4596_vm3 = vmand %vm8578_vm12, %vm8577_vm5  ;;  %v874_v42 = vadd.f32 %v873_v34, %v869_v33  ;;  %v875_v5 = vadd.f32 %v2465_v12, %v870_v60  ;;  %v8597_v60 = vld [vmem:[#allocation70_spill] sm:$0xff] }
 0x12c   :  { %8571 = vst [vmem:[#allocation18_spill] sm:$0xff] %v8570_v59  ;;  %8575 = vst [vmem:[#allocation87_spill] sm:$0xff] %v8574_v16  ;;  %v8580_v21 = vsel %vm4596_vm3, 4294967295, %v8579_v21  ;;  %v883_v54 = vmul.f32 %v2466_v0, %v3957_v50  ;;  %vm4604_vm15 = vcmp.lt.f32.partialorder %v8582_v26, %v8527_v38  ;;  %v8583_v23 = vmov 0 }
 0x12d   :  { %8581 = vst [vmem:[#allocation88_spill] sm:$0xff] %v8580_v21  ;;  %v8584_v23 = vsel %vm4604_vm15, 4294967295, %v8583_v23  ;;  %v8587_v17 = vand.u32 2147483647, %v8586_v30  ;;  %v8588_v24 = vmov 0  ;;  %v771_v34 = vsub.f32 0.0, %v766_v56  ;;  %vm8592_vm12 = vmor %vm4509_vm14, %vm4539_vm13 }
 0x12e   :  { %8585 = vst [vmem:[#allocation89_spill] sm:$0xff] %v8584_v23  ;;  %v747_v40 = vand.u32 2147483647, %v4490_v7  ;;  %v2468_v12 = vsel %vm4433_vm2, 1.0, %v8437_v49  ;;  %v886_v8 = vmul.f32 %v2467_v13, %v8591_v43  ;;  %vm4630_vm1 = vmand %vm8593_vm11, %vm8592_vm12  ;;  %v8594_v38 = vmov 0  ;;  %v8598_v30 = vld [vmem:[#allocation76_spill] sm:$0xff] }
 0x12f   :  { %vm4611_vm9 = vcmp.lt.f32.partialorder %v8587_v17, %v8533_v31  ;;  %v8595_v38 = vsel %vm4630_vm1, 4294967295, %v8594_v38  ;;  %v877_v31 = vadd.f32 %v876_v58, %v872_v37  ;;  %v879_v7 = vadd.f32 %v878_v10, %v874_v42  ;;  %v8607_v10 = vld [vmem:[#allocation69_spill] sm:$0xff] }
 0x130   :  { %v8589_v24 = vsel %vm4611_vm9, 4294967295, %v8588_v24  ;;  %8596 = vst [vmem:[#allocation50_spill] sm:$0xff] %v8595_v38  ;;  %v880_v33 = vadd.f32 %v2466_v0, %v875_v5  ;;  %v888_v26 = vmul.f32 %v2467_v13, %v8597_v60  ;;  %v8599_v51 = vand.u32 2147483647, %v4268_v9  ;;  %v8609_v5 = vld [vmem:[#allocation74_spill] sm:$0xff] }
 0x131   :  { %8590 = vst [vmem:[#allocation68_spill] sm:$0xff] %v8589_v24  ;;  %v8600_v36 = vmov 0  ;;  %vm4643_vm13 = vcmp.lt.f32.partialorder %v734_v63, %v8603_v1  ;;  %v8604_v11 = vmov 0  ;;  %v768_v17 = vmul.f32 %v4158_v25, %v766_v56 }
 0x132   :  { %vm4638_vm0 = vcmp.lt.f32.partialorder %v8599_v51, %v8598_v30  ;;  %v8605_v11 = vsel %vm4643_vm13, 4294967295, %v8604_v11  ;;  %v769_v58 = vmul.f32 %v4161_v29, %v767_v32  ;;  %v2469_v0 = vsel %vm4596_vm3, 1.0, %v8437_v49 }
 0x133   :  { %v8601_v36 = vsel %vm4638_vm0, 4294967295, %v8600_v36  ;;  %8606 = vst [vmem:[#allocation81_spill] sm:$0xff] %v8605_v11  ;;  %v891_v37 = vmul.f32 %v2468_v12, %v8607_v10  ;;  %vm8608_vm4 = vnez %v8531_v53  ;;  %v882_v9 = vadd.f32 %v881_v15, %v877_v31  ;;  %v8612_v31 = vld [vmem:[#allocation37_spill] sm:$0xff] }
 0x134   :  { %8602 = vst [vmem:[#allocation76_spill] sm:$0xff] %v8601_v36  ;;  %vm7773_vm10 = vmand %vm8608_vm4, %vm4484_vm6  ;;  %v884_v63 = vadd.f32 %v883_v54, %v879_v7  ;;  %v885_v42 = vadd.f32 %v2467_v13, %v880_v33  ;;  %v893_v51 = vmul.f32 %v2468_v12, %v8609_v5  ;;  %v772_v56 = vmul.f32 %v4161_v29, %v771_v34  ;;  %v8651_v36 = vld [vmem:[#allocation33_spill] sm:$0xff] }
 0x135   :  { %v773_v44 = vmul.f32 %v4158_v25, %v767_v32  ;;  %v2470_v21 = vsel %vm4630_vm1, 1.0, %v8437_v49  ;;  %v896_v39 = vmul.f32 %v2469_v0, %v8610_v4  ;;  %vm8611_vm14 = vnez %v8552_v20  ;;  %v8613_v32 = vld [vmem:[#allocation77_spill] sm:$0xff] }
 0x136   :  { %vm7774_vm5 = vmand %vm8611_vm14, %vm4523_vm7  ;;  %v887_v15 = vadd.f32 %v886_v8, %v882_v9  ;;  %v889_v54 = vadd.f32 %v888_v26, %v884_v63  ;;  %v890_v13 = vadd.f32 %v2468_v12, %v885_v42  ;;  %v898_v7 = vmul.f32 %v2469_v0, %v8612_v31  ;;  %v8614_v8 = vld [vmem:[#allocation78_spill] sm:$0xff] }
 0x137   :  { %v749_v29 = vand.u32 2147483647, %v4527_v27  ;;  %v760_v34 = vadd.f32 %v759_v47, %v758_v62  ;;  %v2471_v25 = vsel %vm7773_vm10, 1.0, %v8437_v49  ;;  %v901_v33 = vmul.f32 %v2470_v21, %v8613_v32  ;;  %v8615_v47 = vld [vmem:[#allocation25_spill] sm:$0xff]  ;;  %v8617_v42 = vld [vmem:[#allocation26_spill] sm:$0xff] }
 0x138   :  { %v892_v38 = vadd.f32 %v891_v37, %v887_v15  ;;  %v894_v4 = vadd.f32 %v893_v51, %v889_v54  ;;  %v895_v5 = vadd.f32 %v2469_v0, %v890_v13  ;;  %v903_v26 = vmul.f32 %v2470_v21, %v8614_v8 }
 0x139   :  { %v770_v12 = vadd.f32 %v769_v58, %v768_v17  ;;  %v774_v9 = vadd.f32 %v773_v44, %v772_v56  ;;  %v2472_v27 = vsel %vm7774_vm5, 1.0, %v8437_v49  ;;  %v906_v62 = vmul.f32 %v2471_v25, %v8615_v47  ;;  %v8621_v56 = vld [vmem:[#allocation29_spill] sm:$0xff] }
 0x13a   :  { %vm8616_vm12 = vnez %v8570_v59  ;;  %v897_v37 = vadd.f32 %v896_v39, %v892_v38  ;;  %v899_v0 = vadd.f32 %v898_v7, %v894_v4  ;;  %v900_v63 = vadd.f32 %v2470_v21, %v895_v5  ;;  %v8622_v38 = vld [vmem:[#allocation30_spill] sm:$0xff] }
 0x13b   :  { %v908_v17 = vmul.f32 %v2471_v25, %v8617_v42  ;;  %vm4691_vm10 = vcmp.lt.f32.partialorder %v747_v40, %v8598_v30  ;;  %v8618_v44 = vmov 0  ;;  %v761_v58 = vand.u32 2147483647, %v4548_v2  ;;  %vm8626_vm7 = vmand %vm8616_vm12, %vm4575_vm8 }
 0x13c   :  { %v8619_v44 = vsel %vm4691_vm10, 4294967295, %v8618_v44  ;;  %v763_v51 = vand.u32 2147483647, %v760_v34  ;;  %v911_v15 = vmul.f32 %v2472_v27, %v8621_v56  ;;  %v902_v39 = vadd.f32 %v901_v33, %v897_v37 }
 0x13d   :  { %8620 = vst [vmem:[#allocation77_spill] sm:$0xff] %v8619_v44  ;;  %v904_v4 = vadd.f32 %v903_v26, %v899_v0  ;;  %v905_v21 = vadd.f32 %v2471_v25, %v900_v63  ;;  %v913_v5 = vmul.f32 %v2472_v27, %v8622_v38  ;;  %vm4703_vm11 = vcmp.lt.f32.partialorder %v749_v29, %v8603_v1  ;;  %v8635_v0 = vld [vmem:[#allocation40_spill] sm:$0xff] }
 0x13e   :  { %v8623_v40 = vmov 0  ;;  %v775_v54 = vand.u32 2147483647, %v770_v12  ;;  %v777_v2 = vand.u32 2147483647, %v774_v9  ;;  %v2473_v13 = vsel %vm8626_vm7, 1.0, %v8437_v49  ;;  %vm8633_vm7 = vmand %vm4604_vm15, %vm4611_vm9 }
 0x13f   :  { %v8624_v40 = vsel %vm4703_vm11, 4294967295, %v8623_v40  ;;  %v907_v7 = vadd.f32 %v906_v62, %v902_v39  ;;  %v909_v34 = vadd.f32 %v908_v17, %v904_v4  ;;  %v910_v29 = vadd.f32 %v2472_v27, %v905_v21  ;;  %v8634_v12 = vld [vmem:[#allocation39_spill] sm:$0xff]  ;;  %vm8643_vm15 = vmand %vm4691_vm10, %vm4703_vm11  ;;  %v8650_v44 = vld [vmem:[#allocation32_spill] sm:$0xff] }
 0x140   :  { %8625 = vst [vmem:[#allocation78_spill] sm:$0xff] %v8624_v40  ;;  %vm4718_vm14 = vcmp.lt.f32.partialorder %v761_v58, %v8598_v30  ;;  %v8627_v25 = vmov 0  ;;  %vm4723_vm6 = vcmp.lt.f32.partialorder %v763_v51, %v8603_v1  ;;  %v8630_v33 = vmov 0 }
 0x141   :  { %v8628_v25 = vsel %vm4718_vm14, 4294967295, %v8627_v25  ;;  %v8631_v33 = vsel %vm4723_vm6, 4294967295, %v8630_v33  ;;  %v2474_v26 = vsel %vm8633_vm7, 1.0, %v8437_v49  ;;  %v916_v9 = vmul.f32 %v2473_v13, %v8634_v12  ;;  %vm8642_vm7 = vmand %vm4638_vm0, %vm4643_vm13 }
 0x142   :  { %8629 = vst [vmem:[#allocation90_spill] sm:$0xff] %v8628_v25  ;;  %8632 = vst [vmem:[#allocation91_spill] sm:$0xff] %v8631_v33  ;;  %v912_v27 = vadd.f32 %v911_v15, %v907_v7  ;;  %v914_v62 = vadd.f32 %v913_v5, %v909_v34  ;;  %v915_v37 = vadd.f32 %v2473_v13, %v910_v29  ;;  %v8636_v17 = vmov 0  ;;  %v8644_v15 = vld [vmem:[#allocation47_spill] sm:$0xff]  ;;  %v8645_v5 = vld [vmem:[#allocation48_spill] sm:$0xff] }
 0x143   :  { %v918_v63 = vmul.f32 %v2473_v13, %v8635_v0  ;;  %vm4740_vm8 = vcmp.lt.f32.partialorder %v775_v54, %v8598_v30  ;;  %vm4745_vm9 = vcmp.lt.f32.partialorder %v777_v2, %v8603_v1  ;;  %v8639_v58 = vmov 0  ;;  %vm7799_vm5 = vmand %vm4718_vm14, %vm4723_vm6  ;;  %v8646_v29 = vld [vmem:[#allocation27_spill] sm:$0xff] }
 0x144   :  { %v8637_v17 = vsel %vm4740_vm8, 4294967295, %v8636_v17  ;;  %v8640_v58 = vsel %vm4745_vm9, 4294967295, %v8639_v58  ;;  %v2475_v51 = vsel %vm8642_vm7, 1.0, %v8437_v49  ;;  %v920_v30 = vadd.f32 %v2474_v26, %v915_v37  ;;  %vm7797_vm7 = vmand %vm4740_vm8, %vm4745_vm9  ;;  %v8649_v33 = vld [vmem:[#allocation31_spill] sm:$0xff] }
 0x145   :  { %8638 = vst [vmem:[#allocation92_spill] sm:$0xff] %v8637_v17  ;;  %8641 = vst [vmem:[#allocation93_spill] sm:$0xff] %v8640_v58  ;;  %v2476_v1 = vsel %vm8643_vm15, 1.0, %v8437_v49  ;;  %v921_v39 = vmul.f32 %v2474_v26, %v8644_v15  ;;  %v917_v4 = vadd.f32 %v916_v9, %v912_v27  ;;  %v919_v21 = vadd.f32 %v918_v63, %v914_v62  ;;  %v8647_v62 = vld [vmem:[#allocation28_spill] sm:$0xff] }
 0x146   :  { %v923_v54 = vmul.f32 %v2474_v26, %v8645_v5  ;;  %v925_v2 = vadd.f32 %v2475_v51, %v920_v30  ;;  %v2477_v13 = vsel %vm7799_vm5, 1.0, %v8437_v49  ;;  %v2478_v34 = vsel %vm7797_vm7, 1.0, %v8437_v49 }
 0x147   :  { %v926_v9 = vmul.f32 %v2475_v51, %v8646_v29  ;;  %v922_v27 = vadd.f32 %v921_v39, %v917_v4  ;;  %v928_v37 = vmul.f32 %v2475_v51, %v8647_v62  ;;  %v931_v25 = vmul.f32 %v2476_v1, %v8649_v33  ;;  %v8652_v39 = vld [vmem:[#allocation34_spill] sm:$0xff] }
 0x148   :  { %v930_v7 = vadd.f32 %v2476_v1, %v925_v2  ;;  %v924_v26 = vadd.f32 %v923_v54, %v919_v21  ;;  %v933_v11 = vmul.f32 %v2476_v1, %v8650_v44  ;;  %v936_v24 = vmul.f32 %v2477_v13, %v8651_v36 }
 0x149   :  { %v927_v40 = vadd.f32 %v926_v9, %v922_v27  ;;  %v938_v4 = vmul.f32 %v2477_v13, %v8652_v39  ;;  %v941_v54 = vmul.f32 %v2478_v34, %v8565_v55 }
 0x14a   :  { %v935_v63 = vadd.f32 %v2477_v13, %v930_v7  ;;  %v929_v2 = vadd.f32 %v928_v37, %v924_v26  ;;  %v943_v7 = vmul.f32 %v2478_v34, %v8576_v6  ;;  %v8656_v13 = vld [vmem:[#allocation60_spill] sm:$0xff]  ;;  %v8657_v37 = vld [vmem:[#allocation54_spill] sm:$0xff] }
 0x14b   :  { %v932_v58 = vadd.f32 %v931_v25, %v927_v40  ;;  %v8653_v40 = vld [vmem:[#allocation57_spill] sm:$0xff]  ;;  %v8654_v25 = vld [vmem:[#allocation58_spill] sm:$0xff] }
 0x14c   :  { %v4785_v30 = vadd.f32 %v2478_v34, %v935_v63  ;;  %v934_v49 = vadd.f32 %v933_v11, %v929_v2 }
 0x14d   :  { %v937_v21 = vadd.f32 %v936_v24, %v932_v58  ;;  %v8655_v24 = vld [vmem:[#allocation59_spill] sm:$0xff] }
 0x14e   :  { %8648 = vst [vmem:[#allocation94_spill] sm:$0xff] %v4785_v30  ;;  %v945_v17 = vmax.f32 %v4785_v30, 1.0  ;;  %v939_v51 = vadd.f32 %v938_v4, %v934_v49  ;;  %v8658_v49 = vld [vmem:[#allocation38_spill] sm:$0xff] }
 0x14f   :  { %v942_v63 = vadd.f32 %v941_v54, %v937_v21  ;;  %v8659_v21 = vld [vmem:[#allocation61_spill] sm:$0xff] }
 0x150   :  { %2521 = vrcp.f32 %v945_v17  ;;  %v944_v9 = vadd.f32 %v943_v7, %v939_v51 }
 0x15d   :  { %v2522_v27 = vpop.eup %2521 }
 0x15e   :  { %v4794_v26 = vmul.f32 %v2522_v27, %v942_v63  ;;  %v4796_v1 = vmul.f32 %v2522_v27, %v944_v9 }
 0x160   :  { %v4800_v11 = vsub.f32 %v8653_v40, %v4794_v26  ;;  %v4804_v17 = vsub.f32 %v8654_v25, %v4796_v1  ;;  %v4808_v58 = vsub.f32 %v8655_v24, %v4794_v26  ;;  %v4812_v34 = vsub.f32 %v8656_v13, %v4796_v1 }
 0x161   :  { %v4816_v2 = vsub.f32 %v8657_v37, %v4794_v26  ;;  %v4820_v4 = vsub.f32 %v8658_v49, %v4796_v1  ;;  %v4824_v51 = vsub.f32 %v8659_v21, %v4794_v26  ;;  %v4828_v54 = vsub.f32 %v8469_v14, %v4796_v1  ;;  %v8660_v49 = vld [vmem:[#allocation51_spill] sm:$0xff] }
 0x162   :  { %v951_v7 = vand.u32 2147483647, %v4800_v11  ;;  %v952_v63 = vand.u32 2147483647, %v4804_v17  ;;  %v965_v9 = vand.u32 2147483647, %v4808_v58  ;;  %v4837_v23 = vsub.f32 %v8660_v49, %v4794_v26 }
 0x163   :  { %v966_v27 = vand.u32 2147483647, %v4812_v34  ;;  %v979_v30 = vand.u32 2147483647, %v4816_v2  ;;  %v980_v37 = vand.u32 2147483647, %v4820_v4  ;;  %v4844_v13 = vsub.f32 %v8478_v35, %v4796_v1 }
 0x164   :  { %v953_v21 = vadd.f32 %v952_v63, %v951_v7  ;;  %v993_v14 = vand.u32 2147483647, %v4824_v51  ;;  %v994_v59 = vand.u32 2147483647, %v4828_v54  ;;  %v1007_v57 = vand.u32 2147483647, %v4837_v23 }
 0x165   :  { %v967_v16 = vadd.f32 %v966_v27, %v965_v9  ;;  %v981_v25 = vadd.f32 %v980_v37, %v979_v30  ;;  %v4849_v49 = vsub.f32 %v8484_v48, %v4794_v26  ;;  %v1008_v20 = vand.u32 2147483647, %v4844_v13 }
 0x166   :  { %vm954_vm15 = vcmp.gt.f32.partialorder %v953_v21, 1e-12  ;;  %v995_v63 = vadd.f32 %v994_v59, %v993_v14  ;;  %v4854_v37 = vsub.f32 %v8494_v52, %v4796_v1  ;;  %v4859_v14 = vsub.f32 %v8503_v18, %v4794_v26 }
 0x167   :  { %v955_v7 = vsel %vm954_vm15, %v953_v21, 1.0  ;;  %vm968_vm7 = vcmp.gt.f32.partialorder %v967_v16, 1e-12  ;;  %vm982_vm5 = vcmp.gt.f32.partialorder %v981_v25, 1e-12  ;;  %v1009_v35 = vadd.f32 %v1008_v20, %v1007_v57  ;;  %v8661_v57 = vld [vmem:[#allocation71_spill] sm:$0xff] }
 0x168   :  { %2523 = vrcp.f32 %v955_v7  ;;  %v969_v9 = vsel %vm968_vm7, %v967_v16, 1.0  ;;  %v983_v27 = vsel %vm982_vm5, %v981_v25, 1.0  ;;  %vm996_vm9 = vcmp.gt.f32.partialorder %v995_v63, 1e-12 }
 0x169   :  { %2525 = vrcp.f32 %v969_v9  ;;  %v997_v30 = vsel %vm996_vm9, %v995_v63, 1.0  ;;  %v1021_v48 = vand.u32 2147483647, %v4849_v49  ;;  %vm1010_vm15 = vcmp.gt.f32.partialorder %v1009_v35, 1e-12  ;;  %v8662_v9 = vld [vmem:[#allocation75_spill] sm:$0xff] }
 0x16a   :  { %2527 = vrcp.f32 %v983_v27  ;;  %v4863_v59 = vsub.f32 %v8510_v61, %v4796_v1  ;;  %v1011_v16 = vsel %vm1010_vm15, %v1009_v35, 1.0  ;;  %v1022_v20 = vand.u32 2147483647, %v4854_v37 }
 0x16b   :  { %2529 = vrcp.f32 %v997_v30  ;;  %v4868_v25 = vsub.f32 %v8661_v57, %v4794_v26  ;;  %v1035_v21 = vand.u32 2147483647, %v4859_v14  ;;  %v4874_v27 = vsub.f32 %v8662_v9, %v4796_v1 }
 0x16c   :  { %2531 = vrcp.f32 %v1011_v16  ;;  %v1036_v7 = vand.u32 2147483647, %v4863_v59  ;;  %v1023_v63 = vadd.f32 %v1022_v20, %v1021_v48  ;;  %v4879_v35 = vsub.f32 %v8540_v46, %v4794_v26  ;;  %v8663_v16 = vld [vmem:[#allocation56_spill] sm:$0xff] }
 0x16d   :  { %v1049_v61 = vand.u32 2147483647, %v4868_v25  ;;  %v4883_v57 = vsub.f32 %v8545_v3, %v4796_v1  ;;  %v4887_v18 = vsub.f32 %v8663_v16, %v4794_v26  ;;  %v4891_v48 = vsub.f32 %v8564_v41, %v4796_v1 }
 0x16e   :  { %v1037_v30 = vadd.f32 %v1036_v7, %v1035_v21  ;;  %vm1024_vm9 = vcmp.gt.f32.partialorder %v1023_v63, 1e-12  ;;  %v1050_v20 = vand.u32 2147483647, %v4874_v27  ;;  %v1063_v46 = vand.u32 2147483647, %v4879_v35 }
 0x16f   :  { %v1025_v9 = vsel %vm1024_vm9, %v1023_v63, 1.0  ;;  %v1064_v3 = vand.u32 2147483647, %v4883_v57  ;;  %v1077_v16 = vand.u32 2147483647, %v4887_v18  ;;  %v4900_v24 = vsub.f32 %v8566_v19, %v4794_v26 }
 0x170   :  { %vm1038_vm5 = vcmp.gt.f32.partialorder %v1037_v30, 1e-12  ;;  %2533 = vrcp.f32 %v1025_v9  ;;  %v1051_v7 = vadd.f32 %v1050_v20, %v1049_v61  ;;  %v1078_v52 = vand.u32 2147483647, %v4891_v48 }
 0x171   :  { %v1039_v21 = vsel %vm1038_vm5, %v1037_v30, 1.0  ;;  %v1065_v41 = vadd.f32 %v1064_v3, %v1063_v46  ;;  %v4904_v63 = vsub.f32 %v8567_v22, %v4796_v1  ;;  %v1091_v46 = vand.u32 2147483647, %v4900_v24 }
 0x172   :  { %2535 = vrcp.f32 %v1039_v21  ;;  %vm1052_vm7 = vcmp.gt.f32.partialorder %v1051_v7, 1e-12  ;;  %v1079_v61 = vadd.f32 %v1078_v52, %v1077_v16  ;;  %v4912_v52 = vsub.f32 %v3954_v28, %v4794_v26 }
 0x173   :  { %v1053_v30 = vsel %vm1052_vm7, %v1051_v7, 1.0  ;;  %vm1066_vm15 = vcmp.gt.f32.partialorder %v1065_v41, 1e-12  ;;  %v1092_v19 = vand.u32 2147483647, %v4904_v63  ;;  %vm8664_vm7 = vcmp.ge.f32.partialorder %v4804_v17, 0.0 }
 0x174   :  { %2537 = vrcp.f32 %v1053_v30  ;;  %v1067_v3 = vsel %vm1066_vm15, %v1065_v41, 1.0  ;;  %vm1080_vm9 = vcmp.gt.f32.partialorder %v1079_v61, 1e-12  ;;  %vm8665_vm15 = vcmp.ge.f32.partialorder %v4812_v34, 0.0 }
 0x175   :  { %v2524_v9 = vpop.eup %2523  ;;  %2539 = vrcp.f32 %v1067_v3  ;;  %v1081_v22 = vsel %vm1080_vm9, %v1079_v61, 1.0  ;;  %v4938_v17 = vsub.f32 %v8597_v60, %v4796_v1  ;;  %vm8671_vm5 = vcmp.ge.f32.partialorder %v4828_v54, 0.0  ;;  %v8677_v60 = vld [vmem:[#allocation44_spill] sm:$0xff] }
 0x176   :  { %v2526_v20 = vpop.eup %2525  ;;  %v957_v21 = vmul.f32 %v2524_v9, %v4800_v11  ;;  %v4916_v11 = vsub.f32 %v3957_v50, %v4796_v1  ;;  %2541 = vrcp.f32 %v1081_v22 }
 0x177   :  { %v2528_v40 = vpop.eup %2527  ;;  %v971_v45 = vmul.f32 %v2526_v20, %v4808_v58  ;;  %v1093_v20 = vadd.f32 %v1092_v19, %v1091_v46 }
 0x178   :  { %v2530_v53 = vpop.eup %2529  ;;  %v959_v41 = vsub.f32 1.0, %v957_v21  ;;  %v960_v58 = vadd.f32 3.0, %v957_v21  ;;  %v985_v7 = vmul.f32 %v2528_v40, %v4816_v2  ;;  %v1105_v21 = vand.u32 2147483647, %v4912_v52 }
 0x179   :  { %v2532_v16 = vpop.eup %2531  ;;  %v973_v9 = vsub.f32 1.0, %v971_v45  ;;  %v974_v30 = vadd.f32 3.0, %v971_v45  ;;  %v999_v61 = vmul.f32 %v2530_v53, %v4824_v51  ;;  %v1106_v40 = vand.u32 2147483647, %v4916_v11 }
 0x17a   :  { %v1013_v3 = vmul.f32 %v2532_v16, %v4837_v23  ;;  %v961_v2 = vsel %vm8664_vm7, %v959_v41, %v960_v58  ;;  %v987_v45 = vsub.f32 1.0, %v985_v7  ;;  %v988_v22 = vadd.f32 3.0, %v985_v7 }
 0x17b   :  { %vm1094_vm8 = vcmp.gt.f32.partialorder %v1093_v20, 1e-12  ;;  %v975_v53 = vsel %vm8665_vm15, %v973_v9, %v974_v30  ;;  %v1107_v19 = vadd.f32 %v1106_v40, %v1105_v21  ;;  %v4934_v23 = vsub.f32 %v8591_v43, %v4794_v26 }
 0x17c   :  { %v1095_v51 = vsel %vm1094_vm8, %v1093_v20, 1.0  ;;  %v1001_v16 = vsub.f32 1.0, %v999_v61  ;;  %v1002_v28 = vadd.f32 3.0, %v999_v61  ;;  %v1015_v41 = vsub.f32 1.0, %v1013_v3  ;;  %v8666_v61 = vld [vmem:[#allocation21_spill] sm:$0xff] }
 0x17d   :  { %v2534_v50 = vpop.eup %2533  ;;  %2543 = vrcp.f32 %v1095_v51  ;;  %v1016_v58 = vadd.f32 3.0, %v1013_v3  ;;  %vm1108_vm7 = vcmp.gt.f32.partialorder %v1107_v19, 1e-12  ;;  %v1119_v34 = vand.u32 2147483647, %v4934_v23 }
 0x17e   :  { %v1027_v7 = vmul.f32 %v2534_v50, %v4849_v49  ;;  %v1109_v30 = vsel %vm1108_vm7, %v1107_v19, 1.0  ;;  %v1120_v20 = vand.u32 2147483647, %v4938_v17  ;;  %vm8667_vm9 = vnez %v8666_v61 }
 0x17f   :  { %v2536_v46 = vpop.eup %2535  ;;  %2545 = vrcp.f32 %v1109_v30  ;;  %v4949_v3 = vsel %vm8667_vm9, %v961_v2, 1e+09  ;;  %v4954_v49 = vsub.f32 %v8607_v10, %v4794_v26  ;;  %vm8670_vm15 = vcmp.ge.f32.partialorder %v4820_v4, 0.0  ;;  %v8672_v2 = vld [vmem:[#allocation74_spill] sm:$0xff] }
 0x180   :  { %v1041_v9 = vmul.f32 %v2536_v46, %v4859_v14  ;;  %v1121_v50 = vadd.f32 %v1120_v20, %v1119_v34  ;;  %v8668_v14 = vld [vmem:[#allocation53_spill] sm:$0xff]  ;;  %v989_v19 = vsel %vm8670_vm15, %v987_v45, %v988_v22  ;;  %v1003_v46 = vsel %vm8671_vm5, %v1001_v16, %v1002_v28  ;;  %v8674_v45 = vld [vmem:[#allocation72_spill] sm:$0xff] }
 0x181   :  { %v2538_v21 = vpop.eup %2537  ;;  %vm8669_vm7 = vnez %v8668_v14  ;;  %v4966_v30 = vsub.f32 %v8672_v2, %v4796_v1  ;;  %vm8673_vm9 = vcmp.ge.f32.partialorder %v4844_v13, 0.0  ;;  %v1029_v20 = vsub.f32 1.0, %v1027_v7 }
 0x182   :  { %v1055_v40 = vmul.f32 %v2538_v21, %v4868_v25  ;;  %v4958_v51 = vsel %vm8669_vm7, %v975_v53, 1e+09  ;;  %v2540_v25 = vpop.eup %2539  ;;  %v1017_v34 = vsel %vm8673_vm9, %v1015_v41, %v1016_v58  ;;  %v1030_v21 = vadd.f32 3.0, %v1027_v7  ;;  %v8675_v41 = vld [vmem:[#allocation64_spill] sm:$0xff] }
 0x183   :  { %v1043_v61 = vsub.f32 1.0, %v1041_v9  ;;  %vm1122_vm8 = vcmp.gt.f32.partialorder %v1121_v50, 1e-12  ;;  %v1133_v53 = vand.u32 2147483647, %v4954_v49  ;;  %v4974_v54 = vsub.f32 %v8674_v45, %v4794_v26  ;;  %v2542_v28 = vpop.eup %2541 }
 0x184   :  { %v1134_v4 = vand.u32 2147483647, %v4966_v30  ;;  %v1044_v22 = vadd.f32 3.0, %v1041_v9  ;;  %v1057_v16 = vsub.f32 1.0, %v1055_v40  ;;  %v1058_v14 = vadd.f32 3.0, %v1055_v40  ;;  %v8679_v40 = vld [vmem:[#allocation46_spill] sm:$0xff] }
 0x185   :  { %v4980_v13 = vsub.f32 %v8612_v31, %v4796_v1  ;;  %vm8676_vm7 = vnez %v8675_v41  ;;  %v1069_v7 = vmul.f32 %v2540_v25, %v4879_v35  ;;  %v1123_v45 = vsel %vm1122_vm8, %v1121_v50, 1.0 }
 0x186   :  { %v4984_v58 = vsel %vm8676_vm7, %v989_v19, 1e+09  ;;  %v1135_v2 = vadd.f32 %v1134_v4, %v1133_v53  ;;  %vm8678_vm9 = vnez %v8677_v60  ;;  %vm8680_vm5 = vnez %v8679_v40 }
 0x187   :  { %v4989_v9 = vsel %vm8678_vm9, %v1003_v46, 1e+09  ;;  %v4993_v10 = vsel %vm8680_vm5, %v1017_v34, 1e+09  ;;  %vm8681_vm15 = vcmp.ge.f32.partialorder %v4854_v37, 0.0  ;;  %2547 = vrcp.f32 %v1123_v45 }
 0x188   :  { %v1031_v31 = vsel %vm8681_vm15, %v1029_v20, %v1030_v21  ;;  %v1083_v41 = vmul.f32 %v2542_v28, %v4887_v18  ;;  %vm1136_vm7 = vcmp.gt.f32.partialorder %v1135_v2, 1e-12  ;;  %v1147_v19 = vand.u32 2147483647, %v4974_v54 }
 0x189   :  { %v5001_v35 = vsub.f32 %v8613_v32, %v4794_v26  ;;  %vm8682_vm8 = vcmp.ge.f32.partialorder %v4863_v59, 0.0  ;;  %vm8683_vm9 = vcmp.ge.f32.partialorder %v4874_v27, 0.0  ;;  %v1137_v46 = vsel %vm1136_vm7, %v1135_v2, 1.0 }
 0x18a   :  { %v1045_v60 = vsel %vm8682_vm8, %v1043_v61, %v1044_v22  ;;  %v1059_v50 = vsel %vm8683_vm9, %v1057_v16, %v1058_v14  ;;  %v1148_v37 = vand.u32 2147483647, %v4980_v13  ;;  %v2544_v25 = vpop.eup %2543  ;;  %v1071_v34 = vsub.f32 1.0, %v1069_v7 }
 0x18b   :  { %2549 = vrcp.f32 %v1137_v46  ;;  %v5010_v18 = vsub.f32 %v8614_v8, %v4796_v1  ;;  %v1161_v20 = vand.u32 2147483647, %v5001_v35  ;;  %v1072_v21 = vadd.f32 3.0, %v1069_v7  ;;  %v8684_v7 = vld [vmem:[#allocation52_spill] sm:$0xff] }
 0x18c   :  { %v1149_v53 = vadd.f32 %v1148_v37, %v1147_v19  ;;  %v5015_v59 = vsub.f32 %v8615_v47, %v4794_v26  ;;  %v5019_v27 = vsub.f32 %v8617_v42, %v4796_v1  ;;  %v1085_v2 = vsub.f32 1.0, %v1083_v41  ;;  %v2546_v28 = vpop.eup %2545  ;;  %v8688_v42 = vld [vmem:[#allocation24_spill] sm:$0xff] }
 0x18d   :  { %v1086_v61 = vadd.f32 3.0, %v1083_v41  ;;  %v1162_v4 = vand.u32 2147483647, %v5010_v18  ;;  %v5024_v45 = vsub.f32 %v8621_v56, %v4794_v26  ;;  %v1097_v22 = vmul.f32 %v2544_v25, %v4900_v24  ;;  %v8686_v24 = vld [vmem:[#allocation23_spill] sm:$0xff] }
 0x18e   :  { %vm1150_vm15 = vcmp.gt.f32.partialorder %v1149_v53, 1e-12  ;;  %v1175_v16 = vand.u32 2147483647, %v5015_v59  ;;  %v5031_v14 = vsub.f32 %v8622_v38, %v4796_v1  ;;  %vm8685_vm7 = vnez %v8684_v7 }
 0x18f   :  { %v5035_v40 = vsel %vm8685_vm7, %v1031_v31, 1e+09  ;;  %v1151_v41 = vsel %vm1150_vm15, %v1149_v53, 1.0  ;;  %v1163_v19 = vadd.f32 %v1162_v4, %v1161_v20  ;;  %v1176_v46 = vand.u32 2147483647, %v5019_v27 }
 0x190   :  { %vm8687_vm9 = vnez %v8686_v24  ;;  %v1111_v25 = vmul.f32 %v2546_v28, %v4912_v52  ;;  %2551 = vrcp.f32 %v1151_v41  ;;  %v1189_v38 = vand.u32 2147483647, %v5024_v45 }
 0x191   :  { %v5041_v37 = vsel %vm8687_vm9, %v1045_v60, 1e+09  ;;  %vm8689_vm5 = vnez %v8688_v42  ;;  %vm8690_vm7 = vcmp.ge.f32.partialorder %v4883_v57, 0.0  ;;  %vm8691_vm15 = vcmp.ge.f32.partialorder %v4891_v48, 0.0 }
 0x192   :  { %v5047_v7 = vsel %vm8689_vm5, %v1059_v50, 1e+09  ;;  %v1073_v31 = vsel %vm8690_vm7, %v1071_v34, %v1072_v21  ;;  %v1087_v20 = vsel %vm8691_vm15, %v1085_v2, %v1086_v61  ;;  %vm1164_vm8 = vcmp.gt.f32.partialorder %v1163_v19, 1e-12 }
 0x193   :  { %v1099_v53 = vsub.f32 1.0, %v1097_v22  ;;  %v1165_v4 = vsel %vm1164_vm8, %v1163_v19, 1.0  ;;  %v1177_v60 = vadd.f32 %v1176_v46, %v1175_v16  ;;  %v1190_v24 = vand.u32 2147483647, %v5031_v14 }
 0x194   :  { %v1100_v52 = vadd.f32 3.0, %v1097_v22  ;;  %2553 = vrcp.f32 %v1165_v4  ;;  %v5056_v28 = vsub.f32 %v8634_v12, %v4794_v26  ;;  %v5060_v42 = vsub.f32 %v8635_v0, %v4796_v1  ;;  %v2548_v34 = vpop.eup %2547 }
 0x195   :  { %v1113_v57 = vsub.f32 1.0, %v1111_v25  ;;  %vm1178_vm5 = vcmp.gt.f32.partialorder %v1177_v60, 1e-12  ;;  %v1191_v48 = vadd.f32 %v1190_v24, %v1189_v38  ;;  %v5064_v50 = vsub.f32 %v8644_v15, %v4794_v26 }
 0x196   :  { %v1114_v21 = vadd.f32 3.0, %v1111_v25  ;;  %v1179_v2 = vsel %vm1178_vm5, %v1177_v60, 1.0  ;;  %v1203_v61 = vand.u32 2147483647, %v5056_v28  ;;  %v1204_v22 = vand.u32 2147483647, %v5060_v42 }
 0x197   :  { %v1125_v16 = vmul.f32 %v2548_v34, %v4934_v23  ;;  %2555 = vrcp.f32 %v1179_v2  ;;  %vm1192_vm7 = vcmp.gt.f32.partialorder %v1191_v48, 1e-12  ;;  %v5073_v38 = vsub.f32 %v8645_v5, %v4796_v1  ;;  %v8692_v60 = vld [vmem:[#allocation55_spill] sm:$0xff] }
 0x198   :  { %v1193_v41 = vsel %vm1192_vm7, %v1191_v48, 1.0  ;;  %v1205_v19 = vadd.f32 %v1204_v22, %v1203_v61  ;;  %v1217_v46 = vand.u32 2147483647, %v5064_v50  ;;  %v5078_v25 = vsub.f32 %v8646_v29, %v4794_v26  ;;  %v2550_v4 = vpop.eup %2549  ;;  %v8694_v23 = vld [vmem:[#allocation79_spill] sm:$0xff] }
 0x199   :  { %vm8693_vm15 = vnez %v8692_v60  ;;  %vm8695_vm5 = vnez %v8694_v23  ;;  %2557 = vrcp.f32 %v1193_v41  ;;  %v1218_v2 = vand.u32 2147483647, %v5073_v38 }
 0x19a   :  { %v5082_v24 = vsel %vm8693_vm15, %v1073_v31, 1e+09  ;;  %v5086_v34 = vsel %vm8695_vm5, %v1087_v20, 1e+09  ;;  %vm8696_vm7 = vcmp.ge.f32.partialorder %v4904_v63, 0.0  ;;  %v1139_v61 = vmul.f32 %v2550_v4, %v4954_v49 }
 0x19b   :  { %v1101_v48 = vsel %vm8696_vm7, %v1099_v53, %v1100_v52  ;;  %vm1206_vm9 = vcmp.gt.f32.partialorder %v1205_v19, 1e-12  ;;  %v5094_v22 = vsub.f32 %v8647_v62, %v4796_v1  ;;  %vm8697_vm15 = vcmp.ge.f32.partialorder %v4916_v11, 0.0 }
 0x19c   :  { %v1115_v31 = vsel %vm8697_vm15, %v1113_v57, %v1114_v21  ;;  %v1207_v60 = vsel %vm1206_vm9, %v1205_v19, 1.0  ;;  %v1219_v23 = vadd.f32 %v1218_v2, %v1217_v46  ;;  %v1231_v20 = vand.u32 2147483647, %v5078_v25  ;;  %v8700_v2 = vld [vmem:[#allocation22_spill] sm:$0xff] }
 0x19d   :  { %v1127_v41 = vsub.f32 1.0, %v1125_v16  ;;  %v1128_v29 = vadd.f32 3.0, %v1125_v16  ;;  %v1141_v5 = vsub.f32 1.0, %v1139_v61  ;;  %2559 = vrcp.f32 %v1207_v60  ;;  %v2552_v53 = vpop.eup %2551  ;;  %v8698_v16 = vld [vmem:[#allocation17_spill] sm:$0xff] }
 0x19e   :  { %v1142_v63 = vadd.f32 3.0, %v1139_v61  ;;  %vm1220_vm8 = vcmp.gt.f32.partialorder %v1219_v23, 1e-12  ;;  %v1232_v49 = vand.u32 2147483647, %v5094_v22  ;;  %v5104_v11 = vsub.f32 %v8649_v33, %v4794_v26  ;;  %v8772_v33 = vld [vmem:[#allocation92_spill] sm:$0xff] }
 0x19f   :  { %v1221_v52 = vsel %vm1220_vm8, %v1219_v23, 1.0  ;;  %v5109_v57 = vsub.f32 %v8650_v44, %v4796_v1  ;;  %v5113_v21 = vsub.f32 %v8651_v36, %v4794_v26  ;;  %vm8699_vm15 = vnez %v8698_v16 }
 0x1a0   :  { %v5117_v19 = vsel %vm8699_vm15, %v1101_v48, 1e+09  ;;  %v1153_v46 = vmul.f32 %v2552_v53, %v4974_v54  ;;  %2561 = vrcp.f32 %v1221_v52  ;;  %v1233_v4 = vadd.f32 %v1232_v49, %v1231_v20 }
 0x1a1   :  { %vm8701_vm7 = vnez %v8700_v2  ;;  %vm1196_vm8 = vcmp.ge.f32.partialorder %v5031_v14, 0.0  ;;  %v1245_v60 = vand.u32 2147483647, %v5104_v11  ;;  %v1246_v23 = vand.u32 2147483647, %v5109_v57  ;;  %v2554_v48 = vpop.eup %2553 }
 0x1a2   :  { %v5122_v61 = vsel %vm8701_vm7, %v1115_v31, 1e+09  ;;  %v5129_v36 = vsub.f32 %v8652_v39, %v4796_v1  ;;  %vm8702_vm15 = vcmp.ge.f32.partialorder %v4938_v17, 0.0  ;;  %vm8703_vm9 = vcmp.ge.f32.partialorder %v4966_v30, 0.0 }
 0x1a3   :  { %v1129_v54 = vsel %vm8702_vm15, %v1127_v41, %v1128_v29  ;;  %v1143_v20 = vsel %vm8703_vm9, %v1141_v5, %v1142_v63  ;;  %vm1234_vm5 = vcmp.gt.f32.partialorder %v1233_v4, 1e-12  ;;  %v1259_v31 = vand.u32 2147483647, %v5113_v21 }
 0x1a4   :  { %v1167_v49 = vmul.f32 %v2554_v48, %v5001_v35  ;;  %v1235_v53 = vsel %vm1234_vm5, %v1233_v4, 1.0  ;;  %v1247_v52 = vadd.f32 %v1246_v23, %v1245_v60  ;;  %v1260_v16 = vand.u32 2147483647, %v5129_v36  ;;  %v2556_v29 = vpop.eup %2555  ;;  %v8704_v4 = vld [vmem:[#allocation41_spill] sm:$0xff] }
 0x1a5   :  { %v1155_v2 = vsub.f32 1.0, %v1153_v46  ;;  %v1156_v44 = vadd.f32 3.0, %v1153_v46  ;;  %2563 = vrcp.f32 %v1235_v53  ;;  %v5140_v39 = vsub.f32 %v8565_v55, %v4794_v26 }
 0x1a6   :  { %v1169_v17 = vsub.f32 1.0, %v1167_v49  ;;  %v1170_v30 = vadd.f32 3.0, %v1167_v49  ;;  %vm1248_vm9 = vcmp.gt.f32.partialorder %v1247_v52, 1e-12  ;;  %v1181_v5 = vmul.f32 %v2556_v29, %v5015_v59  ;;  %v2558_v46 = vpop.eup %2557 }
 0x1a7   :  { %v1249_v35 = vsel %vm1248_vm9, %v1247_v52, 1.0  ;;  %v1261_v41 = vadd.f32 %v1260_v16, %v1259_v31  ;;  %v5146_v63 = vsub.f32 %v8576_v6, %v4796_v1  ;;  %vm8705_vm5 = vnez %v8704_v4 }
 0x1a8   :  { %v5150_v60 = vsel %vm8705_vm5, %v1129_v54, 1e+09  ;;  %v5154_v23 = vsel %vm4433_vm2, %v1143_v20, 1e+09  ;;  %2565 = vrcp.f32 %v1249_v35  ;;  %v1273_v59 = vand.u32 2147483647, %v5140_v39 }
 0x1a9   :  { %vm8707_vm9 = vcmp.ge.f32.partialorder %v4980_v13, 0.0  ;;  %v1183_v31 = vsub.f32 1.0, %v1181_v5  ;;  %v1184_v1 = vadd.f32 3.0, %v1181_v5  ;;  %v1195_v49 = vmul.f32 %v2558_v46, %v5024_v45  ;;  %v8729_v45 = vld [vmem:[#allocation60_spill] sm:$0xff]  ;;  %v8731_v35 = vld [vmem:[#allocation87_spill] sm:$0xff]  ;;  %v8738_v20 = vld [vmem:[#allocation54_spill] sm:$0xff] }
 0x1aa   :  { %v1157_v48 = vsel %vm8707_vm9, %v1155_v2, %v1156_v44  ;;  %vm8708_vm7 = vcmp.ge.f32.partialorder %v5010_v18, 0.0  ;;  %vm1262_vm5 = vcmp.gt.f32.partialorder %v1261_v41, 1e-12  ;;  %v1274_v53 = vand.u32 2147483647, %v5146_v63  ;;  %v2560_v52 = vpop.eup %2559 }
 0x1ab   :  { %v1171_v54 = vsel %vm8708_vm7, %v1169_v17, %v1170_v30  ;;  %vm5166_vm2 = vcmp.lt.f32.partialorder %v4958_v51, %v4949_v3  ;;  %vm8711_vm15 = vcmp.ge.f32.partialorder %v5019_v27, 0.0  ;;  %v1197_v13 = vsub.f32 1.0, %v1195_v49  ;;  %v8715_v27 = vld [vmem:[#allocation45_spill] sm:$0xff] }
 0x1ac   :  { %v1185_v44 = vsel %vm8711_vm15, %v1183_v31, %v1184_v1  ;;  %v1198_v16 = vadd.f32 3.0, %v1195_v49  ;;  %v1263_v2 = vsel %vm1262_vm5, %v1261_v41, 1.0  ;;  %v5174_v18 = vsel %vm4596_vm3, %v1157_v48, 1e+09  ;;  %v8718_v1 = vld [vmem:[#allocation57_spill] sm:$0xff]  ;;  %v8719_v49 = vld [vmem:[#allocation59_spill] sm:$0xff] }
 0x1ad   :  { %v1209_v29 = vmul.f32 %v2560_v52, %v5056_v28  ;;  %vm1238_vm7 = vcmp.ge.f32.partialorder %v5094_v22, 0.0  ;;  %2567 = vrcp.f32 %v1263_v2  ;;  %v1275_v17 = vadd.f32 %v1274_v53, %v1273_v59  ;;  %v2562_v4 = vpop.eup %2561  ;;  %v8720_v52 = vld [vmem:[#allocation73_spill] sm:$0xff]  ;;  %v8728_v2 = vld [vmem:[#allocation58_spill] sm:$0xff] }
 0x1ae   :  { %v5180_v5 = vsel %vm4630_vm1, %v1171_v54, 1e+09  ;;  %vm8716_vm15 = vnez %v8715_v27  ;;  %v1199_v46 = vsel %vm1196_vm8, %v1197_v13, %v1198_v16  ;;  %v1286_v28 = vsel %vm5166_vm2, %v4958_v51, %v4949_v3 }
 0x1af   :  { %vm8717_vm9 = vmand %vm8608_vm4, %vm8716_vm15  ;;  %v1211_v26 = vsub.f32 1.0, %v1209_v29  ;;  %v1212_v59 = vadd.f32 3.0, %v1209_v29  ;;  %vm1276_vm3 = vcmp.gt.f32.partialorder %v1275_v17, 1e-12  ;;  %v1287_v48 = vsel %vm5166_vm2, %v4949_v3, %v4958_v51 }
 0x1b0   :  { %v5187_v41 = vsel %vm8717_vm9, %v1185_v44, 1e+09  ;;  %v1223_v31 = vmul.f32 %v2562_v4, %v5064_v50  ;;  %vm1252_vm1 = vcmp.ge.f32.partialorder %v5109_v57, 0.0  ;;  %v1277_v14 = vsel %vm1276_vm3, %v1275_v17, 1.0  ;;  %v8722_v44 = vld [vmem:[#allocation86_spill] sm:$0xff] }
 0x1b1   :  { %v1288_v54 = vsel %vm5166_vm2, %v8719_v49, %v8718_v1  ;;  %v1289_v53 = vsel %vm5166_vm2, %v8718_v1, %v8719_v49  ;;  %vm8721_vm4 = vnez %v8720_v52  ;;  %vm8723_vm8 = vnez %v8722_v44  ;;  %v8744_v49 = vld [vmem:[#allocation68_spill] sm:$0xff]  ;;  %v8748_v52 = vld [vmem:[#allocation38_spill] sm:$0xff] }
 0x1b2   :  { %vm8724_vm5 = vmand %vm8721_vm4, %vm8723_vm8  ;;  %vm8725_vm15 = vcmp.ge.f32.partialorder %v5060_v42, 0.0  ;;  %2569 = vrcp.f32 %v1277_v14  ;;  %vm5220_vm9 = vcmp.lt.f32.partialorder %v4989_v9, %v4984_v58  ;;  %v1225_v13 = vsub.f32 1.0, %v1223_v31  ;;  %v2564_v17 = vpop.eup %2563  ;;  %v8739_v14 = vld [vmem:[#allocation61_spill] sm:$0xff]  ;;  %v8749_v44 = vld [vmem:[#allocation42_spill] sm:$0xff] }
 0x1b3   :  { %v5214_v3 = vsel %vm8724_vm5, %v1199_v46, 1e+09  ;;  %v1213_v51 = vsel %vm8725_vm15, %v1211_v26, %v1212_v59  ;;  %v1226_v16 = vadd.f32 3.0, %v1223_v31  ;;  %v1290_v29 = vsel %vm5166_vm2, %v8729_v45, %v8728_v2 }
 0x1b4   :  { %v1293_v42 = vsel %vm5220_vm9, %v4989_v9, %v4984_v58  ;;  %vm8732_vm3 = vnez %v8731_v35  ;;  %v1291_v46 = vsel %vm5166_vm2, %v8728_v2, %v8729_v45  ;;  %v1294_v4 = vsel %vm5220_vm9, %v4984_v58, %v4989_v9  ;;  %v8742_v9 = vld [vmem:[#allocation89_spill] sm:$0xff] }
 0x1b5   :  { %vm8733_vm4 = vmand %vm8616_vm12, %vm8732_vm3  ;;  %vm5249_vm8 = vcmp.lt.f32.partialorder %v5035_v40, %v4993_v10  ;;  %vm8737_vm12 = vcmp.ge.f32.partialorder %v5073_v38, 0.0  ;;  %v1237_v31 = vmul.f32 %v2564_v17, %v5078_v25  ;;  %vm1266_vm5 = vcmp.ge.f32.partialorder %v5129_v36, 0.0  ;;  %v8764_v36 = vld [vmem:[#allocation66_spill] sm:$0xff] }
 0x1b6   :  { %v5237_v27 = vsel %vm8733_vm4, %v1213_v51, 1e+09  ;;  %v1227_v59 = vsel %vm8737_vm12, %v1225_v13, %v1226_v16  ;;  %v1295_v1 = vsel %vm5220_vm9, %v8739_v14, %v8738_v20  ;;  %vm5261_vm2 = vcmp.lt.f32.partialorder %v1293_v42, %v1286_v28  ;;  %v2566_v16 = vpop.eup %2565 }
 0x1b7   :  { %8734 = vst [vmem:[#allocation21_spill] sm:$0xff] %v5237_v27  ;;  %vm8743_vm15 = vnez %v8742_v9  ;;  %vm8745_vm3 = vnez %v8744_v49  ;;  %v1296_v25 = vsel %vm5220_vm9, %v8738_v20, %v8739_v14  ;;  %v1297_v51 = vsel %vm5220_vm9, %v8749_v44, %v8748_v52  ;;  %v8761_v49 = vld [vmem:[#allocation63_spill] sm:$0xff] }
 0x1b8   :  { %vm8746_vm4 = vmand %vm8743_vm15, %vm8745_vm3  ;;  %v1298_v13 = vsel %vm5220_vm9, %v8748_v52, %v8749_v44  ;;  %v1239_v2 = vsub.f32 1.0, %v1237_v31  ;;  %v1240_v45 = vadd.f32 3.0, %v1237_v31  ;;  %v5286_v17 = vsel %vm5261_vm2, %v1293_v42, %v1286_v28 }
 0x1b9   :  { %v5270_v38 = vsel %vm8746_vm4, %v1227_v59, 1e+09  ;;  %v1301_v30 = vsel %vm5261_vm2, %v1286_v28, %v1293_v42  ;;  %v1251_v35 = vmul.f32 %v2566_v16, %v5104_v11  ;;  %v5293_v59 = vsel %vm5261_vm2, %v1295_v1, %v1288_v54 }
 0x1ba   :  { %8747 = vst [vmem:[#allocation53_spill] sm:$0xff] %v5270_v38  ;;  %v1303_v50 = vsel %vm5261_vm2, %v1288_v54, %v1295_v1  ;;  %vm5297_vm9 = vcmp.lt.f32.partialorder %v1294_v4, %v1287_v48  ;;  %v1241_v31 = vsel %vm1238_vm7, %v1239_v2, %v1240_v45  ;;  %vm1280_vm12 = vcmp.ge.f32.partialorder %v5146_v63, 0.0  ;;  %v2568_v9 = vpop.eup %2567  ;;  %vm8754_vm7 = vmand %vm4638_vm0, %vm4643_vm13 }
 0x1bb   :  { %v5306_v28 = vsel %vm5261_vm2, %v1297_v51, %v1290_v29  ;;  %v1305_v11 = vsel %vm5261_vm2, %v1290_v29, %v1297_v51  ;;  %v1307_v42 = vsel %vm5297_vm9, %v1294_v4, %v1287_v48  ;;  %v1253_v54 = vsub.f32 1.0, %v1251_v35  ;;  %vm8758_vm0 = vmand %vm4691_vm10, %vm4703_vm11 }
 0x1bc   :  { %v1254_v14 = vadd.f32 3.0, %v1251_v35  ;;  %v5314_v1 = vsel %vm5297_vm9, %v1287_v48, %v1294_v4  ;;  %v1321_v22 = vsel %vm5249_vm8, %v5035_v40, %v4993_v10  ;;  %v5325_v29 = vsel %vm8754_vm7, %v1241_v31, 1e+09  ;;  %vm8770_vm11 = vmand %vm4718_vm14, %vm4723_vm6 }
 0x1bd   :  { %8755 = vst [vmem:[#allocation64_spill] sm:$0xff] %v5325_v29  ;;  %v1309_v58 = vsel %vm5297_vm9, %v1296_v25, %v1289_v53  ;;  %v5331_v48 = vsel %vm5297_vm9, %v1289_v53, %v1296_v25  ;;  %vm1313_vm2 = vcmp.lt.f32.partialorder %v1301_v30, %v1307_v42  ;;  %v1265_v44 = vmul.f32 %v2568_v9, %v5113_v21  ;;  %v8760_v9 = vld [vmem:[#allocation51_spill] sm:$0xff] }
 0x1be   :  { %v1255_v4 = vsel %vm1252_vm1, %v1253_v54, %v1254_v14  ;;  %v1311_v51 = vsel %vm5297_vm9, %v1298_v13, %v1291_v46  ;;  %v5340_v16 = vsel %vm5297_vm9, %v1291_v46, %v1298_v13  ;;  %v5349_v25 = vsel %vm1313_vm2, %v1301_v30, %v1307_v42 }
 0x1bf   :  { %v5347_v53 = vsel %vm8758_vm0, %v1255_v4, 1e+09  ;;  %v1315_v57 = vsel %vm1313_vm2, %v1307_v42, %v1301_v30  ;;  %v1322_v21 = vsel %vm5249_vm8, %v4993_v10, %v5035_v40  ;;  %v1267_v35 = vsub.f32 1.0, %v1265_v44  ;;  %v2570_v13 = vpop.eup %2569  ;;  %v8763_v42 = vld [vmem:[#allocation65_spill] sm:$0xff] }
 0x1c0   :  { %8759 = vst [vmem:[#allocation44_spill] sm:$0xff] %v5347_v53  ;;  %v1268_v31 = vadd.f32 3.0, %v1265_v44  ;;  %v5355_v20 = vsel %vm1313_vm2, %v1303_v50, %v1309_v58  ;;  %v1317_v46 = vsel %vm1313_vm2, %v1309_v58, %v1303_v50  ;;  %v5357_v54 = vsel %vm1313_vm2, %v1305_v11, %v1311_v51  ;;  %v8765_v44 = vld [vmem:[#allocation71_spill] sm:$0xff] }
 0x1c1   :  { %v1319_v14 = vsel %vm1313_vm2, %v1311_v51, %v1305_v11  ;;  %v1323_v52 = vsel %vm5249_vm8, %v8761_v49, %v8760_v9  ;;  %vm1327_vm13 = vcmp.lt.f32.partialorder %v5047_v7, %v5041_v37  ;;  %v1279_v40 = vmul.f32 %v2570_v13, %v5140_v39  ;;  %v8762_v11 = vld [vmem:[#allocation49_spill] sm:$0xff] }
 0x1c2   :  { %v1269_v10 = vsel %vm1266_vm5, %v1267_v35, %v1268_v31  ;;  %v1324_v30 = vsel %vm5249_vm8, %v8760_v9, %v8761_v49  ;;  %v1328_v50 = vsel %vm1327_vm13, %v5047_v7, %v5041_v37  ;;  %v1325_v58 = vsel %vm5249_vm8, %v8763_v42, %v8762_v11  ;;  %v8766_v35 = vld [vmem:[#allocation67_spill] sm:$0xff] }
 0x1c3   :  { %v1329_v4 = vsel %vm1327_vm13, %v5041_v37, %v5047_v7  ;;  %v1330_v51 = vsel %vm1327_vm13, %v8765_v44, %v8764_v36  ;;  %v1331_v39 = vsel %vm1327_vm13, %v8764_v36, %v8765_v44  ;;  %v1281_v2 = vsub.f32 1.0, %v1279_v40  ;;  %v8767_v31 = vld [vmem:[#allocation75_spill] sm:$0xff] }
 0x1c4   :  { %v1282_v45 = vadd.f32 3.0, %v1279_v40  ;;  %v1332_v13 = vsel %vm1327_vm13, %v8767_v31, %v8766_v35  ;;  %vm1334_vm10 = vcmp.lt.f32.partialorder %v1328_v50, %v1321_v22  ;;  %v5391_v6 = vsel %vm8770_vm11, %v1269_v10, 1e+09 }
 0x1c5   :  { %8771 = vst [vmem:[#allocation46_spill] sm:$0xff] %v5391_v6  ;;  %v1326_v37 = vsel %vm5249_vm8, %v8762_v11, %v8763_v42  ;;  %v1333_v7 = vsel %vm1327_vm13, %v8766_v35, %v8767_v31  ;;  %v1336_v40 = vsel %vm1334_vm10, %v1321_v22, %v1328_v50  ;;  %v1335_v44 = vsel %vm1334_vm10, %v1328_v50, %v1321_v22  ;;  %v8774_v6 = vld [vmem:[#allocation93_spill] sm:$0xff] }
 0x1c6   :  { %v1283_v36 = vsel %vm1280_vm12, %v1281_v2, %v1282_v45  ;;  %v1337_v55 = vsel %vm1334_vm10, %v1330_v51, %v1323_v52  ;;  %vm1341_vm1 = vcmp.lt.f32.partialorder %v1329_v4, %v1322_v21  ;;  %v1338_v9 = vsel %vm1334_vm10, %v1323_v52, %v1330_v51 }
 0x1c7   :  { %v1339_v49 = vsel %vm1334_vm10, %v1332_v13, %v1325_v58  ;;  %v1342_v62 = vsel %vm1341_vm1, %v1329_v4, %v1322_v21  ;;  %v1344_v10 = vsel %vm1341_vm1, %v1331_v39, %v1324_v30  ;;  %vm8773_vm6 = vnez %v8772_v33 }
 0x1c8   :  { %vm8775_vm14 = vnez %v8774_v6  ;;  %v1340_v11 = vsel %vm1334_vm10, %v1325_v58, %v1332_v13  ;;  %v1346_v42 = vsel %vm1341_vm1, %v1333_v7, %v1326_v37  ;;  %vm1348_vm8 = vcmp.lt.f32.partialorder %v1336_v40, %v1342_v62 }
 0x1c9   :  { %vm8776_vm5 = vmand %vm8773_vm6, %vm8775_vm14  ;;  %v1343_v35 = vsel %vm1341_vm1, %v1322_v21, %v1329_v4  ;;  %v1345_v63 = vsel %vm1341_vm1, %v1324_v30, %v1331_v39  ;;  %v1347_v2 = vsel %vm1341_vm1, %v1326_v37, %v1333_v7  ;;  %v1350_v22 = vsel %vm1348_vm8, %v1342_v62, %v1336_v40 }
 0x1ca   :  { %v5406_v26 = vsel %vm8776_vm5, %v1283_v36, 1e+09  ;;  %v1349_v50 = vsel %vm1348_vm8, %v1336_v40, %v1342_v62  ;;  %v1352_v45 = vsel %vm1348_vm8, %v1344_v10, %v1338_v9  ;;  %vm1355_vm15 = vcmp.lt.f32.partialorder %v1335_v44, %v5286_v17 }
 0x1cb   :  { %8777 = vst [vmem:[#allocation52_spill] sm:$0xff] %v5406_v26  ;;  %vm5409_vm3 = vcmp.lt.f32.partialorder %v1350_v22, %v1315_v57  ;;  %v1351_v33 = vsel %vm1348_vm8, %v1338_v9, %v1344_v10  ;;  %v1353_v6 = vsel %vm1348_vm8, %v1340_v11, %v1346_v42  ;;  %v1354_v51 = vsel %vm1348_vm8, %v1346_v42, %v1340_v11 }
 0x1cc   :  { %v1357_v31 = vsel %vm1355_vm15, %v5286_v17, %v1335_v44  ;;  %v5415_v58 = vsel %vm1355_vm15, %v1335_v44, %v5286_v17  ;;  %v5418_v21 = vsel %vm1355_vm15, %v1337_v55, %v5293_v59  ;;  %v1359_v62 = vsel %vm1355_vm15, %v5293_v59, %v1337_v55 }
 0x1cd   :  { %v1363_v30 = vsel %vm5409_vm3, %v1350_v22, %v1315_v57  ;;  %v5424_v4 = vsel %vm1355_vm15, %v1339_v49, %v5306_v28  ;;  %v1361_v39 = vsel %vm1355_vm15, %v5306_v28, %v1339_v49  ;;  %v1364_v13 = vsel %vm5409_vm3, %v1315_v57, %v1350_v22 }
 0x1ce   :  { %v1365_v17 = vsel %vm5409_vm3, %v1352_v45, %v1317_v46  ;;  %v1366_v37 = vsel %vm5409_vm3, %v1317_v46, %v1352_v45  ;;  %v1367_v55 = vsel %vm5409_vm3, %v1354_v51, %v1319_v14  ;;  %vm1369_vm4 = vcmp.lt.f32.partialorder %v1357_v31, %v1363_v30 }
 0x1cf   :  { %vm5436_vm9 = vcmp.lt.f32.partialorder %v1349_v50, %v5349_v25  ;;  %v1368_v28 = vsel %vm5409_vm3, %v1319_v14, %v1354_v51  ;;  %v1370_v7 = vsel %vm1369_vm4, %v1357_v31, %v1363_v30  ;;  %vm5443_vm12 = vcmp.lt.f32.partialorder %v1343_v35, %v5314_v1 }
 0x1d0   :  { %vm5449_vm7 = vcmp.lt.f32.partialorder %v5086_v34, %v5082_v24  ;;  %v1371_v40 = vsel %vm1369_vm4, %v1363_v30, %v1357_v31  ;;  %v1372_v36 = vsel %vm1369_vm4, %v1359_v62, %v1365_v17  ;;  %v1377_v44 = vsel %vm5436_vm9, %v1349_v50, %v5349_v25 }
 0x1d1   :  { %v1378_v14 = vsel %vm5436_vm9, %v5349_v25, %v1349_v50  ;;  %v1373_v9 = vsel %vm1369_vm4, %v1365_v17, %v1359_v62  ;;  %v1374_v49 = vsel %vm1369_vm4, %v1361_v39, %v1367_v55  ;;  %v1375_v10 = vsel %vm1369_vm4, %v1367_v55, %v1361_v39 }
 0x1d2   :  { %v1379_v11 = vsel %vm5436_vm9, %v1351_v33, %v5355_v20  ;;  %v1380_v42 = vsel %vm5436_vm9, %v5355_v20, %v1351_v33  ;;  %v1382_v22 = vsel %vm5436_vm9, %v5357_v54, %v1353_v6  ;;  %v1384_v45 = vsel %vm5443_vm12, %v1343_v35, %v5314_v1 }
 0x1d3   :  { %v1386_v25 = vsel %vm5443_vm12, %v1345_v63, %v5331_v48  ;;  %v1381_v50 = vsel %vm5436_vm9, %v1353_v6, %v5357_v54  ;;  %v1388_v20 = vsel %vm5443_vm12, %v1347_v2, %v5340_v16  ;;  %vm1390_vm2 = vcmp.lt.f32.partialorder %v1378_v14, %v1384_v45 }
 0x1d4   :  { %vm5480_vm0 = vcmp.lt.f32.partialorder %v1370_v7, %v1377_v44  ;;  %v5487_v33 = vsel %vm5443_vm12, %v5314_v1, %v1343_v35  ;;  %v5492_v51 = vsel %vm5443_vm12, %v5331_v48, %v1345_v63  ;;  %v1391_v54 = vsel %vm1390_vm2, %v1378_v14, %v1384_v45 }
 0x1d5   :  { %8788 = vst [vmem:[#allocation23_spill] sm:$0xff] %v5487_v33  ;;  %8789 = vst [vmem:[#allocation24_spill] sm:$0xff] %v5492_v51  ;;  %v1392_v6 = vsel %vm1390_vm2, %v1384_v45, %v1378_v14  ;;  %v5497_v31 = vsel %vm5443_vm12, %v5340_v16, %v1347_v2  ;;  %v1393_v62 = vsel %vm1390_vm2, %v1380_v42, %v1386_v25 }
 0x1d6   :  { %8790 = vst [vmem:[#allocation55_spill] sm:$0xff] %v5497_v31  ;;  %v1394_v30 = vsel %vm1390_vm2, %v1386_v25, %v1380_v42  ;;  %v1395_v39 = vsel %vm1390_vm2, %v1382_v22, %v1388_v20  ;;  %v1396_v17 = vsel %vm1390_vm2, %v1388_v20, %v1382_v22  ;;  %v5501_v1 = vsel %vm5480_vm0, %v1370_v7, %v1377_v44 }
 0x1d7   :  { %v5505_v35 = vsel %vm5480_vm0, %v1377_v44, %v1370_v7  ;;  %v5509_v48 = vsel %vm5480_vm0, %v1372_v36, %v1379_v11  ;;  %v5513_v16 = vsel %vm5480_vm0, %v1379_v11, %v1372_v36  ;;  %v5517_v63 = vsel %vm5480_vm0, %v1374_v49, %v1381_v50 }
 0x1d8   :  { %vm1404_vm13 = vcmp.lt.f32.partialorder %v1371_v40, %v1391_v54  ;;  %vm1411_vm10 = vcmp.lt.f32.partialorder %v1364_v13, %v1392_v6  ;;  %v5521_v2 = vsel %vm5480_vm0, %v1381_v50, %v1374_v49  ;;  %v1419_v59 = vsel %vm5449_vm7, %v5086_v34, %v5082_v24  ;;  %v8796_v50 = vld [vmem:[#allocation83_spill] sm:$0xff] }
 0x1d9   :  { %v5523_v55 = vsel %vm1404_vm13, %v1371_v40, %v1391_v54  ;;  %v1420_v7 = vsel %vm5449_vm7, %v5082_v24, %v5086_v34  ;;  %v5533_v57 = vsel %vm1404_vm13, %v1391_v54, %v1371_v40  ;;  %v5535_v36 = vsel %vm1404_vm13, %v1373_v9, %v1393_v62  ;;  %v8793_v34 = vld [vmem:[#allocation19_spill] sm:$0xff]  ;;  %v8794_v40 = vld [vmem:[#allocation56_spill] sm:$0xff] }
 0x1da   :  { %8791 = vst [vmem:[#allocation79_spill] sm:$0xff] %v5535_v36  ;;  %v5537_v44 = vsel %vm1404_vm13, %v1393_v62, %v1373_v9  ;;  %v5539_v14 = vsel %vm1404_vm13, %v1375_v10, %v1395_v39  ;;  %v5541_v49 = vsel %vm1404_vm13, %v1395_v39, %v1375_v10  ;;  %v5543_v11 = vsel %vm1411_vm10, %v1364_v13, %v1392_v6  ;;  %v8797_v54 = vld [vmem:[#allocation84_spill] sm:$0xff]  ;;  %v8801_v39 = vld [vmem:[#allocation85_spill] sm:$0xff] }
 0x1db   :  { %8792 = vst [vmem:[#allocation17_spill] sm:$0xff] %v5539_v14  ;;  %v5545_v42 = vsel %vm1411_vm10, %v1392_v6, %v1364_v13  ;;  %v5547_v22 = vsel %vm1411_vm10, %v1366_v37, %v1394_v30  ;;  %v5549_v45 = vsel %vm1411_vm10, %v1394_v30, %v1366_v37  ;;  %v5551_v25 = vsel %vm1411_vm10, %v1368_v28, %v1396_v17  ;;  %v8795_v13 = vld [vmem:[#allocation20_spill] sm:$0xff] }
 0x1dc   :  { %v5553_v24 = vsel %vm1411_vm10, %v1396_v17, %v1368_v28  ;;  %v1421_v9 = vsel %vm5449_vm7, %v8794_v40, %v8793_v34  ;;  %v1422_v10 = vsel %vm5449_vm7, %v8793_v34, %v8794_v40  ;;  %v1423_v37 = vsel %vm5449_vm7, %v8796_v50, %v8795_v13  ;;  %v8798_v6 = vld [vmem:[#allocation80_spill] sm:$0xff]  ;;  %v8802_v17 = vld [vmem:[#allocation62_spill] sm:$0xff] }
 0x1dd   :  { %v1424_v28 = vsel %vm5449_vm7, %v8795_v13, %v8796_v50  ;;  %vm1425_vm11 = vcmp.lt.f32.partialorder %v5122_v61, %v5117_v19  ;;  %vm5581_vm1 = vcmp.lt.f32.partialorder %v5154_v23, %v5150_v60  ;;  %vm5595_vm5 = vcmp.lt.f32.partialorder %v5180_v5, %v5174_v18 }
 0x1de   :  { %v1426_v20 = vsel %vm1425_vm11, %v5122_v61, %v5117_v19  ;;  %v1427_v52 = vsel %vm1425_vm11, %v5117_v19, %v5122_v61  ;;  %v1428_v62 = vsel %vm1425_vm11, %v8798_v6, %v8797_v54  ;;  %v1429_v46 = vsel %vm1425_vm11, %v8797_v54, %v8798_v6 }
 0x1df   :  { %v1430_v34 = vsel %vm1425_vm11, %v8802_v17, %v8801_v39  ;;  %vm1432_vm6 = vcmp.lt.f32.partialorder %v1426_v20, %v1419_v59  ;;  %vm1439_vm14 = vcmp.lt.f32.partialorder %v1427_v52, %v1420_v7  ;;  %v1431_v19 = vsel %vm1425_vm11, %v8801_v39, %v8802_v17 }
 0x1e0   :  { %v5591_v61 = vsel %vm1432_vm6, %v1426_v20, %v1419_v59  ;;  %v1434_v40 = vsel %vm1432_vm6, %v1419_v59, %v1426_v20  ;;  %v1435_v50 = vsel %vm1432_vm6, %v1428_v62, %v1421_v9  ;;  %v1436_v26 = vsel %vm1432_vm6, %v1421_v9, %v1428_v62 }
 0x1e1   :  { %v1437_v54 = vsel %vm1432_vm6, %v1430_v34, %v1423_v37  ;;  %v1440_v6 = vsel %vm1439_vm14, %v1427_v52, %v1420_v7  ;;  %v1438_v0 = vsel %vm1432_vm6, %v1423_v37, %v1430_v34  ;;  %v5599_v15 = vsel %vm1439_vm14, %v1420_v7, %v1427_v52  ;;  %v8808_v34 = vld [vmem:[#allocation70_spill] sm:$0xff] }
 0x1e2   :  { %v1442_v12 = vsel %vm1439_vm14, %v1429_v46, %v1422_v10  ;;  %v5601_v53 = vsel %vm1439_vm14, %v1422_v10, %v1429_v46  ;;  %v1444_v39 = vsel %vm1439_vm14, %v1431_v19, %v1424_v28  ;;  %v5603_v17 = vsel %vm1439_vm14, %v1424_v28, %v1431_v19  ;;  %v8807_v28 = vld [vmem:[#allocation69_spill] sm:$0xff]  ;;  %v8809_v19 = vld [vmem:[#allocation74_spill] sm:$0xff] }
 0x1e3   :  { %vm5605_vm8 = vcmp.lt.f32.partialorder %v1434_v40, %v1440_v6  ;;  %v1454_v9 = vsel %vm5581_vm1, %v5154_v23, %v5150_v60  ;;  %v1455_v10 = vsel %vm5581_vm1, %v5150_v60, %v5154_v23  ;;  %v1456_v20 = vsel %vm5581_vm1, %v8807_v28, %v8591_v43 }
 0x1e4   :  { %v1447_v37 = vsel %vm5605_vm8, %v1434_v40, %v1440_v6  ;;  %v5617_v7 = vsel %vm5605_vm8, %v1440_v6, %v1434_v40  ;;  %v1449_v52 = vsel %vm5605_vm8, %v1436_v26, %v1442_v12  ;;  %v1450_v62 = vsel %vm5605_vm8, %v1442_v12, %v1436_v26  ;;  %v8810_v26 = vld [vmem:[#allocation72_spill] sm:$0xff]  ;;  %v8811_v6 = vld [vmem:[#allocation37_spill] sm:$0xff] }
 0x1e5   :  { %v1457_v46 = vsel %vm5581_vm1, %v8591_v43, %v8807_v28  ;;  %v1458_v60 = vsel %vm5581_vm1, %v8809_v19, %v8808_v34  ;;  %v1459_v23 = vsel %vm5581_vm1, %v8808_v34, %v8809_v19  ;;  %v1461_v12 = vsel %vm5595_vm5, %v5180_v5, %v5174_v18 }
 0x1e6   :  { %v1462_v43 = vsel %vm5595_vm5, %v5174_v18, %v5180_v5  ;;  %v1463_v40 = vsel %vm5595_vm5, %v8613_v32, %v8810_v26  ;;  %v1464_v30 = vsel %vm5595_vm5, %v8810_v26, %v8613_v32  ;;  %v1465_v28 = vsel %vm5595_vm5, %v8614_v8, %v8811_v6 }
 0x1e7   :  { %v1466_v18 = vsel %vm5595_vm5, %v8811_v6, %v8614_v8  ;;  %vm1467_vm15 = vcmp.lt.f32.partialorder %v1461_v12, %v1454_v9  ;;  %v1451_v38 = vsel %vm5605_vm8, %v1438_v0, %v1444_v39  ;;  %vm5669_vm3 = vcmp.lt.f32.partialorder %v1462_v43, %v1455_v10 }
 0x1e8   :  { %v1468_v5 = vsel %vm1467_vm15, %v1461_v12, %v1454_v9  ;;  %v1469_v34 = vsel %vm1467_vm15, %v1454_v9, %v1461_v12  ;;  %v1470_v19 = vsel %vm1467_vm15, %v1463_v40, %v1456_v20  ;;  %v1471_v29 = vsel %vm1467_vm15, %v1456_v20, %v1463_v40 }
 0x1e9   :  { %v1472_v27 = vsel %vm1467_vm15, %v1465_v28, %v1458_v60  ;;  %v1473_v32 = vsel %vm1467_vm15, %v1458_v60, %v1465_v28  ;;  %v1475_v56 = vsel %vm5669_vm3, %v1462_v43, %v1455_v10  ;;  %v1477_v8 = vsel %vm5669_vm3, %v1464_v30, %v1457_v46 }
 0x1ea   :  { %v1478_v13 = vsel %vm5669_vm3, %v1457_v46, %v1464_v30  ;;  %vm5680_vm4 = vcmp.lt.f32.partialorder %v1468_v5, %v5591_v61  ;;  %v1452_v20 = vsel %vm5605_vm8, %v1444_v39, %v1438_v0  ;;  %v1479_v60 = vsel %vm5669_vm3, %v1466_v18, %v1459_v23 }
 0x1eb   :  { %v1480_v12 = vsel %vm5669_vm3, %v1459_v23, %v1466_v18  ;;  %vm1481_vm9 = vcmp.lt.f32.partialorder %v1469_v34, %v1475_v56  ;;  %vm5692_vm12 = vcmp.lt.f32.partialorder %v5214_v3, %v5187_v41  ;;  %v1490_v0 = vsel %vm5680_vm4, %v5591_v61, %v1468_v5 }
 0x1ec   :  { %v1482_v46 = vsel %vm1481_vm9, %v1469_v34, %v1475_v56  ;;  %v1483_v30 = vsel %vm1481_vm9, %v1475_v56, %v1469_v34  ;;  %v1484_v6 = vsel %vm1481_vm9, %v1471_v29, %v1477_v8  ;;  %v1485_v28 = vsel %vm1481_vm9, %v1477_v8, %v1471_v29 }
 0x1ed   :  { %v1486_v47 = vsel %vm1481_vm9, %v1473_v32, %v1479_v60  ;;  %v1487_v59 = vsel %vm1481_vm9, %v1479_v60, %v1473_v32  ;;  %v5701_v39 = vsel %vm5680_vm4, %v1470_v19, %v1435_v50  ;;  %v1492_v23 = vsel %vm5680_vm4, %v1435_v50, %v1470_v19 }
 0x1ee   :  { %v5707_v18 = vsel %vm5680_vm4, %v1472_v27, %v1437_v54  ;;  %v1494_v56 = vsel %vm5680_vm4, %v1437_v54, %v1472_v27  ;;  %vm5712_vm7 = vcmp.lt.f32.partialorder %v1483_v30, %v5617_v7  ;;  %v1476_v34 = vsel %vm5669_vm3, %v1455_v10, %v1462_v43 }
 0x1ef   :  { %v1496_v32 = vsel %vm5712_vm7, %v1483_v30, %v5617_v7  ;;  %v1498_v50 = vsel %vm5712_vm7, %v1485_v28, %v1450_v62  ;;  %v1499_v19 = vsel %vm5712_vm7, %v1450_v62, %v1485_v28  ;;  %v1500_v27 = vsel %vm5712_vm7, %v1487_v59, %v1452_v20 }
 0x1f0   :  { %v1501_v54 = vsel %vm5712_vm7, %v1452_v20, %v1487_v59  ;;  %vm1502_vm2 = vcmp.lt.f32.partialorder %v1490_v0, %v1496_v32  ;;  %vm1509_vm0 = vcmp.lt.f32.partialorder %v1482_v46, %v1447_v37  ;;  %v1489_v10 = vsel %vm5680_vm4, %v1468_v5, %v5591_v61 }
 0x1f1   :  { %v1503_v43 = vsel %vm1502_vm2, %v1490_v0, %v1496_v32  ;;  %v1505_v26 = vsel %vm1502_vm2, %v1492_v23, %v1498_v50  ;;  %v1506_v8 = vsel %vm1502_vm2, %v1498_v50, %v1492_v23  ;;  %v1507_v60 = vsel %vm1502_vm2, %v1494_v56, %v1500_v27 }
 0x1f2   :  { %v1508_v31 = vsel %vm1502_vm2, %v1500_v27, %v1494_v56  ;;  %v1510_v51 = vsel %vm1509_vm0, %v1482_v46, %v1447_v37  ;;  %v1511_v14 = vsel %vm1509_vm0, %v1447_v37, %v1482_v46  ;;  %v1512_v62 = vsel %vm1509_vm0, %v1484_v6, %v1449_v52 }
 0x1f3   :  { %v1513_v28 = vsel %vm1509_vm0, %v1449_v52, %v1484_v6  ;;  %v1514_v36 = vsel %vm1509_vm0, %v1486_v47, %v1451_v38  ;;  %v1515_v33 = vsel %vm1509_vm0, %v1451_v38, %v1486_v47  ;;  %v1497_v20 = vsel %vm5712_vm7, %v5617_v7, %v1483_v30 }
 0x1f4   :  { %v1504_v59 = vsel %vm1502_vm2, %v1496_v32, %v1490_v0  ;;  %vm1516_vm13 = vcmp.lt.f32.partialorder %v1476_v34, %v5599_v15  ;;  %vm5736_vm10 = vcmp.lt.f32.partialorder %v1503_v43, %v1510_v51  ;;  %vm5746_vm11 = vcmp.lt.f32.partialorder %v1489_v10, %v5415_v58 }
 0x1f5   :  { %v1517_v5 = vsel %vm1516_vm13, %v1476_v34, %v5599_v15  ;;  %v1519_v9 = vsel %vm1516_vm13, %v1478_v13, %v5601_v53  ;;  %v5743_v37 = vsel %vm1516_vm13, %v5601_v53, %v1478_v13  ;;  %v1521_v38 = vsel %vm1516_vm13, %v1480_v12, %v5603_v17 }
 0x1f6   :  { %v5752_v7 = vsel %vm1516_vm13, %v5603_v17, %v1480_v12  ;;  %vm1523_vm1 = vcmp.lt.f32.partialorder %v1511_v14, %v1517_v5  ;;  %v5758_v52 = vsel %vm5692_vm12, %v5214_v3, %v5187_v41  ;;  %v5761_v53 = vsel %vm1516_vm13, %v5599_v15, %v1476_v34 }
 0x1f7   :  { %8824 = vst [vmem:[#allocation22_spill] sm:$0xff] %v5758_v52  ;;  %v1524_v13 = vsel %vm1523_vm1, %v1511_v14, %v1517_v5  ;;  %v1526_v46 = vsel %vm1523_vm1, %v1513_v28, %v1519_v9  ;;  %v1527_v30 = vsel %vm1523_vm1, %v1519_v9, %v1513_v28  ;;  %v1525_v6 = vsel %vm1523_vm1, %v1517_v5, %v1511_v14 }
 0x1f8   :  { %v1528_v0 = vsel %vm1523_vm1, %v1515_v33, %v1521_v38  ;;  %v1529_v23 = vsel %vm1523_vm1, %v1521_v38, %v1515_v33  ;;  %v5765_v17 = vsel %vm5736_vm10, %v1505_v26, %v1512_v62  ;;  %v1534_v12 = vsel %vm5736_vm10, %v1512_v62, %v1505_v26 }
 0x1f9   :  { %v5771_v56 = vsel %vm5736_vm10, %v1507_v60, %v1514_v36  ;;  %v1536_v15 = vsel %vm5736_vm10, %v1514_v36, %v1507_v60  ;;  %vm1537_vm6 = vcmp.lt.f32.partialorder %v1504_v59, %v1524_v13  ;;  %v5777_v14 = vsel %vm5736_vm10, %v1503_v43, %v1510_v51 }
 0x1fa   :  { %v1532_v33 = vsel %vm5736_vm10, %v1510_v51, %v1503_v43  ;;  %v5781_v29 = vsel %vm1537_vm6, %v1506_v8, %v1526_v46  ;;  %v1541_v34 = vsel %vm1537_vm6, %v1526_v46, %v1506_v8  ;;  %v1539_v32 = vsel %vm1537_vm6, %v1524_v13, %v1504_v59 }
 0x1fb   :  { %v5783_v50 = vsel %vm1537_vm6, %v1508_v31, %v1528_v0  ;;  %v1543_v27 = vsel %vm1537_vm6, %v1528_v0, %v1508_v31  ;;  %vm5785_vm14 = vcmp.lt.f32.partialorder %v1497_v20, %v1525_v6  ;;  %v5789_v36 = vsel %vm1537_vm6, %v1504_v59, %v1524_v13 }
 0x1fc   :  { %v5793_v60 = vsel %vm5785_vm14, %v1499_v19, %v1527_v30  ;;  %v1548_v51 = vsel %vm5785_vm14, %v1527_v30, %v1499_v19  ;;  %v5800_v43 = vsel %vm5746_vm11, %v1489_v10, %v5415_v58  ;;  %v5804_v31 = vsel %vm5785_vm14, %v1501_v54, %v1529_v23 }
 0x1fd   :  { %8827 = vst [vmem:[#allocation41_spill] sm:$0xff] %v5800_v43  ;;  %v1550_v8 = vsel %vm5785_vm14, %v1529_v23, %v1501_v54  ;;  %v1553_v62 = vsel %vm5746_vm11, %v5415_v58, %v1489_v10  ;;  %v5815_v19 = vsel %vm5746_vm11, %v5701_v39, %v5418_v21  ;;  %v1555_v28 = vsel %vm5746_vm11, %v5418_v21, %v5701_v39 }
 0x1fe   :  { %8828 = vst [vmem:[#allocation82_spill] sm:$0xff] %v5815_v19  ;;  %v5825_v54 = vsel %vm5746_vm11, %v5707_v18, %v5424_v4  ;;  %v1557_v58 = vsel %vm5746_vm11, %v5424_v4, %v5707_v18  ;;  %vm5832_vm5 = vcmp.lt.f32.partialorder %v1539_v32, %v5533_v57  ;;  %v5838_v59 = vsel %vm5785_vm14, %v1497_v20, %v1525_v6 }
 0x1ff   :  { %8829 = vst [vmem:[#allocation88_spill] sm:$0xff] %v5825_v54  ;;  %v1559_v21 = vsel %vm5832_vm5, %v1539_v32, %v5533_v57  ;;  %v1561_v39 = vsel %vm5832_vm5, %v1541_v34, %v5537_v44  ;;  %v1562_v4 = vsel %vm5832_vm5, %v5537_v44, %v1541_v34  ;;  %v1563_v18 = vsel %vm5832_vm5, %v1543_v27, %v5541_v49 }
 0x200   :  { %v1564_v61 = vsel %vm5832_vm5, %v5541_v49, %v1543_v27  ;;  %vm1565_vm8 = vcmp.lt.f32.partialorder %v1553_v62, %v1559_v21  ;;  %vm1572_vm15 = vcmp.lt.f32.partialorder %v1532_v33, %v5505_v35  ;;  %v1546_v5 = vsel %vm5785_vm14, %v1525_v6, %v1497_v20 }
 0x201   :  { %v1566_v9 = vsel %vm1565_vm8, %v1553_v62, %v1559_v21  ;;  %v1568_v47 = vsel %vm1565_vm8, %v1555_v28, %v1561_v39  ;;  %v1569_v38 = vsel %vm1565_vm8, %v1561_v39, %v1555_v28  ;;  %v1570_v13 = vsel %vm1565_vm8, %v1557_v58, %v1563_v18 }
 0x202   :  { %v1571_v46 = vsel %vm1565_vm8, %v1563_v18, %v1557_v58  ;;  %v1573_v44 = vsel %vm1572_vm15, %v1532_v33, %v5505_v35  ;;  %v1574_v30 = vsel %vm1572_vm15, %v5505_v35, %v1532_v33  ;;  %v1575_v0 = vsel %vm1572_vm15, %v1534_v12, %v5513_v16 }
 0x203   :  { %v1576_v23 = vsel %vm1572_vm15, %v5513_v16, %v1534_v12  ;;  %v1577_v49 = vsel %vm1572_vm15, %v1536_v15, %v5521_v2  ;;  %v1578_v34 = vsel %vm1572_vm15, %v5521_v2, %v1536_v15  ;;  %v5867_v20 = vsel %vm5832_vm5, %v5533_v57, %v1539_v32  ;;  %v8841_v2 = vld [vmem:[#allocation23_spill] sm:$0xff] }
 0x204   :  { %v1567_v6 = vsel %vm1565_vm8, %v1559_v21, %v1553_v62  ;;  %vm1579_vm3 = vcmp.lt.f32.partialorder %v1546_v5, %v5545_v42  ;;  %vm5870_vm4 = vcmp.lt.f32.partialorder %v1566_v9, %v1573_v44  ;;  %vm5881_vm9 = vcmp.lt.f32.partialorder %v5777_v14, %v5501_v1 }
 0x205   :  { %v1580_v35 = vsel %vm1579_vm3, %v1546_v5, %v5545_v42  ;;  %v1582_v16 = vsel %vm1579_vm3, %v1548_v51, %v5549_v45  ;;  %v5877_v12 = vsel %vm1579_vm3, %v5549_v45, %v1548_v51  ;;  %v1584_v57 = vsel %vm1579_vm3, %v1550_v8, %v5553_v24 }
 0x206   :  { %v5887_v15 = vsel %vm1579_vm3, %v5553_v24, %v1550_v8  ;;  %vm1586_vm7 = vcmp.lt.f32.partialorder %v1574_v30, %v1580_v35  ;;  %vm5891_vm2 = vcmp.lt.f32.partialorder %v5838_v59, %v5543_v11  ;;  %v5896_v45 = vsel %vm1579_vm3, %v5545_v42, %v1546_v5 }
 0x207   :  { %8836 = vst [vmem:[#allocation50_spill] sm:$0xff] %v5887_v15  ;;  %v1587_v32 = vsel %vm1586_vm7, %v1574_v30, %v1580_v35  ;;  %v1589_v26 = vsel %vm1586_vm7, %v1576_v23, %v1582_v16  ;;  %v1590_v51 = vsel %vm1586_vm7, %v1582_v16, %v1576_v23  ;;  %v1588_v62 = vsel %vm1586_vm7, %v1580_v35, %v1574_v30 }
 0x208   :  { %v1591_v28 = vsel %vm1586_vm7, %v1578_v34, %v1584_v57  ;;  %v1592_v58 = vsel %vm1586_vm7, %v1584_v57, %v1578_v34  ;;  %v5900_v24 = vsel %vm5870_vm4, %v1568_v47, %v1575_v0  ;;  %v5904_v8 = vsel %vm5870_vm4, %v1575_v0, %v1568_v47 }
 0x209   :  { %v5908_v10 = vsel %vm5870_vm4, %v1570_v13, %v1577_v49  ;;  %v5912_v42 = vsel %vm5870_vm4, %v1577_v49, %v1570_v13  ;;  %vm1600_vm0 = vcmp.lt.f32.partialorder %v1567_v6, %v1587_v32  ;;  %v5916_v21 = vsel %vm5870_vm4, %v1566_v9, %v1573_v44 }
 0x20a   :  { %v5920_v39 = vsel %vm5870_vm4, %v1573_v44, %v1566_v9  ;;  %v5922_v18 = vsel %vm1600_vm0, %v1569_v38, %v1589_v26  ;;  %v5924_v5 = vsel %vm1600_vm0, %v1589_v26, %v1569_v38  ;;  %v5926_v47 = vsel %vm1600_vm0, %v1567_v6, %v1587_v32 }
 0x20b   :  { %v5928_v30 = vsel %vm1600_vm0, %v1571_v46, %v1591_v28  ;;  %v5930_v0 = vsel %vm1600_vm0, %v1591_v28, %v1571_v46  ;;  %vm5933_vm13 = vcmp.lt.f32.partialorder %v5867_v20, %v1588_v62  ;;  %v5937_v23 = vsel %vm1600_vm0, %v1587_v32, %v1567_v6 }
 0x20c   :  { %v5941_v9 = vsel %vm5933_vm13, %v1562_v4, %v1590_v51  ;;  %v5945_v38 = vsel %vm5933_vm13, %v1590_v51, %v1562_v4  ;;  %v5951_v46 = vsel %vm5881_vm9, %v5777_v14, %v5501_v1  ;;  %v5955_v44 = vsel %vm5933_vm13, %v1564_v61, %v1592_v58  ;;  %v8845_v51 = vld [vmem:[#allocation17_spill] sm:$0xff] }
 0x20d   :  { %v5959_v49 = vsel %vm5933_vm13, %v1592_v58, %v1564_v61  ;;  %v1616_v4 = vsel %vm5881_vm9, %v5501_v1, %v5777_v14  ;;  %v5969_v34 = vsel %vm5881_vm9, %v5765_v17, %v5509_v48  ;;  %v1618_v6 = vsel %vm5881_vm9, %v5509_v48, %v5765_v17 }
 0x20e   :  { %v5979_v61 = vsel %vm5881_vm9, %v5771_v56, %v5517_v63  ;;  %v1620_v1 = vsel %vm5881_vm9, %v5517_v63, %v5771_v56  ;;  %v1622_v14 = vsel %vm5891_vm2, %v5838_v59, %v5543_v11  ;;  %v5992_v48 = vsel %vm5933_vm13, %v5867_v20, %v1588_v62 }
 0x20f   :  { %v1624_v17 = vsel %vm5891_vm2, %v5793_v60, %v5547_v22  ;;  %v1625_v63 = vsel %vm5891_vm2, %v5547_v22, %v5793_v60  ;;  %v1626_v56 = vsel %vm5891_vm2, %v5804_v31, %v5551_v25  ;;  %v1623_v27 = vsel %vm5891_vm2, %v5543_v11, %v5838_v59 }
 0x210   :  { %v1627_v35 = vsel %vm5891_vm2, %v5551_v25, %v5804_v31  ;;  %vm1628_vm10 = vcmp.lt.f32.partialorder %v1616_v4, %v1622_v14  ;;  %vm1635_vm11 = vcmp.lt.f32.partialorder %v5789_v36, %v5523_v55  ;;  %vm6018_vm1 = vcmp.lt.f32.partialorder %v5761_v53, %v8841_v2  ;;  %v8844_v31 = vld [vmem:[#allocation79_spill] sm:$0xff] }
 0x211   :  { %v1629_v22 = vsel %vm1628_vm10, %v1616_v4, %v1622_v14  ;;  %v1631_v60 = vsel %vm1628_vm10, %v1618_v6, %v1624_v17  ;;  %v1632_v16 = vsel %vm1628_vm10, %v1624_v17, %v1618_v6  ;;  %v1633_v32 = vsel %vm1628_vm10, %v1620_v1, %v1626_v56  ;;  %v8846_v17 = vld [vmem:[#allocation24_spill] sm:$0xff] }
 0x212   :  { %v1634_v11 = vsel %vm1628_vm10, %v1626_v56, %v1620_v1  ;;  %v1636_v59 = vsel %vm1635_vm11, %v5789_v36, %v5523_v55  ;;  %v1637_v25 = vsel %vm1635_vm11, %v5523_v55, %v5789_v36  ;;  %v1638_v33 = vsel %vm1635_vm11, %v5781_v29, %v8844_v31  ;;  %v8848_v36 = vld [vmem:[#allocation55_spill] sm:$0xff] }
 0x213   :  { %v1639_v26 = vsel %vm1635_vm11, %v8844_v31, %v5781_v29  ;;  %v1640_v28 = vsel %vm1635_vm11, %v5783_v50, %v8845_v51  ;;  %v1641_v58 = vsel %vm1635_vm11, %v8845_v51, %v5783_v50  ;;  %v1630_v6 = vsel %vm1628_vm10, %v1622_v14, %v1616_v4 }
 0x214   :  { %v1643_v1 = vsel %vm6018_vm1, %v5761_v53, %v8841_v2  ;;  %v1645_v55 = vsel %vm6018_vm1, %v5743_v37, %v8846_v17  ;;  %v6046_v29 = vsel %vm6018_vm1, %v8846_v17, %v5743_v37  ;;  %v1647_v50 = vsel %vm6018_vm1, %v5752_v7, %v8848_v36 }
 0x215   :  { %8847 = vst [vmem:[#allocation43_spill] sm:$0xff] %v6046_v29  ;;  %v6056_v4 = vsel %vm6018_vm1, %v8848_v36, %v5752_v7  ;;  %vm1649_vm6 = vcmp.lt.f32.partialorder %v1637_v25, %v1643_v1  ;;  %vm1656_vm14 = vcmp.lt.f32.partialorder %v1629_v22, %v1636_v59  ;;  %v6061_v37 = vsel %vm5933_vm13, %v1588_v62, %v5867_v20 }
 0x216   :  { %8849 = vst [vmem:[#allocation45_spill] sm:$0xff] %v6056_v4  ;;  %v1650_v14 = vsel %vm1649_vm6, %v1637_v25, %v1643_v1  ;;  %v1651_v56 = vsel %vm1649_vm6, %v1643_v1, %v1637_v25  ;;  %v1652_v31 = vsel %vm1649_vm6, %v1639_v26, %v1645_v55  ;;  %v1653_v51 = vsel %vm1649_vm6, %v1645_v55, %v1639_v26  ;;  %v8896_v4 = vld [vmem:[#allocation22_spill] sm:$0xff] }
 0x217   :  { %v1654_v17 = vsel %vm1649_vm6, %v1641_v58, %v1647_v50  ;;  %v1655_v29 = vsel %vm1649_vm6, %v1647_v50, %v1641_v58  ;;  %v1657_v54 = vsel %vm1656_vm14, %v1629_v22, %v1636_v59  ;;  %v1659_v19 = vsel %vm1656_vm14, %v1631_v60, %v1638_v33 }
 0x218   :  { %v1660_v43 = vsel %vm1656_vm14, %v1638_v33, %v1631_v60  ;;  %v1661_v52 = vsel %vm1656_vm14, %v1633_v32, %v1640_v28  ;;  %v1662_v15 = vsel %vm1656_vm14, %v1640_v28, %v1633_v32  ;;  %v6067_v7 = vsel %vm6018_vm1, %v8841_v2, %v5761_v53 }
 0x219   :  { %8850 = vst [vmem:[#allocation57_spill] sm:$0xff] %v6067_v7  ;;  %v1658_v25 = vsel %vm1656_vm14, %v1636_v59, %v1629_v22  ;;  %vm1663_vm5 = vcmp.lt.f32.partialorder %v1630_v6, %v1650_v14  ;;  %vm1670_vm8 = vcmp.lt.f32.partialorder %v1623_v27, %v1651_v56  ;;  %vm6071_vm15 = vcmp.lt.f32.partialorder %v5916_v21, %v5951_v46 }
 0x21a   :  { %v1666_v26 = vsel %vm1663_vm5, %v1632_v16, %v1652_v31  ;;  %v1667_v13 = vsel %vm1663_vm5, %v1652_v31, %v1632_v16  ;;  %vm6076_vm3 = vcmp.lt.f32.partialorder %v5920_v39, %v1657_v54  ;;  %v1664_v60 = vsel %vm1663_vm5, %v1630_v6, %v1650_v14 }
 0x21b   :  { %v1665_v57 = vsel %vm1663_vm5, %v1650_v14, %v1630_v6  ;;  %v1668_v53 = vsel %vm1663_vm5, %v1634_v11, %v1654_v17  ;;  %v1669_v2 = vsel %vm1663_vm5, %v1654_v17, %v1634_v11  ;;  %v1673_v22 = vsel %vm1670_vm8, %v1625_v63, %v1653_v51  ;;  %v8893_v11 = vld [vmem:[#allocation47_spill] sm:$0xff] }
 0x21c   :  { %v1674_v32 = vsel %vm1670_vm8, %v1653_v51, %v1625_v63  ;;  %v1675_v59 = vsel %vm1670_vm8, %v1627_v35, %v1655_v29  ;;  %v1676_v33 = vsel %vm1670_vm8, %v1655_v29, %v1627_v35  ;;  %v1671_v16 = vsel %vm1670_vm8, %v1623_v27, %v1651_v56 }
 0x21d   :  { %v1672_v28 = vsel %vm1670_vm8, %v1651_v56, %v1623_v27  ;;  %v6084_v58 = vsel %vm6071_vm15, %v5900_v24, %v5969_v34  ;;  %v6090_v1 = vsel %vm6071_vm15, %v5969_v34, %v5900_v24  ;;  %v6096_v63 = vsel %vm6071_vm15, %v5916_v21, %v5951_v46 }
 0x21e   :  { %8855 = vst [vmem:[#allocation59_spill] sm:$0xff] %v6084_v58  ;;  %8856 = vst [vmem:[#allocation73_spill] sm:$0xff] %v6096_v63  ;;  %v6102_v27 = vsel %vm6071_vm15, %v5951_v46, %v5916_v21  ;;  %v6108_v35 = vsel %vm6071_vm15, %v5908_v10, %v5979_v61  ;;  %v6114_v24 = vsel %vm6071_vm15, %v5979_v61, %v5908_v10 }
 0x21f   :  { %8857 = vst [vmem:[#allocation86_spill] sm:$0xff] %v6108_v35  ;;  %v6119_v34 = vsel %vm6076_vm3, %v5904_v8, %v1659_v19  ;;  %v6124_v21 = vsel %vm6076_vm3, %v1659_v19, %v5904_v8  ;;  %v6129_v46 = vsel %vm6076_vm3, %v5912_v42, %v1661_v52  ;;  %v6134_v10 = vsel %vm6076_vm3, %v1661_v52, %v5912_v42  ;;  %v8892_v42 = vld [vmem:[#allocation39_spill] sm:$0xff] }
 0x220   :  { %8858 = vst [vmem:[#allocation58_spill] sm:$0xff] %v6119_v34  ;;  %8859 = vst [vmem:[#allocation60_spill] sm:$0xff] %v6129_v46  ;;  %v6139_v61 = vsel %vm6076_vm3, %v5920_v39, %v1657_v54  ;;  %v6144_v19 = vsel %vm6076_vm3, %v1657_v54, %v5920_v39  ;;  %vm1691_vm4 = vcmp.lt.f32.partialorder %v5926_v47, %v1658_v25 }
 0x221   :  { %8860 = vst [vmem:[#allocation18_spill] sm:$0xff] %v6139_v61  ;;  %vm1698_vm9 = vcmp.lt.f32.partialorder %v5937_v23, %v1664_v60  ;;  %v6149_v8 = vsel %vm1691_vm4, %v5922_v18, %v1660_v43  ;;  %v6152_v52 = vsel %vm1691_vm4, %v1660_v43, %v5922_v18  ;;  %vm6155_vm7 = vcmp.lt.f32.partialorder %v5992_v48, %v1665_v57 }
 0x222   :  { %8861 = vst [vmem:[#allocation87_spill] sm:$0xff] %v6149_v8  ;;  %vm6160_vm2 = vcmp.lt.f32.partialorder %v6061_v37, %v1671_v16  ;;  %v6165_v54 = vsel %vm1691_vm4, %v5926_v47, %v1658_v25  ;;  %v6168_v39 = vsel %vm1691_vm4, %v1658_v25, %v5926_v47  ;;  %v6171_v6 = vsel %vm1691_vm4, %v5928_v30, %v1662_v15  ;;  %v8878_v25 = vld [vmem:[#allocation25_spill] sm:$0xff] }
 0x223   :  { %8866 = vst [vmem:[#allocation54_spill] sm:$0xff] %v6165_v54  ;;  %8867 = vst [vmem:[#allocation61_spill] sm:$0xff] %v6171_v6  ;;  %v6174_v43 = vsel %vm1691_vm4, %v1662_v15, %v5928_v30  ;;  %v6177_v18 = vsel %vm1698_vm9, %v5924_v5, %v1666_v26  ;;  %v6180_v55 = vsel %vm1698_vm9, %v1666_v26, %v5924_v5  ;;  %v8879_v26 = vld [vmem:[#allocation29_spill] sm:$0xff] }
 0x224   :  { %8868 = vst [vmem:[#allocation89_spill] sm:$0xff] %v6177_v18  ;;  %v6183_v29 = vsel %vm1698_vm9, %v5930_v0, %v1668_v53  ;;  %v6186_v36 = vsel %vm1698_vm9, %v1668_v53, %v5930_v0  ;;  %v6189_v47 = vsel %vm1698_vm9, %v5937_v23, %v1664_v60  ;;  %v6192_v50 = vsel %vm1698_vm9, %v1664_v60, %v5937_v23  ;;  %v8884_v60 = vld [vmem:[#allocation26_spill] sm:$0xff]  ;;  %v8898_v18 = vld [vmem:[#allocation52_spill] sm:$0xff] }
 0x225   :  { %8869 = vst [vmem:[#allocation68_spill] sm:$0xff] %v6183_v29  ;;  %8870 = vst [vmem:[#allocation38_spill] sm:$0xff] %v6189_v47  ;;  %v6197_v15 = vsel %vm6155_vm7, %v5941_v9, %v1667_v13  ;;  %v6202_v5 = vsel %vm6155_vm7, %v1667_v13, %v5941_v9  ;;  %v6207_v30 = vsel %vm6155_vm7, %v5992_v48, %v1665_v57 }
 0x226   :  { %8871 = vst [vmem:[#allocation42_spill] sm:$0xff] %v6197_v15  ;;  %8872 = vst [vmem:[#allocation76_spill] sm:$0xff] %v6207_v30  ;;  %v6212_v0 = vsel %vm6155_vm7, %v1665_v57, %v5992_v48  ;;  %v6217_v23 = vsel %vm6155_vm7, %v5955_v44, %v1669_v2  ;;  %v6222_v9 = vsel %vm6155_vm7, %v1669_v2, %v5955_v44  ;;  %v8885_v57 = vld [vmem:[#allocation30_spill] sm:$0xff] }
 0x227   :  { %8873 = vst [vmem:[#allocation81_spill] sm:$0xff] %v6217_v23  ;;  %v6227_v14 = vsel %vm6160_vm2, %v5945_v38, %v1673_v22  ;;  %v6232_v48 = vsel %vm6160_vm2, %v1673_v22, %v5945_v38  ;;  %v6237_v56 = vsel %vm6160_vm2, %v5959_v49, %v1675_v59  ;;  %v6242_v44 = vsel %vm6160_vm2, %v1675_v59, %v5959_v49  ;;  %v8886_v22 = vld [vmem:[#allocation21_spill] sm:$0xff]  ;;  %v8889_v59 = vld [vmem:[#allocation44_spill] sm:$0xff] }
 0x228   :  { %8874 = vst [vmem:[#allocation77_spill] sm:$0xff] %v6227_v14  ;;  %8875 = vst [vmem:[#allocation78_spill] sm:$0xff] %v6237_v56  ;;  %v6247_v31 = vsel %vm6160_vm2, %v6061_v37, %v1671_v16  ;;  %v6252_v38 = vsel %vm6160_vm2, %v1671_v16, %v6061_v37  ;;  %vm1719_vm0 = vcmp.lt.f32.partialorder %v5896_v45, %v1672_v28 }
 0x229   :  { %8876 = vst [vmem:[#allocation51_spill] sm:$0xff] %v6247_v31  ;;  %v1728_v51 = vsel %vm5692_vm12, %v5187_v41, %v5214_v3  ;;  %v6260_v49 = vsel %vm1719_vm0, %v5877_v12, %v1674_v32  ;;  %v6263_v17 = vsel %vm1719_vm0, %v1674_v32, %v5877_v12  ;;  %v1729_v13 = vsel %vm5692_vm12, %v8879_v26, %v8878_v25  ;;  %v8882_v3 = vld [vmem:[#allocation50_spill] sm:$0xff]  ;;  %v8887_v32 = vld [vmem:[#allocation53_spill] sm:$0xff] }
 0x22a   :  { %8877 = vst [vmem:[#allocation63_spill] sm:$0xff] %v6260_v49  ;;  %v1730_v37 = vsel %vm5692_vm12, %v8878_v25, %v8879_v26  ;;  %v6274_v20 = vsel %vm1719_vm0, %v5896_v45, %v1672_v28  ;;  %v6277_v41 = vsel %vm1719_vm0, %v1672_v28, %v5896_v45  ;;  %v6280_v62 = vsel %vm1719_vm0, %v8882_v3, %v1676_v33  ;;  %v8888_v45 = vld [vmem:[#allocation64_spill] sm:$0xff] }
 0x22b   :  { %8880 = vst [vmem:[#allocation49_spill] sm:$0xff] %v6274_v20  ;;  %8881 = vst [vmem:[#allocation65_spill] sm:$0xff] %v6277_v41  ;;  %v6283_v12 = vsel %vm1719_vm0, %v1676_v33, %v8882_v3  ;;  %v1731_v53 = vsel %vm5692_vm12, %v8885_v57, %v8884_v60  ;;  %v1732_v2 = vsel %vm5692_vm12, %v8884_v60, %v8885_v57  ;;  %v8894_v26 = vld [vmem:[#allocation40_spill] sm:$0xff] }
 0x22c   :  { %8883 = vst [vmem:[#allocation66_spill] sm:$0xff] %v6280_v62  ;;  %vm1733_vm13 = vcmp.lt.f32.partialorder %v8887_v32, %v8886_v22  ;;  %vm6297_vm10 = vcmp.lt.f32.partialorder %v8889_v59, %v8888_v45  ;;  %v8895_v3 = vld [vmem:[#allocation48_spill] sm:$0xff] }
 0x22d   :  { %v1734_v33 = vsel %vm1733_vm13, %v8887_v32, %v8886_v22  ;;  %v1735_v28 = vsel %vm1733_vm13, %v8886_v22, %v8887_v32  ;;  %v1736_v25 = vsel %vm1733_vm13, %v8893_v11, %v8892_v42  ;;  %v1737_v40 = vsel %vm1733_vm13, %v8892_v42, %v8893_v11  ;;  %v8897_v32 = vld [vmem:[#allocation46_spill] sm:$0xff]  ;;  %v8903_v49 = vld [vmem:[#allocation28_spill] sm:$0xff] }
 0x22e   :  { %v1738_v60 = vsel %vm1733_vm13, %v8895_v3, %v8894_v26  ;;  %v1739_v57 = vsel %vm1733_vm13, %v8894_v26, %v8895_v3  ;;  %vm1740_vm12 = vcmp.lt.f32.partialorder %v1734_v33, %v8896_v4  ;;  %vm1747_vm11 = vcmp.lt.f32.partialorder %v1735_v28, %v1728_v51  ;;  %v8904_v20 = vld [vmem:[#allocation32_spill] sm:$0xff] }
 0x22f   :  { %v1741_v7 = vsel %vm1740_vm12, %v1734_v33, %v8896_v4  ;;  %v1742_v29 = vsel %vm1740_vm12, %v8896_v4, %v1734_v33  ;;  %v1743_v22 = vsel %vm1740_vm12, %v1736_v25, %v1729_v13  ;;  %vm6318_vm1 = vcmp.lt.f32.partialorder %v8898_v18, %v8897_v32 }
 0x230   :  { %v1744_v42 = vsel %vm1740_vm12, %v1729_v13, %v1736_v25  ;;  %v1745_v11 = vsel %vm1740_vm12, %v1738_v60, %v1731_v53  ;;  %v1746_v14 = vsel %vm1740_vm12, %v1731_v53, %v1738_v60  ;;  %v1748_v31 = vsel %vm1747_vm11, %v1735_v28, %v1728_v51 }
 0x231   :  { %v6322_v46 = vsel %vm1747_vm11, %v1728_v51, %v1735_v28  ;;  %v1750_v26 = vsel %vm1747_vm11, %v1737_v40, %v1730_v37  ;;  %v6324_v3 = vsel %vm1747_vm11, %v1730_v37, %v1737_v40  ;;  %v1752_v34 = vsel %vm1747_vm11, %v1739_v57, %v1732_v2  ;;  %v8901_v28 = vld [vmem:[#allocation27_spill] sm:$0xff] }
 0x232   :  { %v6326_v62 = vsel %vm1747_vm11, %v1732_v2, %v1739_v57  ;;  %vm1754_vm6 = vcmp.lt.f32.partialorder %v1742_v29, %v1748_v31  ;;  %v1762_v4 = vsel %vm6297_vm10, %v8889_v59, %v8888_v45  ;;  %v1763_v13 = vsel %vm6297_vm10, %v8888_v45, %v8889_v59  ;;  %v8902_v37 = vld [vmem:[#allocation31_spill] sm:$0xff] }
 0x233   :  { %v1755_v53 = vsel %vm1754_vm6, %v1742_v29, %v1748_v31  ;;  %v1756_v51 = vsel %vm1754_vm6, %v1748_v31, %v1742_v29  ;;  %v1757_v33 = vsel %vm1754_vm6, %v1744_v42, %v1750_v26  ;;  %v1764_v2 = vsel %vm6297_vm10, %v8902_v37, %v8901_v28  ;;  %v8906_v31 = vld [vmem:[#allocation35_spill] sm:$0xff] }
 0x234   :  { %v1758_v25 = vsel %vm1754_vm6, %v1750_v26, %v1744_v42  ;;  %v1759_v40 = vsel %vm1754_vm6, %v1746_v14, %v1752_v34  ;;  %v1760_v60 = vsel %vm1754_vm6, %v1752_v34, %v1746_v14  ;;  %v1765_v57 = vsel %vm6297_vm10, %v8901_v28, %v8902_v37  ;;  %v8905_v14 = vld [vmem:[#allocation33_spill] sm:$0xff]  ;;  %v8907_v28 = vld [vmem:[#allocation34_spill] sm:$0xff]  ;;  %v8908_v37 = vld [vmem:[#allocation36_spill] sm:$0xff] }
 0x235   :  { %v1766_v45 = vsel %vm6297_vm10, %v8904_v20, %v8903_v49  ;;  %v1769_v29 = vsel %vm6318_vm1, %v8898_v18, %v8897_v32  ;;  %v1770_v34 = vsel %vm6318_vm1, %v8897_v32, %v8898_v18  ;;  %v1771_v59 = vsel %vm6318_vm1, %v8906_v31, %v8905_v14 }
 0x236   :  { %v1767_v42 = vsel %vm6297_vm10, %v8903_v49, %v8904_v20  ;;  %v1772_v26 = vsel %vm6318_vm1, %v8905_v14, %v8906_v31  ;;  %v1773_v18 = vsel %vm6318_vm1, %v8908_v37, %v8907_v28  ;;  %vm1775_vm14 = vcmp.lt.f32.partialorder %v1769_v29, %v1762_v4 }
 0x237   :  { %v1774_v32 = vsel %vm6318_vm1, %v8907_v28, %v8908_v37  ;;  %v1776_v6 = vsel %vm1775_vm14, %v1769_v29, %v1762_v4  ;;  %v1777_v8 = vsel %vm1775_vm14, %v1762_v4, %v1769_v29  ;;  %v1778_v16 = vsel %vm1775_vm14, %v1771_v59, %v1764_v2 }
 0x238   :  { %v1779_v49 = vsel %vm1775_vm14, %v1764_v2, %v1771_v59  ;;  %v1780_v20 = vsel %vm1775_vm14, %v1773_v18, %v1766_v45  ;;  %v1781_v23 = vsel %vm1775_vm14, %v1766_v45, %v1773_v18  ;;  %vm1782_vm5 = vcmp.lt.f32.partialorder %v1770_v34, %v1763_v13 }
 0x239   :  { %v1783_v15 = vsel %vm1782_vm5, %v1770_v34, %v1763_v13  ;;  %v1784_v14 = vsel %vm1782_vm5, %v1763_v13, %v1770_v34  ;;  %v1785_v31 = vsel %vm1782_vm5, %v1772_v26, %v1765_v57  ;;  %vm6376_vm8 = vcmp.lt.f32.partialorder %v1776_v6, %v1741_v7 }
 0x23a   :  { %v1786_v61 = vsel %vm1782_vm5, %v1765_v57, %v1772_v26  ;;  %v1787_v54 = vsel %vm1782_vm5, %v1774_v32, %v1767_v42  ;;  %v1788_v30 = vsel %vm1782_vm5, %v1767_v42, %v1774_v32  ;;  %vm1789_vm15 = vcmp.lt.f32.partialorder %v1777_v8, %v1783_v15 }
 0x23b   :  { %v1790_v56 = vsel %vm1789_vm15, %v1777_v8, %v1783_v15  ;;  %v1791_v28 = vsel %vm1789_vm15, %v1783_v15, %v1777_v8  ;;  %v1793_v37 = vsel %vm1789_vm15, %v1785_v31, %v1779_v49  ;;  %v6382_v4 = vsel %vm6376_vm8, %v1776_v6, %v1741_v7 }
 0x23c   :  { %v1792_v2 = vsel %vm1789_vm15, %v1779_v49, %v1785_v31  ;;  %v1794_v45 = vsel %vm1789_vm15, %v1781_v23, %v1787_v54  ;;  %v1795_v29 = vsel %vm1789_vm15, %v1787_v54, %v1781_v23  ;;  %v1798_v13 = vsel %vm6376_vm8, %v1741_v7, %v1776_v6 }
 0x23d   :  { %v6388_v34 = vsel %vm6376_vm8, %v1778_v16, %v1743_v22  ;;  %v1800_v57 = vsel %vm6376_vm8, %v1743_v22, %v1778_v16  ;;  %v6394_v8 = vsel %vm6376_vm8, %v1780_v20, %v1745_v11  ;;  %vm1803_vm3 = vcmp.lt.f32.partialorder %v1791_v28, %v1756_v51 }
 0x23e   :  { %v1802_v15 = vsel %vm6376_vm8, %v1745_v11, %v1780_v20  ;;  %v1804_v59 = vsel %vm1803_vm3, %v1791_v28, %v1756_v51  ;;  %v1805_v54 = vsel %vm1803_vm3, %v1756_v51, %v1791_v28  ;;  %v1806_v23 = vsel %vm1803_vm3, %v1793_v37, %v1758_v25 }
 0x23f   :  { %v1807_v42 = vsel %vm1803_vm3, %v1758_v25, %v1793_v37  ;;  %v1808_v7 = vsel %vm1803_vm3, %v1795_v29, %v1760_v60  ;;  %vm1810_vm4 = vcmp.lt.f32.partialorder %v1798_v13, %v1804_v59  ;;  %vm1817_vm9 = vcmp.lt.f32.partialorder %v1790_v56, %v1755_v53  ;;  %v8913_v25 = vld [vmem:[#allocation41_spill] sm:$0xff] }
 0x240   :  { %v1809_v6 = vsel %vm1803_vm3, %v1760_v60, %v1795_v29  ;;  %v1811_v26 = vsel %vm1810_vm4, %v1798_v13, %v1804_v59  ;;  %v1812_v18 = vsel %vm1810_vm4, %v1804_v59, %v1798_v13  ;;  %v1813_v32 = vsel %vm1810_vm4, %v1800_v57, %v1806_v23 }
 0x241   :  { %v1814_v22 = vsel %vm1810_vm4, %v1806_v23, %v1800_v57  ;;  %v1815_v16 = vsel %vm1810_vm4, %v1802_v15, %v1808_v7  ;;  %v1816_v49 = vsel %vm1810_vm4, %v1808_v7, %v1802_v15  ;;  %v1818_v31 = vsel %vm1817_vm9, %v1790_v56, %v1755_v53 }
 0x242   :  { %v1819_v35 = vsel %vm1817_vm9, %v1755_v53, %v1790_v56  ;;  %v1820_v58 = vsel %vm1817_vm9, %v1792_v2, %v1757_v33  ;;  %v1821_v63 = vsel %vm1817_vm9, %v1757_v33, %v1792_v2  ;;  %v1822_v47 = vsel %vm1817_vm9, %v1794_v45, %v1759_v40 }
 0x243   :  { %v1823_v11 = vsel %vm1817_vm9, %v1759_v40, %v1794_v45  ;;  %vm1824_vm7 = vcmp.lt.f32.partialorder %v1784_v14, %v6322_v46  ;;  %vm6399_vm2 = vcmp.lt.f32.partialorder %v1811_v26, %v1818_v31  ;;  %vm6405_vm0 = vcmp.lt.f32.partialorder %v6382_v4, %v8913_v25 }
 0x244   :  { %v1825_v20 = vsel %vm1824_vm7, %v1784_v14, %v6322_v46  ;;  %v6411_v53 = vsel %vm1824_vm7, %v6322_v46, %v1784_v14  ;;  %v1827_v33 = vsel %vm1824_vm7, %v1786_v61, %v6324_v3  ;;  %v6415_v40 = vsel %vm1824_vm7, %v6324_v3, %v1786_v61 }
 0x245   :  { %v1829_v56 = vsel %vm1824_vm7, %v1788_v30, %v6326_v62  ;;  %v6419_v28 = vsel %vm1824_vm7, %v6326_v62, %v1788_v30  ;;  %vm1831_vm13 = vcmp.lt.f32.partialorder %v1819_v35, %v1825_v20  ;;  %v1839_v37 = vsel %vm6399_vm2, %v1811_v26, %v1818_v31 }
 0x246   :  { %8916 = vst [vmem:[#allocation71_spill] sm:$0xff] %v6419_v28  ;;  %v1832_v2 = vsel %vm1831_vm13, %v1819_v35, %v1825_v20  ;;  %v1833_v45 = vsel %vm1831_vm13, %v1825_v20, %v1819_v35  ;;  %v1834_v29 = vsel %vm1831_vm13, %v1821_v63, %v1827_v33  ;;  %v1835_v13 = vsel %vm1831_vm13, %v1827_v33, %v1821_v63 }
 0x247   :  { %v1836_v46 = vsel %vm1831_vm13, %v1823_v11, %v1829_v56  ;;  %v1837_v14 = vsel %vm1831_vm13, %v1829_v56, %v1823_v11  ;;  %v1840_v57 = vsel %vm6399_vm2, %v1818_v31, %v1811_v26  ;;  %v1841_v61 = vsel %vm6399_vm2, %v1813_v32, %v1820_v58 }
 0x248   :  { %v1842_v30 = vsel %vm6399_vm2, %v1820_v58, %v1813_v32  ;;  %v1843_v62 = vsel %vm6399_vm2, %v1815_v16, %v1822_v47  ;;  %v1844_v3 = vsel %vm6399_vm2, %v1822_v47, %v1815_v16  ;;  %vm1845_vm10 = vcmp.lt.f32.partialorder %v1812_v18, %v1832_v2 }
 0x249   :  { %v1846_v35 = vsel %vm1845_vm10, %v1812_v18, %v1832_v2  ;;  %v1847_v63 = vsel %vm1845_vm10, %v1832_v2, %v1812_v18  ;;  %v1848_v15 = vsel %vm1845_vm10, %v1814_v22, %v1834_v29  ;;  %v1849_v59 = vsel %vm1845_vm10, %v1834_v29, %v1814_v22  ;;  %v8917_v22 = vld [vmem:[#allocation82_spill] sm:$0xff] }
 0x24a   :  { %v1850_v23 = vsel %vm1845_vm10, %v1816_v49, %v1836_v46  ;;  %v1851_v7 = vsel %vm1845_vm10, %v1836_v46, %v1816_v49  ;;  %vm1852_vm12 = vcmp.lt.f32.partialorder %v1805_v54, %v1833_v45  ;;  %vm1859_vm11 = vcmp.lt.f32.partialorder %v1847_v63, %v1840_v57 }
 0x24b   :  { %v1853_v26 = vsel %vm1852_vm12, %v1805_v54, %v1833_v45  ;;  %v1854_v31 = vsel %vm1852_vm12, %v1833_v45, %v1805_v54  ;;  %v1855_v11 = vsel %vm1852_vm12, %v1807_v42, %v1835_v13  ;;  %v1856_v20 = vsel %vm1852_vm12, %v1835_v13, %v1807_v42 }
 0x24c   :  { %v1857_v58 = vsel %vm1852_vm12, %v1809_v6, %v1837_v14  ;;  %v1858_v32 = vsel %vm1852_vm12, %v1837_v14, %v1809_v6  ;;  %v1860_v33 = vsel %vm1859_vm11, %v1847_v63, %v1840_v57  ;;  %v1861_v56 = vsel %vm1859_vm11, %v1840_v57, %v1847_v63 }
 0x24d   :  { %v1862_v28 = vsel %vm1859_vm11, %v1849_v59, %v1842_v30  ;;  %v1863_v51 = vsel %vm1859_vm11, %v1842_v30, %v1849_v59  ;;  %v1864_v16 = vsel %vm1859_vm11, %v1851_v7, %v1844_v3  ;;  %v1865_v47 = vsel %vm1859_vm11, %v1844_v3, %v1851_v7  ;;  %v8919_v3 = vld [vmem:[#allocation88_spill] sm:$0xff] }
 0x24e   :  { %vm1866_vm1 = vcmp.lt.f32.partialorder %v1853_v26, %v1846_v35  ;;  %vm1873_vm6 = vcmp.lt.f32.partialorder %v1860_v33, %v1839_v37  ;;  %v1895_v18 = vsel %vm6405_vm0, %v8913_v25, %v6382_v4  ;;  %v6441_v54 = vsel %vm6405_vm0, %v6388_v34, %v8917_v22 }
 0x24f   :  { %8918 = vst [vmem:[#allocation67_spill] sm:$0xff] %v6441_v54  ;;  %v1867_v42 = vsel %vm1866_vm1, %v1853_v26, %v1846_v35  ;;  %v1868_v6 = vsel %vm1866_vm1, %v1846_v35, %v1853_v26  ;;  %v1869_v49 = vsel %vm1866_vm1, %v1855_v11, %v1848_v15  ;;  %v1870_v2 = vsel %vm1866_vm1, %v1848_v15, %v1855_v11  ;;  %v8973_v54 = vld [vmem:[#allocation81_spill] sm:$0xff] }
 0x250   :  { %v1871_v45 = vsel %vm1866_vm1, %v1857_v58, %v1850_v23  ;;  %v1872_v29 = vsel %vm1866_vm1, %v1850_v23, %v1857_v58  ;;  %v6443_v13 = vsel %vm1873_vm6, %v1860_v33, %v1839_v37  ;;  %v1875_v46 = vsel %vm1873_vm6, %v1839_v37, %v1860_v33 }
 0x251   :  { %v6445_v14 = vsel %vm1873_vm6, %v1862_v28, %v1841_v61  ;;  %v1877_v57 = vsel %vm1873_vm6, %v1841_v61, %v1862_v28  ;;  %v6447_v30 = vsel %vm1873_vm6, %v1864_v16, %v1843_v62  ;;  %v1879_v4 = vsel %vm1873_vm6, %v1843_v62, %v1864_v16 }
 0x252   :  { %vm1880_vm14 = vcmp.lt.f32.partialorder %v1861_v56, %v1867_v42  ;;  %vm1887_vm5 = vcmp.lt.f32.partialorder %v1854_v31, %v1868_v6  ;;  %v1897_v25 = vsel %vm6405_vm0, %v8917_v22, %v6388_v34  ;;  %v6457_v35 = vsel %vm6405_vm0, %v6394_v8, %v8919_v3 }
 0x253   :  { %8920 = vst [vmem:[#allocation75_spill] sm:$0xff] %v6457_v35  ;;  %v6459_v37 = vsel %vm1880_vm14, %v1861_v56, %v1867_v42  ;;  %v1882_v63 = vsel %vm1880_vm14, %v1867_v42, %v1861_v56  ;;  %v6461_v28 = vsel %vm1880_vm14, %v1863_v51, %v1869_v49  ;;  %v1884_v61 = vsel %vm1880_vm14, %v1869_v49, %v1863_v51 }
 0x254   :  { %v6463_v62 = vsel %vm1880_vm14, %v1865_v47, %v1871_v45  ;;  %v1886_v15 = vsel %vm1880_vm14, %v1871_v45, %v1865_v47  ;;  %v6465_v59 = vsel %vm1887_vm5, %v1854_v31, %v1868_v6  ;;  %v1889_v23 = vsel %vm1887_vm5, %v1868_v6, %v1854_v31 }
 0x255   :  { %v6467_v7 = vsel %vm1887_vm5, %v1856_v20, %v1870_v2  ;;  %v1891_v34 = vsel %vm1887_vm5, %v1870_v2, %v1856_v20  ;;  %v6469_v26 = vsel %vm1887_vm5, %v1858_v32, %v1872_v29  ;;  %v1893_v11 = vsel %vm1887_vm5, %v1872_v29, %v1858_v32 }
 0x256   :  { %v1899_v58 = vsel %vm6405_vm0, %v8919_v3, %v6394_v8  ;;  %vm1900_vm8 = vcmp.lt.f32.partialorder %v1895_v18, %v6192_v50  ;;  %vm1907_vm15 = vcmp.lt.f32.partialorder %v1882_v63, %v6144_v19  ;;  %vm6478_vm3 = vcmp.lt.f32.partialorder %v1875_v46, %v6102_v27 }
 0x257   :  { %v1901_v31 = vsel %vm1900_vm8, %v1895_v18, %v6192_v50  ;;  %v1902_v20 = vsel %vm1900_vm8, %v6192_v50, %v1895_v18  ;;  %v1903_v32 = vsel %vm1900_vm8, %v1897_v25, %v6180_v55  ;;  %v1904_v56 = vsel %vm1900_vm8, %v6180_v55, %v1897_v25 }
 0x258   :  { %v1905_v60 = vsel %vm1900_vm8, %v1899_v58, %v6186_v36  ;;  %v1906_v8 = vsel %vm1900_vm8, %v6186_v36, %v1899_v58  ;;  %v1908_v51 = vsel %vm1907_vm15, %v1882_v63, %v6144_v19  ;;  %v1909_v16 = vsel %vm1907_vm15, %v6144_v19, %v1882_v63 }
 0x259   :  { %v1910_v47 = vsel %vm1907_vm15, %v1884_v61, %v6124_v21  ;;  %v1911_v22 = vsel %vm1907_vm15, %v6124_v21, %v1884_v61  ;;  %v1912_v42 = vsel %vm1907_vm15, %v1886_v15, %v6134_v10  ;;  %v1913_v50 = vsel %vm1907_vm15, %v6134_v10, %v1886_v15 }
 0x25a   :  { %vm1914_vm4 = vcmp.lt.f32.partialorder %v1909_v16, %v6252_v38  ;;  %vm1921_vm9 = vcmp.lt.f32.partialorder %v1901_v31, %v1908_v51  ;;  %v6498_v55 = vsel %vm6478_vm3, %v1875_v46, %v6102_v27  ;;  %v1937_v19 = vsel %vm6478_vm3, %v6102_v27, %v1875_v46 }
 0x25b   :  { %v1915_v36 = vsel %vm1914_vm4, %v1909_v16, %v6252_v38  ;;  %v6505_v21 = vsel %vm1914_vm4, %v6252_v38, %v1909_v16  ;;  %v1917_v18 = vsel %vm1914_vm4, %v1911_v22, %v6232_v48  ;;  %v6509_v10 = vsel %vm1914_vm4, %v6232_v48, %v1911_v22 }
 0x25c   :  { %8923 = vst [vmem:[#allocation90_spill] sm:$0xff] %v6505_v21  ;;  %v1919_v6 = vsel %vm1914_vm4, %v1913_v50, %v6242_v44  ;;  %v6513_v49 = vsel %vm1914_vm4, %v6242_v44, %v1913_v50  ;;  %v6515_v2 = vsel %vm1921_vm9, %v1901_v31, %v1908_v51  ;;  %v6517_v45 = vsel %vm1921_vm9, %v1908_v51, %v1901_v31 }
 0x25d   :  { %v1924_v27 = vsel %vm1921_vm9, %v1903_v32, %v1910_v47  ;;  %v6519_v29 = vsel %vm1921_vm9, %v1910_v47, %v1903_v32  ;;  %v1926_v46 = vsel %vm1921_vm9, %v1905_v60, %v1912_v42  ;;  %v6521_v38 = vsel %vm1921_vm9, %v1912_v42, %v1905_v60 }
 0x25e   :  { %vm1928_vm7 = vcmp.lt.f32.partialorder %v1902_v20, %v1915_v36  ;;  %v1938_v48 = vsel %vm6478_vm3, %v1877_v57, %v6090_v1  ;;  %v1939_v44 = vsel %vm6478_vm3, %v6090_v1, %v1877_v57  ;;  %v1940_v25 = vsel %vm6478_vm3, %v1879_v4, %v6114_v24 }
 0x25f   :  { %v6532_v3 = vsel %vm1928_vm7, %v1902_v20, %v1915_v36  ;;  %v6534_v63 = vsel %vm1928_vm7, %v1915_v36, %v1902_v20  ;;  %v1931_v61 = vsel %vm1928_vm7, %v1904_v56, %v1917_v18  ;;  %v6536_v15 = vsel %vm1928_vm7, %v1917_v18, %v1904_v56 }
 0x260   :  { %8924 = vst [vmem:[#allocation91_spill] sm:$0xff] %v6534_v63  ;;  %v1933_v58 = vsel %vm1928_vm7, %v1906_v8, %v1919_v6  ;;  %v6538_v31 = vsel %vm1928_vm7, %v1919_v6, %v1906_v8  ;;  %v1941_v32 = vsel %vm6478_vm3, %v6114_v24, %v1879_v4  ;;  %vm1942_vm2 = vcmp.lt.f32.partialorder %v1937_v19, %v6212_v0 }
 0x261   :  { %v1943_v1 = vsel %vm1942_vm2, %v1937_v19, %v6212_v0  ;;  %v1944_v57 = vsel %vm1942_vm2, %v6212_v0, %v1937_v19  ;;  %v1945_v60 = vsel %vm1942_vm2, %v1939_v44, %v6202_v5  ;;  %v1946_v20 = vsel %vm1942_vm2, %v6202_v5, %v1939_v44 }
 0x262   :  { %v1947_v56 = vsel %vm1942_vm2, %v1941_v32, %v6222_v9  ;;  %v1948_v51 = vsel %vm1942_vm2, %v6222_v9, %v1941_v32  ;;  %vm1949_vm0 = vcmp.lt.f32.partialorder %v1889_v23, %v6168_v39  ;;  %vm6553_vm13 = vcmp.lt.f32.partialorder %v6515_v2, %v6498_v55 }
 0x263   :  { %v1950_v4 = vsel %vm1949_vm0, %v1889_v23, %v6168_v39  ;;  %v6559_v0 = vsel %vm1949_vm0, %v6168_v39, %v1889_v23  ;;  %v1952_v33 = vsel %vm1949_vm0, %v1891_v34, %v6152_v52  ;;  %v1953_v5 = vsel %vm1949_vm0, %v6152_v52, %v1891_v34 }
 0x264   :  { %8927 = vst [vmem:[#allocation92_spill] sm:$0xff] %v6559_v0  ;;  %v1954_v8 = vsel %vm1949_vm0, %v1893_v11, %v6174_v43  ;;  %v1955_v9 = vsel %vm1949_vm0, %v6174_v43, %v1893_v11  ;;  %vm6567_vm10 = vcmp.lt.f32.partialorder %v6559_v0, %v6277_v41  ;;  %v8928_v16 = vmov 0 }
 0x265   :  { %v8929_v16 = vsel %vm6567_vm10, 4294967295, %v8928_v16  ;;  %vm1963_vm12 = vcmp.lt.f32.partialorder %v1943_v1, %v1950_v4  ;;  %v1957_v39 = vsel %vm6567_vm10, %v6559_v0, %v6277_v41  ;;  %v1959_v43 = vsel %vm6567_vm10, %v1953_v5, %v6263_v17 }
 0x266   :  { %8930 = vst [vmem:[#allocation93_spill] sm:$0xff] %v8929_v16  ;;  %v6585_v23 = vsel %vm6567_vm10, %v6263_v17, %v1953_v5  ;;  %v1961_v34 = vsel %vm6567_vm10, %v1955_v9, %v6283_v12  ;;  %v6593_v11 = vsel %vm6567_vm10, %v6283_v12, %v1955_v9  ;;  %v6595_v47 = vsel %vm1963_vm12, %v1943_v1, %v1950_v4  ;;  %v8964_v17 = vld [vmem:[#allocation76_spill] sm:$0xff] }
 0x267   :  { %8931 = vst [vmem:[#allocation19_spill] sm:$0xff] %v6585_v23  ;;  %8932 = vst [vmem:[#allocation56_spill] sm:$0xff] %v6593_v11  ;;  %v6597_v22 = vsel %vm1963_vm12, %v1950_v4, %v1943_v1  ;;  %v1966_v42 = vsel %vm1963_vm12, %v1945_v60, %v1952_v33  ;;  %v1967_v50 = vsel %vm1963_vm12, %v1952_v33, %v1945_v60  ;;  %v8952_v52 = vmov 0  ;;  %v8966_v11 = vld [vmem:[#allocation18_spill] sm:$0xff] }
 0x268   :  { %v1968_v19 = vsel %vm1963_vm12, %v1947_v56, %v1954_v8  ;;  %v1969_v36 = vsel %vm1963_vm12, %v1954_v8, %v1947_v56  ;;  %vm1970_vm11 = vcmp.lt.f32.partialorder %v1944_v57, %v1957_v39  ;;  %v6609_v18 = vsel %vm6553_vm13, %v1924_v27, %v1938_v48 }
 0x269   :  { %v6611_v6 = vsel %vm1970_vm11, %v1944_v57, %v1957_v39  ;;  %v6613_v44 = vsel %vm1970_vm11, %v1957_v39, %v1944_v57  ;;  %v1973_v32 = vsel %vm1970_vm11, %v1946_v20, %v1959_v43  ;;  %v1974_v1 = vsel %vm1970_vm11, %v1959_v43, %v1946_v20 }
 0x26a   :  { %8933 = vst [vmem:[#allocation20_spill] sm:$0xff] %v6611_v6  ;;  %8934 = vst [vmem:[#allocation83_spill] sm:$0xff] %v6613_v44  ;;  %v1975_v60 = vsel %vm1970_vm11, %v1948_v51, %v1961_v34  ;;  %v1976_v56 = vsel %vm1970_vm11, %v1961_v34, %v1948_v51  ;;  %v6617_v4 = vsel %vm6553_vm13, %v1938_v48, %v1924_v27  ;;  %v8939_v27 = vmov 0 }
 0x26b   :  { %v6621_v33 = vsel %vm6553_vm13, %v1926_v46, %v1940_v25  ;;  %v6625_v5 = vsel %vm6553_vm13, %v1940_v25, %v1926_v46  ;;  %vm6629_vm1 = vcmp.lt.f32.partialorder %v6517_v45, %v6595_v47  ;;  %vm6635_vm6 = vcmp.lt.f32.partialorder %v6532_v3, %v6597_v22 }
 0x26c   :  { %vm6641_vm14 = vcmp.lt.f32.partialorder %v6534_v63, %v6611_v6  ;;  %v6656_v25 = vsel %vm6629_vm1, %v6519_v29, %v1966_v42  ;;  %v6661_v51 = vsel %vm6629_vm1, %v1966_v42, %v6519_v29  ;;  %v6666_v8 = vsel %vm6629_vm1, %v6521_v38, %v1968_v19  ;;  %v8982_v6 = vld [vmem:[#allocation77_spill] sm:$0xff] }
 0x26d   :  { %v8940_v27 = vsel %vm6641_vm14, 4294967295, %v8939_v27  ;;  %8942 = vst [vmem:[#allocation80_spill] sm:$0xff] %v6661_v51  ;;  %v6671_v9 = vsel %vm6629_vm1, %v1968_v19, %v6521_v38  ;;  %v6683_v43 = vsel %vm6635_vm6, %v1931_v61, %v1967_v50  ;;  %v6687_v34 = vsel %vm6635_vm6, %v1967_v50, %v1931_v61  ;;  %v8955_v19 = vld [vmem:[#allocation73_spill] sm:$0xff] }
 0x26e   :  { %8941 = vst [vmem:[#allocation84_spill] sm:$0xff] %v8940_v27  ;;  %8943 = vst [vmem:[#allocation85_spill] sm:$0xff] %v6671_v9  ;;  %v6691_v38 = vsel %vm6635_vm6, %v1933_v58, %v1969_v36  ;;  %v6695_v42 = vsel %vm6635_vm6, %v1969_v36, %v1933_v58  ;;  %v6708_v61 = vsel %vm6641_vm14, %v6536_v15, %v1973_v32 }
 0x26f   :  { %8944 = vst [vmem:[#allocation62_spill] sm:$0xff] %v6683_v43  ;;  %8945 = vst [vmem:[#allocation69_spill] sm:$0xff] %v6687_v34  ;;  %v6713_v58 = vsel %vm6641_vm14, %v1973_v32, %v6536_v15  ;;  %v6718_v50 = vsel %vm6641_vm14, %v6538_v31, %v1975_v60  ;;  %v6723_v36 = vsel %vm6641_vm14, %v1975_v60, %v6538_v31  ;;  %v8965_v31 = vld [vmem:[#allocation54_spill] sm:$0xff]  ;;  %v8996_v15 = vld [vmem:[#allocation45_spill] sm:$0xff] }
 0x270   :  { %8946 = vst [vmem:[#allocation70_spill] sm:$0xff] %v6691_v38  ;;  %8947 = vst [vmem:[#allocation74_spill] sm:$0xff] %v6695_v42  ;;  %vm6727_vm5 = vcmp.lt.f32.partialorder %v6505_v21, %v6613_v44  ;;  %vm6733_vm8 = vcmp.lt.f32.partialorder %v6443_v13, %v8955_v19  ;;  %vm2026_vm3 = vcmp.lt.f32.partialorder %v6465_v59, %v8965_v31 }
 0x271   :  { %8948 = vst [vmem:[#allocation72_spill] sm:$0xff] %v6708_v61  ;;  %8949 = vst [vmem:[#allocation37_spill] sm:$0xff] %v6713_v58  ;;  %v8953_v52 = vsel %vm6727_vm5, 4294967295, %v8952_v52  ;;  %v6748_v60 = vsel %vm6727_vm5, %v6509_v10, %v1974_v1  ;;  %v6753_v29 = vsel %vm6727_vm5, %v1974_v1, %v6509_v10  ;;  %v6758_v39 = vsel %vm6727_vm5, %v6513_v49, %v1976_v56  ;;  %v8962_v1 = vld [vmem:[#allocation59_spill] sm:$0xff] }
 0x272   :  { %8950 = vst [vmem:[#allocation23_spill] sm:$0xff] %v6718_v50  ;;  %8951 = vst [vmem:[#allocation79_spill] sm:$0xff] %v6723_v36  ;;  %v6763_v32 = vsel %vm6727_vm5, %v1976_v56, %v6513_v49  ;;  %v2014_v10 = vsel %vm6733_vm8, %v8955_v19, %v6443_v13  ;;  %v6777_v48 = vsel %vm6733_vm8, %v6445_v14, %v8962_v1  ;;  %v8963_v56 = vld [vmem:[#allocation86_spill] sm:$0xff]  ;;  %v9027_v20 = vld [vmem:[#allocation83_spill] sm:$0xff] }
 0x273   :  { %8954 = vst [vmem:[#allocation17_spill] sm:$0xff] %v8953_v52  ;;  %8958 = vst [vmem:[#allocation24_spill] sm:$0xff] %v6748_v60  ;;  %v2016_v49 = vsel %vm6733_vm8, %v8962_v1, %v6445_v14  ;;  %v6787_v46 = vsel %vm6733_vm8, %v6447_v30, %v8963_v56  ;;  %v2018_v12 = vsel %vm6733_vm8, %v8963_v56, %v6447_v30  ;;  %v8969_v1 = vld [vmem:[#allocation38_spill] sm:$0xff]  ;;  %v8974_v60 = vld [vmem:[#allocation87_spill] sm:$0xff] }
 0x274   :  { %8959 = vst [vmem:[#allocation55_spill] sm:$0xff] %v6753_v29  ;;  %8960 = vst [vmem:[#allocation25_spill] sm:$0xff] %v6758_v39  ;;  %vm2019_vm15 = vcmp.lt.f32.partialorder %v2014_v10, %v8964_v17  ;;  %vm6798_vm4 = vcmp.lt.f32.partialorder %v6459_v37, %v8966_v11  ;;  %vm6804_vm9 = vcmp.lt.f32.partialorder %v6411_v53, %v8969_v1  ;;  %v8972_v56 = vld [vmem:[#allocation42_spill] sm:$0xff]  ;;  %v8984_v14 = vld [vmem:[#allocation89_spill] sm:$0xff] }
 0x275   :  { %8961 = vst [vmem:[#allocation29_spill] sm:$0xff] %v6763_v32  ;;  %v2020_v32 = vsel %vm2019_vm15, %v2014_v10, %v8964_v17  ;;  %v2021_v30 = vsel %vm2019_vm15, %v8964_v17, %v2014_v10  ;;  %v2022_v29 = vsel %vm2019_vm15, %v2016_v49, %v8972_v56  ;;  %v2023_v35 = vsel %vm2019_vm15, %v8972_v56, %v2016_v49  ;;  %v8975_v10 = vld [vmem:[#allocation61_spill] sm:$0xff] }
 0x276   :  { %v2024_v0 = vsel %vm2019_vm15, %v2018_v12, %v8973_v54  ;;  %v2025_v41 = vsel %vm2019_vm15, %v8973_v54, %v2018_v12  ;;  %v2027_v16 = vsel %vm2026_vm3, %v6465_v59, %v8965_v31  ;;  %v2028_v39 = vsel %vm2026_vm3, %v8965_v31, %v6465_v59  ;;  %v8976_v56 = vld [vmem:[#allocation49_spill] sm:$0xff] }
 0x277   :  { %v2029_v36 = vsel %vm2026_vm3, %v6467_v7, %v8974_v60  ;;  %v2030_v17 = vsel %vm2026_vm3, %v8974_v60, %v6467_v7  ;;  %v2031_v58 = vsel %vm2026_vm3, %v6469_v26, %v8975_v10  ;;  %v2032_v49 = vsel %vm2026_vm3, %v8975_v10, %v6469_v26  ;;  %v8977_v26 = vld [vmem:[#allocation63_spill] sm:$0xff]  ;;  %v8978_v10 = vld [vmem:[#allocation66_spill] sm:$0xff] }
 0x278   :  { %vm2033_vm7 = vcmp.lt.f32.partialorder %v2028_v39, %v8976_v56  ;;  %vm2040_vm2 = vcmp.lt.f32.partialorder %v2020_v32, %v2027_v16  ;;  %v6831_v54 = vsel %vm6798_vm4, %v6459_v37, %v8966_v11  ;;  %v2056_v59 = vsel %vm6798_vm4, %v8966_v11, %v6459_v37 }
 0x279   :  { %v2034_v7 = vsel %vm2033_vm7, %v2028_v39, %v8976_v56  ;;  %v6839_v12 = vsel %vm2033_vm7, %v8976_v56, %v2028_v39  ;;  %v2036_v31 = vsel %vm2033_vm7, %v2030_v17, %v8977_v26  ;;  %v6843_v60 = vsel %vm2033_vm7, %v8977_v26, %v2030_v17  ;;  %v8979_v56 = vld [vmem:[#allocation58_spill] sm:$0xff]  ;;  %v8980_v26 = vld [vmem:[#allocation60_spill] sm:$0xff] }
 0x27a   :  { %v2038_v50 = vsel %vm2033_vm7, %v2032_v49, %v8978_v10  ;;  %v6847_v61 = vsel %vm2033_vm7, %v8978_v10, %v2032_v49  ;;  %v6849_v42 = vsel %vm2040_vm2, %v2020_v32, %v2027_v16  ;;  %v6851_v34 = vsel %vm2040_vm2, %v2027_v16, %v2020_v32 }
 0x27b   :  { %v2043_v37 = vsel %vm2040_vm2, %v2022_v29, %v2029_v36  ;;  %v6853_v11 = vsel %vm2040_vm2, %v2029_v36, %v2022_v29  ;;  %v2045_v44 = vsel %vm2040_vm2, %v2024_v0, %v2031_v58  ;;  %v6855_v39 = vsel %vm2040_vm2, %v2031_v58, %v2024_v0 }
 0x27c   :  { %vm2047_vm0 = vcmp.lt.f32.partialorder %v2021_v30, %v2034_v7  ;;  %v2057_v17 = vsel %vm6798_vm4, %v6461_v28, %v8979_v56  ;;  %v2058_v49 = vsel %vm6798_vm4, %v8979_v56, %v6461_v28  ;;  %v2059_v16 = vsel %vm6798_vm4, %v6463_v62, %v8980_v26  ;;  %v8981_v56 = vld [vmem:[#allocation51_spill] sm:$0xff] }
 0x27d   :  { %v6869_v29 = vsel %vm2047_vm0, %v2021_v30, %v2034_v7  ;;  %v6871_v0 = vsel %vm2047_vm0, %v2034_v7, %v2021_v30  ;;  %v2050_v58 = vsel %vm2047_vm0, %v2023_v35, %v2036_v31  ;;  %v6873_v36 = vsel %vm2047_vm0, %v2036_v31, %v2023_v35  ;;  %v8983_v35 = vld [vmem:[#allocation78_spill] sm:$0xff] }
 0x27e   :  { %v2052_v32 = vsel %vm2047_vm0, %v2025_v41, %v2038_v50  ;;  %v6875_v10 = vsel %vm2047_vm0, %v2038_v50, %v2025_v41  ;;  %v2060_v28 = vsel %vm6798_vm4, %v8980_v26, %v6463_v62  ;;  %vm2061_vm12 = vcmp.lt.f32.partialorder %v2056_v59, %v8981_v56  ;;  %v8986_v26 = vld [vmem:[#allocation71_spill] sm:$0xff] }
 0x27f   :  { %v2062_v21 = vsel %vm2061_vm12, %v2056_v59, %v8981_v56  ;;  %v2063_v52 = vsel %vm2061_vm12, %v8981_v56, %v2056_v59  ;;  %v2064_v30 = vsel %vm2061_vm12, %v2058_v49, %v8982_v6  ;;  %v2065_v7 = vsel %vm2061_vm12, %v8982_v6, %v2058_v49  ;;  %v8985_v49 = vld [vmem:[#allocation68_spill] sm:$0xff] }
 0x280   :  { %v2066_v31 = vsel %vm2061_vm12, %v2060_v28, %v8983_v35  ;;  %v2067_v41 = vsel %vm2061_vm12, %v8983_v35, %v2060_v28  ;;  %v2069_v50 = vsel %vm6804_vm9, %v6411_v53, %v8969_v1  ;;  %v2070_v62 = vsel %vm6804_vm9, %v8969_v1, %v6411_v53  ;;  %v8987_v1 = vld [vmem:[#allocation57_spill] sm:$0xff] }
 0x281   :  { %v2071_v59 = vsel %vm6804_vm9, %v6415_v40, %v8984_v14  ;;  %v2072_v6 = vsel %vm6804_vm9, %v8984_v14, %v6415_v40  ;;  %v2073_v28 = vsel %vm6804_vm9, %v8986_v26, %v8985_v49  ;;  %v2074_v53 = vsel %vm6804_vm9, %v8985_v49, %v8986_v26  ;;  %v8994_v49 = vld [vmem:[#allocation43_spill] sm:$0xff] }
 0x282   :  { %vm2075_vm11 = vcmp.lt.f32.partialorder %v2070_v62, %v8987_v1  ;;  %vm2081_vm15 = vcmp.lt.f32.partialorder %v2062_v21, %v2069_v50  ;;  %vm6915_vm3 = vcmp.lt.f32.partialorder %v6849_v42, %v6831_v54  ;;  %v8990_v40 = vsel %vm6733_vm8, %v6443_v13, %v8955_v19 }
 0x283   :  { %v8991_v23 = vsel %vm6553_vm13, %v6515_v2, %v6498_v55  ;;  %v2076_v14 = vsel %vm2075_vm11, %v2070_v62, %v8987_v1  ;;  %v2077_v26 = vsel %vm2075_vm11, %v2072_v6, %v8994_v49  ;;  %v6936_v63 = vsel %vm2075_vm11, %v8994_v49, %v2072_v6 }
 0x284   :  { %vm6929_vm4 = vcmp.lt.f32.partialorder %v8991_v23, %v8990_v40  ;;  %8995 = vst [vmem:[#allocation50_spill] sm:$0xff] %v6936_v63  ;;  %v2079_v27 = vsel %vm2075_vm11, %v2074_v53, %v8996_v15  ;;  %v6940_v13 = vsel %vm2075_vm11, %v8996_v15, %v2074_v53  ;;  %v2082_v19 = vsel %vm2081_vm15, %v2062_v21, %v2069_v50 }
 0x285   :  { %8997 = vst [vmem:[#allocation26_spill] sm:$0xff] %v6940_v13  ;;  %v6942_v38 = vsel %vm2081_vm15, %v2069_v50, %v2062_v21  ;;  %v2084_v43 = vsel %vm2081_vm15, %v2064_v30, %v2071_v59  ;;  %v2085_v40 = vsel %vm2081_vm15, %v2071_v59, %v2064_v30  ;;  %v2086_v23 = vsel %vm2081_vm15, %v2066_v31, %v2073_v28 }
 0x286   :  { %v2087_v9 = vsel %vm2081_vm15, %v2073_v28, %v2066_v31  ;;  %vm2088_vm8 = vcmp.lt.f32.partialorder %v2063_v52, %v2076_v14  ;;  %v2096_v53 = vsel %vm6915_vm3, %v6849_v42, %v6831_v54  ;;  %v2097_v21 = vsel %vm6915_vm3, %v6831_v54, %v6849_v42  ;;  %v9021_v31 = vld [vmem:[#allocation91_spill] sm:$0xff]  ;;  %v9022_v42 = vld [vmem:[#allocation20_spill] sm:$0xff] }
 0x287   :  { %v6944_v51 = vsel %vm2088_vm8, %v2063_v52, %v2076_v14  ;;  %v6946_v62 = vsel %vm2088_vm8, %v2076_v14, %v2063_v52  ;;  %v2091_v1 = vsel %vm2088_vm8, %v2065_v7, %v2077_v26  ;;  %v2092_v6 = vsel %vm2088_vm8, %v2077_v26, %v2065_v7 }
 0x288   :  { %v2093_v49 = vsel %vm2088_vm8, %v2067_v41, %v2079_v27  ;;  %v2094_v63 = vsel %vm2088_vm8, %v2079_v27, %v2067_v41  ;;  %v2098_v30 = vsel %vm6915_vm3, %v2043_v37, %v2057_v17  ;;  %v2099_v52 = vsel %vm6915_vm3, %v2057_v17, %v2043_v37 }
 0x289   :  { %v2100_v7 = vsel %vm6915_vm3, %v2045_v44, %v2059_v16  ;;  %v2101_v27 = vsel %vm6915_vm3, %v2059_v16, %v2045_v44  ;;  %vm6965_vm9 = vcmp.lt.f32.partialorder %v6851_v34, %v2082_v19  ;;  %vm6971_vm7 = vcmp.lt.f32.partialorder %v6869_v29, %v6942_v38 }
 0x28a   :  { %vm6977_vm2 = vcmp.lt.f32.partialorder %v6871_v0, %v6944_v51  ;;  %vm6983_vm0 = vcmp.lt.f32.partialorder %v6839_v12, %v6946_v62  ;;  %v2103_v37 = vsel %vm6965_vm9, %v6851_v34, %v2082_v19  ;;  %v2104_v17 = vsel %vm6965_vm9, %v2082_v19, %v6851_v34 }
 0x28b   :  { %v2105_v16 = vsel %vm6965_vm9, %v6853_v11, %v2084_v43  ;;  %v2106_v41 = vsel %vm6965_vm9, %v2084_v43, %v6853_v11  ;;  %v2107_v50 = vsel %vm6965_vm9, %v6855_v39, %v2086_v23  ;;  %v2108_v59 = vsel %vm6965_vm9, %v2086_v23, %v6855_v39 }
 0x28c   :  { %v2110_v34 = vsel %vm6971_vm7, %v6869_v29, %v6942_v38  ;;  %v2111_v28 = vsel %vm6971_vm7, %v6942_v38, %v6869_v29  ;;  %v2112_v43 = vsel %vm6971_vm7, %v2050_v58, %v2085_v40  ;;  %v2113_v11 = vsel %vm6971_vm7, %v2085_v40, %v2050_v58 }
 0x28d   :  { %v2114_v56 = vsel %vm6971_vm7, %v2052_v32, %v2087_v9  ;;  %v2115_v39 = vsel %vm6971_vm7, %v2087_v9, %v2052_v32  ;;  %v2117_v14 = vsel %vm6977_vm2, %v6871_v0, %v6944_v51  ;;  %v2118_v38 = vsel %vm6977_vm2, %v6944_v51, %v6871_v0 }
 0x28e   :  { %v2119_v29 = vsel %vm6977_vm2, %v6873_v36, %v2091_v1  ;;  %v2120_v58 = vsel %vm6977_vm2, %v2091_v1, %v6873_v36  ;;  %v2121_v9 = vsel %vm6977_vm2, %v6875_v10, %v2093_v49  ;;  %v2122_v32 = vsel %vm6977_vm2, %v2093_v49, %v6875_v10 }
 0x28f   :  { %v2124_v51 = vsel %vm6983_vm0, %v6839_v12, %v6946_v62  ;;  %v2125_v0 = vsel %vm6983_vm0, %v6946_v62, %v6839_v12  ;;  %v2126_v36 = vsel %vm6983_vm0, %v6843_v60, %v2092_v6  ;;  %v2127_v26 = vsel %vm6983_vm0, %v2092_v6, %v6843_v60 }
 0x290   :  { %v2128_v10 = vsel %vm6983_vm0, %v6847_v61, %v2094_v63  ;;  %v2129_v15 = vsel %vm6983_vm0, %v2094_v63, %v6847_v61  ;;  %v7065_v12 = vsel %vm6929_vm4, %v6609_v18, %v6777_v48  ;;  %v7071_v19 = vsel %vm6929_vm4, %v6777_v48, %v6609_v18 }
 0x291   :  { %v7077_v60 = vsel %vm6929_vm4, %v6621_v33, %v6787_v46  ;;  %v7083_v63 = vsel %vm6929_vm4, %v6787_v46, %v6621_v33  ;;  %v9006_v61 = vsel %vm6553_vm13, %v6498_v55, %v6515_v2  ;;  %v9007_v18 = vsel %vm6629_vm1, %v6517_v45, %v6595_v47 }
 0x292   :  { %vm2135_vm12 = vcmp.lt.f32.partialorder %v9006_v61, %v2096_v53  ;;  %vm2140_vm11 = vcmp.lt.f32.partialorder %v9007_v18, %v2097_v21  ;;  %v9008_v48 = vsel %vm6629_vm1, %v6595_v47, %v6517_v45  ;;  %v9009_v24 = vsel %vm6635_vm6, %v6532_v3, %v6597_v22  ;;  %v9016_v53 = vld [vmem:[#allocation70_spill] sm:$0xff]  ;;  %v9034_v18 = vld [vmem:[#allocation23_spill] sm:$0xff] }
 0x293   :  { %vm2145_vm15 = vcmp.lt.f32.partialorder %v9008_v48, %v2103_v37  ;;  %vm7105_vm3 = vcmp.lt.f32.partialorder %v9009_v24, %v2104_v17  ;;  %v7110_v2 = vsel %vm2135_vm12, %v6617_v4, %v2098_v30  ;;  %v7113_v33 = vsel %vm2135_vm12, %v2098_v30, %v6617_v4  ;;  %v9013_v4 = vld [vmem:[#allocation80_spill] sm:$0xff]  ;;  %v9026_v17 = vld [vmem:[#allocation90_spill] sm:$0xff] }
 0x294   :  { %v7116_v57 = vsel %vm2135_vm12, %v6625_v5, %v2100_v7  ;;  %v7119_v45 = vsel %vm2135_vm12, %v2100_v7, %v6625_v5  ;;  %v7122_v47 = vsel %vm2140_vm11, %v6656_v25, %v2099_v52  ;;  %v7125_v46 = vsel %vm2140_vm11, %v2099_v52, %v6656_v25  ;;  %v9014_v5 = vld [vmem:[#allocation85_spill] sm:$0xff]  ;;  %v9015_v25 = vld [vmem:[#allocation62_spill] sm:$0xff] }
 0x295   :  { %9012 = vst [vmem:[#allocation30_spill] sm:$0xff] %v7119_v45  ;;  %v7128_v35 = vsel %vm2140_vm11, %v6666_v8, %v2101_v27  ;;  %v7131_v40 = vsel %vm2140_vm11, %v2101_v27, %v6666_v8  ;;  %v7134_v23 = vsel %vm2145_vm15, %v9013_v4, %v2105_v16  ;;  %v7137_v62 = vsel %vm2145_vm15, %v2105_v16, %v9013_v4  ;;  %v9018_v52 = vld [vmem:[#allocation94_spill] sm:$0xff] }
 0x296   :  { %v7140_v1 = vsel %vm2145_vm15, %v9014_v5, %v2107_v50  ;;  %v7143_v6 = vsel %vm2145_vm15, %v2107_v50, %v9014_v5  ;;  %v7148_v49 = vsel %vm7105_vm3, %v9015_v25, %v2106_v41  ;;  %v7153_v8 = vsel %vm7105_vm3, %v2106_v41, %v9015_v25 }
 0x297   :  { %v7158_v21 = vsel %vm7105_vm3, %v9016_v53, %v2108_v59  ;;  %v7163_v30 = vsel %vm7105_vm3, %v2108_v59, %v9016_v53  ;;  %vm2185_vm13 = vcmp.gt.f32.partialorder %v9018_v52, 1.0  ;;  %v9019_v7 = vsel %vm6635_vm6, %v6597_v22, %v6532_v3  ;;  %v9031_v22 = vld [vmem:[#allocation69_spill] sm:$0xff]  ;;  %v9032_v59 = vld [vmem:[#allocation74_spill] sm:$0xff] }
 0x298   :  { %9017 = vst [vmem:[#allocation21_spill] sm:$0xff] %v7163_v30  ;;  %vm2155_vm1 = vcmp.lt.f32.partialorder %v9019_v7, %v2110_v34  ;;  %v9023_v54 = vsel %vm6641_vm14, %v9021_v31, %v9022_v42  ;;  %v9024_v44 = vsel %vm6641_vm14, %v9022_v42, %v9021_v31  ;;  %v9028_v16 = vsel %vm6727_vm5, %v9026_v17, %v9027_v20  ;;  %v9039_v7 = vld [vmem:[#allocation25_spill] sm:$0xff]  ;;  %v9043_v42 = vld [vmem:[#allocation92_spill] sm:$0xff] }
 0x299   :  { %vm2160_vm4 = vcmp.lt.f32.partialorder %v9023_v54, %v2111_v28  ;;  %vm2165_vm8 = vcmp.lt.f32.partialorder %v9024_v44, %v2117_v14  ;;  %vm7186_vm9 = vcmp.lt.f32.partialorder %v9028_v16, %v2118_v38  ;;  %v7191_v41 = vsel %vm2155_vm1, %v9031_v22, %v2112_v43  ;;  %v9033_v14 = vld [vmem:[#allocation72_spill] sm:$0xff]  ;;  %v9045_v44 = vld [vmem:[#allocation67_spill] sm:$0xff] }
 0x29a   :  { %v7194_v50 = vsel %vm2155_vm1, %v2112_v43, %v9031_v22  ;;  %v7197_v34 = vsel %vm2155_vm1, %v9032_v59, %v2114_v56  ;;  %v7200_v28 = vsel %vm2155_vm1, %v2114_v56, %v9032_v59  ;;  %v7203_v61 = vsel %vm2160_vm4, %v9033_v14, %v2113_v11  ;;  %v9035_v43 = vld [vmem:[#allocation37_spill] sm:$0xff]  ;;  %v9036_v56 = vld [vmem:[#allocation79_spill] sm:$0xff] }
 0x29b   :  { %v7206_v38 = vsel %vm2160_vm4, %v2113_v11, %v9033_v14  ;;  %v7209_v48 = vsel %vm2160_vm4, %v9034_v18, %v2115_v39  ;;  %v7212_v24 = vsel %vm2160_vm4, %v2115_v39, %v9034_v18  ;;  %v7215_v55 = vsel %vm2165_vm8, %v9035_v43, %v2119_v29  ;;  %v9038_v11 = vld [vmem:[#allocation24_spill] sm:$0xff]  ;;  %v9046_v22 = vld [vmem:[#allocation75_spill] sm:$0xff] }
 0x29c   :  { %v7218_v4 = vsel %vm2165_vm8, %v2119_v29, %v9035_v43  ;;  %v7221_v5 = vsel %vm2165_vm8, %v9036_v56, %v2121_v9  ;;  %v7224_v25 = vsel %vm2165_vm8, %v2121_v9, %v9036_v56  ;;  %v7229_v53 = vsel %vm7186_vm9, %v9038_v11, %v2120_v58  ;;  %v9050_v14 = vld [vmem:[#allocation19_spill] sm:$0xff]  ;;  %v9051_v43 = vld [vmem:[#allocation56_spill] sm:$0xff] }
 0x29d   :  { %9037 = vst [vmem:[#allocation53_spill] sm:$0xff] %v7221_v5  ;;  %v7234_v39 = vsel %vm7186_vm9, %v2120_v58, %v9038_v11  ;;  %v7239_v29 = vsel %vm7186_vm9, %v9039_v7, %v2122_v32  ;;  %v7244_v9 = vsel %vm7186_vm9, %v2122_v32, %v9039_v7  ;;  %v9040_v27 = vsel %vm6727_vm5, %v9027_v20, %v9026_v17  ;;  %v9042_v58 = vld [vmem:[#allocation65_spill] sm:$0xff]  ;;  %v9047_v32 = vld [vmem:[#allocation55_spill] sm:$0xff] }
 0x29e   :  { %vm2175_vm6 = vcmp.lt.f32.partialorder %v9040_v27, %v2124_v51  ;;  %v9044_v54 = vsel %vm6567_vm10, %v9042_v58, %v9043_v42  ;;  %v2186_v16 = vmul.f32 %v7077_v60, %v9045_v44  ;;  %v2187_v3 = vmul.f32 %v7065_v12, %v9046_v22  ;;  %v9049_v17 = vld [vmem:[#allocation29_spill] sm:$0xff] }
 0x29f   :  { %vm2180_vm14 = vcmp.lt.f32.partialorder %v9044_v54, %v2125_v0  ;;  %v7261_v59 = vsel %vm2175_vm6, %v9047_v32, %v2126_v36  ;;  %v7264_v37 = vsel %vm2175_vm6, %v2126_v36, %v9047_v32  ;;  %v7267_v51 = vsel %vm2175_vm6, %v9049_v17, %v2128_v10 }
 0x2a0   :  { %9048 = vst [vmem:[#allocation64_spill] sm:$0xff] %v7264_v37  ;;  %v7270_v20 = vsel %vm2175_vm6, %v2128_v10, %v9049_v17  ;;  %v7273_v0 = vsel %vm2180_vm14, %v9050_v14, %v2127_v26  ;;  %v7276_v18 = vsel %vm2180_vm14, %v2127_v26, %v9050_v14  ;;  %v7279_v56 = vsel %vm2180_vm14, %v9051_v43, %v2129_v15 }
 0x2a1   :  { %v7282_v11 = vsel %vm2180_vm14, %v2129_v15, %v9051_v43  ;;  %v2188_v36 = vsub.f32 %v2186_v16, %v2187_v3  ;;  %vm2191_vm10 = vcmp.gt.f32.partialorder %v9018_v52, 2.0  ;;  %v2192_v7 = vmul.f32 %v7083_v63, %v7065_v12 }
 0x2a2   :  { %v2193_v10 = vmul.f32 %v7077_v60, %v7071_v19  ;;  %vm2197_vm5 = vcmp.gt.f32.partialorder %v9018_v52, 3.0  ;;  %v2198_v26 = vmul.f32 %v7116_v57, %v7071_v19  ;;  %v2199_v27 = vmul.f32 %v7110_v2, %v7083_v63 }
 0x2a3   :  { %v2204_v15 = vmul.f32 %v7119_v45, %v7110_v2  ;;  %v2189_v31 = vsel %vm2185_vm13, %v2188_v36, 0.0  ;;  %vm2203_vm7 = vcmp.gt.f32.partialorder %v9018_v52, 4.0  ;;  %v2205_v42 = vmul.f32 %v7116_v57, %v7113_v33 }
 0x2a4   :  { %v2194_v58 = vsub.f32 %v2192_v7, %v2193_v10  ;;  %v2200_v54 = vsub.f32 %v2198_v26, %v2199_v27  ;;  %vm2209_vm2 = vcmp.gt.f32.partialorder %v9018_v52, 5.0  ;;  %v2210_v16 = vmul.f32 %v7128_v35, %v7113_v33 }
 0x2a5   :  { %v2211_v3 = vmul.f32 %v7122_v47, %v7119_v45  ;;  %v2206_v17 = vsub.f32 %v2204_v15, %v2205_v42  ;;  %v2216_v14 = vmul.f32 %v7131_v40, %v7122_v47  ;;  %v2217_v43 = vmul.f32 %v7128_v35, %v7125_v46 }
 0x2a6   :  { %v2195_v32 = vsel %vm2191_vm10, %v2194_v58, 0.0  ;;  %v2201_v7 = vsel %vm2197_vm5, %v2200_v54, 0.0  ;;  %vm2215_vm0 = vcmp.gt.f32.partialorder %v9018_v52, 6.0  ;;  %v2222_v45 = vmul.f32 %v7140_v1, %v7125_v46 }
 0x2a7   :  { %v2196_v36 = vadd.f32 %v2195_v32, %v2189_v31  ;;  %v2212_v10 = vsub.f32 %v2210_v16, %v2211_v3  ;;  %v2207_v26 = vsel %vm2203_vm7, %v2206_v17, 0.0  ;;  %v2218_v27 = vsub.f32 %v2216_v14, %v2217_v43 }
 0x2a8   :  { %v2223_v15 = vmul.f32 %v7134_v23, %v7131_v40  ;;  %vm2221_vm12 = vcmp.gt.f32.partialorder %v9018_v52, 7.0  ;;  %v2228_v31 = vmul.f32 %v7143_v6, %v7134_v23  ;;  %vm2227_vm11 = vcmp.gt.f32.partialorder %v9018_v52, 8.0 }
 0x2a9   :  { %v2202_v58 = vadd.f32 %v2201_v7, %v2196_v36  ;;  %v2213_v42 = vsel %vm2209_vm2, %v2212_v10, 0.0  ;;  %v2229_v16 = vmul.f32 %v7140_v1, %v7137_v62  ;;  %v2219_v32 = vsel %vm2215_vm0, %v2218_v27, 0.0 }
 0x2aa   :  { %v2224_v54 = vsub.f32 %v2222_v45, %v2223_v15  ;;  %v2234_v17 = vmul.f32 %v7158_v21, %v7137_v62  ;;  %v2235_v14 = vmul.f32 %v7148_v49, %v7143_v6  ;;  %vm2233_vm15 = vcmp.gt.f32.partialorder %v9018_v52, 9.0 }
 0x2ab   :  { %v2208_v3 = vadd.f32 %v2207_v26, %v2202_v58  ;;  %v2230_v43 = vsub.f32 %v2228_v31, %v2229_v16  ;;  %v2240_v36 = vmul.f32 %v7163_v30, %v7148_v49  ;;  %v2241_v45 = vmul.f32 %v7158_v21, %v7153_v8 }
 0x2ac   :  { %v2236_v10 = vsub.f32 %v2234_v17, %v2235_v14  ;;  %vm2239_vm3 = vcmp.gt.f32.partialorder %v9018_v52, 10.0  ;;  %v2246_v26 = vmul.f32 %v7197_v34, %v7153_v8  ;;  %v2225_v27 = vsel %vm2221_vm12, %v2224_v54, 0.0 }
 0x2ad   :  { %v2214_v7 = vadd.f32 %v2213_v42, %v2208_v3  ;;  %v2242_v15 = vsub.f32 %v2240_v36, %v2241_v45  ;;  %vm2245_vm13 = vcmp.gt.f32.partialorder %v9018_v52, 11.0  ;;  %v2247_v58 = vmul.f32 %v7191_v41, %v7163_v30 }
 0x2ae   :  { %v2231_v16 = vsel %vm2227_vm11, %v2230_v43, 0.0  ;;  %v2252_v42 = vmul.f32 %v7200_v28, %v7191_v41  ;;  %v2253_v3 = vmul.f32 %v7197_v34, %v7194_v50  ;;  %v2237_v17 = vsel %vm2233_vm15, %v2236_v10, 0.0 }
 0x2af   :  { %v2220_v31 = vadd.f32 %v2219_v32, %v2214_v7  ;;  %v2248_v14 = vsub.f32 %v2246_v26, %v2247_v58  ;;  %vm2251_vm1 = vcmp.gt.f32.partialorder %v9018_v52, 12.0  ;;  %v2258_v54 = vmul.f32 %v7209_v48, %v7194_v50 }
 0x2b0   :  { %v2243_v45 = vsel %vm2239_vm3, %v2242_v15, 0.0  ;;  %v2254_v30 = vsub.f32 %v2252_v42, %v2253_v3  ;;  %v2259_v32 = vmul.f32 %v7203_v61, %v7200_v28  ;;  %vm2257_vm4 = vcmp.gt.f32.partialorder %v9018_v52, 13.0 }
 0x2b1   :  { %v2226_v36 = vadd.f32 %v2225_v27, %v2220_v31  ;;  %vm2263_vm8 = vcmp.gt.f32.partialorder %v9018_v52, 14.0  ;;  %v2264_v43 = vmul.f32 %v7212_v24, %v7203_v61  ;;  %v2265_v7 = vmul.f32 %v7209_v48, %v7206_v38 }
 0x2b2   :  { %v2249_v26 = vsel %vm2245_vm13, %v2248_v14, 0.0  ;;  %v2260_v27 = vsub.f32 %v2258_v54, %v2259_v32  ;;  %v2270_v15 = vmul.f32 %v7221_v5, %v7206_v38  ;;  %vm2269_vm9 = vcmp.gt.f32.partialorder %v9018_v52, 15.0 }
 0x2b3   :  { %v2232_v10 = vadd.f32 %v2231_v16, %v2226_v36  ;;  %v2266_v58 = vsub.f32 %v2264_v43, %v2265_v7  ;;  %v2271_v31 = vmul.f32 %v7215_v55, %v7212_v24  ;;  %v2276_v42 = vmul.f32 %v7224_v25, %v7215_v55 }
 0x2b4   :  { %v2255_v16 = vsel %vm2251_vm1, %v2254_v30, 0.0  ;;  %vm2275_vm6 = vcmp.gt.f32.partialorder %v9018_v52, 16.0  ;;  %v2277_v14 = vmul.f32 %v7221_v5, %v7218_v4  ;;  %v2261_v54 = vsel %vm2257_vm4, %v2260_v27, 0.0 }
 0x2b5   :  { %v2238_v3 = vadd.f32 %v2237_v17, %v2232_v10  ;;  %v2272_v36 = vsub.f32 %v2270_v15, %v2271_v31  ;;  %v2282_v32 = vmul.f32 %v7239_v29, %v7218_v4  ;;  %v2283_v43 = vmul.f32 %v7229_v53, %v7224_v25 }
 0x2b6   :  { %v2278_v17 = vsub.f32 %v2276_v42, %v2277_v14  ;;  %vm2281_vm14 = vcmp.gt.f32.partialorder %v9018_v52, 17.0  ;;  %v2288_v30 = vmul.f32 %v7244_v9, %v7229_v53  ;;  %v2267_v10 = vsel %vm2263_vm8, %v2266_v58, 0.0 }
 0x2b7   :  { %v2244_v7 = vadd.f32 %v2243_v45, %v2238_v3  ;;  %v2284_v5 = vsub.f32 %v2282_v32, %v2283_v43  ;;  %vm2287_vm10 = vcmp.gt.f32.partialorder %v9018_v52, 18.0  ;;  %v2289_v27 = vmul.f32 %v7239_v29, %v7234_v39 }
 0x2b8   :  { %v2273_v31 = vsel %vm2269_vm9, %v2272_v36, 0.0  ;;  %v2294_v45 = vmul.f32 %v7267_v51, %v7234_v39  ;;  %v2295_v42 = vmul.f32 %v7261_v59, %v7244_v9  ;;  %v2279_v3 = vsel %vm2275_vm6, %v2278_v17, 0.0 }
 0x2b9   :  { %v2250_v15 = vadd.f32 %v2249_v26, %v2244_v7  ;;  %v2290_v58 = vsub.f32 %v2288_v30, %v2289_v27  ;;  %vm2293_vm5 = vcmp.gt.f32.partialorder %v9018_v52, 19.0  ;;  %v2300_v14 = vmul.f32 %v7270_v20, %v7261_v59 }
 0x2ba   :  { %v2285_v26 = vsel %vm2281_vm14, %v2284_v5, 0.0  ;;  %v2296_v43 = vsub.f32 %v2294_v45, %v2295_v42  ;;  %v2301_v36 = vmul.f32 %v7267_v51, %v7264_v37  ;;  %vm2299_vm7 = vcmp.gt.f32.partialorder %v9018_v52, 20.0 }
 0x2bb   :  { %v2256_v32 = vadd.f32 %v2255_v16, %v2250_v15  ;;  %vm2305_vm2 = vcmp.gt.f32.partialorder %v9018_v52, 21.0  ;;  %v2306_v7 = vmul.f32 %v7279_v56, %v7264_v37  ;;  %v2307_v17 = vmul.f32 %v7273_v0, %v7270_v20 }
 0x2bc   :  { %v2291_v27 = vsel %vm2287_vm10, %v2290_v58, 0.0  ;;  %v2302_v16 = vsub.f32 %v2300_v14, %v2301_v36  ;;  %v2312_v5 = vmul.f32 %v7282_v11, %v7273_v0  ;;  %vm2311_vm0 = vcmp.gt.f32.partialorder %v9018_v52, 22.0 }
 0x2bd   :  { %v2262_v30 = vadd.f32 %v2261_v54, %v2256_v32  ;;  %v2308_v15 = vsub.f32 %v2306_v7, %v2307_v17  ;;  %v2313_v45 = vmul.f32 %v7279_v56, %v7276_v18  ;;  %v2318_v42 = vmul.f32 %v7276_v18, %v6940_v13  ;;  %v9052_v32 = vld [vmem:[#allocation50_spill] sm:$0xff] }
 0x2be   :  { %v2297_v54 = vsel %vm2293_vm5, %v2296_v43, 0.0  ;;  %v2319_v58 = vmul.f32 %v7282_v11, %v9052_v32  ;;  %vm2323_vm12 = vcmp.eq.f32.partialorder %v9018_v52, 2.0  ;;  %vm2317_vm11 = vcmp.gt.f32.partialorder %v9018_v52, 23.0 }
 0x2bf   :  { %v2268_v37 = vadd.f32 %v2267_v10, %v2262_v30  ;;  %v2314_v14 = vsub.f32 %v2312_v5, %v2313_v45  ;;  %v2324_v36 = vsel %vm2323_vm12, %v7065_v12, %v9045_v44  ;;  %v2325_v7 = vsel %vm2323_vm12, %v7077_v60, %v9046_v22  ;;  %v9053_v45 = vld [vmem:[#allocation30_spill] sm:$0xff] }
 0x2c0   :  { %v2320_v13 = vsub.f32 %v2318_v42, %v2319_v58  ;;  %vm2326_vm15 = vcmp.eq.f32.partialorder %v9018_v52, 3.0  ;;  %vm2329_vm3 = vcmp.eq.f32.partialorder %v9018_v52, 4.0  ;;  %v2303_v10 = vsel %vm2299_vm7, %v2302_v16, 0.0  ;;  %v9054_v58 = vld [vmem:[#allocation21_spill] sm:$0xff] }
 0x2c1   :  { %v2274_v17 = vadd.f32 %v2273_v31, %v2268_v37  ;;  %v2327_v43 = vsel %vm2326_vm15, %v7071_v19, %v2324_v36  ;;  %v2328_v30 = vsel %vm2326_vm15, %v7083_v63, %v2325_v7  ;;  %vm2332_vm13 = vcmp.eq.f32.partialorder %v9018_v52, 5.0 }
 0x2c2   :  { %v2309_v12 = vsel %vm2305_vm2, %v2308_v15, 0.0  ;;  %v2330_v60 = vsel %vm2329_vm3, %v7110_v2, %v2327_v43  ;;  %v2331_v37 = vsel %vm2329_vm3, %v7116_v57, %v2328_v30  ;;  %vm2335_vm1 = vcmp.eq.f32.partialorder %v9018_v52, 6.0 }
 0x2c3   :  { %v2280_v5 = vadd.f32 %v2279_v3, %v2274_v17  ;;  %v2333_v31 = vsel %vm2332_vm13, %v7113_v33, %v2330_v60  ;;  %v2334_v42 = vsel %vm2332_vm13, %v9053_v45, %v2331_v37  ;;  %vm2338_vm4 = vcmp.eq.f32.partialorder %v9018_v52, 7.0  ;;  %v9055_v17 = vld [vmem:[#allocation53_spill] sm:$0xff]  ;;  %v9056_v45 = vld [vmem:[#allocation64_spill] sm:$0xff] }
 0x2c4   :  { %v2336_v63 = vsel %vm2335_vm1, %v7122_v47, %v2333_v31  ;;  %v2337_v3 = vsel %vm2335_vm1, %v7128_v35, %v2334_v42  ;;  %vm2341_vm8 = vcmp.eq.f32.partialorder %v9018_v52, 8.0  ;;  %vm2344_vm9 = vcmp.eq.f32.partialorder %v9018_v52, 9.0 }
 0x2c5   :  { %v2286_v19 = vadd.f32 %v2285_v26, %v2280_v5  ;;  %v2339_v16 = vsel %vm2338_vm4, %v7125_v46, %v2336_v63  ;;  %v2340_v2 = vsel %vm2338_vm4, %v7131_v40, %v2337_v3  ;;  %vm2347_vm6 = vcmp.eq.f32.partialorder %v9018_v52, 10.0  ;;  %v2405_v5 = vld [vmem:[#allocation10 + $0x10] sm:$0xff] }
 0x2c6   :  { %v2342_v57 = vsel %vm2341_vm8, %v7134_v23, %v2339_v16  ;;  %v2343_v15 = vsel %vm2341_vm8, %v7140_v1, %v2340_v2  ;;  %vm2350_vm14 = vcmp.eq.f32.partialorder %v9018_v52, 11.0  ;;  %v2315_v47 = vsel %vm2311_vm0, %v2314_v14, 0.0  ;;  %v9057_v16 = vld [vmem:[#allocation26_spill] sm:$0xff] }
 0x2c7   :  { %v2292_v33 = vadd.f32 %v2291_v27, %v2286_v19  ;;  %v2345_v35 = vsel %vm2344_vm9, %v7137_v62, %v2342_v57  ;;  %v2346_v46 = vsel %vm2344_vm9, %v7143_v6, %v2343_v15  ;;  %vm2353_vm10 = vcmp.eq.f32.partialorder %v9018_v52, 12.0 }
 0x2c8   :  { %v2348_v26 = vsel %vm2347_vm6, %v7148_v49, %v2345_v35  ;;  %v2349_v27 = vsel %vm2347_vm6, %v7158_v21, %v2346_v46  ;;  %vm2356_vm5 = vcmp.eq.f32.partialorder %v9018_v52, 13.0  ;;  %v2321_v23 = vsel %vm2317_vm11, %v2320_v13, 0.0  ;;  %v2581_v46 = vld [vmem:[#allocation10 + $0x18] sm:$0xff] }
 0x2c9   :  { %v2298_v40 = vadd.f32 %v2297_v54, %v2292_v33  ;;  %v2351_v1 = vsel %vm2350_vm14, %v7153_v8, %v2348_v26  ;;  %v2352_v14 = vsel %vm2350_vm14, %v9054_v58, %v2349_v27  ;;  %vm2359_vm7 = vcmp.eq.f32.partialorder %v9018_v52, 14.0 }
 0x2ca   :  { %v2354_v6 = vsel %vm2353_vm10, %v7191_v41, %v2351_v1  ;;  %v2355_v54 = vsel %vm2353_vm10, %v7197_v34, %v2352_v14  ;;  %vm2362_vm2 = vcmp.eq.f32.partialorder %v9018_v52, 15.0  ;;  %vm2365_vm0 = vcmp.eq.f32.partialorder %v9018_v52, 16.0 }
 0x2cb   :  { %v2304_v62 = vadd.f32 %v2303_v10, %v2298_v40  ;;  %v2357_v49 = vsel %vm2356_vm5, %v7194_v50, %v2354_v6  ;;  %v2358_v21 = vsel %vm2356_vm5, %v7200_v28, %v2355_v54  ;;  %vm2368_vm12 = vcmp.eq.f32.partialorder %v9018_v52, 17.0  ;;  %v2403_v50 = vld [vmem:[#allocation9 + $0x28] sm:$0xff]  ;;  %v2582_v40 = vld [vmem:[#allocation10 + $0x20] sm:$0xff] }
 0x2cc   :  { %v2360_v8 = vsel %vm2359_vm7, %v7203_v61, %v2357_v49  ;;  %v2361_v36 = vsel %vm2359_vm7, %v7209_v48, %v2358_v21  ;;  %vm2371_vm11 = vcmp.eq.f32.partialorder %v9018_v52, 18.0  ;;  %vm2374_vm15 = vcmp.eq.f32.partialorder %v9018_v52, 19.0  ;;  %v2407_v61 = vld [vmem:[#allocation10 + $0x28] sm:$0xff] }
 0x2cd   :  { %v2310_v13 = vadd.f32 %v2309_v12, %v2304_v62  ;;  %v2363_v41 = vsel %vm2362_vm2, %v7206_v38, %v2360_v8  ;;  %v2364_v34 = vsel %vm2362_vm2, %v7212_v24, %v2361_v36  ;;  %vm2377_vm3 = vcmp.eq.f32.partialorder %v9018_v52, 20.0  ;;  %v2401_v24 = vld [vmem:[#allocation9 + $0x10] sm:$0xff] }
 0x2ce   :  { %v2366_v7 = vsel %vm2365_vm0, %v7215_v55, %v2363_v41  ;;  %v2367_v10 = vsel %vm2365_vm0, %v9055_v17, %v2364_v34  ;;  %vm2380_vm13 = vcmp.eq.f32.partialorder %v9018_v52, 21.0  ;;  %vm2383_vm1 = vcmp.eq.f32.partialorder %v9018_v52, 22.0  ;;  %v2431_v8 = vld [vmem:[#allocation4] sm:$0xff]  ;;  %v2430_v34 = vld [vmem:[#allocation7] sm:$0xff] }
 0x2cf   :  { %v2316_v28 = vadd.f32 %v2315_v47, %v2310_v13  ;;  %v2369_v48 = vsel %vm2368_vm12, %v7218_v4, %v2366_v7  ;;  %v2370_v38 = vsel %vm2368_vm12, %v7224_v25, %v2367_v10  ;;  %vm2386_vm4 = vcmp.eq.f32.partialorder %v9018_v52, 23.0  ;;  %v2579_v47 = vld [vmem:[#allocation9 + $0x18] sm:$0xff] }
 0x2d0   :  { %v2372_v55 = vsel %vm2371_vm11, %v7229_v53, %v2369_v48  ;;  %v2373_v30 = vsel %vm2371_vm11, %v7239_v29, %v2370_v38  ;;  %v2408_v4 = vmul.f32 0.5, %v2403_v50  ;;  %vm2389_vm8 = vcmp.eq.f32.partialorder %v9018_v52, 24.0 }
 0x2d1   :  { %v2322_v43 = vadd.f32 %v2321_v23, %v2316_v28  ;;  %v2375_v25 = vsel %vm2374_vm15, %v7234_v39, %v2372_v55  ;;  %v2376_v12 = vsel %vm2374_vm15, %v7244_v9, %v2373_v30  ;;  %v2410_v60 = vmul.f32 0.5, %v2407_v61 }
 0x2d2   :  { %v2378_v53 = vsel %vm2377_vm3, %v7261_v59, %v2375_v25  ;;  %v2379_v29 = vsel %vm2377_vm3, %v7267_v51, %v2376_v12  ;;  %v2409_v37 = vadd.f32 %v2408_v4, %v2401_v24  ;;  %v2413_v31 = vsub.f32 %v2401_v24, %v2408_v4 }
 0x2d3   :  { %v2381_v39 = vsel %vm2380_vm13, %v9056_v45, %v2378_v53  ;;  %v2382_v9 = vsel %vm2380_vm13, %v7270_v20, %v2379_v29  ;;  %v2411_v42 = vadd.f32 %v2410_v60, %v2405_v5  ;;  %v2414_v19 = vsub.f32 %v2405_v5, %v2410_v60 }
 0x2d4   :  { %v2384_v59 = vsel %vm2383_vm1, %v7273_v0, %v2381_v39  ;;  %v2385_v51 = vsel %vm2383_vm1, %v7279_v56, %v2382_v9  ;;  %v2580_v56 = vld [vmem:[#allocation9 + $0x20] sm:$0xff]  ;;  %vm2396_vm9 = vcmp.ge.f32.partialorder %v9018_v52, 3.0 }
 0x2d5   :  { %v2387_v63 = vsel %vm2386_vm4, %v7276_v18, %v2384_v59  ;;  %v2388_v3 = vsel %vm2386_vm4, %v7282_v11, %v2385_v51  ;;  %v2412_v33 = vmin.f32 %v2409_v37, %v2411_v42  ;;  %v2415_v57 = vmax.f32 %v2413_v31, %v2414_v19 }
 0x2d6   :  { %v2390_v20 = vsel %vm2389_vm8, %v9052_v32, %v2387_v63  ;;  %v2391_v2 = vsel %vm2389_vm8, %v9057_v16, %v2388_v3  ;;  %v2419_v35 = vmul.f32 %v2580_v56, %v2579_v47  ;;  %v2421_v18 = vmul.f32 %v2582_v40, %v2581_v46 }
 0x2d7   :  { %v2392_v0 = vmul.f32 %v2390_v20, %v9046_v22  ;;  %v2393_v15 = vmul.f32 %v2391_v2, %v9045_v44  ;;  %v2416_v27 = vsub.f32 %v2412_v33, %v2415_v57 }
 0x2d8   :  { %v2420_v11 = vmul.f32 %v2419_v35, %v2403_v50  ;;  %v2422_v1 = vmul.f32 %v2421_v18, %v2407_v61 }
 0x2d9   :  { %v2394_v26 = vsub.f32 %v2392_v0, %v2393_v15  ;;  %v2417_v58 = vmax.f32 %v2416_v27, 0.0 }
 0x2da   :  { %v2423_v62 = vadd.f32 %v2422_v1, %v2420_v11 }
 0x2db   :  { %v2395_v23 = vadd.f32 %v2394_v26, %v2322_v43 }
 0x2dd   :  { %v2397_v32 = vand.u32 2147483647, %v2395_v23 }
 0x2df   :  { %v2398_v14 = vmul.f32 0.5, %v2397_v32 }
 0x2e1   :  { %v2399_v22 = vsel %vm2396_vm9, %v2398_v14, 0.0 }
 0x2e2   :  { %v2418_v6 = vmul.f32 %v2417_v58, %v2399_v22 }
 0x2e4   :  { %v2424_v44 = vsub.f32 %v2423_v62, %v2418_v6 }
 0x2e6   :  { %v2425_v54 = vmax.f32 %v2424_v44, 1e-06 }
 0x2e8   :  { %2571 = vrcp.f32 %v2425_v54 }
 0x2f5   :  { %v2572_v49 = vpop.eup %2571 }
 0x2f6   :  { %v2427_v21 = vmul.f32 %v2572_v49, %v2418_v6 }
 0x2f8   :  { %v2428_v13 = vmul.f32 2.0, %v2427_v21 }
 0x2fa   :  { %v2479_v36 = vadd.f32 -1.0, %v2428_v13 }
 0x2fc   :  { %v2432_v41 = vsub.f32 %v2431_v8, %v2479_v36 }
 0x2fe   :  { %v2433_v50 = vand.u32 2147483647, %v2432_v41 }
 0x300   :  { %v2434_v28 = vmul.f32 %v2433_v50, %v2430_v34 }
 0x302   :  { %2435 = vst [vmem:[#allocation12] sm:$0xff] %v2434_v28 }
 0x303 PF:  { %s2699_s4 = smov [#allocation12]  }
 0x304   :  { %s2442_s15 = sshll.u32 %s2699_s4, 4  ;;  %s2443_s15 = int_to_ptr.vmem [resolvable:$true] %s2442_s15 }
 0x305   :  { %s2663_s16 = scalar_lea.vmem %s2443_s15, 128  ;;  %p2668_p9 = scmp.lt.s32.totalorder %s2443_s15, %s2443_s15 }
 0x306   :  { %p2664_p8 = scmp.ne.s32.totalorder %s2443_s15, %s2663_s16  ;;  %p2669_p10 = scmp.lt.s32.totalorder %s2663_s16, %s2663_s16 }
 0x308   :  { %p2670_p11 = por %p2669_p10, %p2668_p9 }
 0x30a   :  { %p2671_p12 = pnand %p2670_p11, %p2664_p8 }
 0x30c   :  { %2674 = shalt.err (!%p2671_p12)
}
 0x30d   :  { %2445 = dma.vmem_to_hbm [thread:$0]  %s2443_s15, 128, %s7538_s5, [#allocation6]  }
 0x30e   :  { %2689 = dma.done.wait [#allocation6], 128  }
 0x30f   :  { %2690 = vsyncadd [#allocation6], 4294967168 }
 0x310   :  { %2449 = vsyncpa [#allocation5], 1 }
 0x311   :  { %2450 = vsyncpa [#allocation8], 1 }
 0x312   :  { %2451 = vsyncpa [#allocation11], 1 }
 0x313   :  { %2452 = vsyncpa [#allocation6], 1 }

</bundles_post_ra>
